<compile_context>
chip_gen: v6e
topology: v6e:2x2x1
jax: 0.10.0
libtpu: 0.0.40
codegen_flags: <defaults>
</compile_context>

<pallas_src>
import jax
import jax.numpy as jnp
from jax import lax
from jax.experimental import pallas as pl
from jax.experimental.pallas import tpu as pltpu

# ----------------------------- configuration ------------------------------
B            = 2           # batch
N_FRAMES     = 8           # time steps produced by the feature extractor
FRAME_LEN    = 128         # samples per frame
N_SAMPLES    = N_FRAMES * FRAME_LEN
FEAT_DIM     = 32          # feature_extractor_output_vectors_dimension
HIDDEN       = 32          # hidden_size
EMBED_LAYERS = 1           # embedding_layers
N_LAYERS     = 2           # n_layers (paper default 20; kept small here)
N_SPEAKERS   = 4
EMBED_SIZE   = 8
HEAD_PAD     = 128         # lane-dense padded width for head outputs

DTYPE = jnp.float32


# --------------------- fused forward kernel ---------------------
def make_fused_kernel(n_embed, n_main, T, H):
    """Build the fused forward kernel for a fixed layer configuration."""
    n_total = n_embed + n_main

    def cell(gates, c_prev):
        # gates: [B, 4H] pre-activations whose g-columns were pre-scaled by 2,
        # so one full-width sigmoid covers all four gates (tanh(x)=2*sigmoid(2x)-1).
        s = jax.nn.sigmoid(gates)
        i = s[:, 0 * H:1 * H]
        f = s[:, 1 * H:2 * H]
        g = 2.0 * s[:, 2 * H:3 * H] - 1.0
        o = s[:, 3 * H:4 * H]
        c = f * c_prev + i * g
        h = o * jnp.tanh(c)
        return h, c

    def bilstm(x_flat, Bx, wih_f, whh_f, b_f, wih_b, whh_b, b_b,
               dst_ref, gxf_ref, gxb_ref):
        # x_flat: [B*T, Din]. Hoisted input projections (off the serial chain).
        gxf_ref[...] = (jnp.dot(x_flat, wih_f, preferred_element_type=jnp.float32)
                        + b_f).reshape(Bx, T, 4 * H)
        gxb_ref[...] = (jnp.dot(x_flat, wih_b, preferred_element_type=jnp.float32)
                        + b_b).reshape(Bx, T, 4 * H)
        hf = jnp.zeros((Bx, H), jnp.float32)
        cf = jnp.zeros((Bx, H), jnp.float32)
        hb = jnp.zeros((Bx, H), jnp.float32)
        cb = jnp.zeros((Bx, H), jnp.float32)
        # Fully unrolled (T small & static); both directions interleaved.
        for t in range(T):
            tb = T - 1 - t
            gf = gxf_ref[:, t, :] + jnp.dot(hf, whh_f,
                                            preferred_element_type=jnp.float32)
            gb = gxb_ref[:, tb, :] + jnp.dot(hb, whh_b,
                                             preferred_element_type=jnp.float32)
            hf, cf = cell(gf, cf)
            hb, cb = cell(gb, cb)
            dst_ref[:, t, 0:H] = hf            # forward half of [B,T,2H]
            dst_ref[:, tb, H:2 * H] = hb       # backward half (reversed indexing)
        return hf, cf, hb, cb

    def kernel(*refs):
        it = iter(refs)
        frames_ref = next(it)
        wfe_ref, bfe_ref, gamma_ref, beta_ref = (next(it) for _ in range(4))
        layer_refs = [tuple(next(it) for _ in range(6)) for _ in range(n_total)]
        w1_ref, b1_ref, w2_ref, b2_ref = (next(it) for _ in range(4))
        y_ref, e_ref, hmain_ref, cmain_ref, hemb_ref, cemb_ref = (
            next(it) for _ in range(6))
        embed_buf, buf_a, buf_b, gxf_ref, gxb_ref = (next(it) for _ in range(5))

        frames = frames_ref[...]                       # [B, T, FRAME_LEN]
        Bx = frames.shape[0]
        F = frames.shape[2]

        # ---- feature-extractor surrogate + LayerNorm (biased var, eps=1e-5) ----
        # TODO(synk): SpectrogramExtractor's class is not in the provided module;
        # surrogate = non-overlapping framing + frozen linear projection, then the
        # exact nn.LayerNorm math.
        feats = jnp.dot(frames.reshape(Bx * T, F), wfe_ref[...],
                        preferred_element_type=jnp.float32) + bfe_ref[...]
        mean = jnp.mean(feats, axis=-1, keepdims=True)
        var = jnp.mean((feats - mean) ** 2, axis=-1, keepdims=True)
        feats = (feats - mean) * lax.rsqrt(var + 1e-5) * gamma_ref[...] + beta_ref[...]

        # ---- embedding BiLSTM stack ----
        x_flat = feats                                 # [B*T, FEAT_DIM]
        emb_states = []
        for l in range(n_embed):
            dst = embed_buf if l == n_embed - 1 else (buf_a if l % 2 == 0 else buf_b)
            w = [r[...] for r in layer_refs[l]]
            emb_states.append(bilstm(x_flat, Bx, *w, dst, gxf_ref, gxb_ref))
            x_flat = dst[...].reshape(Bx * T, 2 * H)
        e_flat = x_flat                                # [B*T, 2H] (embedding output)

        # ---- main BiLSTM stack (inference: inter-layer dropout = identity) ----
        main_states = []
        for l in range(n_main):
            dst = buf_a if l % 2 == 0 else buf_b
            w = [r[...] for r in layer_refs[n_embed + l]]
            main_states.append(bilstm(x_flat, Bx, *w, dst, gxf_ref, gxb_ref))
            x_flat = dst[...].reshape(Bx * T, 2 * H)
        y_flat = x_flat                                # [B*T, 2H]

        # ---- heads: linear1 (raw logits) ; linear2 + tanh + L2-normalize ----
        y_ref[...] = (jnp.dot(y_flat, w1_ref[...], preferred_element_type=jnp.float32)
                      + b1_ref[...]).astype(y_ref.dtype)
        e = jnp.tanh(jnp.dot(e_flat, w2_ref[...], preferred_element_type=jnp.float32)
                     + b2_ref[...])
        ss = jnp.sum(e * e, axis=-1, keepdims=True)    # zero-padded lanes add 0
        e_ref[...] = (e * lax.rsqrt(jnp.maximum(ss, 1e-24))).astype(e_ref.dtype)

        # ---- final hidden / cell states (PyTorch [layers*dirs, B, H] layout) ----
        for l, (hf, cf, hb, cb) in enumerate(emb_states):
            hemb_ref[2 * l] = hf
            hemb_ref[2 * l + 1] = hb
            cemb_ref[2 * l] = cf
            cemb_ref[2 * l + 1] = cb
        for l, (hf, cf, hb, cb) in enumerate(main_states):
            hmain_ref[2 * l] = hf
            hmain_ref[2 * l + 1] = hb
            cmain_ref[2 * l] = cf
            cmain_ref[2 * l + 1] = cb

    return kernel


# --------------------- wrapper ---------------------
def blstm_eend_forward(x, prepped):
    """x: [B, 1, N_SAMPLES] -> ((hidden, cell, hidden_embed, cell_embed), y, embed)."""
    Bx = x.shape[0]
    T, H = N_FRAMES, HIDDEN
    frames = jnp.squeeze(x, axis=1).reshape(Bx, T, FRAME_LEN)

    inputs = [frames, prepped["wfe"], prepped["bfe"], prepped["gamma"], prepped["beta"]]
    for layer in prepped["layers"]:
        inputs.extend(layer)
    inputs.extend([prepped["w1"], prepped["b1"], prepped["w2"], prepped["b2"]])

    out_shape = (
        jax.ShapeDtypeStruct((Bx * T, HEAD_PAD), DTYPE),          # padded logits
        jax.ShapeDtypeStruct((Bx * T, HEAD_PAD), DTYPE),          # padded embeddings
        jax.ShapeDtypeStruct((2 * N_LAYERS, Bx, H), DTYPE),       # hidden_state
        jax.ShapeDtypeStruct((2 * N_LAYERS, Bx, H), DTYPE),       # cell_state
        jax.ShapeDtypeStruct((2 * EMBED_LAYERS, Bx, H), DTYPE),   # hidden_state_embed
        jax.ShapeDtypeStruct((2 * EMBED_LAYERS, Bx, H), DTYPE),   # cell_state_embed
    )
    vmem = pl.BlockSpec(memory_space=pltpu.MemorySpace.VMEM)
    scratch = [
        pltpu.VMEM((Bx, T, 2 * H), jnp.float32),   # embedding-stack output
        pltpu.VMEM((Bx, T, 2 * H), jnp.float32),   # ping-pong buffer A
        pltpu.VMEM((Bx, T, 2 * H), jnp.float32),   # ping-pong buffer B
        pltpu.VMEM((Bx, T, 4 * H), jnp.float32),   # hoisted fwd gate pre-activations
        pltpu.VMEM((Bx, T, 4 * H), jnp.float32),   # hoisted bwd gate pre-activations
    ]
    y_pad, e_pad, h_main, c_main, h_emb, c_emb = pl.pallas_call(
        make_fused_kernel(EMBED_LAYERS, N_LAYERS, T, H),
        out_shape=out_shape,
        in_specs=[vmem] * len(inputs),
        out_specs=tuple(vmem for _ in out_shape),
        scratch_shapes=scratch,
    )(*inputs)

    y_out = y_pad[:, :N_SPEAKERS].reshape(Bx, T, N_SPEAKERS)
    embed_out = e_pad[:, :EMBED_SIZE].reshape(Bx, T, EMBED_SIZE)
    return ((h_main, c_main, h_emb, c_emb), y_out, embed_out)


# --------------------- parameter init / prep ---------------------
def init_lstm_dir_params(key, input_size, hidden):
    k0, k1, k2, k3 = jax.random.split(key, 4)
    s = 1.0 / jnp.sqrt(hidden)
    wih = jax.random.uniform(k0, (input_size, 4 * hidden), DTYPE, -s, s)   # W_ih^T
    whh = jax.random.uniform(k1, (hidden, 4 * hidden), DTYPE, -s, s)       # W_hh^T
    b_ih = jax.random.uniform(k2, (1, 4 * hidden), DTYPE, -s, s)
    b_hh = jax.random.uniform(k3, (1, 4 * hidden), DTYPE, -s, s)
    return wih, whh, b_ih + b_hh


def init_params(key):
    keys = jax.random.split(key, 8)
    params = {}
    params["wfe"] = jax.random.normal(keys[0], (FRAME_LEN, FEAT_DIM), DTYPE) * 0.05
    params["bfe"] = jnp.zeros((1, FEAT_DIM), DTYPE)
    params["gamma"] = jnp.ones((1, FEAT_DIM), DTYPE)
    params["beta"] = jnp.zeros((1, FEAT_DIM), DTYPE)
    embed_layers = []
    kk = jax.random.split(keys[1], EMBED_LAYERS * 2)
    for l in range(EMBED_LAYERS):
        d_in = FEAT_DIM if l == 0 else 2 * HIDDEN
        embed_layers.append({"fwd": init_lstm_dir_params(kk[2 * l], d_in, HIDDEN),
                             "bwd": init_lstm_dir_params(kk[2 * l + 1], d_in, HIDDEN)})
    params["embed"] = embed_layers
    main_layers = []
    kk = jax.random.split(keys[2], N_LAYERS * 2)
    for l in range(N_LAYERS):
        main_layers.append({"fwd": init_lstm_dir_params(kk[2 * l], 2 * HIDDEN, HIDDEN),
                            "bwd": init_lstm_dir_params(kk[2 * l + 1], 2 * HIDDEN, HIDDEN)})
    params["main"] = main_layers
    s1 = 1.0 / jnp.sqrt(2 * HIDDEN)
    params["w1"] = jax.random.uniform(keys[3], (2 * HIDDEN, N_SPEAKERS), DTYPE, -s1, s1)
    params["b1"] = jax.random.uniform(keys[4], (1, N_SPEAKERS), DTYPE, -s1, s1)
    params["w2"] = jax.random.uniform(keys[5], (2 * HIDDEN, EMBED_SIZE), DTYPE, -s1, s1)
    params["b2"] = jax.random.uniform(keys[6], (1, EMBED_SIZE), DTYPE, -s1, s1)
    return params


def prepare_params(params):
    """One-time transform of canonical params into the kernel's fused form."""
    H = HIDDEN

    def prescale(wih, whh, b):
        # Fold tanh(x) = 2*sigmoid(2x) - 1 into the g-gate columns.
        sl = slice(2 * H, 3 * H)
        return (wih.at[:, sl].multiply(2.0),
                whh.at[:, sl].multiply(2.0),
                b.at[:, sl].multiply(2.0))

    def pad_head(w, b):
        wp = jnp.zeros((w.shape[0], HEAD_PAD), DTYPE).at[:, :w.shape[1]].set(w)
        bp = jnp.zeros((1, HEAD_PAD), DTYPE).at[:, :b.shape[1]].set(b)
        return wp, bp

    layers = []
    for layer in params["embed"] + params["main"]:
        layers.append(prescale(*layer["fwd"]) + prescale(*layer["bwd"]))
    w1p, b1p = pad_head(params["w1"], params["b1"])
    w2p, b2p = pad_head(params["w2"], params["b2"])
    return {"wfe": params["wfe"], "bfe": params["bfe"],
            "gamma": params["gamma"], "beta": params["beta"],
            "layers": layers, "w1": w1p, "b1": b1p, "w2": w2p, "b2": b2p}


# --------------------- pure-JAX reference (canonical PyTorch math) ---------------------
def _ref_lstm_dir(x_btd, wih, whh, b, reverse):
    Bx, T, _ = x_btd.shape
    H = whh.shape[0]
    h = jnp.zeros((Bx, H), jnp.float32)
    c = jnp.zeros((Bx, H), jnp.float32)
    outs = [None] * T
    order = range(T - 1, -1, -1) if reverse else range(T)
    for t in order:
        g = x_btd[:, t, :] @ wih + h @ whh + b
        i = jax.nn.sigmoid(g[:, 0:H])
        f = jax.nn.sigmoid(g[:, H:2 * H])
        gg = jnp.tanh(g[:, 2 * H:3 * H])
        o = jax.nn.sigmoid(g[:, 3 * H:4 * H])
        c = f * c + i * gg
        h = o * jnp.tanh(c)
        outs[t] = h
    return jnp.stack(outs, axis=1), h, c


def reference_forward(x, params):
    Bx = x.shape[0]
    frames = jnp.squeeze(x, axis=1).reshape(Bx, N_FRAMES, FRAME_LEN)
    feats = frames.reshape(-1, FRAME_LEN) @ params["wfe"] + params["bfe"]
    mean = jnp.mean(feats, axis=-1, keepdims=True)
    var = jnp.mean((feats - mean) ** 2, axis=-1, keepdims=True)
    feats = (feats - mean) / jnp.sqrt(var + 1e-5) * params["gamma"] + params["beta"]
    cur = feats.reshape(Bx, N_FRAMES, FEAT_DIM)

    def run_stack(cur, layers):
        hs, cs = [], []
        for layer in layers:
            sf, hf, cf = _ref_lstm_dir(cur, *layer["fwd"], reverse=False)
            sb, hb, cb = _ref_lstm_dir(cur, *layer["bwd"], reverse=True)
            cur = jnp.concatenate([sf, sb], axis=-1)
            hs += [hf, hb]
            cs += [cf, cb]
        return cur, hs, cs

    embed, h_e, c_e = run_stack(cur, params["embed"])
    y, h_m, c_m = run_stack(embed, params["main"])

    y_out = (y.reshape(-1, 2 * HIDDEN) @ params["w1"] + params["b1"]
             ).reshape(Bx, N_FRAMES, N_SPEAKERS)
    e = jnp.tanh(embed.reshape(-1, 2 * HIDDEN) @ params["w2"] + params["b2"])
    norm = jnp.linalg.norm(e, axis=-1, keepdims=True)
    e_out = (e / jnp.maximum(norm, 1e-12)).reshape(Bx, N_FRAMES, EMBED_SIZE)
    return ((jnp.stack(h_m, 0), jnp.stack(c_m, 0), jnp.stack(h_e, 0), jnp.stack(c_e, 0)),
            y_out, e_out)


# --------------------- main ---------------------
if __name__ == "__main__":
    key = jax.random.PRNGKey(0)
    k_param, k_input = jax.random.split(key)
    params = init_params(k_param)
    prepped = prepare_params(params)

    x = jax.random.normal(k_input, (B, 1, N_SAMPLES), DTYPE)   # [batch, 1, segment*sr]

    fwd = jax.jit(blstm_eend_forward)
    states, y_out, embed_out = fwd(x, prepped)
    jax.block_until_ready((states, y_out, embed_out))

    # shape checks
    assert y_out.shape == (B, N_FRAMES, N_SPEAKERS)
    assert embed_out.shape == (B, N_FRAMES, EMBED_SIZE)
    assert states[0].shape == (N_LAYERS * 2, B, HIDDEN)
    assert states[1].shape == (N_LAYERS * 2, B, HIDDEN)
    assert states[2].shape == (EMBED_LAYERS * 2, B, HIDDEN)
    assert states[3].shape == (EMBED_LAYERS * 2, B, HIDDEN)

    # numerical check against a pure-JAX reference of the PyTorch math
    ref_states, ref_y, ref_e = reference_forward(x, params)
    assert jnp.allclose(y_out, ref_y, atol=1e-3, rtol=1e-3)
    assert jnp.allclose(embed_out, ref_e, atol=1e-3, rtol=1e-3)
    for got, want in zip(states, ref_states):
        assert jnp.allclose(got, want, atol=1e-3, rtol=1e-3)

    # embedding rows should be unit-norm (F.normalize semantics)
    norms = jnp.linalg.norm(embed_out.reshape(-1, EMBED_SIZE), axis=-1)
    assert jnp.allclose(norms, 1.0, atol=1e-4)

    print("KERNEL_OK")
</pallas_src>

<mosaic_0001>
module attributes {stable_mosaic.version = 11 : i64} {
  func.func @kernel(%arg0: memref<2x8x128xf32, #tpu.memory_space<vmem>>, %arg1: memref<128x32xf32, #tpu.memory_space<vmem>>, %arg2: memref<1x32xf32, #tpu.memory_space<vmem>>, %arg3: memref<1x32xf32, #tpu.memory_space<vmem>>, %arg4: memref<1x32xf32, #tpu.memory_space<vmem>>, %arg5: memref<32x128xf32, #tpu.memory_space<vmem>>, %arg6: memref<32x128xf32, #tpu.memory_space<vmem>>, %arg7: memref<1x128xf32, #tpu.memory_space<vmem>>, %arg8: memref<32x128xf32, #tpu.memory_space<vmem>>, %arg9: memref<32x128xf32, #tpu.memory_space<vmem>>, %arg10: memref<1x128xf32, #tpu.memory_space<vmem>>, %arg11: memref<64x128xf32, #tpu.memory_space<vmem>>, %arg12: memref<32x128xf32, #tpu.memory_space<vmem>>, %arg13: memref<1x128xf32, #tpu.memory_space<vmem>>, %arg14: memref<64x128xf32, #tpu.memory_space<vmem>>, %arg15: memref<32x128xf32, #tpu.memory_space<vmem>>, %arg16: memref<1x128xf32, #tpu.memory_space<vmem>>, %arg17: memref<64x128xf32, #tpu.memory_space<vmem>>, %arg18: memref<32x128xf32, #tpu.memory_space<vmem>>, %arg19: memref<1x128xf32, #tpu.memory_space<vmem>>, %arg20: memref<64x128xf32, #tpu.memory_space<vmem>>, %arg21: memref<32x128xf32, #tpu.memory_space<vmem>>, %arg22: memref<1x128xf32, #tpu.memory_space<vmem>>, %arg23: memref<64x128xf32, #tpu.memory_space<vmem>>, %arg24: memref<1x128xf32, #tpu.memory_space<vmem>>, %arg25: memref<64x128xf32, #tpu.memory_space<vmem>>, %arg26: memref<1x128xf32, #tpu.memory_space<vmem>>, %arg27: memref<16x128xf32, #tpu.memory_space<vmem>>, %arg28: memref<16x128xf32, #tpu.memory_space<vmem>>, %arg29: memref<4x2x32xf32, #tpu.memory_space<vmem>>, %arg30: memref<4x2x32xf32, #tpu.memory_space<vmem>>, %arg31: memref<2x2x32xf32, #tpu.memory_space<vmem>>, %arg32: memref<2x2x32xf32, #tpu.memory_space<vmem>>, %arg33: memref<2x8x64xf32, #tpu.memory_space<vmem>>, %arg34: memref<2x8x64xf32, #tpu.memory_space<vmem>>, %arg35: memref<2x8x64xf32, #tpu.memory_space<vmem>>, %arg36: memref<2x8x128xf32, #tpu.memory_space<vmem>>, %arg37: memref<2x8x128xf32, #tpu.memory_space<vmem>>) attributes {dimension_semantics = [], scalar_prefetch = 0 : i64, scratch_operands = 5 : i64, tpu.core_type = #tpu.core_type<tc>} {
    %c0 = arith.constant 0 : index
    %c0_0 = arith.constant 0 : index
    %c0_1 = arith.constant 0 : index
    %0 = vector.load %arg0[%c0, %c0_0, %c0_1] : memref<2x8x128xf32, #tpu.memory_space<vmem>>, vector<2x8x128xf32>
    %1 = vector.shape_cast %0 : vector<2x8x128xf32> to vector<16x128xf32>
    %c0_2 = arith.constant 0 : index
    %c0_3 = arith.constant 0 : index
    %2 = vector.load %arg1[%c0_2, %c0_3] : memref<128x32xf32, #tpu.memory_space<vmem>>, vector<128x32xf32>
    %cst = arith.constant dense<0.000000e+00> : vector<16x32xf32>
    %3 = tpu.matmul %1, %2, %cst {dimension_numbers = #tpu.dot_dimension_numbers<[1], [0], [0], [1], [0, 0, 1, 1], [], []>} : vector<16x128xf32>, vector<128x32xf32>, vector<16x32xf32> -> vector<16x32xf32>
    %c0_4 = arith.constant 0 : index
    %c0_5 = arith.constant 0 : index
    %4 = vector.load %arg2[%c0_4, %c0_5] : memref<1x32xf32, #tpu.memory_space<vmem>>, vector<1x32xf32>
    %5 = vector.broadcast %4 : vector<1x32xf32> to vector<16x32xf32>
    %6 = arith.addf %3, %5 : vector<16x32xf32>
    %cst_6 = arith.constant dense<0.000000e+00> : vector<16xf32>
    %7 = vector.multi_reduction <add>, %6, %cst_6 [1] : vector<16x32xf32> to vector<16xf32>
    %8 = vector.shape_cast %7 : vector<16xf32> to vector<16x1xf32>
    %cst_7 = arith.constant 3.200000e+01 : f32
    %9 = vector.broadcast %cst_7 : f32 to vector<16x1xf32>
    %10 = arith.divf %8, %9 : vector<16x1xf32>
    %11 = vector.broadcast %10 : vector<16x1xf32> to vector<16x32xf32>
    %12 = arith.subf %6, %11 : vector<16x32xf32>
    %13 = arith.mulf %12, %12 : vector<16x32xf32>
    %cst_8 = arith.constant dense<0.000000e+00> : vector<16xf32>
    %14 = vector.multi_reduction <add>, %13, %cst_8 [1] : vector<16x32xf32> to vector<16xf32>
    %15 = vector.shape_cast %14 : vector<16xf32> to vector<16x1xf32>
    %cst_9 = arith.constant 3.200000e+01 : f32
    %16 = vector.broadcast %cst_9 : f32 to vector<16x1xf32>
    %17 = arith.divf %15, %16 : vector<16x1xf32>
    %18 = vector.broadcast %10 : vector<16x1xf32> to vector<16x32xf32>
    %19 = arith.subf %6, %18 : vector<16x32xf32>
    %cst_10 = arith.constant 9.99999974E-6 : f32
    %20 = vector.broadcast %cst_10 : f32 to vector<16x1xf32>
    %21 = arith.addf %17, %20 : vector<16x1xf32>
    %22 = math.rsqrt %21 : vector<16x1xf32>
    %23 = vector.broadcast %22 : vector<16x1xf32> to vector<16x32xf32>
    %24 = arith.mulf %19, %23 : vector<16x32xf32>
    %c0_11 = arith.constant 0 : index
    %c0_12 = arith.constant 0 : index
    %25 = vector.load %arg3[%c0_11, %c0_12] : memref<1x32xf32, #tpu.memory_space<vmem>>, vector<1x32xf32>
    %26 = vector.broadcast %25 : vector<1x32xf32> to vector<16x32xf32>
    %27 = arith.mulf %24, %26 : vector<16x32xf32>
    %c0_13 = arith.constant 0 : index
    %c0_14 = arith.constant 0 : index
    %28 = vector.load %arg4[%c0_13, %c0_14] : memref<1x32xf32, #tpu.memory_space<vmem>>, vector<1x32xf32>
    %29 = vector.broadcast %28 : vector<1x32xf32> to vector<16x32xf32>
    %30 = arith.addf %27, %29 : vector<16x32xf32>
    %c0_15 = arith.constant 0 : index
    %c0_16 = arith.constant 0 : index
    %31 = vector.load %arg5[%c0_15, %c0_16] : memref<32x128xf32, #tpu.memory_space<vmem>>, vector<32x128xf32>
    %c0_17 = arith.constant 0 : index
    %c0_18 = arith.constant 0 : index
    %32 = vector.load %arg6[%c0_17, %c0_18] : memref<32x128xf32, #tpu.memory_space<vmem>>, vector<32x128xf32>
    %c0_19 = arith.constant 0 : index
    %c0_20 = arith.constant 0 : index
    %33 = vector.load %arg7[%c0_19, %c0_20] : memref<1x128xf32, #tpu.memory_space<vmem>>, vector<1x128xf32>
    %c0_21 = arith.constant 0 : index
    %c0_22 = arith.constant 0 : index
    %34 = vector.load %arg8[%c0_21, %c0_22] : memref<32x128xf32, #tpu.memory_space<vmem>>, vector<32x128xf32>
    %c0_23 = arith.constant 0 : index
    %c0_24 = arith.constant 0 : index
    %35 = vector.load %arg9[%c0_23, %c0_24] : memref<32x128xf32, #tpu.memory_space<vmem>>, vector<32x128xf32>
    %c0_25 = arith.constant 0 : index
    %c0_26 = arith.constant 0 : index
    %36 = vector.load %arg10[%c0_25, %c0_26] : memref<1x128xf32, #tpu.memory_space<vmem>>, vector<1x128xf32>
    %cst_27 = arith.constant dense<0.000000e+00> : vector<16x128xf32>
    %37 = tpu.matmul %30, %31, %cst_27 {dimension_numbers = #tpu.dot_dimension_numbers<[1], [0], [0], [1], [0, 0, 1, 1], [], []>} : vector<16x32xf32>, vector<32x128xf32>, vector<16x128xf32> -> vector<16x128xf32>
    %38 = vector.broadcast %33 : vector<1x128xf32> to vector<16x128xf32>
    %39 = arith.addf %37, %38 : vector<16x128xf32>
    %40 = vector.shape_cast %39 : vector<16x128xf32> to vector<2x8x128xf32>
    %c0_28 = arith.constant 0 : index
    %c0_29 = arith.constant 0 : index
    %c0_30 = arith.constant 0 : index
    %41 = vector.load %arg36[%c0_28, %c0_29, %c0_30] : memref<2x8x128xf32, #tpu.memory_space<vmem>>, vector<2x8x128xf32>
    tpu.vector_store %arg36[%c0_28, %c0_29, %c0_30], %40 {strides = array<i32>} : memref<2x8x128xf32, #tpu.memory_space<vmem>>, vector<2x8x128xf32>,
    %cst_31 = arith.constant dense<0.000000e+00> : vector<16x128xf32>
    %42 = tpu.matmul %30, %34, %cst_31 {dimension_numbers = #tpu.dot_dimension_numbers<[1], [0], [0], [1], [0, 0, 1, 1], [], []>} : vector<16x32xf32>, vector<32x128xf32>, vector<16x128xf32> -> vector<16x128xf32>
    %43 = vector.broadcast %36 : vector<1x128xf32> to vector<16x128xf32>
    %44 = arith.addf %42, %43 : vector<16x128xf32>
    %45 = vector.shape_cast %44 : vector<16x128xf32> to vector<2x8x128xf32>
    %c0_32 = arith.constant 0 : index
    %c0_33 = arith.constant 0 : index
    %c0_34 = arith.constant 0 : index
    %46 = vector.load %arg37[%c0_32, %c0_33, %c0_34] : memref<2x8x128xf32, #tpu.memory_space<vmem>>, vector<2x8x128xf32>
    tpu.vector_store %arg37[%c0_32, %c0_33, %c0_34], %45 {strides = array<i32>} : memref<2x8x128xf32, #tpu.memory_space<vmem>>, vector<2x8x128xf32>,
    %cst_35 = arith.constant 0.000000e+00 : f32
    %47 = vector.broadcast %cst_35 : f32 to vector<2x32xf32>
    %cst_36 = arith.constant 0.000000e+00 : f32
    %48 = vector.broadcast %cst_36 : f32 to vector<2x32xf32>
    %cst_37 = arith.constant 0.000000e+00 : f32
    %49 = vector.broadcast %cst_37 : f32 to vector<2x32xf32>
    %cst_38 = arith.constant 0.000000e+00 : f32
    %50 = vector.broadcast %cst_38 : f32 to vector<2x32xf32>
    %c0_39 = arith.constant 0 : index
    %c0_40 = arith.constant 0 : index
    %c0_41 = arith.constant 0 : index
    %51 = vector.load %arg36[%c0_39, %c0_40, %c0_41] : memref<2x8x128xf32, #tpu.memory_space<vmem>>, vector<2x1x128xf32>
    %52 = vector.shape_cast %51 : vector<2x1x128xf32> to vector<2x128xf32>
    %cst_42 = arith.constant dense<0.000000e+00> : vector<2x128xf32>
    %53 = tpu.matmul %47, %32, %cst_42 {dimension_numbers = #tpu.dot_dimension_numbers<[1], [0], [0], [1], [0, 0, 1, 1], [], []>} : vector<2x32xf32>, vector<32x128xf32>, vector<2x128xf32> -> vector<2x128xf32>
    %54 = arith.addf %52, %53 : vector<2x128xf32>
    %c0_43 = arith.constant 0 : index
    %c7 = arith.constant 7 : index
    %c0_44 = arith.constant 0 : index
    %55 = vector.load %arg37[%c0_43, %c7, %c0_44] : memref<2x8x128xf32, #tpu.memory_space<vmem>>, vector<2x1x128xf32>
    %56 = vector.shape_cast %55 : vector<2x1x128xf32> to vector<2x128xf32>
    %cst_45 = arith.constant dense<0.000000e+00> : vector<2x128xf32>
    %57 = tpu.matmul %49, %35, %cst_45 {dimension_numbers = #tpu.dot_dimension_numbers<[1], [0], [0], [1], [0, 0, 1, 1], [], []>} : vector<2x32xf32>, vector<32x128xf32>, vector<2x128xf32> -> vector<2x128xf32>
    %58 = arith.addf %56, %57 : vector<2x128xf32>
    %59 = arith.negf %54 : vector<2x128xf32>
    %60 = math.exp %59 : vector<2x128xf32>
    %cst_46 = arith.constant 1.000000e+00 : f32
    %61 = vector.broadcast %cst_46 : f32 to vector<2x128xf32>
    %62 = arith.addf %61, %60 : vector<2x128xf32>
    %63 = arith.divf %61, %62 : vector<2x128xf32>
    %64 = vector.extract_strided_slice %63 {offsets = [0, 0], sizes = [2, 32], strides = [1, 1]} : vector<2x128xf32> to vector<2x32xf32>
    %65 = vector.extract_strided_slice %63 {offsets = [0, 32], sizes = [2, 32], strides = [1, 1]} : vector<2x128xf32> to vector<2x32xf32>
    %66 = vector.extract_strided_slice %63 {offsets = [0, 64], sizes = [2, 32], strides = [1, 1]} : vector<2x128xf32> to vector<2x32xf32>
    %cst_47 = arith.constant 2.000000e+00 : f32
    %67 = vector.broadcast %cst_47 : f32 to vector<2x32xf32>
    %68 = arith.mulf %67, %66 : vector<2x32xf32>
    %cst_48 = arith.constant 1.000000e+00 : f32
    %69 = vector.broadcast %cst_48 : f32 to vector<2x32xf32>
    %70 = arith.subf %68, %69 : vector<2x32xf32>
    %71 = vector.extract_strided_slice %63 {offsets = [0, 96], sizes = [2, 32], strides = [1, 1]} : vector<2x128xf32> to vector<2x32xf32>
    %72 = arith.mulf %65, %48 : vector<2x32xf32>
    %73 = arith.mulf %64, %70 : vector<2x32xf32>
    %74 = arith.addf %72, %73 : vector<2x32xf32>
    %75 = math.tanh %74 : vector<2x32xf32>
    %76 = arith.mulf %71, %75 : vector<2x32xf32>
    %77 = arith.negf %58 : vector<2x128xf32>
    %78 = math.exp %77 : vector<2x128xf32>
    %cst_49 = arith.constant 1.000000e+00 : f32
    %79 = vector.broadcast %cst_49 : f32 to vector<2x128xf32>
    %80 = arith.addf %79, %78 : vector<2x128xf32>
    %81 = arith.divf %79, %80 : vector<2x128xf32>
    %82 = vector.extract_strided_slice %81 {offsets = [0, 0], sizes = [2, 32], strides = [1, 1]} : vector<2x128xf32> to vector<2x32xf32>
    %83 = vector.extract_strided_slice %81 {offsets = [0, 32], sizes = [2, 32], strides = [1, 1]} : vector<2x128xf32> to vector<2x32xf32>
    %84 = vector.extract_strided_slice %81 {offsets = [0, 64], sizes = [2, 32], strides = [1, 1]} : vector<2x128xf32> to vector<2x32xf32>
    %cst_50 = arith.constant 2.000000e+00 : f32
    %85 = vector.broadcast %cst_50 : f32 to vector<2x32xf32>
    %86 = arith.mulf %85, %84 : vector<2x32xf32>
    %cst_51 = arith.constant 1.000000e+00 : f32
    %87 = vector.broadcast %cst_51 : f32 to vector<2x32xf32>
    %88 = arith.subf %86, %87 : vector<2x32xf32>
    %89 = vector.extract_strided_slice %81 {offsets = [0, 96], sizes = [2, 32], strides = [1, 1]} : vector<2x128xf32> to vector<2x32xf32>
    %90 = arith.mulf %83, %50 : vector<2x32xf32>
    %91 = arith.mulf %82, %88 : vector<2x32xf32>
    %92 = arith.addf %90, %91 : vector<2x32xf32>
    %93 = math.tanh %92 : vector<2x32xf32>
    %94 = arith.mulf %89, %93 : vector<2x32xf32>
    %c0_52 = arith.constant 0 : index
    %c0_53 = arith.constant 0 : index
    %c0_54 = arith.constant 0 : index
    %95 = vector.load %arg33[%c0_52, %c0_53, %c0_54] : memref<2x8x64xf32, #tpu.memory_space<vmem>>, vector<2x1x32xf32>
    %96 = vector.shape_cast %95 : vector<2x1x32xf32> to vector<2x32xf32>
    %97 = vector.shape_cast %76 : vector<2x32xf32> to vector<2x1x32xf32>
    tpu.vector_store %arg33[%c0_52, %c0_53, %c0_54], %97 {strides = array<i32>} : memref<2x8x64xf32, #tpu.memory_space<vmem>>, vector<2x1x32xf32>,
    %c0_55 = arith.constant 0 : index
    %c7_56 = arith.constant 7 : index
    %c32 = arith.constant 32 : index
    %98 = vector.load %arg33[%c0_55, %c7_56, %c32] : memref<2x8x64xf32, #tpu.memory_space<vmem>>, vector<2x1x32xf32>
    %99 = vector.shape_cast %98 : vector<2x1x32xf32> to vector<2x32xf32>
    %100 = vector.shape_cast %94 : vector<2x32xf32> to vector<2x1x32xf32>
    tpu.vector_store %arg33[%c0_55, %c7_56, %c32], %100 {strides = array<i32>} : memref<2x8x64xf32, #tpu.memory_space<vmem>>, vector<2x1x32xf32>,
    %c0_57 = arith.constant 0 : index
    %c1 = arith.constant 1 : index
    %c0_58 = arith.constant 0 : index
    %101 = vector.load %arg36[%c0_57, %c1, %c0_58] : memref<2x8x128xf32, #tpu.memory_space<vmem>>, vector<2x1x128xf32>
    %102 = vector.shape_cast %101 : vector<2x1x128xf32> to vector<2x128xf32>
    %cst_59 = arith.constant dense<0.000000e+00> : vector<2x128xf32>
    %103 = tpu.matmul %76, %32, %cst_59 {dimension_numbers = #tpu.dot_dimension_numbers<[1], [0], [0], [1], [0, 0, 1, 1], [], []>} : vector<2x32xf32>, vector<32x128xf32>, vector<2x128xf32> -> vector<2x128xf32>
    %104 = arith.addf %102, %103 : vector<2x128xf32>
    %c0_60 = arith.constant 0 : index
    %c6 = arith.constant 6 : index
    %c0_61 = arith.constant 0 : index
    %105 = vector.load %arg37[%c0_60, %c6, %c0_61] : memref<2x8x128xf32, #tpu.memory_space<vmem>>, vector<2x1x128xf32>
    %106 = vector.shape_cast %105 : vector<2x1x128xf32> to vector<2x128xf32>
    %cst_62 = arith.constant dense<0.000000e+00> : vector<2x128xf32>
    %107 = tpu.matmul %94, %35, %cst_62 {dimension_numbers = #tpu.dot_dimension_numbers<[1], [0], [0], [1], [0, 0, 1, 1], [], []>} : vector<2x32xf32>, vector<32x128xf32>, vector<2x128xf32> -> vector<2x128xf32>
    %108 = arith.addf %106, %107 : vector<2x128xf32>
    %109 = arith.negf %104 : vector<2x128xf32>
    %110 = math.exp %109 : vector<2x128xf32>
    %cst_63 = arith.constant 1.000000e+00 : f32
    %111 = vector.broadcast %cst_63 : f32 to vector<2x128xf32>
    %112 = arith.addf %111, %110 : vector<2x128xf32>
    %113 = arith.divf %111, %112 : vector<2x128xf32>
    %114 = vector.extract_strided_slice %113 {offsets = [0, 0], sizes = [2, 32], strides = [1, 1]} : vector<2x128xf32> to vector<2x32xf32>
    %115 = vector.extract_strided_slice %113 {offsets = [0, 32], sizes = [2, 32], strides = [1, 1]} : vector<2x128xf32> to vector<2x32xf32>
    %116 = vector.extract_strided_slice %113 {offsets = [0, 64], sizes = [2, 32], strides = [1, 1]} : vector<2x128xf32> to vector<2x32xf32>
    %cst_64 = arith.constant 2.000000e+00 : f32
    %117 = vector.broadcast %cst_64 : f32 to vector<2x32xf32>
    %118 = arith.mulf %117, %116 : vector<2x32xf32>
    %cst_65 = arith.constant 1.000000e+00 : f32
    %119 = vector.broadcast %cst_65 : f32 to vector<2x32xf32>
    %120 = arith.subf %118, %119 : vector<2x32xf32>
    %121 = vector.extract_strided_slice %113 {offsets = [0, 96], sizes = [2, 32], strides = [1, 1]} : vector<2x128xf32> to vector<2x32xf32>
    %122 = arith.mulf %115, %74 : vector<2x32xf32>
    %123 = arith.mulf %114, %120 : vector<2x32xf32>
    %124 = arith.addf %122, %123 : vector<2x32xf32>
    %125 = math.tanh %124 : vector<2x32xf32>
    %126 = arith.mulf %121, %125 : vector<2x32xf32>
    %127 = arith.negf %108 : vector<2x128xf32>
    %128 = math.exp %127 : vector<2x128xf32>
    %cst_66 = arith.constant 1.000000e+00 : f32
    %129 = vector.broadcast %cst_66 : f32 to vector<2x128xf32>
    %130 = arith.addf %129, %128 : vector<2x128xf32>
    %131 = arith.divf %129, %130 : vector<2x128xf32>
    %132 = vector.extract_strided_slice %131 {offsets = [0, 0], sizes = [2, 32], strides = [1, 1]} : vector<2x128xf32> to vector<2x32xf32>
    %133 = vector.extract_strided_slice %131 {offsets = [0, 32], sizes = [2, 32], strides = [1, 1]} : vector<2x128xf32> to vector<2x32xf32>
    %134 = vector.extract_strided_slice %131 {offsets = [0, 64], sizes = [2, 32], strides = [1, 1]} : vector<2x128xf32> to vector<2x32xf32>
    %cst_67 = arith.constant 2.000000e+00 : f32
    %135 = vector.broadcast %cst_67 : f32 to vector<2x32xf32>
    %136 = arith.mulf %135, %134 : vector<2x32xf32>
    %cst_68 = arith.constant 1.000000e+00 : f32
    %137 = vector.broadcast %cst_68 : f32 to vector<2x32xf32>
    %138 = arith.subf %136, %137 : vector<2x32xf32>
    %139 = vector.extract_strided_slice %131 {offsets = [0, 96], sizes = [2, 32], strides = [1, 1]} : vector<2x128xf32> to vector<2x32xf32>
    %140 = arith.mulf %133, %92 : vector<2x32xf32>
    %141 = arith.mulf %132, %138 : vector<2x32xf32>
    %142 = arith.addf %140, %141 : vector<2x32xf32>
    %143 = math.tanh %142 : vector<2x32xf32>
    %144 = arith.mulf %139, %143 : vector<2x32xf32>
    %c0_69 = arith.constant 0 : index
    %c1_70 = arith.constant 1 : index
    %c0_71 = arith.constant 0 : index
    %145 = vector.load %arg33[%c0_69, %c1_70, %c0_71] : memref<2x8x64xf32, #tpu.memory_space<vmem>>, vector<2x1x32xf32>
    %146 = vector.shape_cast %145 : vector<2x1x32xf32> to vector<2x32xf32>
    %147 = vector.shape_cast %126 : vector<2x32xf32> to vector<2x1x32xf32>
    tpu.vector_store %arg33[%c0_69, %c1_70, %c0_71], %147 {strides = array<i32>} : memref<2x8x64xf32, #tpu.memory_space<vmem>>, vector<2x1x32xf32>,
    %c0_72 = arith.constant 0 : index
    %c6_73 = arith.constant 6 : index
    %c32_74 = arith.constant 32 : index
    %148 = vector.load %arg33[%c0_72, %c6_73, %c32_74] : memref<2x8x64xf32, #tpu.memory_space<vmem>>, vector<2x1x32xf32>
    %149 = vector.shape_cast %148 : vector<2x1x32xf32> to vector<2x32xf32>
    %150 = vector.shape_cast %144 : vector<2x32xf32> to vector<2x1x32xf32>
    tpu.vector_store %arg33[%c0_72, %c6_73, %c32_74], %150 {strides = array<i32>} : memref<2x8x64xf32, #tpu.memory_space<vmem>>, vector<2x1x32xf32>,
    %c0_75 = arith.constant 0 : index
    %c2 = arith.constant 2 : index
    %c0_76 = arith.constant 0 : index
    %151 = vector.load %arg36[%c0_75, %c2, %c0_76] : memref<2x8x128xf32, #tpu.memory_space<vmem>>, vector<2x1x128xf32>
    %152 = vector.shape_cast %151 : vector<2x1x128xf32> to vector<2x128xf32>
    %cst_77 = arith.constant dense<0.000000e+00> : vector<2x128xf32>
    %153 = tpu.matmul %126, %32, %cst_77 {dimension_numbers = #tpu.dot_dimension_numbers<[1], [0], [0], [1], [0, 0, 1, 1], [], []>} : vector<2x32xf32>, vector<32x128xf32>, vector<2x128xf32> -> vector<2x128xf32>
    %154 = arith.addf %152, %153 : vector<2x128xf32>
    %c0_78 = arith.constant 0 : index
    %c5 = arith.constant 5 : index
    %c0_79 = arith.constant 0 : index
    %155 = vector.load %arg37[%c0_78, %c5, %c0_79] : memref<2x8x128xf32, #tpu.memory_space<vmem>>, vector<2x1x128xf32>
    %156 = vector.shape_cast %155 : vector<2x1x128xf32> to vector<2x128xf32>
    %cst_80 = arith.constant dense<0.000000e+00> : vector<2x128xf32>
    %157 = tpu.matmul %144, %35, %cst_80 {dimension_numbers = #tpu.dot_dimension_numbers<[1], [0], [0], [1], [0, 0, 1, 1], [], []>} : vector<2x32xf32>, vector<32x128xf32>, vector<2x128xf32> -> vector<2x128xf32>
    %158 = arith.addf %156, %157 : vector<2x128xf32>
    %159 = arith.negf %154 : vector<2x128xf32>
    %160 = math.exp %159 : vector<2x128xf32>
    %cst_81 = arith.constant 1.000000e+00 : f32
    %161 = vector.broadcast %cst_81 : f32 to vector<2x128xf32>
    %162 = arith.addf %161, %160 : vector<2x128xf32>
    %163 = arith.divf %161, %162 : vector<2x128xf32>
    %164 = vector.extract_strided_slice %163 {offsets = [0, 0], sizes = [2, 32], strides = [1, 1]} : vector<2x128xf32> to vector<2x32xf32>
    %165 = vector.extract_strided_slice %163 {offsets = [0, 32], sizes = [2, 32], strides = [1, 1]} : vector<2x128xf32> to vector<2x32xf32>
    %166 = vector.extract_strided_slice %163 {offsets = [0, 64], sizes = [2, 32], strides = [1, 1]} : vector<2x128xf32> to vector<2x32xf32>
    %cst_82 = arith.constant 2.000000e+00 : f32
    %167 = vector.broadcast %cst_82 : f32 to vector<2x32xf32>
    %168 = arith.mulf %167, %166 : vector<2x32xf32>
    %cst_83 = arith.constant 1.000000e+00 : f32
    %169 = vector.broadcast %cst_83 : f32 to vector<2x32xf32>
    %170 = arith.subf %168, %169 : vector<2x32xf32>
    %171 = vector.extract_strided_slice %163 {offsets = [0, 96], sizes = [2, 32], strides = [1, 1]} : vector<2x128xf32> to vector<2x32xf32>
    %172 = arith.mulf %165, %124 : vector<2x32xf32>
    %173 = arith.mulf %164, %170 : vector<2x32xf32>
    %174 = arith.addf %172, %173 : vector<2x32xf32>
    %175 = math.tanh %174 : vector<2x32xf32>
    %176 = arith.mulf %171, %175 : vector<2x32xf32>
    %177 = arith.negf %158 : vector<2x128xf32>
    %178 = math.exp %177 : vector<2x128xf32>
    %cst_84 = arith.constant 1.000000e+00 : f32
    %179 = vector.broadcast %cst_84 : f32 to vector<2x128xf32>
    %180 = arith.addf %179, %178 : vector<2x128xf32>
    %181 = arith.divf %179, %180 : vector<2x128xf32>
    %182 = vector.extract_strided_slice %181 {offsets = [0, 0], sizes = [2, 32], strides = [1, 1]} : vector<2x128xf32> to vector<2x32xf32>
    %183 = vector.extract_strided_slice %181 {offsets = [0, 32], sizes = [2, 32], strides = [1, 1]} : vector<2x128xf32> to vector<2x32xf32>
    %184 = vector.extract_strided_slice %181 {offsets = [0, 64], sizes = [2, 32], strides = [1, 1]} : vector<2x128xf32> to vector<2x32xf32>
    %cst_85 = arith.constant 2.000000e+00 : f32
    %185 = vector.broadcast %cst_85 : f32 to vector<2x32xf32>
    %186 = arith.mulf %185, %184 : vector<2x32xf32>
    %cst_86 = arith.constant 1.000000e+00 : f32
    %187 = vector.broadcast %cst_86 : f32 to vector<2x32xf32>
    %188 = arith.subf %186, %187 : vector<2x32xf32>
    %189 = vector.extract_strided_slice %181 {offsets = [0, 96], sizes = [2, 32], strides = [1, 1]} : vector<2x128xf32> to vector<2x32xf32>
    %190 = arith.mulf %183, %142 : vector<2x32xf32>
    %191 = arith.mulf %182, %188 : vector<2x32xf32>
    %192 = arith.addf %190, %191 : vector<2x32xf32>
    %193 = math.tanh %192 : vector<2x32xf32>
    %194 = arith.mulf %189, %193 : vector<2x32xf32>
    %c0_87 = arith.constant 0 : index
    %c2_88 = arith.constant 2 : index
    %c0_89 = arith.constant 0 : index
    %195 = vector.load %arg33[%c0_87, %c2_88, %c0_89] : memref<2x8x64xf32, #tpu.memory_space<vmem>>, vector<2x1x32xf32>
    %196 = vector.shape_cast %195 : vector<2x1x32xf32> to vector<2x32xf32>
    %197 = vector.shape_cast %176 : vector<2x32xf32> to vector<2x1x32xf32>
    tpu.vector_store %arg33[%c0_87, %c2_88, %c0_89], %197 {strides = array<i32>} : memref<2x8x64xf32, #tpu.memory_space<vmem>>, vector<2x1x32xf32>,
    %c0_90 = arith.constant 0 : index
    %c5_91 = arith.constant 5 : index
    %c32_92 = arith.constant 32 : index
    %198 = vector.load %arg33[%c0_90, %c5_91, %c32_92] : memref<2x8x64xf32, #tpu.memory_space<vmem>>, vector<2x1x32xf32>
    %199 = vector.shape_cast %198 : vector<2x1x32xf32> to vector<2x32xf32>
    %200 = vector.shape_cast %194 : vector<2x32xf32> to vector<2x1x32xf32>
    tpu.vector_store %arg33[%c0_90, %c5_91, %c32_92], %200 {strides = array<i32>} : memref<2x8x64xf32, #tpu.memory_space<vmem>>, vector<2x1x32xf32>,
    %c0_93 = arith.constant 0 : index
    %c3 = arith.constant 3 : index
    %c0_94 = arith.constant 0 : index
    %201 = vector.load %arg36[%c0_93, %c3, %c0_94] : memref<2x8x128xf32, #tpu.memory_space<vmem>>, vector<2x1x128xf32>
    %202 = vector.shape_cast %201 : vector<2x1x128xf32> to vector<2x128xf32>
    %cst_95 = arith.constant dense<0.000000e+00> : vector<2x128xf32>
    %203 = tpu.matmul %176, %32, %cst_95 {dimension_numbers = #tpu.dot_dimension_numbers<[1], [0], [0], [1], [0, 0, 1, 1], [], []>} : vector<2x32xf32>, vector<32x128xf32>, vector<2x128xf32> -> vector<2x128xf32>
    %204 = arith.addf %202, %203 : vector<2x128xf32>
    %c0_96 = arith.constant 0 : index
    %c4 = arith.constant 4 : index
    %c0_97 = arith.constant 0 : index
    %205 = vector.load %arg37[%c0_96, %c4, %c0_97] : memref<2x8x128xf32, #tpu.memory_space<vmem>>, vector<2x1x128xf32>
    %206 = vector.shape_cast %205 : vector<2x1x128xf32> to vector<2x128xf32>
    %cst_98 = arith.constant dense<0.000000e+00> : vector<2x128xf32>
    %207 = tpu.matmul %194, %35, %cst_98 {dimension_numbers = #tpu.dot_dimension_numbers<[1], [0], [0], [1], [0, 0, 1, 1], [], []>} : vector<2x32xf32>, vector<32x128xf32>, vector<2x128xf32> -> vector<2x128xf32>
    %208 = arith.addf %206, %207 : vector<2x128xf32>
    %209 = arith.negf %204 : vector<2x128xf32>
    %210 = math.exp %209 : vector<2x128xf32>
    %cst_99 = arith.constant 1.000000e+00 : f32
    %211 = vector.broadcast %cst_99 : f32 to vector<2x128xf32>
    %212 = arith.addf %211, %210 : vector<2x128xf32>
    %213 = arith.divf %211, %212 : vector<2x128xf32>
    %214 = vector.extract_strided_slice %213 {offsets = [0, 0], sizes = [2, 32], strides = [1, 1]} : vector<2x128xf32> to vector<2x32xf32>
    %215 = vector.extract_strided_slice %213 {offsets = [0, 32], sizes = [2, 32], strides = [1, 1]} : vector<2x128xf32> to vector<2x32xf32>
    %216 = vector.extract_strided_slice %213 {offsets = [0, 64], sizes = [2, 32], strides = [1, 1]} : vector<2x128xf32> to vector<2x32xf32>
    %cst_100 = arith.constant 2.000000e+00 : f32
    %217 = vector.broadcast %cst_100 : f32 to vector<2x32xf32>
    %218 = arith.mulf %217, %216 : vector<2x32xf32>
    %cst_101 = arith.constant 1.000000e+00 : f32
    %219 = vector.broadcast %cst_101 : f32 to vector<2x32xf32>
    %220 = arith.subf %218, %219 : vector<2x32xf32>
    %221 = vector.extract_strided_slice %213 {offsets = [0, 96], sizes = [2, 32], strides = [1, 1]} : vector<2x128xf32> to vector<2x32xf32>
    %222 = arith.mulf %215, %174 : vector<2x32xf32>
    %223 = arith.mulf %214, %220 : vector<2x32xf32>
    %224 = arith.addf %222, %223 : vector<2x32xf32>
    %225 = math.tanh %224 : vector<2x32xf32>
    %226 = arith.mulf %221, %225 : vector<2x32xf32>
    %227 = arith.negf %208 : vector<2x128xf32>
    %228 = math.exp %227 : vector<2x128xf32>
    %cst_102 = arith.constant 1.000000e+00 : f32
    %229 = vector.broadcast %cst_102 : f32 to vector<2x128xf32>
    %230 = arith.addf %229, %228 : vector<2x128xf32>
    %231 = arith.divf %229, %230 : vector<2x128xf32>
    %232 = vector.extract_strided_slice %231 {offsets = [0, 0], sizes = [2, 32], strides = [1, 1]} : vector<2x128xf32> to vector<2x32xf32>
    %233 = vector.extract_strided_slice %231 {offsets = [0, 32], sizes = [2, 32], strides = [1, 1]} : vector<2x128xf32> to vector<2x32xf32>
    %234 = vector.extract_strided_slice %231 {offsets = [0, 64], sizes = [2, 32], strides = [1, 1]} : vector<2x128xf32> to vector<2x32xf32>
    %cst_103 = arith.constant 2.000000e+00 : f32
    %235 = vector.broadcast %cst_103 : f32 to vector<2x32xf32>
    %236 = arith.mulf %235, %234 : vector<2x32xf32>
    %cst_104 = arith.constant 1.000000e+00 : f32
    %237 = vector.broadcast %cst_104 : f32 to vector<2x32xf32>
    %238 = arith.subf %236, %237 : vector<2x32xf32>
    %239 = vector.extract_strided_slice %231 {offsets = [0, 96], sizes = [2, 32], strides = [1, 1]} : vector<2x128xf32> to vector<2x32xf32>
    %240 = arith.mulf %233, %192 : vector<2x32xf32>
    %241 = arith.mulf %232, %238 : vector<2x32xf32>
    %242 = arith.addf %240, %241 : vector<2x32xf32>
    %243 = math.tanh %242 : vector<2x32xf32>
    %244 = arith.mulf %239, %243 : vector<2x32xf32>
    %c0_105 = arith.constant 0 : index
    %c3_106 = arith.constant 3 : index
    %c0_107 = arith.constant 0 : index
    %245 = vector.load %arg33[%c0_105, %c3_106, %c0_107] : memref<2x8x64xf32, #tpu.memory_space<vmem>>, vector<2x1x32xf32>
    %246 = vector.shape_cast %245 : vector<2x1x32xf32> to vector<2x32xf32>
    %247 = vector.shape_cast %226 : vector<2x32xf32> to vector<2x1x32xf32>
    tpu.vector_store %arg33[%c0_105, %c3_106, %c0_107], %247 {strides = array<i32>} : memref<2x8x64xf32, #tpu.memory_space<vmem>>, vector<2x1x32xf32>,
    %c0_108 = arith.constant 0 : index
    %c4_109 = arith.constant 4 : index
    %c32_110 = arith.constant 32 : index
    %248 = vector.load %arg33[%c0_108, %c4_109, %c32_110] : memref<2x8x64xf32, #tpu.memory_space<vmem>>, vector<2x1x32xf32>
    %249 = vector.shape_cast %248 : vector<2x1x32xf32> to vector<2x32xf32>
    %250 = vector.shape_cast %244 : vector<2x32xf32> to vector<2x1x32xf32>
    tpu.vector_store %arg33[%c0_108, %c4_109, %c32_110], %250 {strides = array<i32>} : memref<2x8x64xf32, #tpu.memory_space<vmem>>, vector<2x1x32xf32>,
    %c0_111 = arith.constant 0 : index
    %c4_112 = arith.constant 4 : index
    %c0_113 = arith.constant 0 : index
    %251 = vector.load %arg36[%c0_111, %c4_112, %c0_113] : memref<2x8x128xf32, #tpu.memory_space<vmem>>, vector<2x1x128xf32>
    %252 = vector.shape_cast %251 : vector<2x1x128xf32> to vector<2x128xf32>
    %cst_114 = arith.constant dense<0.000000e+00> : vector<2x128xf32>
    %253 = tpu.matmul %226, %32, %cst_114 {dimension_numbers = #tpu.dot_dimension_numbers<[1], [0], [0], [1], [0, 0, 1, 1], [], []>} : vector<2x32xf32>, vector<32x128xf32>, vector<2x128xf32> -> vector<2x128xf32>
    %254 = arith.addf %252, %253 : vector<2x128xf32>
    %c0_115 = arith.constant 0 : index
    %c3_116 = arith.constant 3 : index
    %c0_117 = arith.constant 0 : index
    %255 = vector.load %arg37[%c0_115, %c3_116, %c0_117] : memref<2x8x128xf32, #tpu.memory_space<vmem>>, vector<2x1x128xf32>
    %256 = vector.shape_cast %255 : vector<2x1x128xf32> to vector<2x128xf32>
    %cst_118 = arith.constant dense<0.000000e+00> : vector<2x128xf32>
    %257 = tpu.matmul %244, %35, %cst_118 {dimension_numbers = #tpu.dot_dimension_numbers<[1], [0], [0], [1], [0, 0, 1, 1], [], []>} : vector<2x32xf32>, vector<32x128xf32>, vector<2x128xf32> -> vector<2x128xf32>
    %258 = arith.addf %256, %257 : vector<2x128xf32>
    %259 = arith.negf %254 : vector<2x128xf32>
    %260 = math.exp %259 : vector<2x128xf32>
    %cst_119 = arith.constant 1.000000e+00 : f32
    %261 = vector.broadcast %cst_119 : f32 to vector<2x128xf32>
    %262 = arith.addf %261, %260 : vector<2x128xf32>
    %263 = arith.divf %261, %262 : vector<2x128xf32>
    %264 = vector.extract_strided_slice %263 {offsets = [0, 0], sizes = [2, 32], strides = [1, 1]} : vector<2x128xf32> to vector<2x32xf32>
    %265 = vector.extract_strided_slice %263 {offsets = [0, 32], sizes = [2, 32], strides = [1, 1]} : vector<2x128xf32> to vector<2x32xf32>
    %266 = vector.extract_strided_slice %263 {offsets = [0, 64], sizes = [2, 32], strides = [1, 1]} : vector<2x128xf32> to vector<2x32xf32>
    %cst_120 = arith.constant 2.000000e+00 : f32
    %267 = vector.broadcast %cst_120 : f32 to vector<2x32xf32>
    %268 = arith.mulf %267, %266 : vector<2x32xf32>
    %cst_121 = arith.constant 1.000000e+00 : f32
    %269 = vector.broadcast %cst_121 : f32 to vector<2x32xf32>
    %270 = arith.subf %268, %269 : vector<2x32xf32>
    %271 = vector.extract_strided_slice %263 {offsets = [0, 96], sizes = [2, 32], strides = [1, 1]} : vector<2x128xf32> to vector<2x32xf32>
    %272 = arith.mulf %265, %224 : vector<2x32xf32>
    %273 = arith.mulf %264, %270 : vector<2x32xf32>
    %274 = arith.addf %272, %273 : vector<2x32xf32>
    %275 = math.tanh %274 : vector<2x32xf32>
    %276 = arith.mulf %271, %275 : vector<2x32xf32>
    %277 = arith.negf %258 : vector<2x128xf32>
    %278 = math.exp %277 : vector<2x128xf32>
    %cst_122 = arith.constant 1.000000e+00 : f32
    %279 = vector.broadcast %cst_122 : f32 to vector<2x128xf32>
    %280 = arith.addf %279, %278 : vector<2x128xf32>
    %281 = arith.divf %279, %280 : vector<2x128xf32>
    %282 = vector.extract_strided_slice %281 {offsets = [0, 0], sizes = [2, 32], strides = [1, 1]} : vector<2x128xf32> to vector<2x32xf32>
    %283 = vector.extract_strided_slice %281 {offsets = [0, 32], sizes = [2, 32], strides = [1, 1]} : vector<2x128xf32> to vector<2x32xf32>
    %284 = vector.extract_strided_slice %281 {offsets = [0, 64], sizes = [2, 32], strides = [1, 1]} : vector<2x128xf32> to vector<2x32xf32>
    %cst_123 = arith.constant 2.000000e+00 : f32
    %285 = vector.broadcast %cst_123 : f32 to vector<2x32xf32>
    %286 = arith.mulf %285, %284 : vector<2x32xf32>
    %cst_124 = arith.constant 1.000000e+00 : f32
    %287 = vector.broadcast %cst_124 : f32 to vector<2x32xf32>
    %288 = arith.subf %286, %287 : vector<2x32xf32>
    %289 = vector.extract_strided_slice %281 {offsets = [0, 96], sizes = [2, 32], strides = [1, 1]} : vector<2x128xf32> to vector<2x32xf32>
    %290 = arith.mulf %283, %242 : vector<2x32xf32>
    %291 = arith.mulf %282, %288 : vector<2x32xf32>
    %292 = arith.addf %290, %291 : vector<2x32xf32>
    %293 = math.tanh %292 : vector<2x32xf32>
    %294 = arith.mulf %289, %293 : vector<2x32xf32>
    %c0_125 = arith.constant 0 : index
    %c4_126 = arith.constant 4 : index
    %c0_127 = arith.constant 0 : index
    %295 = vector.load %arg33[%c0_125, %c4_126, %c0_127] : memref<2x8x64xf32, #tpu.memory_space<vmem>>, vector<2x1x32xf32>
    %296 = vector.shape_cast %295 : vector<2x1x32xf32> to vector<2x32xf32>
    %297 = vector.shape_cast %276 : vector<2x32xf32> to vector<2x1x32xf32>
    tpu.vector_store %arg33[%c0_125, %c4_126, %c0_127], %297 {strides = array<i32>} : memref<2x8x64xf32, #tpu.memory_space<vmem>>, vector<2x1x32xf32>,
    %c0_128 = arith.constant 0 : index
    %c3_129 = arith.constant 3 : index
    %c32_130 = arith.constant 32 : index
    %298 = vector.load %arg33[%c0_128, %c3_129, %c32_130] : memref<2x8x64xf32, #tpu.memory_space<vmem>>, vector<2x1x32xf32>
    %299 = vector.shape_cast %298 : vector<2x1x32xf32> to vector<2x32xf32>
    %300 = vector.shape_cast %294 : vector<2x32xf32> to vector<2x1x32xf32>
    tpu.vector_store %arg33[%c0_128, %c3_129, %c32_130], %300 {strides = array<i32>} : memref<2x8x64xf32, #tpu.memory_space<vmem>>, vector<2x1x32xf32>,
    %c0_131 = arith.constant 0 : index
    %c5_132 = arith.constant 5 : index
    %c0_133 = arith.constant 0 : index
    %301 = vector.load %arg36[%c0_131, %c5_132, %c0_133] : memref<2x8x128xf32, #tpu.memory_space<vmem>>, vector<2x1x128xf32>
    %302 = vector.shape_cast %301 : vector<2x1x128xf32> to vector<2x128xf32>
    %cst_134 = arith.constant dense<0.000000e+00> : vector<2x128xf32>
    %303 = tpu.matmul %276, %32, %cst_134 {dimension_numbers = #tpu.dot_dimension_numbers<[1], [0], [0], [1], [0, 0, 1, 1], [], []>} : vector<2x32xf32>, vector<32x128xf32>, vector<2x128xf32> -> vector<2x128xf32>
    %304 = arith.addf %302, %303 : vector<2x128xf32>
    %c0_135 = arith.constant 0 : index
    %c2_136 = arith.constant 2 : index
    %c0_137 = arith.constant 0 : index
    %305 = vector.load %arg37[%c0_135, %c2_136, %c0_137] : memref<2x8x128xf32, #tpu.memory_space<vmem>>, vector<2x1x128xf32>
    %306 = vector.shape_cast %305 : vector<2x1x128xf32> to vector<2x128xf32>
    %cst_138 = arith.constant dense<0.000000e+00> : vector<2x128xf32>
    %307 = tpu.matmul %294, %35, %cst_138 {dimension_numbers = #tpu.dot_dimension_numbers<[1], [0], [0], [1], [0, 0, 1, 1], [], []>} : vector<2x32xf32>, vector<32x128xf32>, vector<2x128xf32> -> vector<2x128xf32>
    %308 = arith.addf %306, %307 : vector<2x128xf32>
    %309 = arith.negf %304 : vector<2x128xf32>
    %310 = math.exp %309 : vector<2x128xf32>
    %cst_139 = arith.constant 1.000000e+00 : f32
    %311 = vector.broadcast %cst_139 : f32 to vector<2x128xf32>
    %312 = arith.addf %311, %310 : vector<2x128xf32>
    %313 = arith.divf %311, %312 : vector<2x128xf32>
    %314 = vector.extract_strided_slice %313 {offsets = [0, 0], sizes = [2, 32], strides = [1, 1]} : vector<2x128xf32> to vector<2x32xf32>
    %315 = vector.extract_strided_slice %313 {offsets = [0, 32], sizes = [2, 32], strides = [1, 1]} : vector<2x128xf32> to vector<2x32xf32>
    %316 = vector.extract_strided_slice %313 {offsets = [0, 64], sizes = [2, 32], strides = [1, 1]} : vector<2x128xf32> to vector<2x32xf32>
    %cst_140 = arith.constant 2.000000e+00 : f32
    %317 = vector.broadcast %cst_140 : f32 to vector<2x32xf32>
    %318 = arith.mulf %317, %316 : vector<2x32xf32>
    %cst_141 = arith.constant 1.000000e+00 : f32
    %319 = vector.broadcast %cst_141 : f32 to vector<2x32xf32>
    %320 = arith.subf %318, %319 : vector<2x32xf32>
    %321 = vector.extract_strided_slice %313 {offsets = [0, 96], sizes = [2, 32], strides = [1, 1]} : vector<2x128xf32> to vector<2x32xf32>
    %322 = arith.mulf %315, %274 : vector<2x32xf32>
    %323 = arith.mulf %314, %320 : vector<2x32xf32>
    %324 = arith.addf %322, %323 : vector<2x32xf32>
    %325 = math.tanh %324 : vector<2x32xf32>
    %326 = arith.mulf %321, %325 : vector<2x32xf32>
    %327 = arith.negf %308 : vector<2x128xf32>
    %328 = math.exp %327 : vector<2x128xf32>
    %cst_142 = arith.constant 1.000000e+00 : f32
    %329 = vector.broadcast %cst_142 : f32 to vector<2x128xf32>
    %330 = arith.addf %329, %328 : vector<2x128xf32>
    %331 = arith.divf %329, %330 : vector<2x128xf32>
    %332 = vector.extract_strided_slice %331 {offsets = [0, 0], sizes = [2, 32], strides = [1, 1]} : vector<2x128xf32> to vector<2x32xf32>
    %333 = vector.extract_strided_slice %331 {offsets = [0, 32], sizes = [2, 32], strides = [1, 1]} : vector<2x128xf32> to vector<2x32xf32>
    %334 = vector.extract_strided_slice %331 {offsets = [0, 64], sizes = [2, 32], strides = [1, 1]} : vector<2x128xf32> to vector<2x32xf32>
    %cst_143 = arith.constant 2.000000e+00 : f32
    %335 = vector.broadcast %cst_143 : f32 to vector<2x32xf32>
    %336 = arith.mulf %335, %334 : vector<2x32xf32>
    %cst_144 = arith.constant 1.000000e+00 : f32
    %337 = vector.broadcast %cst_144 : f32 to vector<2x32xf32>
    %338 = arith.subf %336, %337 : vector<2x32xf32>
    %339 = vector.extract_strided_slice %331 {offsets = [0, 96], sizes = [2, 32], strides = [1, 1]} : vector<2x128xf32> to vector<2x32xf32>
    %340 = arith.mulf %333, %292 : vector<2x32xf32>
    %341 = arith.mulf %332, %338 : vector<2x32xf32>
    %342 = arith.addf %340, %341 : vector<2x32xf32>
    %343 = math.tanh %342 : vector<2x32xf32>
    %344 = arith.mulf %339, %343 : vector<2x32xf32>
    %c0_145 = arith.constant 0 : index
    %c5_146 = arith.constant 5 : index
    %c0_147 = arith.constant 0 : index
    %345 = vector.load %arg33[%c0_145, %c5_146, %c0_147] : memref<2x8x64xf32, #tpu.memory_space<vmem>>, vector<2x1x32xf32>
    %346 = vector.shape_cast %345 : vector<2x1x32xf32> to vector<2x32xf32>
    %347 = vector.shape_cast %326 : vector<2x32xf32> to vector<2x1x32xf32>
    tpu.vector_store %arg33[%c0_145, %c5_146, %c0_147], %347 {strides = array<i32>} : memref<2x8x64xf32, #tpu.memory_space<vmem>>, vector<2x1x32xf32>,
    %c0_148 = arith.constant 0 : index
    %c2_149 = arith.constant 2 : index
    %c32_150 = arith.constant 32 : index
    %348 = vector.load %arg33[%c0_148, %c2_149, %c32_150] : memref<2x8x64xf32, #tpu.memory_space<vmem>>, vector<2x1x32xf32>
    %349 = vector.shape_cast %348 : vector<2x1x32xf32> to vector<2x32xf32>
    %350 = vector.shape_cast %344 : vector<2x32xf32> to vector<2x1x32xf32>
    tpu.vector_store %arg33[%c0_148, %c2_149, %c32_150], %350 {strides = array<i32>} : memref<2x8x64xf32, #tpu.memory_space<vmem>>, vector<2x1x32xf32>,
    %c0_151 = arith.constant 0 : index
    %c6_152 = arith.constant 6 : index
    %c0_153 = arith.constant 0 : index
    %351 = vector.load %arg36[%c0_151, %c6_152, %c0_153] : memref<2x8x128xf32, #tpu.memory_space<vmem>>, vector<2x1x128xf32>
    %352 = vector.shape_cast %351 : vector<2x1x128xf32> to vector<2x128xf32>
    %cst_154 = arith.constant dense<0.000000e+00> : vector<2x128xf32>
    %353 = tpu.matmul %326, %32, %cst_154 {dimension_numbers = #tpu.dot_dimension_numbers<[1], [0], [0], [1], [0, 0, 1, 1], [], []>} : vector<2x32xf32>, vector<32x128xf32>, vector<2x128xf32> -> vector<2x128xf32>
    %354 = arith.addf %352, %353 : vector<2x128xf32>
    %c0_155 = arith.constant 0 : index
    %c1_156 = arith.constant 1 : index
    %c0_157 = arith.constant 0 : index
    %355 = vector.load %arg37[%c0_155, %c1_156, %c0_157] : memref<2x8x128xf32, #tpu.memory_space<vmem>>, vector<2x1x128xf32>
    %356 = vector.shape_cast %355 : vector<2x1x128xf32> to vector<2x128xf32>
    %cst_158 = arith.constant dense<0.000000e+00> : vector<2x128xf32>
    %357 = tpu.matmul %344, %35, %cst_158 {dimension_numbers = #tpu.dot_dimension_numbers<[1], [0], [0], [1], [0, 0, 1, 1], [], []>} : vector<2x32xf32>, vector<32x128xf32>, vector<2x128xf32> -> vector<2x128xf32>
    %358 = arith.addf %356, %357 : vector<2x128xf32>
    %359 = arith.negf %354 : vector<2x128xf32>
    %360 = math.exp %359 : vector<2x128xf32>
    %cst_159 = arith.constant 1.000000e+00 : f32
    %361 = vector.broadcast %cst_159 : f32 to vector<2x128xf32>
    %362 = arith.addf %361, %360 : vector<2x128xf32>
    %363 = arith.divf %361, %362 : vector<2x128xf32>
    %364 = vector.extract_strided_slice %363 {offsets = [0, 0], sizes = [2, 32], strides = [1, 1]} : vector<2x128xf32> to vector<2x32xf32>
    %365 = vector.extract_strided_slice %363 {offsets = [0, 32], sizes = [2, 32], strides = [1, 1]} : vector<2x128xf32> to vector<2x32xf32>
    %366 = vector.extract_strided_slice %363 {offsets = [0, 64], sizes = [2, 32], strides = [1, 1]} : vector<2x128xf32> to vector<2x32xf32>
    %cst_160 = arith.constant 2.000000e+00 : f32
    %367 = vector.broadcast %cst_160 : f32 to vector<2x32xf32>
    %368 = arith.mulf %367, %366 : vector<2x32xf32>
    %cst_161 = arith.constant 1.000000e+00 : f32
    %369 = vector.broadcast %cst_161 : f32 to vector<2x32xf32>
    %370 = arith.subf %368, %369 : vector<2x32xf32>
    %371 = vector.extract_strided_slice %363 {offsets = [0, 96], sizes = [2, 32], strides = [1, 1]} : vector<2x128xf32> to vector<2x32xf32>
    %372 = arith.mulf %365, %324 : vector<2x32xf32>
    %373 = arith.mulf %364, %370 : vector<2x32xf32>
    %374 = arith.addf %372, %373 : vector<2x32xf32>
    %375 = math.tanh %374 : vector<2x32xf32>
    %376 = arith.mulf %371, %375 : vector<2x32xf32>
    %377 = arith.negf %358 : vector<2x128xf32>
    %378 = math.exp %377 : vector<2x128xf32>
    %cst_162 = arith.constant 1.000000e+00 : f32
    %379 = vector.broadcast %cst_162 : f32 to vector<2x128xf32>
    %380 = arith.addf %379, %378 : vector<2x128xf32>
    %381 = arith.divf %379, %380 : vector<2x128xf32>
    %382 = vector.extract_strided_slice %381 {offsets = [0, 0], sizes = [2, 32], strides = [1, 1]} : vector<2x128xf32> to vector<2x32xf32>
    %383 = vector.extract_strided_slice %381 {offsets = [0, 32], sizes = [2, 32], strides = [1, 1]} : vector<2x128xf32> to vector<2x32xf32>
    %384 = vector.extract_strided_slice %381 {offsets = [0, 64], sizes = [2, 32], strides = [1, 1]} : vector<2x128xf32> to vector<2x32xf32>
    %cst_163 = arith.constant 2.000000e+00 : f32
    %385 = vector.broadcast %cst_163 : f32 to vector<2x32xf32>
    %386 = arith.mulf %385, %384 : vector<2x32xf32>
    %cst_164 = arith.constant 1.000000e+00 : f32
    %387 = vector.broadcast %cst_164 : f32 to vector<2x32xf32>
    %388 = arith.subf %386, %387 : vector<2x32xf32>
    %389 = vector.extract_strided_slice %381 {offsets = [0, 96], sizes = [2, 32], strides = [1, 1]} : vector<2x128xf32> to vector<2x32xf32>
    %390 = arith.mulf %383, %342 : vector<2x32xf32>
    %391 = arith.mulf %382, %388 : vector<2x32xf32>
    %392 = arith.addf %390, %391 : vector<2x32xf32>
    %393 = math.tanh %392 : vector<2x32xf32>
    %394 = arith.mulf %389, %393 : vector<2x32xf32>
    %c0_165 = arith.constant 0 : index
    %c6_166 = arith.constant 6 : index
    %c0_167 = arith.constant 0 : index
    %395 = vector.load %arg33[%c0_165, %c6_166, %c0_167] : memref<2x8x64xf32, #tpu.memory_space<vmem>>, vector<2x1x32xf32>
    %396 = vector.shape_cast %395 : vector<2x1x32xf32> to vector<2x32xf32>
    %397 = vector.shape_cast %376 : vector<2x32xf32> to vector<2x1x32xf32>
    tpu.vector_store %arg33[%c0_165, %c6_166, %c0_167], %397 {strides = array<i32>} : memref<2x8x64xf32, #tpu.memory_space<vmem>>, vector<2x1x32xf32>,
    %c0_168 = arith.constant 0 : index
    %c1_169 = arith.constant 1 : index
    %c32_170 = arith.constant 32 : index
    %398 = vector.load %arg33[%c0_168, %c1_169, %c32_170] : memref<2x8x64xf32, #tpu.memory_space<vmem>>, vector<2x1x32xf32>
    %399 = vector.shape_cast %398 : vector<2x1x32xf32> to vector<2x32xf32>
    %400 = vector.shape_cast %394 : vector<2x32xf32> to vector<2x1x32xf32>
    tpu.vector_store %arg33[%c0_168, %c1_169, %c32_170], %400 {strides = array<i32>} : memref<2x8x64xf32, #tpu.memory_space<vmem>>, vector<2x1x32xf32>,
    %c0_171 = arith.constant 0 : index
    %c7_172 = arith.constant 7 : index
    %c0_173 = arith.constant 0 : index
    %401 = vector.load %arg36[%c0_171, %c7_172, %c0_173] : memref<2x8x128xf32, #tpu.memory_space<vmem>>, vector<2x1x128xf32>
    %402 = vector.shape_cast %401 : vector<2x1x128xf32> to vector<2x128xf32>
    %cst_174 = arith.constant dense<0.000000e+00> : vector<2x128xf32>
    %403 = tpu.matmul %376, %32, %cst_174 {dimension_numbers = #tpu.dot_dimension_numbers<[1], [0], [0], [1], [0, 0, 1, 1], [], []>} : vector<2x32xf32>, vector<32x128xf32>, vector<2x128xf32> -> vector<2x128xf32>
    %404 = arith.addf %402, %403 : vector<2x128xf32>
    %c0_175 = arith.constant 0 : index
    %c0_176 = arith.constant 0 : index
    %c0_177 = arith.constant 0 : index
    %405 = vector.load %arg37[%c0_175, %c0_176, %c0_177] : memref<2x8x128xf32, #tpu.memory_space<vmem>>, vector<2x1x128xf32>
    %406 = vector.shape_cast %405 : vector<2x1x128xf32> to vector<2x128xf32>
    %cst_178 = arith.constant dense<0.000000e+00> : vector<2x128xf32>
    %407 = tpu.matmul %394, %35, %cst_178 {dimension_numbers = #tpu.dot_dimension_numbers<[1], [0], [0], [1], [0, 0, 1, 1], [], []>} : vector<2x32xf32>, vector<32x128xf32>, vector<2x128xf32> -> vector<2x128xf32>
    %408 = arith.addf %406, %407 : vector<2x128xf32>
    %409 = arith.negf %404 : vector<2x128xf32>
    %410 = math.exp %409 : vector<2x128xf32>
    %cst_179 = arith.constant 1.000000e+00 : f32
    %411 = vector.broadcast %cst_179 : f32 to vector<2x128xf32>
    %412 = arith.addf %411, %410 : vector<2x128xf32>
    %413 = arith.divf %411, %412 : vector<2x128xf32>
    %414 = vector.extract_strided_slice %413 {offsets = [0, 0], sizes = [2, 32], strides = [1, 1]} : vector<2x128xf32> to vector<2x32xf32>
    %415 = vector.extract_strided_slice %413 {offsets = [0, 32], sizes = [2, 32], strides = [1, 1]} : vector<2x128xf32> to vector<2x32xf32>
    %416 = vector.extract_strided_slice %413 {offsets = [0, 64], sizes = [2, 32], strides = [1, 1]} : vector<2x128xf32> to vector<2x32xf32>
    %cst_180 = arith.constant 2.000000e+00 : f32
    %417 = vector.broadcast %cst_180 : f32 to vector<2x32xf32>
    %418 = arith.mulf %417, %416 : vector<2x32xf32>
    %cst_181 = arith.constant 1.000000e+00 : f32
    %419 = vector.broadcast %cst_181 : f32 to vector<2x32xf32>
    %420 = arith.subf %418, %419 : vector<2x32xf32>
    %421 = vector.extract_strided_slice %413 {offsets = [0, 96], sizes = [2, 32], strides = [1, 1]} : vector<2x128xf32> to vector<2x32xf32>
    %422 = arith.mulf %415, %374 : vector<2x32xf32>
    %423 = arith.mulf %414, %420 : vector<2x32xf32>
    %424 = arith.addf %422, %423 : vector<2x32xf32>
    %425 = math.tanh %424 : vector<2x32xf32>
    %426 = arith.mulf %421, %425 : vector<2x32xf32>
    %427 = arith.negf %408 : vector<2x128xf32>
    %428 = math.exp %427 : vector<2x128xf32>
    %cst_182 = arith.constant 1.000000e+00 : f32
    %429 = vector.broadcast %cst_182 : f32 to vector<2x128xf32>
    %430 = arith.addf %429, %428 : vector<2x128xf32>
    %431 = arith.divf %429, %430 : vector<2x128xf32>
    %432 = vector.extract_strided_slice %431 {offsets = [0, 0], sizes = [2, 32], strides = [1, 1]} : vector<2x128xf32> to vector<2x32xf32>
    %433 = vector.extract_strided_slice %431 {offsets = [0, 32], sizes = [2, 32], strides = [1, 1]} : vector<2x128xf32> to vector<2x32xf32>
    %434 = vector.extract_strided_slice %431 {offsets = [0, 64], sizes = [2, 32], strides = [1, 1]} : vector<2x128xf32> to vector<2x32xf32>
    %cst_183 = arith.constant 2.000000e+00 : f32
    %435 = vector.broadcast %cst_183 : f32 to vector<2x32xf32>
    %436 = arith.mulf %435, %434 : vector<2x32xf32>
    %cst_184 = arith.constant 1.000000e+00 : f32
    %437 = vector.broadcast %cst_184 : f32 to vector<2x32xf32>
    %438 = arith.subf %436, %437 : vector<2x32xf32>
    %439 = vector.extract_strided_slice %431 {offsets = [0, 96], sizes = [2, 32], strides = [1, 1]} : vector<2x128xf32> to vector<2x32xf32>
    %440 = arith.mulf %433, %392 : vector<2x32xf32>
    %441 = arith.mulf %432, %438 : vector<2x32xf32>
    %442 = arith.addf %440, %441 : vector<2x32xf32>
    %443 = math.tanh %442 : vector<2x32xf32>
    %444 = arith.mulf %439, %443 : vector<2x32xf32>
    %c0_185 = arith.constant 0 : index
    %c7_186 = arith.constant 7 : index
    %c0_187 = arith.constant 0 : index
    %445 = vector.load %arg33[%c0_185, %c7_186, %c0_187] : memref<2x8x64xf32, #tpu.memory_space<vmem>>, vector<2x1x32xf32>
    %446 = vector.shape_cast %445 : vector<2x1x32xf32> to vector<2x32xf32>
    %447 = vector.shape_cast %426 : vector<2x32xf32> to vector<2x1x32xf32>
    tpu.vector_store %arg33[%c0_185, %c7_186, %c0_187], %447 {strides = array<i32>} : memref<2x8x64xf32, #tpu.memory_space<vmem>>, vector<2x1x32xf32>,
    %c0_188 = arith.constant 0 : index
    %c0_189 = arith.constant 0 : index
    %c32_190 = arith.constant 32 : index
    %448 = vector.load %arg33[%c0_188, %c0_189, %c32_190] : memref<2x8x64xf32, #tpu.memory_space<vmem>>, vector<2x1x32xf32>
    %449 = vector.shape_cast %448 : vector<2x1x32xf32> to vector<2x32xf32>
    %450 = vector.shape_cast %444 : vector<2x32xf32> to vector<2x1x32xf32>
    tpu.vector_store %arg33[%c0_188, %c0_189, %c32_190], %450 {strides = array<i32>} : memref<2x8x64xf32, #tpu.memory_space<vmem>>, vector<2x1x32xf32>,
    %c0_191 = arith.constant 0 : index
    %c0_192 = arith.constant 0 : index
    %c0_193 = arith.constant 0 : index
    %451 = vector.load %arg33[%c0_191, %c0_192, %c0_193] : memref<2x8x64xf32, #tpu.memory_space<vmem>>, vector<2x8x64xf32>
    %452 = vector.shape_cast %451 : vector<2x8x64xf32> to vector<16x64xf32>
    %c0_194 = arith.constant 0 : index
    %c0_195 = arith.constant 0 : index
    %453 = vector.load %arg11[%c0_194, %c0_195] : memref<64x128xf32, #tpu.memory_space<vmem>>, vector<64x128xf32>
    %c0_196 = arith.constant 0 : index
    %c0_197 = arith.constant 0 : index
    %454 = vector.load %arg12[%c0_196, %c0_197] : memref<32x128xf32, #tpu.memory_space<vmem>>, vector<32x128xf32>
    %c0_198 = arith.constant 0 : index
    %c0_199 = arith.constant 0 : index
    %455 = vector.load %arg13[%c0_198, %c0_199] : memref<1x128xf32, #tpu.memory_space<vmem>>, vector<1x128xf32>
    %c0_200 = arith.constant 0 : index
    %c0_201 = arith.constant 0 : index
    %456 = vector.load %arg14[%c0_200, %c0_201] : memref<64x128xf32, #tpu.memory_space<vmem>>, vector<64x128xf32>
    %c0_202 = arith.constant 0 : index
    %c0_203 = arith.constant 0 : index
    %457 = vector.load %arg15[%c0_202, %c0_203] : memref<32x128xf32, #tpu.memory_space<vmem>>, vector<32x128xf32>
    %c0_204 = arith.constant 0 : index
    %c0_205 = arith.constant 0 : index
    %458 = vector.load %arg16[%c0_204, %c0_205] : memref<1x128xf32, #tpu.memory_space<vmem>>, vector<1x128xf32>
    %cst_206 = arith.constant dense<0.000000e+00> : vector<16x128xf32>
    %459 = tpu.matmul %452, %453, %cst_206 {dimension_numbers = #tpu.dot_dimension_numbers<[1], [0], [0], [1], [0, 0, 1, 1], [], []>} : vector<16x64xf32>, vector<64x128xf32>, vector<16x128xf32> -> vector<16x128xf32>
    %460 = vector.broadcast %455 : vector<1x128xf32> to vector<16x128xf32>
    %461 = arith.addf %459, %460 : vector<16x128xf32>
    %462 = vector.shape_cast %461 : vector<16x128xf32> to vector<2x8x128xf32>
    %c0_207 = arith.constant 0 : index
    %c0_208 = arith.constant 0 : index
    %c0_209 = arith.constant 0 : index
    %463 = vector.load %arg36[%c0_207, %c0_208, %c0_209] : memref<2x8x128xf32, #tpu.memory_space<vmem>>, vector<2x8x128xf32>
    tpu.vector_store %arg36[%c0_207, %c0_208, %c0_209], %462 {strides = array<i32>} : memref<2x8x128xf32, #tpu.memory_space<vmem>>, vector<2x8x128xf32>,
    %cst_210 = arith.constant dense<0.000000e+00> : vector<16x128xf32>
    %464 = tpu.matmul %452, %456, %cst_210 {dimension_numbers = #tpu.dot_dimension_numbers<[1], [0], [0], [1], [0, 0, 1, 1], [], []>} : vector<16x64xf32>, vector<64x128xf32>, vector<16x128xf32> -> vector<16x128xf32>
    %465 = vector.broadcast %458 : vector<1x128xf32> to vector<16x128xf32>
    %466 = arith.addf %464, %465 : vector<16x128xf32>
    %467 = vector.shape_cast %466 : vector<16x128xf32> to vector<2x8x128xf32>
    %c0_211 = arith.constant 0 : index
    %c0_212 = arith.constant 0 : index
    %c0_213 = arith.constant 0 : index
    %468 = vector.load %arg37[%c0_211, %c0_212, %c0_213] : memref<2x8x128xf32, #tpu.memory_space<vmem>>, vector<2x8x128xf32>
    tpu.vector_store %arg37[%c0_211, %c0_212, %c0_213], %467 {strides = array<i32>} : memref<2x8x128xf32, #tpu.memory_space<vmem>>, vector<2x8x128xf32>,
    %cst_214 = arith.constant 0.000000e+00 : f32
    %469 = vector.broadcast %cst_214 : f32 to vector<2x32xf32>
    %cst_215 = arith.constant 0.000000e+00 : f32
    %470 = vector.broadcast %cst_215 : f32 to vector<2x32xf32>
    %cst_216 = arith.constant 0.000000e+00 : f32
    %471 = vector.broadcast %cst_216 : f32 to vector<2x32xf32>
    %cst_217 = arith.constant 0.000000e+00 : f32
    %472 = vector.broadcast %cst_217 : f32 to vector<2x32xf32>
    %c0_218 = arith.constant 0 : index
    %c0_219 = arith.constant 0 : index
    %c0_220 = arith.constant 0 : index
    %473 = vector.load %arg36[%c0_218, %c0_219, %c0_220] : memref<2x8x128xf32, #tpu.memory_space<vmem>>, vector<2x1x128xf32>
    %474 = vector.shape_cast %473 : vector<2x1x128xf32> to vector<2x128xf32>
    %cst_221 = arith.constant dense<0.000000e+00> : vector<2x128xf32>
    %475 = tpu.matmul %469, %454, %cst_221 {dimension_numbers = #tpu.dot_dimension_numbers<[1], [0], [0], [1], [0, 0, 1, 1], [], []>} : vector<2x32xf32>, vector<32x128xf32>, vector<2x128xf32> -> vector<2x128xf32>
    %476 = arith.addf %474, %475 : vector<2x128xf32>
    %c0_222 = arith.constant 0 : index
    %c7_223 = arith.constant 7 : index
    %c0_224 = arith.constant 0 : index
    %477 = vector.load %arg37[%c0_222, %c7_223, %c0_224] : memref<2x8x128xf32, #tpu.memory_space<vmem>>, vector<2x1x128xf32>
    %478 = vector.shape_cast %477 : vector<2x1x128xf32> to vector<2x128xf32>
    %cst_225 = arith.constant dense<0.000000e+00> : vector<2x128xf32>
    %479 = tpu.matmul %471, %457, %cst_225 {dimension_numbers = #tpu.dot_dimension_numbers<[1], [0], [0], [1], [0, 0, 1, 1], [], []>} : vector<2x32xf32>, vector<32x128xf32>, vector<2x128xf32> -> vector<2x128xf32>
    %480 = arith.addf %478, %479 : vector<2x128xf32>
    %481 = arith.negf %476 : vector<2x128xf32>
    %482 = math.exp %481 : vector<2x128xf32>
    %cst_226 = arith.constant 1.000000e+00 : f32
    %483 = vector.broadcast %cst_226 : f32 to vector<2x128xf32>
    %484 = arith.addf %483, %482 : vector<2x128xf32>
    %485 = arith.divf %483, %484 : vector<2x128xf32>
    %486 = vector.extract_strided_slice %485 {offsets = [0, 0], sizes = [2, 32], strides = [1, 1]} : vector<2x128xf32> to vector<2x32xf32>
    %487 = vector.extract_strided_slice %485 {offsets = [0, 32], sizes = [2, 32], strides = [1, 1]} : vector<2x128xf32> to vector<2x32xf32>
    %488 = vector.extract_strided_slice %485 {offsets = [0, 64], sizes = [2, 32], strides = [1, 1]} : vector<2x128xf32> to vector<2x32xf32>
    %cst_227 = arith.constant 2.000000e+00 : f32
    %489 = vector.broadcast %cst_227 : f32 to vector<2x32xf32>
    %490 = arith.mulf %489, %488 : vector<2x32xf32>
    %cst_228 = arith.constant 1.000000e+00 : f32
    %491 = vector.broadcast %cst_228 : f32 to vector<2x32xf32>
    %492 = arith.subf %490, %491 : vector<2x32xf32>
    %493 = vector.extract_strided_slice %485 {offsets = [0, 96], sizes = [2, 32], strides = [1, 1]} : vector<2x128xf32> to vector<2x32xf32>
    %494 = arith.mulf %487, %470 : vector<2x32xf32>
    %495 = arith.mulf %486, %492 : vector<2x32xf32>
    %496 = arith.addf %494, %495 : vector<2x32xf32>
    %497 = math.tanh %496 : vector<2x32xf32>
    %498 = arith.mulf %493, %497 : vector<2x32xf32>
    %499 = arith.negf %480 : vector<2x128xf32>
    %500 = math.exp %499 : vector<2x128xf32>
    %cst_229 = arith.constant 1.000000e+00 : f32
    %501 = vector.broadcast %cst_229 : f32 to vector<2x128xf32>
    %502 = arith.addf %501, %500 : vector<2x128xf32>
    %503 = arith.divf %501, %502 : vector<2x128xf32>
    %504 = vector.extract_strided_slice %503 {offsets = [0, 0], sizes = [2, 32], strides = [1, 1]} : vector<2x128xf32> to vector<2x32xf32>
    %505 = vector.extract_strided_slice %503 {offsets = [0, 32], sizes = [2, 32], strides = [1, 1]} : vector<2x128xf32> to vector<2x32xf32>
    %506 = vector.extract_strided_slice %503 {offsets = [0, 64], sizes = [2, 32], strides = [1, 1]} : vector<2x128xf32> to vector<2x32xf32>
    %cst_230 = arith.constant 2.000000e+00 : f32
    %507 = vector.broadcast %cst_230 : f32 to vector<2x32xf32>
    %508 = arith.mulf %507, %506 : vector<2x32xf32>
    %cst_231 = arith.constant 1.000000e+00 : f32
    %509 = vector.broadcast %cst_231 : f32 to vector<2x32xf32>
    %510 = arith.subf %508, %509 : vector<2x32xf32>
    %511 = vector.extract_strided_slice %503 {offsets = [0, 96], sizes = [2, 32], strides = [1, 1]} : vector<2x128xf32> to vector<2x32xf32>
    %512 = arith.mulf %505, %472 : vector<2x32xf32>
    %513 = arith.mulf %504, %510 : vector<2x32xf32>
    %514 = arith.addf %512, %513 : vector<2x32xf32>
    %515 = math.tanh %514 : vector<2x32xf32>
    %516 = arith.mulf %511, %515 : vector<2x32xf32>
    %c0_232 = arith.constant 0 : index
    %c0_233 = arith.constant 0 : index
    %c0_234 = arith.constant 0 : index
    %517 = vector.load %arg34[%c0_232, %c0_233, %c0_234] : memref<2x8x64xf32, #tpu.memory_space<vmem>>, vector<2x1x32xf32>
    %518 = vector.shape_cast %517 : vector<2x1x32xf32> to vector<2x32xf32>
    %519 = vector.shape_cast %498 : vector<2x32xf32> to vector<2x1x32xf32>
    tpu.vector_store %arg34[%c0_232, %c0_233, %c0_234], %519 {strides = array<i32>} : memref<2x8x64xf32, #tpu.memory_space<vmem>>, vector<2x1x32xf32>,
    %c0_235 = arith.constant 0 : index
    %c7_236 = arith.constant 7 : index
    %c32_237 = arith.constant 32 : index
    %520 = vector.load %arg34[%c0_235, %c7_236, %c32_237] : memref<2x8x64xf32, #tpu.memory_space<vmem>>, vector<2x1x32xf32>
    %521 = vector.shape_cast %520 : vector<2x1x32xf32> to vector<2x32xf32>
    %522 = vector.shape_cast %516 : vector<2x32xf32> to vector<2x1x32xf32>
    tpu.vector_store %arg34[%c0_235, %c7_236, %c32_237], %522 {strides = array<i32>} : memref<2x8x64xf32, #tpu.memory_space<vmem>>, vector<2x1x32xf32>,
    %c0_238 = arith.constant 0 : index
    %c1_239 = arith.constant 1 : index
    %c0_240 = arith.constant 0 : index
    %523 = vector.load %arg36[%c0_238, %c1_239, %c0_240] : memref<2x8x128xf32, #tpu.memory_space<vmem>>, vector<2x1x128xf32>
    %524 = vector.shape_cast %523 : vector<2x1x128xf32> to vector<2x128xf32>
    %cst_241 = arith.constant dense<0.000000e+00> : vector<2x128xf32>
    %525 = tpu.matmul %498, %454, %cst_241 {dimension_numbers = #tpu.dot_dimension_numbers<[1], [0], [0], [1], [0, 0, 1, 1], [], []>} : vector<2x32xf32>, vector<32x128xf32>, vector<2x128xf32> -> vector<2x128xf32>
    %526 = arith.addf %524, %525 : vector<2x128xf32>
    %c0_242 = arith.constant 0 : index
    %c6_243 = arith.constant 6 : index
    %c0_244 = arith.constant 0 : index
    %527 = vector.load %arg37[%c0_242, %c6_243, %c0_244] : memref<2x8x128xf32, #tpu.memory_space<vmem>>, vector<2x1x128xf32>
    %528 = vector.shape_cast %527 : vector<2x1x128xf32> to vector<2x128xf32>
    %cst_245 = arith.constant dense<0.000000e+00> : vector<2x128xf32>
    %529 = tpu.matmul %516, %457, %cst_245 {dimension_numbers = #tpu.dot_dimension_numbers<[1], [0], [0], [1], [0, 0, 1, 1], [], []>} : vector<2x32xf32>, vector<32x128xf32>, vector<2x128xf32> -> vector<2x128xf32>
    %530 = arith.addf %528, %529 : vector<2x128xf32>
    %531 = arith.negf %526 : vector<2x128xf32>
    %532 = math.exp %531 : vector<2x128xf32>
    %cst_246 = arith.constant 1.000000e+00 : f32
    %533 = vector.broadcast %cst_246 : f32 to vector<2x128xf32>
    %534 = arith.addf %533, %532 : vector<2x128xf32>
    %535 = arith.divf %533, %534 : vector<2x128xf32>
    %536 = vector.extract_strided_slice %535 {offsets = [0, 0], sizes = [2, 32], strides = [1, 1]} : vector<2x128xf32> to vector<2x32xf32>
    %537 = vector.extract_strided_slice %535 {offsets = [0, 32], sizes = [2, 32], strides = [1, 1]} : vector<2x128xf32> to vector<2x32xf32>
    %538 = vector.extract_strided_slice %535 {offsets = [0, 64], sizes = [2, 32], strides = [1, 1]} : vector<2x128xf32> to vector<2x32xf32>
    %cst_247 = arith.constant 2.000000e+00 : f32
    %539 = vector.broadcast %cst_247 : f32 to vector<2x32xf32>
    %540 = arith.mulf %539, %538 : vector<2x32xf32>
    %cst_248 = arith.constant 1.000000e+00 : f32
    %541 = vector.broadcast %cst_248 : f32 to vector<2x32xf32>
    %542 = arith.subf %540, %541 : vector<2x32xf32>
    %543 = vector.extract_strided_slice %535 {offsets = [0, 96], sizes = [2, 32], strides = [1, 1]} : vector<2x128xf32> to vector<2x32xf32>
    %544 = arith.mulf %537, %496 : vector<2x32xf32>
    %545 = arith.mulf %536, %542 : vector<2x32xf32>
    %546 = arith.addf %544, %545 : vector<2x32xf32>
    %547 = math.tanh %546 : vector<2x32xf32>
    %548 = arith.mulf %543, %547 : vector<2x32xf32>
    %549 = arith.negf %530 : vector<2x128xf32>
    %550 = math.exp %549 : vector<2x128xf32>
    %cst_249 = arith.constant 1.000000e+00 : f32
    %551 = vector.broadcast %cst_249 : f32 to vector<2x128xf32>
    %552 = arith.addf %551, %550 : vector<2x128xf32>
    %553 = arith.divf %551, %552 : vector<2x128xf32>
    %554 = vector.extract_strided_slice %553 {offsets = [0, 0], sizes = [2, 32], strides = [1, 1]} : vector<2x128xf32> to vector<2x32xf32>
    %555 = vector.extract_strided_slice %553 {offsets = [0, 32], sizes = [2, 32], strides = [1, 1]} : vector<2x128xf32> to vector<2x32xf32>
    %556 = vector.extract_strided_slice %553 {offsets = [0, 64], sizes = [2, 32], strides = [1, 1]} : vector<2x128xf32> to vector<2x32xf32>
    %cst_250 = arith.constant 2.000000e+00 : f32
    %557 = vector.broadcast %cst_250 : f32 to vector<2x32xf32>
    %558 = arith.mulf %557, %556 : vector<2x32xf32>
    %cst_251 = arith.constant 1.000000e+00 : f32
    %559 = vector.broadcast %cst_251 : f32 to vector<2x32xf32>
    %560 = arith.subf %558, %559 : vector<2x32xf32>
    %561 = vector.extract_strided_slice %553 {offsets = [0, 96], sizes = [2, 32], strides = [1, 1]} : vector<2x128xf32> to vector<2x32xf32>
    %562 = arith.mulf %555, %514 : vector<2x32xf32>
    %563 = arith.mulf %554, %560 : vector<2x32xf32>
    %564 = arith.addf %562, %563 : vector<2x32xf32>
    %565 = math.tanh %564 : vector<2x32xf32>
    %566 = arith.mulf %561, %565 : vector<2x32xf32>
    %c0_252 = arith.constant 0 : index
    %c1_253 = arith.constant 1 : index
    %c0_254 = arith.constant 0 : index
    %567 = vector.load %arg34[%c0_252, %c1_253, %c0_254] : memref<2x8x64xf32, #tpu.memory_space<vmem>>, vector<2x1x32xf32>
    %568 = vector.shape_cast %567 : vector<2x1x32xf32> to vector<2x32xf32>
    %569 = vector.shape_cast %548 : vector<2x32xf32> to vector<2x1x32xf32>
    tpu.vector_store %arg34[%c0_252, %c1_253, %c0_254], %569 {strides = array<i32>} : memref<2x8x64xf32, #tpu.memory_space<vmem>>, vector<2x1x32xf32>,
    %c0_255 = arith.constant 0 : index
    %c6_256 = arith.constant 6 : index
    %c32_257 = arith.constant 32 : index
    %570 = vector.load %arg34[%c0_255, %c6_256, %c32_257] : memref<2x8x64xf32, #tpu.memory_space<vmem>>, vector<2x1x32xf32>
    %571 = vector.shape_cast %570 : vector<2x1x32xf32> to vector<2x32xf32>
    %572 = vector.shape_cast %566 : vector<2x32xf32> to vector<2x1x32xf32>
    tpu.vector_store %arg34[%c0_255, %c6_256, %c32_257], %572 {strides = array<i32>} : memref<2x8x64xf32, #tpu.memory_space<vmem>>, vector<2x1x32xf32>,
    %c0_258 = arith.constant 0 : index
    %c2_259 = arith.constant 2 : index
    %c0_260 = arith.constant 0 : index
    %573 = vector.load %arg36[%c0_258, %c2_259, %c0_260] : memref<2x8x128xf32, #tpu.memory_space<vmem>>, vector<2x1x128xf32>
    %574 = vector.shape_cast %573 : vector<2x1x128xf32> to vector<2x128xf32>
    %cst_261 = arith.constant dense<0.000000e+00> : vector<2x128xf32>
    %575 = tpu.matmul %548, %454, %cst_261 {dimension_numbers = #tpu.dot_dimension_numbers<[1], [0], [0], [1], [0, 0, 1, 1], [], []>} : vector<2x32xf32>, vector<32x128xf32>, vector<2x128xf32> -> vector<2x128xf32>
    %576 = arith.addf %574, %575 : vector<2x128xf32>
    %c0_262 = arith.constant 0 : index
    %c5_263 = arith.constant 5 : index
    %c0_264 = arith.constant 0 : index
    %577 = vector.load %arg37[%c0_262, %c5_263, %c0_264] : memref<2x8x128xf32, #tpu.memory_space<vmem>>, vector<2x1x128xf32>
    %578 = vector.shape_cast %577 : vector<2x1x128xf32> to vector<2x128xf32>
    %cst_265 = arith.constant dense<0.000000e+00> : vector<2x128xf32>
    %579 = tpu.matmul %566, %457, %cst_265 {dimension_numbers = #tpu.dot_dimension_numbers<[1], [0], [0], [1], [0, 0, 1, 1], [], []>} : vector<2x32xf32>, vector<32x128xf32>, vector<2x128xf32> -> vector<2x128xf32>
    %580 = arith.addf %578, %579 : vector<2x128xf32>
    %581 = arith.negf %576 : vector<2x128xf32>
    %582 = math.exp %581 : vector<2x128xf32>
    %cst_266 = arith.constant 1.000000e+00 : f32
    %583 = vector.broadcast %cst_266 : f32 to vector<2x128xf32>
    %584 = arith.addf %583, %582 : vector<2x128xf32>
    %585 = arith.divf %583, %584 : vector<2x128xf32>
    %586 = vector.extract_strided_slice %585 {offsets = [0, 0], sizes = [2, 32], strides = [1, 1]} : vector<2x128xf32> to vector<2x32xf32>
    %587 = vector.extract_strided_slice %585 {offsets = [0, 32], sizes = [2, 32], strides = [1, 1]} : vector<2x128xf32> to vector<2x32xf32>
    %588 = vector.extract_strided_slice %585 {offsets = [0, 64], sizes = [2, 32], strides = [1, 1]} : vector<2x128xf32> to vector<2x32xf32>
    %cst_267 = arith.constant 2.000000e+00 : f32
    %589 = vector.broadcast %cst_267 : f32 to vector<2x32xf32>
    %590 = arith.mulf %589, %588 : vector<2x32xf32>
    %cst_268 = arith.constant 1.000000e+00 : f32
    %591 = vector.broadcast %cst_268 : f32 to vector<2x32xf32>
    %592 = arith.subf %590, %591 : vector<2x32xf32>
    %593 = vector.extract_strided_slice %585 {offsets = [0, 96], sizes = [2, 32], strides = [1, 1]} : vector<2x128xf32> to vector<2x32xf32>
    %594 = arith.mulf %587, %546 : vector<2x32xf32>
    %595 = arith.mulf %586, %592 : vector<2x32xf32>
    %596 = arith.addf %594, %595 : vector<2x32xf32>
    %597 = math.tanh %596 : vector<2x32xf32>
    %598 = arith.mulf %593, %597 : vector<2x32xf32>
    %599 = arith.negf %580 : vector<2x128xf32>
    %600 = math.exp %599 : vector<2x128xf32>
    %cst_269 = arith.constant 1.000000e+00 : f32
    %601 = vector.broadcast %cst_269 : f32 to vector<2x128xf32>
    %602 = arith.addf %601, %600 : vector<2x128xf32>
    %603 = arith.divf %601, %602 : vector<2x128xf32>
    %604 = vector.extract_strided_slice %603 {offsets = [0, 0], sizes = [2, 32], strides = [1, 1]} : vector<2x128xf32> to vector<2x32xf32>
    %605 = vector.extract_strided_slice %603 {offsets = [0, 32], sizes = [2, 32], strides = [1, 1]} : vector<2x128xf32> to vector<2x32xf32>
    %606 = vector.extract_strided_slice %603 {offsets = [0, 64], sizes = [2, 32], strides = [1, 1]} : vector<2x128xf32> to vector<2x32xf32>
    %cst_270 = arith.constant 2.000000e+00 : f32
    %607 = vector.broadcast %cst_270 : f32 to vector<2x32xf32>
    %608 = arith.mulf %607, %606 : vector<2x32xf32>
    %cst_271 = arith.constant 1.000000e+00 : f32
    %609 = vector.broadcast %cst_271 : f32 to vector<2x32xf32>
    %610 = arith.subf %608, %609 : vector<2x32xf32>
    %611 = vector.extract_strided_slice %603 {offsets = [0, 96], sizes = [2, 32], strides = [1, 1]} : vector<2x128xf32> to vector<2x32xf32>
    %612 = arith.mulf %605, %564 : vector<2x32xf32>
    %613 = arith.mulf %604, %610 : vector<2x32xf32>
    %614 = arith.addf %612, %613 : vector<2x32xf32>
    %615 = math.tanh %614 : vector<2x32xf32>
    %616 = arith.mulf %611, %615 : vector<2x32xf32>
    %c0_272 = arith.constant 0 : index
    %c2_273 = arith.constant 2 : index
    %c0_274 = arith.constant 0 : index
    %617 = vector.load %arg34[%c0_272, %c2_273, %c0_274] : memref<2x8x64xf32, #tpu.memory_space<vmem>>, vector<2x1x32xf32>
    %618 = vector.shape_cast %617 : vector<2x1x32xf32> to vector<2x32xf32>
    %619 = vector.shape_cast %598 : vector<2x32xf32> to vector<2x1x32xf32>
    tpu.vector_store %arg34[%c0_272, %c2_273, %c0_274], %619 {strides = array<i32>} : memref<2x8x64xf32, #tpu.memory_space<vmem>>, vector<2x1x32xf32>,
    %c0_275 = arith.constant 0 : index
    %c5_276 = arith.constant 5 : index
    %c32_277 = arith.constant 32 : index
    %620 = vector.load %arg34[%c0_275, %c5_276, %c32_277] : memref<2x8x64xf32, #tpu.memory_space<vmem>>, vector<2x1x32xf32>
    %621 = vector.shape_cast %620 : vector<2x1x32xf32> to vector<2x32xf32>
    %622 = vector.shape_cast %616 : vector<2x32xf32> to vector<2x1x32xf32>
    tpu.vector_store %arg34[%c0_275, %c5_276, %c32_277], %622 {strides = array<i32>} : memref<2x8x64xf32, #tpu.memory_space<vmem>>, vector<2x1x32xf32>,
    %c0_278 = arith.constant 0 : index
    %c3_279 = arith.constant 3 : index
    %c0_280 = arith.constant 0 : index
    %623 = vector.load %arg36[%c0_278, %c3_279, %c0_280] : memref<2x8x128xf32, #tpu.memory_space<vmem>>, vector<2x1x128xf32>
    %624 = vector.shape_cast %623 : vector<2x1x128xf32> to vector<2x128xf32>
    %cst_281 = arith.constant dense<0.000000e+00> : vector<2x128xf32>
    %625 = tpu.matmul %598, %454, %cst_281 {dimension_numbers = #tpu.dot_dimension_numbers<[1], [0], [0], [1], [0, 0, 1, 1], [], []>} : vector<2x32xf32>, vector<32x128xf32>, vector<2x128xf32> -> vector<2x128xf32>
    %626 = arith.addf %624, %625 : vector<2x128xf32>
    %c0_282 = arith.constant 0 : index
    %c4_283 = arith.constant 4 : index
    %c0_284 = arith.constant 0 : index
    %627 = vector.load %arg37[%c0_282, %c4_283, %c0_284] : memref<2x8x128xf32, #tpu.memory_space<vmem>>, vector<2x1x128xf32>
    %628 = vector.shape_cast %627 : vector<2x1x128xf32> to vector<2x128xf32>
    %cst_285 = arith.constant dense<0.000000e+00> : vector<2x128xf32>
    %629 = tpu.matmul %616, %457, %cst_285 {dimension_numbers = #tpu.dot_dimension_numbers<[1], [0], [0], [1], [0, 0, 1, 1], [], []>} : vector<2x32xf32>, vector<32x128xf32>, vector<2x128xf32> -> vector<2x128xf32>
    %630 = arith.addf %628, %629 : vector<2x128xf32>
    %631 = arith.negf %626 : vector<2x128xf32>
    %632 = math.exp %631 : vector<2x128xf32>
    %cst_286 = arith.constant 1.000000e+00 : f32
    %633 = vector.broadcast %cst_286 : f32 to vector<2x128xf32>
    %634 = arith.addf %633, %632 : vector<2x128xf32>
    %635 = arith.divf %633, %634 : vector<2x128xf32>
    %636 = vector.extract_strided_slice %635 {offsets = [0, 0], sizes = [2, 32], strides = [1, 1]} : vector<2x128xf32> to vector<2x32xf32>
    %637 = vector.extract_strided_slice %635 {offsets = [0, 32], sizes = [2, 32], strides = [1, 1]} : vector<2x128xf32> to vector<2x32xf32>
    %638 = vector.extract_strided_slice %635 {offsets = [0, 64], sizes = [2, 32], strides = [1, 1]} : vector<2x128xf32> to vector<2x32xf32>
    %cst_287 = arith.constant 2.000000e+00 : f32
    %639 = vector.broadcast %cst_287 : f32 to vector<2x32xf32>
    %640 = arith.mulf %639, %638 : vector<2x32xf32>
    %cst_288 = arith.constant 1.000000e+00 : f32
    %641 = vector.broadcast %cst_288 : f32 to vector<2x32xf32>
    %642 = arith.subf %640, %641 : vector<2x32xf32>
    %643 = vector.extract_strided_slice %635 {offsets = [0, 96], sizes = [2, 32], strides = [1, 1]} : vector<2x128xf32> to vector<2x32xf32>
    %644 = arith.mulf %637, %596 : vector<2x32xf32>
    %645 = arith.mulf %636, %642 : vector<2x32xf32>
    %646 = arith.addf %644, %645 : vector<2x32xf32>
    %647 = math.tanh %646 : vector<2x32xf32>
    %648 = arith.mulf %643, %647 : vector<2x32xf32>
    %649 = arith.negf %630 : vector<2x128xf32>
    %650 = math.exp %649 : vector<2x128xf32>
    %cst_289 = arith.constant 1.000000e+00 : f32
    %651 = vector.broadcast %cst_289 : f32 to vector<2x128xf32>
    %652 = arith.addf %651, %650 : vector<2x128xf32>
    %653 = arith.divf %651, %652 : vector<2x128xf32>
    %654 = vector.extract_strided_slice %653 {offsets = [0, 0], sizes = [2, 32], strides = [1, 1]} : vector<2x128xf32> to vector<2x32xf32>
    %655 = vector.extract_strided_slice %653 {offsets = [0, 32], sizes = [2, 32], strides = [1, 1]} : vector<2x128xf32> to vector<2x32xf32>
    %656 = vector.extract_strided_slice %653 {offsets = [0, 64], sizes = [2, 32], strides = [1, 1]} : vector<2x128xf32> to vector<2x32xf32>
    %cst_290 = arith.constant 2.000000e+00 : f32
    %657 = vector.broadcast %cst_290 : f32 to vector<2x32xf32>
    %658 = arith.mulf %657, %656 : vector<2x32xf32>
    %cst_291 = arith.constant 1.000000e+00 : f32
    %659 = vector.broadcast %cst_291 : f32 to vector<2x32xf32>
    %660 = arith.subf %658, %659 : vector<2x32xf32>
    %661 = vector.extract_strided_slice %653 {offsets = [0, 96], sizes = [2, 32], strides = [1, 1]} : vector<2x128xf32> to vector<2x32xf32>
    %662 = arith.mulf %655, %614 : vector<2x32xf32>
    %663 = arith.mulf %654, %660 : vector<2x32xf32>
    %664 = arith.addf %662, %663 : vector<2x32xf32>
    %665 = math.tanh %664 : vector<2x32xf32>
    %666 = arith.mulf %661, %665 : vector<2x32xf32>
    %c0_292 = arith.constant 0 : index
    %c3_293 = arith.constant 3 : index
    %c0_294 = arith.constant 0 : index
    %667 = vector.load %arg34[%c0_292, %c3_293, %c0_294] : memref<2x8x64xf32, #tpu.memory_space<vmem>>, vector<2x1x32xf32>
    %668 = vector.shape_cast %667 : vector<2x1x32xf32> to vector<2x32xf32>
    %669 = vector.shape_cast %648 : vector<2x32xf32> to vector<2x1x32xf32>
    tpu.vector_store %arg34[%c0_292, %c3_293, %c0_294], %669 {strides = array<i32>} : memref<2x8x64xf32, #tpu.memory_space<vmem>>, vector<2x1x32xf32>,
    %c0_295 = arith.constant 0 : index
    %c4_296 = arith.constant 4 : index
    %c32_297 = arith.constant 32 : index
    %670 = vector.load %arg34[%c0_295, %c4_296, %c32_297] : memref<2x8x64xf32, #tpu.memory_space<vmem>>, vector<2x1x32xf32>
    %671 = vector.shape_cast %670 : vector<2x1x32xf32> to vector<2x32xf32>
    %672 = vector.shape_cast %666 : vector<2x32xf32> to vector<2x1x32xf32>
    tpu.vector_store %arg34[%c0_295, %c4_296, %c32_297], %672 {strides = array<i32>} : memref<2x8x64xf32, #tpu.memory_space<vmem>>, vector<2x1x32xf32>,
    %c0_298 = arith.constant 0 : index
    %c4_299 = arith.constant 4 : index
    %c0_300 = arith.constant 0 : index
    %673 = vector.load %arg36[%c0_298, %c4_299, %c0_300] : memref<2x8x128xf32, #tpu.memory_space<vmem>>, vector<2x1x128xf32>
    %674 = vector.shape_cast %673 : vector<2x1x128xf32> to vector<2x128xf32>
    %cst_301 = arith.constant dense<0.000000e+00> : vector<2x128xf32>
    %675 = tpu.matmul %648, %454, %cst_301 {dimension_numbers = #tpu.dot_dimension_numbers<[1], [0], [0], [1], [0, 0, 1, 1], [], []>} : vector<2x32xf32>, vector<32x128xf32>, vector<2x128xf32> -> vector<2x128xf32>
    %676 = arith.addf %674, %675 : vector<2x128xf32>
    %c0_302 = arith.constant 0 : index
    %c3_303 = arith.constant 3 : index
    %c0_304 = arith.constant 0 : index
    %677 = vector.load %arg37[%c0_302, %c3_303, %c0_304] : memref<2x8x128xf32, #tpu.memory_space<vmem>>, vector<2x1x128xf32>
    %678 = vector.shape_cast %677 : vector<2x1x128xf32> to vector<2x128xf32>
    %cst_305 = arith.constant dense<0.000000e+00> : vector<2x128xf32>
    %679 = tpu.matmul %666, %457, %cst_305 {dimension_numbers = #tpu.dot_dimension_numbers<[1], [0], [0], [1], [0, 0, 1, 1], [], []>} : vector<2x32xf32>, vector<32x128xf32>, vector<2x128xf32> -> vector<2x128xf32>
    %680 = arith.addf %678, %679 : vector<2x128xf32>
    %681 = arith.negf %676 : vector<2x128xf32>
    %682 = math.exp %681 : vector<2x128xf32>
    %cst_306 = arith.constant 1.000000e+00 : f32
    %683 = vector.broadcast %cst_306 : f32 to vector<2x128xf32>
    %684 = arith.addf %683, %682 : vector<2x128xf32>
    %685 = arith.divf %683, %684 : vector<2x128xf32>
    %686 = vector.extract_strided_slice %685 {offsets = [0, 0], sizes = [2, 32], strides = [1, 1]} : vector<2x128xf32> to vector<2x32xf32>
    %687 = vector.extract_strided_slice %685 {offsets = [0, 32], sizes = [2, 32], strides = [1, 1]} : vector<2x128xf32> to vector<2x32xf32>
    %688 = vector.extract_strided_slice %685 {offsets = [0, 64], sizes = [2, 32], strides = [1, 1]} : vector<2x128xf32> to vector<2x32xf32>
    %cst_307 = arith.constant 2.000000e+00 : f32
    %689 = vector.broadcast %cst_307 : f32 to vector<2x32xf32>
    %690 = arith.mulf %689, %688 : vector<2x32xf32>
    %cst_308 = arith.constant 1.000000e+00 : f32
    %691 = vector.broadcast %cst_308 : f32 to vector<2x32xf32>
    %692 = arith.subf %690, %691 : vector<2x32xf32>
    %693 = vector.extract_strided_slice %685 {offsets = [0, 96], sizes = [2, 32], strides = [1, 1]} : vector<2x128xf32> to vector<2x32xf32>
    %694 = arith.mulf %687, %646 : vector<2x32xf32>
    %695 = arith.mulf %686, %692 : vector<2x32xf32>
    %696 = arith.addf %694, %695 : vector<2x32xf32>
    %697 = math.tanh %696 : vector<2x32xf32>
    %698 = arith.mulf %693, %697 : vector<2x32xf32>
    %699 = arith.negf %680 : vector<2x128xf32>
    %700 = math.exp %699 : vector<2x128xf32>
    %cst_309 = arith.constant 1.000000e+00 : f32
    %701 = vector.broadcast %cst_309 : f32 to vector<2x128xf32>
    %702 = arith.addf %701, %700 : vector<2x128xf32>
    %703 = arith.divf %701, %702 : vector<2x128xf32>
    %704 = vector.extract_strided_slice %703 {offsets = [0, 0], sizes = [2, 32], strides = [1, 1]} : vector<2x128xf32> to vector<2x32xf32>
    %705 = vector.extract_strided_slice %703 {offsets = [0, 32], sizes = [2, 32], strides = [1, 1]} : vector<2x128xf32> to vector<2x32xf32>
    %706 = vector.extract_strided_slice %703 {offsets = [0, 64], sizes = [2, 32], strides = [1, 1]} : vector<2x128xf32> to vector<2x32xf32>
    %cst_310 = arith.constant 2.000000e+00 : f32
    %707 = vector.broadcast %cst_310 : f32 to vector<2x32xf32>
    %708 = arith.mulf %707, %706 : vector<2x32xf32>
    %cst_311 = arith.constant 1.000000e+00 : f32
    %709 = vector.broadcast %cst_311 : f32 to vector<2x32xf32>
    %710 = arith.subf %708, %709 : vector<2x32xf32>
    %711 = vector.extract_strided_slice %703 {offsets = [0, 96], sizes = [2, 32], strides = [1, 1]} : vector<2x128xf32> to vector<2x32xf32>
    %712 = arith.mulf %705, %664 : vector<2x32xf32>
    %713 = arith.mulf %704, %710 : vector<2x32xf32>
    %714 = arith.addf %712, %713 : vector<2x32xf32>
    %715 = math.tanh %714 : vector<2x32xf32>
    %716 = arith.mulf %711, %715 : vector<2x32xf32>
    %c0_312 = arith.constant 0 : index
    %c4_313 = arith.constant 4 : index
    %c0_314 = arith.constant 0 : index
    %717 = vector.load %arg34[%c0_312, %c4_313, %c0_314] : memref<2x8x64xf32, #tpu.memory_space<vmem>>, vector<2x1x32xf32>
    %718 = vector.shape_cast %717 : vector<2x1x32xf32> to vector<2x32xf32>
    %719 = vector.shape_cast %698 : vector<2x32xf32> to vector<2x1x32xf32>
    tpu.vector_store %arg34[%c0_312, %c4_313, %c0_314], %719 {strides = array<i32>} : memref<2x8x64xf32, #tpu.memory_space<vmem>>, vector<2x1x32xf32>,
    %c0_315 = arith.constant 0 : index
    %c3_316 = arith.constant 3 : index
    %c32_317 = arith.constant 32 : index
    %720 = vector.load %arg34[%c0_315, %c3_316, %c32_317] : memref<2x8x64xf32, #tpu.memory_space<vmem>>, vector<2x1x32xf32>
    %721 = vector.shape_cast %720 : vector<2x1x32xf32> to vector<2x32xf32>
    %722 = vector.shape_cast %716 : vector<2x32xf32> to vector<2x1x32xf32>
    tpu.vector_store %arg34[%c0_315, %c3_316, %c32_317], %722 {strides = array<i32>} : memref<2x8x64xf32, #tpu.memory_space<vmem>>, vector<2x1x32xf32>,
    %c0_318 = arith.constant 0 : index
    %c5_319 = arith.constant 5 : index
    %c0_320 = arith.constant 0 : index
    %723 = vector.load %arg36[%c0_318, %c5_319, %c0_320] : memref<2x8x128xf32, #tpu.memory_space<vmem>>, vector<2x1x128xf32>
    %724 = vector.shape_cast %723 : vector<2x1x128xf32> to vector<2x128xf32>
    %cst_321 = arith.constant dense<0.000000e+00> : vector<2x128xf32>
    %725 = tpu.matmul %698, %454, %cst_321 {dimension_numbers = #tpu.dot_dimension_numbers<[1], [0], [0], [1], [0, 0, 1, 1], [], []>} : vector<2x32xf32>, vector<32x128xf32>, vector<2x128xf32> -> vector<2x128xf32>
    %726 = arith.addf %724, %725 : vector<2x128xf32>
    %c0_322 = arith.constant 0 : index
    %c2_323 = arith.constant 2 : index
    %c0_324 = arith.constant 0 : index
    %727 = vector.load %arg37[%c0_322, %c2_323, %c0_324] : memref<2x8x128xf32, #tpu.memory_space<vmem>>, vector<2x1x128xf32>
    %728 = vector.shape_cast %727 : vector<2x1x128xf32> to vector<2x128xf32>
    %cst_325 = arith.constant dense<0.000000e+00> : vector<2x128xf32>
    %729 = tpu.matmul %716, %457, %cst_325 {dimension_numbers = #tpu.dot_dimension_numbers<[1], [0], [0], [1], [0, 0, 1, 1], [], []>} : vector<2x32xf32>, vector<32x128xf32>, vector<2x128xf32> -> vector<2x128xf32>
    %730 = arith.addf %728, %729 : vector<2x128xf32>
    %731 = arith.negf %726 : vector<2x128xf32>
    %732 = math.exp %731 : vector<2x128xf32>
    %cst_326 = arith.constant 1.000000e+00 : f32
    %733 = vector.broadcast %cst_326 : f32 to vector<2x128xf32>
    %734 = arith.addf %733, %732 : vector<2x128xf32>
    %735 = arith.divf %733, %734 : vector<2x128xf32>
    %736 = vector.extract_strided_slice %735 {offsets = [0, 0], sizes = [2, 32], strides = [1, 1]} : vector<2x128xf32> to vector<2x32xf32>
    %737 = vector.extract_strided_slice %735 {offsets = [0, 32], sizes = [2, 32], strides = [1, 1]} : vector<2x128xf32> to vector<2x32xf32>
    %738 = vector.extract_strided_slice %735 {offsets = [0, 64], sizes = [2, 32], strides = [1, 1]} : vector<2x128xf32> to vector<2x32xf32>
    %cst_327 = arith.constant 2.000000e+00 : f32
    %739 = vector.broadcast %cst_327 : f32 to vector<2x32xf32>
    %740 = arith.mulf %739, %738 : vector<2x32xf32>
    %cst_328 = arith.constant 1.000000e+00 : f32
    %741 = vector.broadcast %cst_328 : f32 to vector<2x32xf32>
    %742 = arith.subf %740, %741 : vector<2x32xf32>
    %743 = vector.extract_strided_slice %735 {offsets = [0, 96], sizes = [2, 32], strides = [1, 1]} : vector<2x128xf32> to vector<2x32xf32>
    %744 = arith.mulf %737, %696 : vector<2x32xf32>
    %745 = arith.mulf %736, %742 : vector<2x32xf32>
    %746 = arith.addf %744, %745 : vector<2x32xf32>
    %747 = math.tanh %746 : vector<2x32xf32>
    %748 = arith.mulf %743, %747 : vector<2x32xf32>
    %749 = arith.negf %730 : vector<2x128xf32>
    %750 = math.exp %749 : vector<2x128xf32>
    %cst_329 = arith.constant 1.000000e+00 : f32
    %751 = vector.broadcast %cst_329 : f32 to vector<2x128xf32>
    %752 = arith.addf %751, %750 : vector<2x128xf32>
    %753 = arith.divf %751, %752 : vector<2x128xf32>
    %754 = vector.extract_strided_slice %753 {offsets = [0, 0], sizes = [2, 32], strides = [1, 1]} : vector<2x128xf32> to vector<2x32xf32>
    %755 = vector.extract_strided_slice %753 {offsets = [0, 32], sizes = [2, 32], strides = [1, 1]} : vector<2x128xf32> to vector<2x32xf32>
    %756 = vector.extract_strided_slice %753 {offsets = [0, 64], sizes = [2, 32], strides = [1, 1]} : vector<2x128xf32> to vector<2x32xf32>
    %cst_330 = arith.constant 2.000000e+00 : f32
    %757 = vector.broadcast %cst_330 : f32 to vector<2x32xf32>
    %758 = arith.mulf %757, %756 : vector<2x32xf32>
    %cst_331 = arith.constant 1.000000e+00 : f32
    %759 = vector.broadcast %cst_331 : f32 to vector<2x32xf32>
    %760 = arith.subf %758, %759 : vector<2x32xf32>
    %761 = vector.extract_strided_slice %753 {offsets = [0, 96], sizes = [2, 32], strides = [1, 1]} : vector<2x128xf32> to vector<2x32xf32>
    %762 = arith.mulf %755, %714 : vector<2x32xf32>
    %763 = arith.mulf %754, %760 : vector<2x32xf32>
    %764 = arith.addf %762, %763 : vector<2x32xf32>
    %765 = math.tanh %764 : vector<2x32xf32>
    %766 = arith.mulf %761, %765 : vector<2x32xf32>
    %c0_332 = arith.constant 0 : index
    %c5_333 = arith.constant 5 : index
    %c0_334 = arith.constant 0 : index
    %767 = vector.load %arg34[%c0_332, %c5_333, %c0_334] : memref<2x8x64xf32, #tpu.memory_space<vmem>>, vector<2x1x32xf32>
    %768 = vector.shape_cast %767 : vector<2x1x32xf32> to vector<2x32xf32>
    %769 = vector.shape_cast %748 : vector<2x32xf32> to vector<2x1x32xf32>
    tpu.vector_store %arg34[%c0_332, %c5_333, %c0_334], %769 {strides = array<i32>} : memref<2x8x64xf32, #tpu.memory_space<vmem>>, vector<2x1x32xf32>,
    %c0_335 = arith.constant 0 : index
    %c2_336 = arith.constant 2 : index
    %c32_337 = arith.constant 32 : index
    %770 = vector.load %arg34[%c0_335, %c2_336, %c32_337] : memref<2x8x64xf32, #tpu.memory_space<vmem>>, vector<2x1x32xf32>
    %771 = vector.shape_cast %770 : vector<2x1x32xf32> to vector<2x32xf32>
    %772 = vector.shape_cast %766 : vector<2x32xf32> to vector<2x1x32xf32>
    tpu.vector_store %arg34[%c0_335, %c2_336, %c32_337], %772 {strides = array<i32>} : memref<2x8x64xf32, #tpu.memory_space<vmem>>, vector<2x1x32xf32>,
    %c0_338 = arith.constant 0 : index
    %c6_339 = arith.constant 6 : index
    %c0_340 = arith.constant 0 : index
    %773 = vector.load %arg36[%c0_338, %c6_339, %c0_340] : memref<2x8x128xf32, #tpu.memory_space<vmem>>, vector<2x1x128xf32>
    %774 = vector.shape_cast %773 : vector<2x1x128xf32> to vector<2x128xf32>
    %cst_341 = arith.constant dense<0.000000e+00> : vector<2x128xf32>
    %775 = tpu.matmul %748, %454, %cst_341 {dimension_numbers = #tpu.dot_dimension_numbers<[1], [0], [0], [1], [0, 0, 1, 1], [], []>} : vector<2x32xf32>, vector<32x128xf32>, vector<2x128xf32> -> vector<2x128xf32>
    %776 = arith.addf %774, %775 : vector<2x128xf32>
    %c0_342 = arith.constant 0 : index
    %c1_343 = arith.constant 1 : index
    %c0_344 = arith.constant 0 : index
    %777 = vector.load %arg37[%c0_342, %c1_343, %c0_344] : memref<2x8x128xf32, #tpu.memory_space<vmem>>, vector<2x1x128xf32>
    %778 = vector.shape_cast %777 : vector<2x1x128xf32> to vector<2x128xf32>
    %cst_345 = arith.constant dense<0.000000e+00> : vector<2x128xf32>
    %779 = tpu.matmul %766, %457, %cst_345 {dimension_numbers = #tpu.dot_dimension_numbers<[1], [0], [0], [1], [0, 0, 1, 1], [], []>} : vector<2x32xf32>, vector<32x128xf32>, vector<2x128xf32> -> vector<2x128xf32>
    %780 = arith.addf %778, %779 : vector<2x128xf32>
    %781 = arith.negf %776 : vector<2x128xf32>
    %782 = math.exp %781 : vector<2x128xf32>
    %cst_346 = arith.constant 1.000000e+00 : f32
    %783 = vector.broadcast %cst_346 : f32 to vector<2x128xf32>
    %784 = arith.addf %783, %782 : vector<2x128xf32>
    %785 = arith.divf %783, %784 : vector<2x128xf32>
    %786 = vector.extract_strided_slice %785 {offsets = [0, 0], sizes = [2, 32], strides = [1, 1]} : vector<2x128xf32> to vector<2x32xf32>
    %787 = vector.extract_strided_slice %785 {offsets = [0, 32], sizes = [2, 32], strides = [1, 1]} : vector<2x128xf32> to vector<2x32xf32>
    %788 = vector.extract_strided_slice %785 {offsets = [0, 64], sizes = [2, 32], strides = [1, 1]} : vector<2x128xf32> to vector<2x32xf32>
    %cst_347 = arith.constant 2.000000e+00 : f32
    %789 = vector.broadcast %cst_347 : f32 to vector<2x32xf32>
    %790 = arith.mulf %789, %788 : vector<2x32xf32>
    %cst_348 = arith.constant 1.000000e+00 : f32
    %791 = vector.broadcast %cst_348 : f32 to vector<2x32xf32>
    %792 = arith.subf %790, %791 : vector<2x32xf32>
    %793 = vector.extract_strided_slice %785 {offsets = [0, 96], sizes = [2, 32], strides = [1, 1]} : vector<2x128xf32> to vector<2x32xf32>
    %794 = arith.mulf %787, %746 : vector<2x32xf32>
    %795 = arith.mulf %786, %792 : vector<2x32xf32>
    %796 = arith.addf %794, %795 : vector<2x32xf32>
    %797 = math.tanh %796 : vector<2x32xf32>
    %798 = arith.mulf %793, %797 : vector<2x32xf32>
    %799 = arith.negf %780 : vector<2x128xf32>
    %800 = math.exp %799 : vector<2x128xf32>
    %cst_349 = arith.constant 1.000000e+00 : f32
    %801 = vector.broadcast %cst_349 : f32 to vector<2x128xf32>
    %802 = arith.addf %801, %800 : vector<2x128xf32>
    %803 = arith.divf %801, %802 : vector<2x128xf32>
    %804 = vector.extract_strided_slice %803 {offsets = [0, 0], sizes = [2, 32], strides = [1, 1]} : vector<2x128xf32> to vector<2x32xf32>
    %805 = vector.extract_strided_slice %803 {offsets = [0, 32], sizes = [2, 32], strides = [1, 1]} : vector<2x128xf32> to vector<2x32xf32>
    %806 = vector.extract_strided_slice %803 {offsets = [0, 64], sizes = [2, 32], strides = [1, 1]} : vector<2x128xf32> to vector<2x32xf32>
    %cst_350 = arith.constant 2.000000e+00 : f32
    %807 = vector.broadcast %cst_350 : f32 to vector<2x32xf32>
    %808 = arith.mulf %807, %806 : vector<2x32xf32>
    %cst_351 = arith.constant 1.000000e+00 : f32
    %809 = vector.broadcast %cst_351 : f32 to vector<2x32xf32>
    %810 = arith.subf %808, %809 : vector<2x32xf32>
    %811 = vector.extract_strided_slice %803 {offsets = [0, 96], sizes = [2, 32], strides = [1, 1]} : vector<2x128xf32> to vector<2x32xf32>
    %812 = arith.mulf %805, %764 : vector<2x32xf32>
    %813 = arith.mulf %804, %810 : vector<2x32xf32>
    %814 = arith.addf %812, %813 : vector<2x32xf32>
    %815 = math.tanh %814 : vector<2x32xf32>
    %816 = arith.mulf %811, %815 : vector<2x32xf32>
    %c0_352 = arith.constant 0 : index
    %c6_353 = arith.constant 6 : index
    %c0_354 = arith.constant 0 : index
    %817 = vector.load %arg34[%c0_352, %c6_353, %c0_354] : memref<2x8x64xf32, #tpu.memory_space<vmem>>, vector<2x1x32xf32>
    %818 = vector.shape_cast %817 : vector<2x1x32xf32> to vector<2x32xf32>
    %819 = vector.shape_cast %798 : vector<2x32xf32> to vector<2x1x32xf32>
    tpu.vector_store %arg34[%c0_352, %c6_353, %c0_354], %819 {strides = array<i32>} : memref<2x8x64xf32, #tpu.memory_space<vmem>>, vector<2x1x32xf32>,
    %c0_355 = arith.constant 0 : index
    %c1_356 = arith.constant 1 : index
    %c32_357 = arith.constant 32 : index
    %820 = vector.load %arg34[%c0_355, %c1_356, %c32_357] : memref<2x8x64xf32, #tpu.memory_space<vmem>>, vector<2x1x32xf32>
    %821 = vector.shape_cast %820 : vector<2x1x32xf32> to vector<2x32xf32>
    %822 = vector.shape_cast %816 : vector<2x32xf32> to vector<2x1x32xf32>
    tpu.vector_store %arg34[%c0_355, %c1_356, %c32_357], %822 {strides = array<i32>} : memref<2x8x64xf32, #tpu.memory_space<vmem>>, vector<2x1x32xf32>,
    %c0_358 = arith.constant 0 : index
    %c7_359 = arith.constant 7 : index
    %c0_360 = arith.constant 0 : index
    %823 = vector.load %arg36[%c0_358, %c7_359, %c0_360] : memref<2x8x128xf32, #tpu.memory_space<vmem>>, vector<2x1x128xf32>
    %824 = vector.shape_cast %823 : vector<2x1x128xf32> to vector<2x128xf32>
    %cst_361 = arith.constant dense<0.000000e+00> : vector<2x128xf32>
    %825 = tpu.matmul %798, %454, %cst_361 {dimension_numbers = #tpu.dot_dimension_numbers<[1], [0], [0], [1], [0, 0, 1, 1], [], []>} : vector<2x32xf32>, vector<32x128xf32>, vector<2x128xf32> -> vector<2x128xf32>
    %826 = arith.addf %824, %825 : vector<2x128xf32>
    %c0_362 = arith.constant 0 : index
    %c0_363 = arith.constant 0 : index
    %c0_364 = arith.constant 0 : index
    %827 = vector.load %arg37[%c0_362, %c0_363, %c0_364] : memref<2x8x128xf32, #tpu.memory_space<vmem>>, vector<2x1x128xf32>
    %828 = vector.shape_cast %827 : vector<2x1x128xf32> to vector<2x128xf32>
    %cst_365 = arith.constant dense<0.000000e+00> : vector<2x128xf32>
    %829 = tpu.matmul %816, %457, %cst_365 {dimension_numbers = #tpu.dot_dimension_numbers<[1], [0], [0], [1], [0, 0, 1, 1], [], []>} : vector<2x32xf32>, vector<32x128xf32>, vector<2x128xf32> -> vector<2x128xf32>
    %830 = arith.addf %828, %829 : vector<2x128xf32>
    %831 = arith.negf %826 : vector<2x128xf32>
    %832 = math.exp %831 : vector<2x128xf32>
    %cst_366 = arith.constant 1.000000e+00 : f32
    %833 = vector.broadcast %cst_366 : f32 to vector<2x128xf32>
    %834 = arith.addf %833, %832 : vector<2x128xf32>
    %835 = arith.divf %833, %834 : vector<2x128xf32>
    %836 = vector.extract_strided_slice %835 {offsets = [0, 0], sizes = [2, 32], strides = [1, 1]} : vector<2x128xf32> to vector<2x32xf32>
    %837 = vector.extract_strided_slice %835 {offsets = [0, 32], sizes = [2, 32], strides = [1, 1]} : vector<2x128xf32> to vector<2x32xf32>
    %838 = vector.extract_strided_slice %835 {offsets = [0, 64], sizes = [2, 32], strides = [1, 1]} : vector<2x128xf32> to vector<2x32xf32>
    %cst_367 = arith.constant 2.000000e+00 : f32
    %839 = vector.broadcast %cst_367 : f32 to vector<2x32xf32>
    %840 = arith.mulf %839, %838 : vector<2x32xf32>
    %cst_368 = arith.constant 1.000000e+00 : f32
    %841 = vector.broadcast %cst_368 : f32 to vector<2x32xf32>
    %842 = arith.subf %840, %841 : vector<2x32xf32>
    %843 = vector.extract_strided_slice %835 {offsets = [0, 96], sizes = [2, 32], strides = [1, 1]} : vector<2x128xf32> to vector<2x32xf32>
    %844 = arith.mulf %837, %796 : vector<2x32xf32>
    %845 = arith.mulf %836, %842 : vector<2x32xf32>
    %846 = arith.addf %844, %845 : vector<2x32xf32>
    %847 = math.tanh %846 : vector<2x32xf32>
    %848 = arith.mulf %843, %847 : vector<2x32xf32>
    %849 = arith.negf %830 : vector<2x128xf32>
    %850 = math.exp %849 : vector<2x128xf32>
    %cst_369 = arith.constant 1.000000e+00 : f32
    %851 = vector.broadcast %cst_369 : f32 to vector<2x128xf32>
    %852 = arith.addf %851, %850 : vector<2x128xf32>
    %853 = arith.divf %851, %852 : vector<2x128xf32>
    %854 = vector.extract_strided_slice %853 {offsets = [0, 0], sizes = [2, 32], strides = [1, 1]} : vector<2x128xf32> to vector<2x32xf32>
    %855 = vector.extract_strided_slice %853 {offsets = [0, 32], sizes = [2, 32], strides = [1, 1]} : vector<2x128xf32> to vector<2x32xf32>
    %856 = vector.extract_strided_slice %853 {offsets = [0, 64], sizes = [2, 32], strides = [1, 1]} : vector<2x128xf32> to vector<2x32xf32>
    %cst_370 = arith.constant 2.000000e+00 : f32
    %857 = vector.broadcast %cst_370 : f32 to vector<2x32xf32>
    %858 = arith.mulf %857, %856 : vector<2x32xf32>
    %cst_371 = arith.constant 1.000000e+00 : f32
    %859 = vector.broadcast %cst_371 : f32 to vector<2x32xf32>
    %860 = arith.subf %858, %859 : vector<2x32xf32>
    %861 = vector.extract_strided_slice %853 {offsets = [0, 96], sizes = [2, 32], strides = [1, 1]} : vector<2x128xf32> to vector<2x32xf32>
    %862 = arith.mulf %855, %814 : vector<2x32xf32>
    %863 = arith.mulf %854, %860 : vector<2x32xf32>
    %864 = arith.addf %862, %863 : vector<2x32xf32>
    %865 = math.tanh %864 : vector<2x32xf32>
    %866 = arith.mulf %861, %865 : vector<2x32xf32>
    %c0_372 = arith.constant 0 : index
    %c7_373 = arith.constant 7 : index
    %c0_374 = arith.constant 0 : index
    %867 = vector.load %arg34[%c0_372, %c7_373, %c0_374] : memref<2x8x64xf32, #tpu.memory_space<vmem>>, vector<2x1x32xf32>
    %868 = vector.shape_cast %867 : vector<2x1x32xf32> to vector<2x32xf32>
    %869 = vector.shape_cast %848 : vector<2x32xf32> to vector<2x1x32xf32>
    tpu.vector_store %arg34[%c0_372, %c7_373, %c0_374], %869 {strides = array<i32>} : memref<2x8x64xf32, #tpu.memory_space<vmem>>, vector<2x1x32xf32>,
    %c0_375 = arith.constant 0 : index
    %c0_376 = arith.constant 0 : index
    %c32_377 = arith.constant 32 : index
    %870 = vector.load %arg34[%c0_375, %c0_376, %c32_377] : memref<2x8x64xf32, #tpu.memory_space<vmem>>, vector<2x1x32xf32>
    %871 = vector.shape_cast %870 : vector<2x1x32xf32> to vector<2x32xf32>
    %872 = vector.shape_cast %866 : vector<2x32xf32> to vector<2x1x32xf32>
    tpu.vector_store %arg34[%c0_375, %c0_376, %c32_377], %872 {strides = array<i32>} : memref<2x8x64xf32, #tpu.memory_space<vmem>>, vector<2x1x32xf32>,
    %c0_378 = arith.constant 0 : index
    %c0_379 = arith.constant 0 : index
    %c0_380 = arith.constant 0 : index
    %873 = vector.load %arg34[%c0_378, %c0_379, %c0_380] : memref<2x8x64xf32, #tpu.memory_space<vmem>>, vector<2x8x64xf32>
    %874 = vector.shape_cast %873 : vector<2x8x64xf32> to vector<16x64xf32>
    %c0_381 = arith.constant 0 : index
    %c0_382 = arith.constant 0 : index
    %875 = vector.load %arg17[%c0_381, %c0_382] : memref<64x128xf32, #tpu.memory_space<vmem>>, vector<64x128xf32>
    %c0_383 = arith.constant 0 : index
    %c0_384 = arith.constant 0 : index
    %876 = vector.load %arg18[%c0_383, %c0_384] : memref<32x128xf32, #tpu.memory_space<vmem>>, vector<32x128xf32>
    %c0_385 = arith.constant 0 : index
    %c0_386 = arith.constant 0 : index
    %877 = vector.load %arg19[%c0_385, %c0_386] : memref<1x128xf32, #tpu.memory_space<vmem>>, vector<1x128xf32>
    %c0_387 = arith.constant 0 : index
    %c0_388 = arith.constant 0 : index
    %878 = vector.load %arg20[%c0_387, %c0_388] : memref<64x128xf32, #tpu.memory_space<vmem>>, vector<64x128xf32>
    %c0_389 = arith.constant 0 : index
    %c0_390 = arith.constant 0 : index
    %879 = vector.load %arg21[%c0_389, %c0_390] : memref<32x128xf32, #tpu.memory_space<vmem>>, vector<32x128xf32>
    %c0_391 = arith.constant 0 : index
    %c0_392 = arith.constant 0 : index
    %880 = vector.load %arg22[%c0_391, %c0_392] : memref<1x128xf32, #tpu.memory_space<vmem>>, vector<1x128xf32>
    %cst_393 = arith.constant dense<0.000000e+00> : vector<16x128xf32>
    %881 = tpu.matmul %874, %875, %cst_393 {dimension_numbers = #tpu.dot_dimension_numbers<[1], [0], [0], [1], [0, 0, 1, 1], [], []>} : vector<16x64xf32>, vector<64x128xf32>, vector<16x128xf32> -> vector<16x128xf32>
    %882 = vector.broadcast %877 : vector<1x128xf32> to vector<16x128xf32>
    %883 = arith.addf %881, %882 : vector<16x128xf32>
    %884 = vector.shape_cast %883 : vector<16x128xf32> to vector<2x8x128xf32>
    %c0_394 = arith.constant 0 : index
    %c0_395 = arith.constant 0 : index
    %c0_396 = arith.constant 0 : index
    %885 = vector.load %arg36[%c0_394, %c0_395, %c0_396] : memref<2x8x128xf32, #tpu.memory_space<vmem>>, vector<2x8x128xf32>
    tpu.vector_store %arg36[%c0_394, %c0_395, %c0_396], %884 {strides = array<i32>} : memref<2x8x128xf32, #tpu.memory_space<vmem>>, vector<2x8x128xf32>,
    %cst_397 = arith.constant dense<0.000000e+00> : vector<16x128xf32>
    %886 = tpu.matmul %874, %878, %cst_397 {dimension_numbers = #tpu.dot_dimension_numbers<[1], [0], [0], [1], [0, 0, 1, 1], [], []>} : vector<16x64xf32>, vector<64x128xf32>, vector<16x128xf32> -> vector<16x128xf32>
    %887 = vector.broadcast %880 : vector<1x128xf32> to vector<16x128xf32>
    %888 = arith.addf %886, %887 : vector<16x128xf32>
    %889 = vector.shape_cast %888 : vector<16x128xf32> to vector<2x8x128xf32>
    %c0_398 = arith.constant 0 : index
    %c0_399 = arith.constant 0 : index
    %c0_400 = arith.constant 0 : index
    %890 = vector.load %arg37[%c0_398, %c0_399, %c0_400] : memref<2x8x128xf32, #tpu.memory_space<vmem>>, vector<2x8x128xf32>
    tpu.vector_store %arg37[%c0_398, %c0_399, %c0_400], %889 {strides = array<i32>} : memref<2x8x128xf32, #tpu.memory_space<vmem>>, vector<2x8x128xf32>,
    %cst_401 = arith.constant 0.000000e+00 : f32
    %891 = vector.broadcast %cst_401 : f32 to vector<2x32xf32>
    %cst_402 = arith.constant 0.000000e+00 : f32
    %892 = vector.broadcast %cst_402 : f32 to vector<2x32xf32>
    %cst_403 = arith.constant 0.000000e+00 : f32
    %893 = vector.broadcast %cst_403 : f32 to vector<2x32xf32>
    %cst_404 = arith.constant 0.000000e+00 : f32
    %894 = vector.broadcast %cst_404 : f32 to vector<2x32xf32>
    %c0_405 = arith.constant 0 : index
    %c0_406 = arith.constant 0 : index
    %c0_407 = arith.constant 0 : index
    %895 = vector.load %arg36[%c0_405, %c0_406, %c0_407] : memref<2x8x128xf32, #tpu.memory_space<vmem>>, vector<2x1x128xf32>
    %896 = vector.shape_cast %895 : vector<2x1x128xf32> to vector<2x128xf32>
    %cst_408 = arith.constant dense<0.000000e+00> : vector<2x128xf32>
    %897 = tpu.matmul %891, %876, %cst_408 {dimension_numbers = #tpu.dot_dimension_numbers<[1], [0], [0], [1], [0, 0, 1, 1], [], []>} : vector<2x32xf32>, vector<32x128xf32>, vector<2x128xf32> -> vector<2x128xf32>
    %898 = arith.addf %896, %897 : vector<2x128xf32>
    %c0_409 = arith.constant 0 : index
    %c7_410 = arith.constant 7 : index
    %c0_411 = arith.constant 0 : index
    %899 = vector.load %arg37[%c0_409, %c7_410, %c0_411] : memref<2x8x128xf32, #tpu.memory_space<vmem>>, vector<2x1x128xf32>
    %900 = vector.shape_cast %899 : vector<2x1x128xf32> to vector<2x128xf32>
    %cst_412 = arith.constant dense<0.000000e+00> : vector<2x128xf32>
    %901 = tpu.matmul %893, %879, %cst_412 {dimension_numbers = #tpu.dot_dimension_numbers<[1], [0], [0], [1], [0, 0, 1, 1], [], []>} : vector<2x32xf32>, vector<32x128xf32>, vector<2x128xf32> -> vector<2x128xf32>
    %902 = arith.addf %900, %901 : vector<2x128xf32>
    %903 = arith.negf %898 : vector<2x128xf32>
    %904 = math.exp %903 : vector<2x128xf32>
    %cst_413 = arith.constant 1.000000e+00 : f32
    %905 = vector.broadcast %cst_413 : f32 to vector<2x128xf32>
    %906 = arith.addf %905, %904 : vector<2x128xf32>
    %907 = arith.divf %905, %906 : vector<2x128xf32>
    %908 = vector.extract_strided_slice %907 {offsets = [0, 0], sizes = [2, 32], strides = [1, 1]} : vector<2x128xf32> to vector<2x32xf32>
    %909 = vector.extract_strided_slice %907 {offsets = [0, 32], sizes = [2, 32], strides = [1, 1]} : vector<2x128xf32> to vector<2x32xf32>
    %910 = vector.extract_strided_slice %907 {offsets = [0, 64], sizes = [2, 32], strides = [1, 1]} : vector<2x128xf32> to vector<2x32xf32>
    %cst_414 = arith.constant 2.000000e+00 : f32
    %911 = vector.broadcast %cst_414 : f32 to vector<2x32xf32>
    %912 = arith.mulf %911, %910 : vector<2x32xf32>
    %cst_415 = arith.constant 1.000000e+00 : f32
    %913 = vector.broadcast %cst_415 : f32 to vector<2x32xf32>
    %914 = arith.subf %912, %913 : vector<2x32xf32>
    %915 = vector.extract_strided_slice %907 {offsets = [0, 96], sizes = [2, 32], strides = [1, 1]} : vector<2x128xf32> to vector<2x32xf32>
    %916 = arith.mulf %909, %892 : vector<2x32xf32>
    %917 = arith.mulf %908, %914 : vector<2x32xf32>
    %918 = arith.addf %916, %917 : vector<2x32xf32>
    %919 = math.tanh %918 : vector<2x32xf32>
    %920 = arith.mulf %915, %919 : vector<2x32xf32>
    %921 = arith.negf %902 : vector<2x128xf32>
    %922 = math.exp %921 : vector<2x128xf32>
    %cst_416 = arith.constant 1.000000e+00 : f32
    %923 = vector.broadcast %cst_416 : f32 to vector<2x128xf32>
    %924 = arith.addf %923, %922 : vector<2x128xf32>
    %925 = arith.divf %923, %924 : vector<2x128xf32>
    %926 = vector.extract_strided_slice %925 {offsets = [0, 0], sizes = [2, 32], strides = [1, 1]} : vector<2x128xf32> to vector<2x32xf32>
    %927 = vector.extract_strided_slice %925 {offsets = [0, 32], sizes = [2, 32], strides = [1, 1]} : vector<2x128xf32> to vector<2x32xf32>
    %928 = vector.extract_strided_slice %925 {offsets = [0, 64], sizes = [2, 32], strides = [1, 1]} : vector<2x128xf32> to vector<2x32xf32>
    %cst_417 = arith.constant 2.000000e+00 : f32
    %929 = vector.broadcast %cst_417 : f32 to vector<2x32xf32>
    %930 = arith.mulf %929, %928 : vector<2x32xf32>
    %cst_418 = arith.constant 1.000000e+00 : f32
    %931 = vector.broadcast %cst_418 : f32 to vector<2x32xf32>
    %932 = arith.subf %930, %931 : vector<2x32xf32>
    %933 = vector.extract_strided_slice %925 {offsets = [0, 96], sizes = [2, 32], strides = [1, 1]} : vector<2x128xf32> to vector<2x32xf32>
    %934 = arith.mulf %927, %894 : vector<2x32xf32>
    %935 = arith.mulf %926, %932 : vector<2x32xf32>
    %936 = arith.addf %934, %935 : vector<2x32xf32>
    %937 = math.tanh %936 : vector<2x32xf32>
    %938 = arith.mulf %933, %937 : vector<2x32xf32>
    %c0_419 = arith.constant 0 : index
    %c0_420 = arith.constant 0 : index
    %c0_421 = arith.constant 0 : index
    %939 = vector.load %arg35[%c0_419, %c0_420, %c0_421] : memref<2x8x64xf32, #tpu.memory_space<vmem>>, vector<2x1x32xf32>
    %940 = vector.shape_cast %939 : vector<2x1x32xf32> to vector<2x32xf32>
    %941 = vector.shape_cast %920 : vector<2x32xf32> to vector<2x1x32xf32>
    tpu.vector_store %arg35[%c0_419, %c0_420, %c0_421], %941 {strides = array<i32>} : memref<2x8x64xf32, #tpu.memory_space<vmem>>, vector<2x1x32xf32>,
    %c0_422 = arith.constant 0 : index
    %c7_423 = arith.constant 7 : index
    %c32_424 = arith.constant 32 : index
    %942 = vector.load %arg35[%c0_422, %c7_423, %c32_424] : memref<2x8x64xf32, #tpu.memory_space<vmem>>, vector<2x1x32xf32>
    %943 = vector.shape_cast %942 : vector<2x1x32xf32> to vector<2x32xf32>
    %944 = vector.shape_cast %938 : vector<2x32xf32> to vector<2x1x32xf32>
    tpu.vector_store %arg35[%c0_422, %c7_423, %c32_424], %944 {strides = array<i32>} : memref<2x8x64xf32, #tpu.memory_space<vmem>>, vector<2x1x32xf32>,
    %c0_425 = arith.constant 0 : index
    %c1_426 = arith.constant 1 : index
    %c0_427 = arith.constant 0 : index
    %945 = vector.load %arg36[%c0_425, %c1_426, %c0_427] : memref<2x8x128xf32, #tpu.memory_space<vmem>>, vector<2x1x128xf32>
    %946 = vector.shape_cast %945 : vector<2x1x128xf32> to vector<2x128xf32>
    %cst_428 = arith.constant dense<0.000000e+00> : vector<2x128xf32>
    %947 = tpu.matmul %920, %876, %cst_428 {dimension_numbers = #tpu.dot_dimension_numbers<[1], [0], [0], [1], [0, 0, 1, 1], [], []>} : vector<2x32xf32>, vector<32x128xf32>, vector<2x128xf32> -> vector<2x128xf32>
    %948 = arith.addf %946, %947 : vector<2x128xf32>
    %c0_429 = arith.constant 0 : index
    %c6_430 = arith.constant 6 : index
    %c0_431 = arith.constant 0 : index
    %949 = vector.load %arg37[%c0_429, %c6_430, %c0_431] : memref<2x8x128xf32, #tpu.memory_space<vmem>>, vector<2x1x128xf32>
    %950 = vector.shape_cast %949 : vector<2x1x128xf32> to vector<2x128xf32>
    %cst_432 = arith.constant dense<0.000000e+00> : vector<2x128xf32>
    %951 = tpu.matmul %938, %879, %cst_432 {dimension_numbers = #tpu.dot_dimension_numbers<[1], [0], [0], [1], [0, 0, 1, 1], [], []>} : vector<2x32xf32>, vector<32x128xf32>, vector<2x128xf32> -> vector<2x128xf32>
    %952 = arith.addf %950, %951 : vector<2x128xf32>
    %953 = arith.negf %948 : vector<2x128xf32>
    %954 = math.exp %953 : vector<2x128xf32>
    %cst_433 = arith.constant 1.000000e+00 : f32
    %955 = vector.broadcast %cst_433 : f32 to vector<2x128xf32>
    %956 = arith.addf %955, %954 : vector<2x128xf32>
    %957 = arith.divf %955, %956 : vector<2x128xf32>
    %958 = vector.extract_strided_slice %957 {offsets = [0, 0], sizes = [2, 32], strides = [1, 1]} : vector<2x128xf32> to vector<2x32xf32>
    %959 = vector.extract_strided_slice %957 {offsets = [0, 32], sizes = [2, 32], strides = [1, 1]} : vector<2x128xf32> to vector<2x32xf32>
    %960 = vector.extract_strided_slice %957 {offsets = [0, 64], sizes = [2, 32], strides = [1, 1]} : vector<2x128xf32> to vector<2x32xf32>
    %cst_434 = arith.constant 2.000000e+00 : f32
    %961 = vector.broadcast %cst_434 : f32 to vector<2x32xf32>
    %962 = arith.mulf %961, %960 : vector<2x32xf32>
    %cst_435 = arith.constant 1.000000e+00 : f32
    %963 = vector.broadcast %cst_435 : f32 to vector<2x32xf32>
    %964 = arith.subf %962, %963 : vector<2x32xf32>
    %965 = vector.extract_strided_slice %957 {offsets = [0, 96], sizes = [2, 32], strides = [1, 1]} : vector<2x128xf32> to vector<2x32xf32>
    %966 = arith.mulf %959, %918 : vector<2x32xf32>
    %967 = arith.mulf %958, %964 : vector<2x32xf32>
    %968 = arith.addf %966, %967 : vector<2x32xf32>
    %969 = math.tanh %968 : vector<2x32xf32>
    %970 = arith.mulf %965, %969 : vector<2x32xf32>
    %971 = arith.negf %952 : vector<2x128xf32>
    %972 = math.exp %971 : vector<2x128xf32>
    %cst_436 = arith.constant 1.000000e+00 : f32
    %973 = vector.broadcast %cst_436 : f32 to vector<2x128xf32>
    %974 = arith.addf %973, %972 : vector<2x128xf32>
    %975 = arith.divf %973, %974 : vector<2x128xf32>
    %976 = vector.extract_strided_slice %975 {offsets = [0, 0], sizes = [2, 32], strides = [1, 1]} : vector<2x128xf32> to vector<2x32xf32>
    %977 = vector.extract_strided_slice %975 {offsets = [0, 32], sizes = [2, 32], strides = [1, 1]} : vector<2x128xf32> to vector<2x32xf32>
    %978 = vector.extract_strided_slice %975 {offsets = [0, 64], sizes = [2, 32], strides = [1, 1]} : vector<2x128xf32> to vector<2x32xf32>
    %cst_437 = arith.constant 2.000000e+00 : f32
    %979 = vector.broadcast %cst_437 : f32 to vector<2x32xf32>
    %980 = arith.mulf %979, %978 : vector<2x32xf32>
    %cst_438 = arith.constant 1.000000e+00 : f32
    %981 = vector.broadcast %cst_438 : f32 to vector<2x32xf32>
    %982 = arith.subf %980, %981 : vector<2x32xf32>
    %983 = vector.extract_strided_slice %975 {offsets = [0, 96], sizes = [2, 32], strides = [1, 1]} : vector<2x128xf32> to vector<2x32xf32>
    %984 = arith.mulf %977, %936 : vector<2x32xf32>
    %985 = arith.mulf %976, %982 : vector<2x32xf32>
    %986 = arith.addf %984, %985 : vector<2x32xf32>
    %987 = math.tanh %986 : vector<2x32xf32>
    %988 = arith.mulf %983, %987 : vector<2x32xf32>
    %c0_439 = arith.constant 0 : index
    %c1_440 = arith.constant 1 : index
    %c0_441 = arith.constant 0 : index
    %989 = vector.load %arg35[%c0_439, %c1_440, %c0_441] : memref<2x8x64xf32, #tpu.memory_space<vmem>>, vector<2x1x32xf32>
    %990 = vector.shape_cast %989 : vector<2x1x32xf32> to vector<2x32xf32>
    %991 = vector.shape_cast %970 : vector<2x32xf32> to vector<2x1x32xf32>
    tpu.vector_store %arg35[%c0_439, %c1_440, %c0_441], %991 {strides = array<i32>} : memref<2x8x64xf32, #tpu.memory_space<vmem>>, vector<2x1x32xf32>,
    %c0_442 = arith.constant 0 : index
    %c6_443 = arith.constant 6 : index
    %c32_444 = arith.constant 32 : index
    %992 = vector.load %arg35[%c0_442, %c6_443, %c32_444] : memref<2x8x64xf32, #tpu.memory_space<vmem>>, vector<2x1x32xf32>
    %993 = vector.shape_cast %992 : vector<2x1x32xf32> to vector<2x32xf32>
    %994 = vector.shape_cast %988 : vector<2x32xf32> to vector<2x1x32xf32>
    tpu.vector_store %arg35[%c0_442, %c6_443, %c32_444], %994 {strides = array<i32>} : memref<2x8x64xf32, #tpu.memory_space<vmem>>, vector<2x1x32xf32>,
    %c0_445 = arith.constant 0 : index
    %c2_446 = arith.constant 2 : index
    %c0_447 = arith.constant 0 : index
    %995 = vector.load %arg36[%c0_445, %c2_446, %c0_447] : memref<2x8x128xf32, #tpu.memory_space<vmem>>, vector<2x1x128xf32>
    %996 = vector.shape_cast %995 : vector<2x1x128xf32> to vector<2x128xf32>
    %cst_448 = arith.constant dense<0.000000e+00> : vector<2x128xf32>
    %997 = tpu.matmul %970, %876, %cst_448 {dimension_numbers = #tpu.dot_dimension_numbers<[1], [0], [0], [1], [0, 0, 1, 1], [], []>} : vector<2x32xf32>, vector<32x128xf32>, vector<2x128xf32> -> vector<2x128xf32>
    %998 = arith.addf %996, %997 : vector<2x128xf32>
    %c0_449 = arith.constant 0 : index
    %c5_450 = arith.constant 5 : index
    %c0_451 = arith.constant 0 : index
    %999 = vector.load %arg37[%c0_449, %c5_450, %c0_451] : memref<2x8x128xf32, #tpu.memory_space<vmem>>, vector<2x1x128xf32>
    %1000 = vector.shape_cast %999 : vector<2x1x128xf32> to vector<2x128xf32>
    %cst_452 = arith.constant dense<0.000000e+00> : vector<2x128xf32>
    %1001 = tpu.matmul %988, %879, %cst_452 {dimension_numbers = #tpu.dot_dimension_numbers<[1], [0], [0], [1], [0, 0, 1, 1], [], []>} : vector<2x32xf32>, vector<32x128xf32>, vector<2x128xf32> -> vector<2x128xf32>
    %1002 = arith.addf %1000, %1001 : vector<2x128xf32>
    %1003 = arith.negf %998 : vector<2x128xf32>
    %1004 = math.exp %1003 : vector<2x128xf32>
    %cst_453 = arith.constant 1.000000e+00 : f32
    %1005 = vector.broadcast %cst_453 : f32 to vector<2x128xf32>
    %1006 = arith.addf %1005, %1004 : vector<2x128xf32>
    %1007 = arith.divf %1005, %1006 : vector<2x128xf32>
    %1008 = vector.extract_strided_slice %1007 {offsets = [0, 0], sizes = [2, 32], strides = [1, 1]} : vector<2x128xf32> to vector<2x32xf32>
    %1009 = vector.extract_strided_slice %1007 {offsets = [0, 32], sizes = [2, 32], strides = [1, 1]} : vector<2x128xf32> to vector<2x32xf32>
    %1010 = vector.extract_strided_slice %1007 {offsets = [0, 64], sizes = [2, 32], strides = [1, 1]} : vector<2x128xf32> to vector<2x32xf32>
    %cst_454 = arith.constant 2.000000e+00 : f32
    %1011 = vector.broadcast %cst_454 : f32 to vector<2x32xf32>
    %1012 = arith.mulf %1011, %1010 : vector<2x32xf32>
    %cst_455 = arith.constant 1.000000e+00 : f32
    %1013 = vector.broadcast %cst_455 : f32 to vector<2x32xf32>
    %1014 = arith.subf %1012, %1013 : vector<2x32xf32>
    %1015 = vector.extract_strided_slice %1007 {offsets = [0, 96], sizes = [2, 32], strides = [1, 1]} : vector<2x128xf32> to vector<2x32xf32>
    %1016 = arith.mulf %1009, %968 : vector<2x32xf32>
    %1017 = arith.mulf %1008, %1014 : vector<2x32xf32>
    %1018 = arith.addf %1016, %1017 : vector<2x32xf32>
    %1019 = math.tanh %1018 : vector<2x32xf32>
    %1020 = arith.mulf %1015, %1019 : vector<2x32xf32>
    %1021 = arith.negf %1002 : vector<2x128xf32>
    %1022 = math.exp %1021 : vector<2x128xf32>
    %cst_456 = arith.constant 1.000000e+00 : f32
    %1023 = vector.broadcast %cst_456 : f32 to vector<2x128xf32>
    %1024 = arith.addf %1023, %1022 : vector<2x128xf32>
    %1025 = arith.divf %1023, %1024 : vector<2x128xf32>
    %1026 = vector.extract_strided_slice %1025 {offsets = [0, 0], sizes = [2, 32], strides = [1, 1]} : vector<2x128xf32> to vector<2x32xf32>
    %1027 = vector.extract_strided_slice %1025 {offsets = [0, 32], sizes = [2, 32], strides = [1, 1]} : vector<2x128xf32> to vector<2x32xf32>
    %1028 = vector.extract_strided_slice %1025 {offsets = [0, 64], sizes = [2, 32], strides = [1, 1]} : vector<2x128xf32> to vector<2x32xf32>
    %cst_457 = arith.constant 2.000000e+00 : f32
    %1029 = vector.broadcast %cst_457 : f32 to vector<2x32xf32>
    %1030 = arith.mulf %1029, %1028 : vector<2x32xf32>
    %cst_458 = arith.constant 1.000000e+00 : f32
    %1031 = vector.broadcast %cst_458 : f32 to vector<2x32xf32>
    %1032 = arith.subf %1030, %1031 : vector<2x32xf32>
    %1033 = vector.extract_strided_slice %1025 {offsets = [0, 96], sizes = [2, 32], strides = [1, 1]} : vector<2x128xf32> to vector<2x32xf32>
    %1034 = arith.mulf %1027, %986 : vector<2x32xf32>
    %1035 = arith.mulf %1026, %1032 : vector<2x32xf32>
    %1036 = arith.addf %1034, %1035 : vector<2x32xf32>
    %1037 = math.tanh %1036 : vector<2x32xf32>
    %1038 = arith.mulf %1033, %1037 : vector<2x32xf32>
    %c0_459 = arith.constant 0 : index
    %c2_460 = arith.constant 2 : index
    %c0_461 = arith.constant 0 : index
    %1039 = vector.load %arg35[%c0_459, %c2_460, %c0_461] : memref<2x8x64xf32, #tpu.memory_space<vmem>>, vector<2x1x32xf32>
    %1040 = vector.shape_cast %1039 : vector<2x1x32xf32> to vector<2x32xf32>
    %1041 = vector.shape_cast %1020 : vector<2x32xf32> to vector<2x1x32xf32>
    tpu.vector_store %arg35[%c0_459, %c2_460, %c0_461], %1041 {strides = array<i32>} : memref<2x8x64xf32, #tpu.memory_space<vmem>>, vector<2x1x32xf32>,
    %c0_462 = arith.constant 0 : index
    %c5_463 = arith.constant 5 : index
    %c32_464 = arith.constant 32 : index
    %1042 = vector.load %arg35[%c0_462, %c5_463, %c32_464] : memref<2x8x64xf32, #tpu.memory_space<vmem>>, vector<2x1x32xf32>
    %1043 = vector.shape_cast %1042 : vector<2x1x32xf32> to vector<2x32xf32>
    %1044 = vector.shape_cast %1038 : vector<2x32xf32> to vector<2x1x32xf32>
    tpu.vector_store %arg35[%c0_462, %c5_463, %c32_464], %1044 {strides = array<i32>} : memref<2x8x64xf32, #tpu.memory_space<vmem>>, vector<2x1x32xf32>,
    %c0_465 = arith.constant 0 : index
    %c3_466 = arith.constant 3 : index
    %c0_467 = arith.constant 0 : index
    %1045 = vector.load %arg36[%c0_465, %c3_466, %c0_467] : memref<2x8x128xf32, #tpu.memory_space<vmem>>, vector<2x1x128xf32>
    %1046 = vector.shape_cast %1045 : vector<2x1x128xf32> to vector<2x128xf32>
    %cst_468 = arith.constant dense<0.000000e+00> : vector<2x128xf32>
    %1047 = tpu.matmul %1020, %876, %cst_468 {dimension_numbers = #tpu.dot_dimension_numbers<[1], [0], [0], [1], [0, 0, 1, 1], [], []>} : vector<2x32xf32>, vector<32x128xf32>, vector<2x128xf32> -> vector<2x128xf32>
    %1048 = arith.addf %1046, %1047 : vector<2x128xf32>
    %c0_469 = arith.constant 0 : index
    %c4_470 = arith.constant 4 : index
    %c0_471 = arith.constant 0 : index
    %1049 = vector.load %arg37[%c0_469, %c4_470, %c0_471] : memref<2x8x128xf32, #tpu.memory_space<vmem>>, vector<2x1x128xf32>
    %1050 = vector.shape_cast %1049 : vector<2x1x128xf32> to vector<2x128xf32>
    %cst_472 = arith.constant dense<0.000000e+00> : vector<2x128xf32>
    %1051 = tpu.matmul %1038, %879, %cst_472 {dimension_numbers = #tpu.dot_dimension_numbers<[1], [0], [0], [1], [0, 0, 1, 1], [], []>} : vector<2x32xf32>, vector<32x128xf32>, vector<2x128xf32> -> vector<2x128xf32>
    %1052 = arith.addf %1050, %1051 : vector<2x128xf32>
    %1053 = arith.negf %1048 : vector<2x128xf32>
    %1054 = math.exp %1053 : vector<2x128xf32>
    %cst_473 = arith.constant 1.000000e+00 : f32
    %1055 = vector.broadcast %cst_473 : f32 to vector<2x128xf32>
    %1056 = arith.addf %1055, %1054 : vector<2x128xf32>
    %1057 = arith.divf %1055, %1056 : vector<2x128xf32>
    %1058 = vector.extract_strided_slice %1057 {offsets = [0, 0], sizes = [2, 32], strides = [1, 1]} : vector<2x128xf32> to vector<2x32xf32>
    %1059 = vector.extract_strided_slice %1057 {offsets = [0, 32], sizes = [2, 32], strides = [1, 1]} : vector<2x128xf32> to vector<2x32xf32>
    %1060 = vector.extract_strided_slice %1057 {offsets = [0, 64], sizes = [2, 32], strides = [1, 1]} : vector<2x128xf32> to vector<2x32xf32>
    %cst_474 = arith.constant 2.000000e+00 : f32
    %1061 = vector.broadcast %cst_474 : f32 to vector<2x32xf32>
    %1062 = arith.mulf %1061, %1060 : vector<2x32xf32>
    %cst_475 = arith.constant 1.000000e+00 : f32
    %1063 = vector.broadcast %cst_475 : f32 to vector<2x32xf32>
    %1064 = arith.subf %1062, %1063 : vector<2x32xf32>
    %1065 = vector.extract_strided_slice %1057 {offsets = [0, 96], sizes = [2, 32], strides = [1, 1]} : vector<2x128xf32> to vector<2x32xf32>
    %1066 = arith.mulf %1059, %1018 : vector<2x32xf32>
    %1067 = arith.mulf %1058, %1064 : vector<2x32xf32>
    %1068 = arith.addf %1066, %1067 : vector<2x32xf32>
    %1069 = math.tanh %1068 : vector<2x32xf32>
    %1070 = arith.mulf %1065, %1069 : vector<2x32xf32>
    %1071 = arith.negf %1052 : vector<2x128xf32>
    %1072 = math.exp %1071 : vector<2x128xf32>
    %cst_476 = arith.constant 1.000000e+00 : f32
    %1073 = vector.broadcast %cst_476 : f32 to vector<2x128xf32>
    %1074 = arith.addf %1073, %1072 : vector<2x128xf32>
    %1075 = arith.divf %1073, %1074 : vector<2x128xf32>
    %1076 = vector.extract_strided_slice %1075 {offsets = [0, 0], sizes = [2, 32], strides = [1, 1]} : vector<2x128xf32> to vector<2x32xf32>
    %1077 = vector.extract_strided_slice %1075 {offsets = [0, 32], sizes = [2, 32], strides = [1, 1]} : vector<2x128xf32> to vector<2x32xf32>
    %1078 = vector.extract_strided_slice %1075 {offsets = [0, 64], sizes = [2, 32], strides = [1, 1]} : vector<2x128xf32> to vector<2x32xf32>
    %cst_477 = arith.constant 2.000000e+00 : f32
    %1079 = vector.broadcast %cst_477 : f32 to vector<2x32xf32>
    %1080 = arith.mulf %1079, %1078 : vector<2x32xf32>
    %cst_478 = arith.constant 1.000000e+00 : f32
    %1081 = vector.broadcast %cst_478 : f32 to vector<2x32xf32>
    %1082 = arith.subf %1080, %1081 : vector<2x32xf32>
    %1083 = vector.extract_strided_slice %1075 {offsets = [0, 96], sizes = [2, 32], strides = [1, 1]} : vector<2x128xf32> to vector<2x32xf32>
    %1084 = arith.mulf %1077, %1036 : vector<2x32xf32>
    %1085 = arith.mulf %1076, %1082 : vector<2x32xf32>
    %1086 = arith.addf %1084, %1085 : vector<2x32xf32>
    %1087 = math.tanh %1086 : vector<2x32xf32>
    %1088 = arith.mulf %1083, %1087 : vector<2x32xf32>
    %c0_479 = arith.constant 0 : index
    %c3_480 = arith.constant 3 : index
    %c0_481 = arith.constant 0 : index
    %1089 = vector.load %arg35[%c0_479, %c3_480, %c0_481] : memref<2x8x64xf32, #tpu.memory_space<vmem>>, vector<2x1x32xf32>
    %1090 = vector.shape_cast %1089 : vector<2x1x32xf32> to vector<2x32xf32>
    %1091 = vector.shape_cast %1070 : vector<2x32xf32> to vector<2x1x32xf32>
    tpu.vector_store %arg35[%c0_479, %c3_480, %c0_481], %1091 {strides = array<i32>} : memref<2x8x64xf32, #tpu.memory_space<vmem>>, vector<2x1x32xf32>,
    %c0_482 = arith.constant 0 : index
    %c4_483 = arith.constant 4 : index
    %c32_484 = arith.constant 32 : index
    %1092 = vector.load %arg35[%c0_482, %c4_483, %c32_484] : memref<2x8x64xf32, #tpu.memory_space<vmem>>, vector<2x1x32xf32>
    %1093 = vector.shape_cast %1092 : vector<2x1x32xf32> to vector<2x32xf32>
    %1094 = vector.shape_cast %1088 : vector<2x32xf32> to vector<2x1x32xf32>
    tpu.vector_store %arg35[%c0_482, %c4_483, %c32_484], %1094 {strides = array<i32>} : memref<2x8x64xf32, #tpu.memory_space<vmem>>, vector<2x1x32xf32>,
    %c0_485 = arith.constant 0 : index
    %c4_486 = arith.constant 4 : index
    %c0_487 = arith.constant 0 : index
    %1095 = vector.load %arg36[%c0_485, %c4_486, %c0_487] : memref<2x8x128xf32, #tpu.memory_space<vmem>>, vector<2x1x128xf32>
    %1096 = vector.shape_cast %1095 : vector<2x1x128xf32> to vector<2x128xf32>
    %cst_488 = arith.constant dense<0.000000e+00> : vector<2x128xf32>
    %1097 = tpu.matmul %1070, %876, %cst_488 {dimension_numbers = #tpu.dot_dimension_numbers<[1], [0], [0], [1], [0, 0, 1, 1], [], []>} : vector<2x32xf32>, vector<32x128xf32>, vector<2x128xf32> -> vector<2x128xf32>
    %1098 = arith.addf %1096, %1097 : vector<2x128xf32>
    %c0_489 = arith.constant 0 : index
    %c3_490 = arith.constant 3 : index
    %c0_491 = arith.constant 0 : index
    %1099 = vector.load %arg37[%c0_489, %c3_490, %c0_491] : memref<2x8x128xf32, #tpu.memory_space<vmem>>, vector<2x1x128xf32>
    %1100 = vector.shape_cast %1099 : vector<2x1x128xf32> to vector<2x128xf32>
    %cst_492 = arith.constant dense<0.000000e+00> : vector<2x128xf32>
    %1101 = tpu.matmul %1088, %879, %cst_492 {dimension_numbers = #tpu.dot_dimension_numbers<[1], [0], [0], [1], [0, 0, 1, 1], [], []>} : vector<2x32xf32>, vector<32x128xf32>, vector<2x128xf32> -> vector<2x128xf32>
    %1102 = arith.addf %1100, %1101 : vector<2x128xf32>
    %1103 = arith.negf %1098 : vector<2x128xf32>
    %1104 = math.exp %1103 : vector<2x128xf32>
    %cst_493 = arith.constant 1.000000e+00 : f32
    %1105 = vector.broadcast %cst_493 : f32 to vector<2x128xf32>
    %1106 = arith.addf %1105, %1104 : vector<2x128xf32>
    %1107 = arith.divf %1105, %1106 : vector<2x128xf32>
    %1108 = vector.extract_strided_slice %1107 {offsets = [0, 0], sizes = [2, 32], strides = [1, 1]} : vector<2x128xf32> to vector<2x32xf32>
    %1109 = vector.extract_strided_slice %1107 {offsets = [0, 32], sizes = [2, 32], strides = [1, 1]} : vector<2x128xf32> to vector<2x32xf32>
    %1110 = vector.extract_strided_slice %1107 {offsets = [0, 64], sizes = [2, 32], strides = [1, 1]} : vector<2x128xf32> to vector<2x32xf32>
    %cst_494 = arith.constant 2.000000e+00 : f32
    %1111 = vector.broadcast %cst_494 : f32 to vector<2x32xf32>
    %1112 = arith.mulf %1111, %1110 : vector<2x32xf32>
    %cst_495 = arith.constant 1.000000e+00 : f32
    %1113 = vector.broadcast %cst_495 : f32 to vector<2x32xf32>
    %1114 = arith.subf %1112, %1113 : vector<2x32xf32>
    %1115 = vector.extract_strided_slice %1107 {offsets = [0, 96], sizes = [2, 32], strides = [1, 1]} : vector<2x128xf32> to vector<2x32xf32>
    %1116 = arith.mulf %1109, %1068 : vector<2x32xf32>
    %1117 = arith.mulf %1108, %1114 : vector<2x32xf32>
    %1118 = arith.addf %1116, %1117 : vector<2x32xf32>
    %1119 = math.tanh %1118 : vector<2x32xf32>
    %1120 = arith.mulf %1115, %1119 : vector<2x32xf32>
    %1121 = arith.negf %1102 : vector<2x128xf32>
    %1122 = math.exp %1121 : vector<2x128xf32>
    %cst_496 = arith.constant 1.000000e+00 : f32
    %1123 = vector.broadcast %cst_496 : f32 to vector<2x128xf32>
    %1124 = arith.addf %1123, %1122 : vector<2x128xf32>
    %1125 = arith.divf %1123, %1124 : vector<2x128xf32>
    %1126 = vector.extract_strided_slice %1125 {offsets = [0, 0], sizes = [2, 32], strides = [1, 1]} : vector<2x128xf32> to vector<2x32xf32>
    %1127 = vector.extract_strided_slice %1125 {offsets = [0, 32], sizes = [2, 32], strides = [1, 1]} : vector<2x128xf32> to vector<2x32xf32>
    %1128 = vector.extract_strided_slice %1125 {offsets = [0, 64], sizes = [2, 32], strides = [1, 1]} : vector<2x128xf32> to vector<2x32xf32>
    %cst_497 = arith.constant 2.000000e+00 : f32
    %1129 = vector.broadcast %cst_497 : f32 to vector<2x32xf32>
    %1130 = arith.mulf %1129, %1128 : vector<2x32xf32>
    %cst_498 = arith.constant 1.000000e+00 : f32
    %1131 = vector.broadcast %cst_498 : f32 to vector<2x32xf32>
    %1132 = arith.subf %1130, %1131 : vector<2x32xf32>
    %1133 = vector.extract_strided_slice %1125 {offsets = [0, 96], sizes = [2, 32], strides = [1, 1]} : vector<2x128xf32> to vector<2x32xf32>
    %1134 = arith.mulf %1127, %1086 : vector<2x32xf32>
    %1135 = arith.mulf %1126, %1132 : vector<2x32xf32>
    %1136 = arith.addf %1134, %1135 : vector<2x32xf32>
    %1137 = math.tanh %1136 : vector<2x32xf32>
    %1138 = arith.mulf %1133, %1137 : vector<2x32xf32>
    %c0_499 = arith.constant 0 : index
    %c4_500 = arith.constant 4 : index
    %c0_501 = arith.constant 0 : index
    %1139 = vector.load %arg35[%c0_499, %c4_500, %c0_501] : memref<2x8x64xf32, #tpu.memory_space<vmem>>, vector<2x1x32xf32>
    %1140 = vector.shape_cast %1139 : vector<2x1x32xf32> to vector<2x32xf32>
    %1141 = vector.shape_cast %1120 : vector<2x32xf32> to vector<2x1x32xf32>
    tpu.vector_store %arg35[%c0_499, %c4_500, %c0_501], %1141 {strides = array<i32>} : memref<2x8x64xf32, #tpu.memory_space<vmem>>, vector<2x1x32xf32>,
    %c0_502 = arith.constant 0 : index
    %c3_503 = arith.constant 3 : index
    %c32_504 = arith.constant 32 : index
    %1142 = vector.load %arg35[%c0_502, %c3_503, %c32_504] : memref<2x8x64xf32, #tpu.memory_space<vmem>>, vector<2x1x32xf32>
    %1143 = vector.shape_cast %1142 : vector<2x1x32xf32> to vector<2x32xf32>
    %1144 = vector.shape_cast %1138 : vector<2x32xf32> to vector<2x1x32xf32>
    tpu.vector_store %arg35[%c0_502, %c3_503, %c32_504], %1144 {strides = array<i32>} : memref<2x8x64xf32, #tpu.memory_space<vmem>>, vector<2x1x32xf32>,
    %c0_505 = arith.constant 0 : index
    %c5_506 = arith.constant 5 : index
    %c0_507 = arith.constant 0 : index
    %1145 = vector.load %arg36[%c0_505, %c5_506, %c0_507] : memref<2x8x128xf32, #tpu.memory_space<vmem>>, vector<2x1x128xf32>
    %1146 = vector.shape_cast %1145 : vector<2x1x128xf32> to vector<2x128xf32>
    %cst_508 = arith.constant dense<0.000000e+00> : vector<2x128xf32>
    %1147 = tpu.matmul %1120, %876, %cst_508 {dimension_numbers = #tpu.dot_dimension_numbers<[1], [0], [0], [1], [0, 0, 1, 1], [], []>} : vector<2x32xf32>, vector<32x128xf32>, vector<2x128xf32> -> vector<2x128xf32>
    %1148 = arith.addf %1146, %1147 : vector<2x128xf32>
    %c0_509 = arith.constant 0 : index
    %c2_510 = arith.constant 2 : index
    %c0_511 = arith.constant 0 : index
    %1149 = vector.load %arg37[%c0_509, %c2_510, %c0_511] : memref<2x8x128xf32, #tpu.memory_space<vmem>>, vector<2x1x128xf32>
    %1150 = vector.shape_cast %1149 : vector<2x1x128xf32> to vector<2x128xf32>
    %cst_512 = arith.constant dense<0.000000e+00> : vector<2x128xf32>
    %1151 = tpu.matmul %1138, %879, %cst_512 {dimension_numbers = #tpu.dot_dimension_numbers<[1], [0], [0], [1], [0, 0, 1, 1], [], []>} : vector<2x32xf32>, vector<32x128xf32>, vector<2x128xf32> -> vector<2x128xf32>
    %1152 = arith.addf %1150, %1151 : vector<2x128xf32>
    %1153 = arith.negf %1148 : vector<2x128xf32>
    %1154 = math.exp %1153 : vector<2x128xf32>
    %cst_513 = arith.constant 1.000000e+00 : f32
    %1155 = vector.broadcast %cst_513 : f32 to vector<2x128xf32>
    %1156 = arith.addf %1155, %1154 : vector<2x128xf32>
    %1157 = arith.divf %1155, %1156 : vector<2x128xf32>
    %1158 = vector.extract_strided_slice %1157 {offsets = [0, 0], sizes = [2, 32], strides = [1, 1]} : vector<2x128xf32> to vector<2x32xf32>
    %1159 = vector.extract_strided_slice %1157 {offsets = [0, 32], sizes = [2, 32], strides = [1, 1]} : vector<2x128xf32> to vector<2x32xf32>
    %1160 = vector.extract_strided_slice %1157 {offsets = [0, 64], sizes = [2, 32], strides = [1, 1]} : vector<2x128xf32> to vector<2x32xf32>
    %cst_514 = arith.constant 2.000000e+00 : f32
    %1161 = vector.broadcast %cst_514 : f32 to vector<2x32xf32>
    %1162 = arith.mulf %1161, %1160 : vector<2x32xf32>
    %cst_515 = arith.constant 1.000000e+00 : f32
    %1163 = vector.broadcast %cst_515 : f32 to vector<2x32xf32>
    %1164 = arith.subf %1162, %1163 : vector<2x32xf32>
    %1165 = vector.extract_strided_slice %1157 {offsets = [0, 96], sizes = [2, 32], strides = [1, 1]} : vector<2x128xf32> to vector<2x32xf32>
    %1166 = arith.mulf %1159, %1118 : vector<2x32xf32>
    %1167 = arith.mulf %1158, %1164 : vector<2x32xf32>
    %1168 = arith.addf %1166, %1167 : vector<2x32xf32>
    %1169 = math.tanh %1168 : vector<2x32xf32>
    %1170 = arith.mulf %1165, %1169 : vector<2x32xf32>
    %1171 = arith.negf %1152 : vector<2x128xf32>
    %1172 = math.exp %1171 : vector<2x128xf32>
    %cst_516 = arith.constant 1.000000e+00 : f32
    %1173 = vector.broadcast %cst_516 : f32 to vector<2x128xf32>
    %1174 = arith.addf %1173, %1172 : vector<2x128xf32>
    %1175 = arith.divf %1173, %1174 : vector<2x128xf32>
    %1176 = vector.extract_strided_slice %1175 {offsets = [0, 0], sizes = [2, 32], strides = [1, 1]} : vector<2x128xf32> to vector<2x32xf32>
    %1177 = vector.extract_strided_slice %1175 {offsets = [0, 32], sizes = [2, 32], strides = [1, 1]} : vector<2x128xf32> to vector<2x32xf32>
    %1178 = vector.extract_strided_slice %1175 {offsets = [0, 64], sizes = [2, 32], strides = [1, 1]} : vector<2x128xf32> to vector<2x32xf32>
    %cst_517 = arith.constant 2.000000e+00 : f32
    %1179 = vector.broadcast %cst_517 : f32 to vector<2x32xf32>
    %1180 = arith.mulf %1179, %1178 : vector<2x32xf32>
    %cst_518 = arith.constant 1.000000e+00 : f32
    %1181 = vector.broadcast %cst_518 : f32 to vector<2x32xf32>
    %1182 = arith.subf %1180, %1181 : vector<2x32xf32>
    %1183 = vector.extract_strided_slice %1175 {offsets = [0, 96], sizes = [2, 32], strides = [1, 1]} : vector<2x128xf32> to vector<2x32xf32>
    %1184 = arith.mulf %1177, %1136 : vector<2x32xf32>
    %1185 = arith.mulf %1176, %1182 : vector<2x32xf32>
    %1186 = arith.addf %1184, %1185 : vector<2x32xf32>
    %1187 = math.tanh %1186 : vector<2x32xf32>
    %1188 = arith.mulf %1183, %1187 : vector<2x32xf32>
    %c0_519 = arith.constant 0 : index
    %c5_520 = arith.constant 5 : index
    %c0_521 = arith.constant 0 : index
    %1189 = vector.load %arg35[%c0_519, %c5_520, %c0_521] : memref<2x8x64xf32, #tpu.memory_space<vmem>>, vector<2x1x32xf32>
    %1190 = vector.shape_cast %1189 : vector<2x1x32xf32> to vector<2x32xf32>
    %1191 = vector.shape_cast %1170 : vector<2x32xf32> to vector<2x1x32xf32>
    tpu.vector_store %arg35[%c0_519, %c5_520, %c0_521], %1191 {strides = array<i32>} : memref<2x8x64xf32, #tpu.memory_space<vmem>>, vector<2x1x32xf32>,
    %c0_522 = arith.constant 0 : index
    %c2_523 = arith.constant 2 : index
    %c32_524 = arith.constant 32 : index
    %1192 = vector.load %arg35[%c0_522, %c2_523, %c32_524] : memref<2x8x64xf32, #tpu.memory_space<vmem>>, vector<2x1x32xf32>
    %1193 = vector.shape_cast %1192 : vector<2x1x32xf32> to vector<2x32xf32>
    %1194 = vector.shape_cast %1188 : vector<2x32xf32> to vector<2x1x32xf32>
    tpu.vector_store %arg35[%c0_522, %c2_523, %c32_524], %1194 {strides = array<i32>} : memref<2x8x64xf32, #tpu.memory_space<vmem>>, vector<2x1x32xf32>,
    %c0_525 = arith.constant 0 : index
    %c6_526 = arith.constant 6 : index
    %c0_527 = arith.constant 0 : index
    %1195 = vector.load %arg36[%c0_525, %c6_526, %c0_527] : memref<2x8x128xf32, #tpu.memory_space<vmem>>, vector<2x1x128xf32>
    %1196 = vector.shape_cast %1195 : vector<2x1x128xf32> to vector<2x128xf32>
    %cst_528 = arith.constant dense<0.000000e+00> : vector<2x128xf32>
    %1197 = tpu.matmul %1170, %876, %cst_528 {dimension_numbers = #tpu.dot_dimension_numbers<[1], [0], [0], [1], [0, 0, 1, 1], [], []>} : vector<2x32xf32>, vector<32x128xf32>, vector<2x128xf32> -> vector<2x128xf32>
    %1198 = arith.addf %1196, %1197 : vector<2x128xf32>
    %c0_529 = arith.constant 0 : index
    %c1_530 = arith.constant 1 : index
    %c0_531 = arith.constant 0 : index
    %1199 = vector.load %arg37[%c0_529, %c1_530, %c0_531] : memref<2x8x128xf32, #tpu.memory_space<vmem>>, vector<2x1x128xf32>
    %1200 = vector.shape_cast %1199 : vector<2x1x128xf32> to vector<2x128xf32>
    %cst_532 = arith.constant dense<0.000000e+00> : vector<2x128xf32>
    %1201 = tpu.matmul %1188, %879, %cst_532 {dimension_numbers = #tpu.dot_dimension_numbers<[1], [0], [0], [1], [0, 0, 1, 1], [], []>} : vector<2x32xf32>, vector<32x128xf32>, vector<2x128xf32> -> vector<2x128xf32>
    %1202 = arith.addf %1200, %1201 : vector<2x128xf32>
    %1203 = arith.negf %1198 : vector<2x128xf32>
    %1204 = math.exp %1203 : vector<2x128xf32>
    %cst_533 = arith.constant 1.000000e+00 : f32
    %1205 = vector.broadcast %cst_533 : f32 to vector<2x128xf32>
    %1206 = arith.addf %1205, %1204 : vector<2x128xf32>
    %1207 = arith.divf %1205, %1206 : vector<2x128xf32>
    %1208 = vector.extract_strided_slice %1207 {offsets = [0, 0], sizes = [2, 32], strides = [1, 1]} : vector<2x128xf32> to vector<2x32xf32>
    %1209 = vector.extract_strided_slice %1207 {offsets = [0, 32], sizes = [2, 32], strides = [1, 1]} : vector<2x128xf32> to vector<2x32xf32>
    %1210 = vector.extract_strided_slice %1207 {offsets = [0, 64], sizes = [2, 32], strides = [1, 1]} : vector<2x128xf32> to vector<2x32xf32>
    %cst_534 = arith.constant 2.000000e+00 : f32
    %1211 = vector.broadcast %cst_534 : f32 to vector<2x32xf32>
    %1212 = arith.mulf %1211, %1210 : vector<2x32xf32>
    %cst_535 = arith.constant 1.000000e+00 : f32
    %1213 = vector.broadcast %cst_535 : f32 to vector<2x32xf32>
    %1214 = arith.subf %1212, %1213 : vector<2x32xf32>
    %1215 = vector.extract_strided_slice %1207 {offsets = [0, 96], sizes = [2, 32], strides = [1, 1]} : vector<2x128xf32> to vector<2x32xf32>
    %1216 = arith.mulf %1209, %1168 : vector<2x32xf32>
    %1217 = arith.mulf %1208, %1214 : vector<2x32xf32>
    %1218 = arith.addf %1216, %1217 : vector<2x32xf32>
    %1219 = math.tanh %1218 : vector<2x32xf32>
    %1220 = arith.mulf %1215, %1219 : vector<2x32xf32>
    %1221 = arith.negf %1202 : vector<2x128xf32>
    %1222 = math.exp %1221 : vector<2x128xf32>
    %cst_536 = arith.constant 1.000000e+00 : f32
    %1223 = vector.broadcast %cst_536 : f32 to vector<2x128xf32>
    %1224 = arith.addf %1223, %1222 : vector<2x128xf32>
    %1225 = arith.divf %1223, %1224 : vector<2x128xf32>
    %1226 = vector.extract_strided_slice %1225 {offsets = [0, 0], sizes = [2, 32], strides = [1, 1]} : vector<2x128xf32> to vector<2x32xf32>
    %1227 = vector.extract_strided_slice %1225 {offsets = [0, 32], sizes = [2, 32], strides = [1, 1]} : vector<2x128xf32> to vector<2x32xf32>
    %1228 = vector.extract_strided_slice %1225 {offsets = [0, 64], sizes = [2, 32], strides = [1, 1]} : vector<2x128xf32> to vector<2x32xf32>
    %cst_537 = arith.constant 2.000000e+00 : f32
    %1229 = vector.broadcast %cst_537 : f32 to vector<2x32xf32>
    %1230 = arith.mulf %1229, %1228 : vector<2x32xf32>
    %cst_538 = arith.constant 1.000000e+00 : f32
    %1231 = vector.broadcast %cst_538 : f32 to vector<2x32xf32>
    %1232 = arith.subf %1230, %1231 : vector<2x32xf32>
    %1233 = vector.extract_strided_slice %1225 {offsets = [0, 96], sizes = [2, 32], strides = [1, 1]} : vector<2x128xf32> to vector<2x32xf32>
    %1234 = arith.mulf %1227, %1186 : vector<2x32xf32>
    %1235 = arith.mulf %1226, %1232 : vector<2x32xf32>
    %1236 = arith.addf %1234, %1235 : vector<2x32xf32>
    %1237 = math.tanh %1236 : vector<2x32xf32>
    %1238 = arith.mulf %1233, %1237 : vector<2x32xf32>
    %c0_539 = arith.constant 0 : index
    %c6_540 = arith.constant 6 : index
    %c0_541 = arith.constant 0 : index
    %1239 = vector.load %arg35[%c0_539, %c6_540, %c0_541] : memref<2x8x64xf32, #tpu.memory_space<vmem>>, vector<2x1x32xf32>
    %1240 = vector.shape_cast %1239 : vector<2x1x32xf32> to vector<2x32xf32>
    %1241 = vector.shape_cast %1220 : vector<2x32xf32> to vector<2x1x32xf32>
    tpu.vector_store %arg35[%c0_539, %c6_540, %c0_541], %1241 {strides = array<i32>} : memref<2x8x64xf32, #tpu.memory_space<vmem>>, vector<2x1x32xf32>,
    %c0_542 = arith.constant 0 : index
    %c1_543 = arith.constant 1 : index
    %c32_544 = arith.constant 32 : index
    %1242 = vector.load %arg35[%c0_542, %c1_543, %c32_544] : memref<2x8x64xf32, #tpu.memory_space<vmem>>, vector<2x1x32xf32>
    %1243 = vector.shape_cast %1242 : vector<2x1x32xf32> to vector<2x32xf32>
    %1244 = vector.shape_cast %1238 : vector<2x32xf32> to vector<2x1x32xf32>
    tpu.vector_store %arg35[%c0_542, %c1_543, %c32_544], %1244 {strides = array<i32>} : memref<2x8x64xf32, #tpu.memory_space<vmem>>, vector<2x1x32xf32>,
    %c0_545 = arith.constant 0 : index
    %c7_546 = arith.constant 7 : index
    %c0_547 = arith.constant 0 : index
    %1245 = vector.load %arg36[%c0_545, %c7_546, %c0_547] : memref<2x8x128xf32, #tpu.memory_space<vmem>>, vector<2x1x128xf32>
    %1246 = vector.shape_cast %1245 : vector<2x1x128xf32> to vector<2x128xf32>
    %cst_548 = arith.constant dense<0.000000e+00> : vector<2x128xf32>
    %1247 = tpu.matmul %1220, %876, %cst_548 {dimension_numbers = #tpu.dot_dimension_numbers<[1], [0], [0], [1], [0, 0, 1, 1], [], []>} : vector<2x32xf32>, vector<32x128xf32>, vector<2x128xf32> -> vector<2x128xf32>
    %1248 = arith.addf %1246, %1247 : vector<2x128xf32>
    %c0_549 = arith.constant 0 : index
    %c0_550 = arith.constant 0 : index
    %c0_551 = arith.constant 0 : index
    %1249 = vector.load %arg37[%c0_549, %c0_550, %c0_551] : memref<2x8x128xf32, #tpu.memory_space<vmem>>, vector<2x1x128xf32>
    %1250 = vector.shape_cast %1249 : vector<2x1x128xf32> to vector<2x128xf32>
    %cst_552 = arith.constant dense<0.000000e+00> : vector<2x128xf32>
    %1251 = tpu.matmul %1238, %879, %cst_552 {dimension_numbers = #tpu.dot_dimension_numbers<[1], [0], [0], [1], [0, 0, 1, 1], [], []>} : vector<2x32xf32>, vector<32x128xf32>, vector<2x128xf32> -> vector<2x128xf32>
    %1252 = arith.addf %1250, %1251 : vector<2x128xf32>
    %1253 = arith.negf %1248 : vector<2x128xf32>
    %1254 = math.exp %1253 : vector<2x128xf32>
    %cst_553 = arith.constant 1.000000e+00 : f32
    %1255 = vector.broadcast %cst_553 : f32 to vector<2x128xf32>
    %1256 = arith.addf %1255, %1254 : vector<2x128xf32>
    %1257 = arith.divf %1255, %1256 : vector<2x128xf32>
    %1258 = vector.extract_strided_slice %1257 {offsets = [0, 0], sizes = [2, 32], strides = [1, 1]} : vector<2x128xf32> to vector<2x32xf32>
    %1259 = vector.extract_strided_slice %1257 {offsets = [0, 32], sizes = [2, 32], strides = [1, 1]} : vector<2x128xf32> to vector<2x32xf32>
    %1260 = vector.extract_strided_slice %1257 {offsets = [0, 64], sizes = [2, 32], strides = [1, 1]} : vector<2x128xf32> to vector<2x32xf32>
    %cst_554 = arith.constant 2.000000e+00 : f32
    %1261 = vector.broadcast %cst_554 : f32 to vector<2x32xf32>
    %1262 = arith.mulf %1261, %1260 : vector<2x32xf32>
    %cst_555 = arith.constant 1.000000e+00 : f32
    %1263 = vector.broadcast %cst_555 : f32 to vector<2x32xf32>
    %1264 = arith.subf %1262, %1263 : vector<2x32xf32>
    %1265 = vector.extract_strided_slice %1257 {offsets = [0, 96], sizes = [2, 32], strides = [1, 1]} : vector<2x128xf32> to vector<2x32xf32>
    %1266 = arith.mulf %1259, %1218 : vector<2x32xf32>
    %1267 = arith.mulf %1258, %1264 : vector<2x32xf32>
    %1268 = arith.addf %1266, %1267 : vector<2x32xf32>
    %1269 = math.tanh %1268 : vector<2x32xf32>
    %1270 = arith.mulf %1265, %1269 : vector<2x32xf32>
    %1271 = arith.negf %1252 : vector<2x128xf32>
    %1272 = math.exp %1271 : vector<2x128xf32>
    %cst_556 = arith.constant 1.000000e+00 : f32
    %1273 = vector.broadcast %cst_556 : f32 to vector<2x128xf32>
    %1274 = arith.addf %1273, %1272 : vector<2x128xf32>
    %1275 = arith.divf %1273, %1274 : vector<2x128xf32>
    %1276 = vector.extract_strided_slice %1275 {offsets = [0, 0], sizes = [2, 32], strides = [1, 1]} : vector<2x128xf32> to vector<2x32xf32>
    %1277 = vector.extract_strided_slice %1275 {offsets = [0, 32], sizes = [2, 32], strides = [1, 1]} : vector<2x128xf32> to vector<2x32xf32>
    %1278 = vector.extract_strided_slice %1275 {offsets = [0, 64], sizes = [2, 32], strides = [1, 1]} : vector<2x128xf32> to vector<2x32xf32>
    %cst_557 = arith.constant 2.000000e+00 : f32
    %1279 = vector.broadcast %cst_557 : f32 to vector<2x32xf32>
    %1280 = arith.mulf %1279, %1278 : vector<2x32xf32>
    %cst_558 = arith.constant 1.000000e+00 : f32
    %1281 = vector.broadcast %cst_558 : f32 to vector<2x32xf32>
    %1282 = arith.subf %1280, %1281 : vector<2x32xf32>
    %1283 = vector.extract_strided_slice %1275 {offsets = [0, 96], sizes = [2, 32], strides = [1, 1]} : vector<2x128xf32> to vector<2x32xf32>
    %1284 = arith.mulf %1277, %1236 : vector<2x32xf32>
    %1285 = arith.mulf %1276, %1282 : vector<2x32xf32>
    %1286 = arith.addf %1284, %1285 : vector<2x32xf32>
    %1287 = math.tanh %1286 : vector<2x32xf32>
    %1288 = arith.mulf %1283, %1287 : vector<2x32xf32>
    %c0_559 = arith.constant 0 : index
    %c7_560 = arith.constant 7 : index
    %c0_561 = arith.constant 0 : index
    %1289 = vector.load %arg35[%c0_559, %c7_560, %c0_561] : memref<2x8x64xf32, #tpu.memory_space<vmem>>, vector<2x1x32xf32>
    %1290 = vector.shape_cast %1289 : vector<2x1x32xf32> to vector<2x32xf32>
    %1291 = vector.shape_cast %1270 : vector<2x32xf32> to vector<2x1x32xf32>
    tpu.vector_store %arg35[%c0_559, %c7_560, %c0_561], %1291 {strides = array<i32>} : memref<2x8x64xf32, #tpu.memory_space<vmem>>, vector<2x1x32xf32>,
    %c0_562 = arith.constant 0 : index
    %c0_563 = arith.constant 0 : index
    %c32_564 = arith.constant 32 : index
    %1292 = vector.load %arg35[%c0_562, %c0_563, %c32_564] : memref<2x8x64xf32, #tpu.memory_space<vmem>>, vector<2x1x32xf32>
    %1293 = vector.shape_cast %1292 : vector<2x1x32xf32> to vector<2x32xf32>
    %1294 = vector.shape_cast %1288 : vector<2x32xf32> to vector<2x1x32xf32>
    tpu.vector_store %arg35[%c0_562, %c0_563, %c32_564], %1294 {strides = array<i32>} : memref<2x8x64xf32, #tpu.memory_space<vmem>>, vector<2x1x32xf32>,
    %c0_565 = arith.constant 0 : index
    %c0_566 = arith.constant 0 : index
    %c0_567 = arith.constant 0 : index
    %1295 = vector.load %arg35[%c0_565, %c0_566, %c0_567] : memref<2x8x64xf32, #tpu.memory_space<vmem>>, vector<2x8x64xf32>
    %1296 = vector.shape_cast %1295 : vector<2x8x64xf32> to vector<16x64xf32>
    %c0_568 = arith.constant 0 : index
    %c0_569 = arith.constant 0 : index
    %1297 = vector.load %arg23[%c0_568, %c0_569] : memref<64x128xf32, #tpu.memory_space<vmem>>, vector<64x128xf32>
    %cst_570 = arith.constant dense<0.000000e+00> : vector<16x128xf32>
    %1298 = tpu.matmul %1296, %1297, %cst_570 {dimension_numbers = #tpu.dot_dimension_numbers<[1], [0], [0], [1], [0, 0, 1, 1], [], []>} : vector<16x64xf32>, vector<64x128xf32>, vector<16x128xf32> -> vector<16x128xf32>
    %c0_571 = arith.constant 0 : index
    %c0_572 = arith.constant 0 : index
    %1299 = vector.load %arg24[%c0_571, %c0_572] : memref<1x128xf32, #tpu.memory_space<vmem>>, vector<1x128xf32>
    %1300 = vector.broadcast %1299 : vector<1x128xf32> to vector<16x128xf32>
    %1301 = arith.addf %1298, %1300 : vector<16x128xf32>
    %c0_573 = arith.constant 0 : index
    %c0_574 = arith.constant 0 : index
    %1302 = vector.load %arg27[%c0_573, %c0_574] : memref<16x128xf32, #tpu.memory_space<vmem>>, vector<16x128xf32>
    tpu.vector_store %arg27[%c0_573, %c0_574], %1301 {strides = array<i32>} : memref<16x128xf32, #tpu.memory_space<vmem>>, vector<16x128xf32>,
    %c0_575 = arith.constant 0 : index
    %c0_576 = arith.constant 0 : index
    %1303 = vector.load %arg25[%c0_575, %c0_576] : memref<64x128xf32, #tpu.memory_space<vmem>>, vector<64x128xf32>
    %cst_577 = arith.constant dense<0.000000e+00> : vector<16x128xf32>
    %1304 = tpu.matmul %452, %1303, %cst_577 {dimension_numbers = #tpu.dot_dimension_numbers<[1], [0], [0], [1], [0, 0, 1, 1], [], []>} : vector<16x64xf32>, vector<64x128xf32>, vector<16x128xf32> -> vector<16x128xf32>
    %c0_578 = arith.constant 0 : index
    %c0_579 = arith.constant 0 : index
    %1305 = vector.load %arg26[%c0_578, %c0_579] : memref<1x128xf32, #tpu.memory_space<vmem>>, vector<1x128xf32>
    %1306 = vector.broadcast %1305 : vector<1x128xf32> to vector<16x128xf32>
    %1307 = arith.addf %1304, %1306 : vector<16x128xf32>
    %1308 = math.tanh %1307 : vector<16x128xf32>
    %1309 = arith.mulf %1308, %1308 : vector<16x128xf32>
    %cst_580 = arith.constant dense<0.000000e+00> : vector<16xf32>
    %1310 = vector.multi_reduction <add>, %1309, %cst_580 [1] : vector<16x128xf32> to vector<16xf32>
    %1311 = vector.shape_cast %1310 : vector<16xf32> to vector<16x1xf32>
    %cst_581 = arith.constant 1.000000e-24 : f32
    %1312 = vector.broadcast %cst_581 : f32 to vector<16x1xf32>
    %1313 = arith.maximumf %1311, %1312 : vector<16x1xf32>
    %1314 = math.rsqrt %1313 : vector<16x1xf32>
    %1315 = vector.broadcast %1314 : vector<16x1xf32> to vector<16x128xf32>
    %1316 = arith.mulf %1308, %1315 : vector<16x128xf32>
    %c0_582 = arith.constant 0 : index
    %c0_583 = arith.constant 0 : index
    %1317 = vector.load %arg28[%c0_582, %c0_583] : memref<16x128xf32, #tpu.memory_space<vmem>>, vector<16x128xf32>
    tpu.vector_store %arg28[%c0_582, %c0_583], %1316 {strides = array<i32>} : memref<16x128xf32, #tpu.memory_space<vmem>>, vector<16x128xf32>,
    %c0_584 = arith.constant 0 : index
    %c0_585 = arith.constant 0 : index
    %c0_586 = arith.constant 0 : index
    %1318 = vector.load %arg31[%c0_584, %c0_585, %c0_586] : memref<2x2x32xf32, #tpu.memory_space<vmem>>, vector<1x2x32xf32>
    %1319 = vector.shape_cast %1318 : vector<1x2x32xf32> to vector<2x32xf32>
    %1320 = vector.shape_cast %426 : vector<2x32xf32> to vector<1x2x32xf32>
    tpu.vector_store %arg31[%c0_584, %c0_585, %c0_586], %1320 {strides = array<i32>} : memref<2x2x32xf32, #tpu.memory_space<vmem>>, vector<1x2x32xf32>,
    %c1_587 = arith.constant 1 : index
    %c0_588 = arith.constant 0 : index
    %c0_589 = arith.constant 0 : index
    %1321 = vector.load %arg31[%c1_587, %c0_588, %c0_589] : memref<2x2x32xf32, #tpu.memory_space<vmem>>, vector<1x2x32xf32>
    %1322 = vector.shape_cast %1321 : vector<1x2x32xf32> to vector<2x32xf32>
    %1323 = vector.shape_cast %444 : vector<2x32xf32> to vector<1x2x32xf32>
    tpu.vector_store %arg31[%c1_587, %c0_588, %c0_589], %1323 {strides = array<i32>} : memref<2x2x32xf32, #tpu.memory_space<vmem>>, vector<1x2x32xf32>,
    %c0_590 = arith.constant 0 : index
    %c0_591 = arith.constant 0 : index
    %c0_592 = arith.constant 0 : index
    %1324 = vector.load %arg32[%c0_590, %c0_591, %c0_592] : memref<2x2x32xf32, #tpu.memory_space<vmem>>, vector<1x2x32xf32>
    %1325 = vector.shape_cast %1324 : vector<1x2x32xf32> to vector<2x32xf32>
    %1326 = vector.shape_cast %424 : vector<2x32xf32> to vector<1x2x32xf32>
    tpu.vector_store %arg32[%c0_590, %c0_591, %c0_592], %1326 {strides = array<i32>} : memref<2x2x32xf32, #tpu.memory_space<vmem>>, vector<1x2x32xf32>,
    %c1_593 = arith.constant 1 : index
    %c0_594 = arith.constant 0 : index
    %c0_595 = arith.constant 0 : index
    %1327 = vector.load %arg32[%c1_593, %c0_594, %c0_595] : memref<2x2x32xf32, #tpu.memory_space<vmem>>, vector<1x2x32xf32>
    %1328 = vector.shape_cast %1327 : vector<1x2x32xf32> to vector<2x32xf32>
    %1329 = vector.shape_cast %442 : vector<2x32xf32> to vector<1x2x32xf32>
    tpu.vector_store %arg32[%c1_593, %c0_594, %c0_595], %1329 {strides = array<i32>} : memref<2x2x32xf32, #tpu.memory_space<vmem>>, vector<1x2x32xf32>,
    %c0_596 = arith.constant 0 : index
    %c0_597 = arith.constant 0 : index
    %c0_598 = arith.constant 0 : index
    %1330 = vector.load %arg29[%c0_596, %c0_597, %c0_598] : memref<4x2x32xf32, #tpu.memory_space<vmem>>, vector<1x2x32xf32>
    %1331 = vector.shape_cast %1330 : vector<1x2x32xf32> to vector<2x32xf32>
    %1332 = vector.shape_cast %848 : vector<2x32xf32> to vector<1x2x32xf32>
    tpu.vector_store %arg29[%c0_596, %c0_597, %c0_598], %1332 {strides = array<i32>} : memref<4x2x32xf32, #tpu.memory_space<vmem>>, vector<1x2x32xf32>,
    %c1_599 = arith.constant 1 : index
    %c0_600 = arith.constant 0 : index
    %c0_601 = arith.constant 0 : index
    %1333 = vector.load %arg29[%c1_599, %c0_600, %c0_601] : memref<4x2x32xf32, #tpu.memory_space<vmem>>, vector<1x2x32xf32>
    %1334 = vector.shape_cast %1333 : vector<1x2x32xf32> to vector<2x32xf32>
    %1335 = vector.shape_cast %866 : vector<2x32xf32> to vector<1x2x32xf32>
    tpu.vector_store %arg29[%c1_599, %c0_600, %c0_601], %1335 {strides = array<i32>} : memref<4x2x32xf32, #tpu.memory_space<vmem>>, vector<1x2x32xf32>,
    %c0_602 = arith.constant 0 : index
    %c0_603 = arith.constant 0 : index
    %c0_604 = arith.constant 0 : index
    %1336 = vector.load %arg30[%c0_602, %c0_603, %c0_604] : memref<4x2x32xf32, #tpu.memory_space<vmem>>, vector<1x2x32xf32>
    %1337 = vector.shape_cast %1336 : vector<1x2x32xf32> to vector<2x32xf32>
    %1338 = vector.shape_cast %846 : vector<2x32xf32> to vector<1x2x32xf32>
    tpu.vector_store %arg30[%c0_602, %c0_603, %c0_604], %1338 {strides = array<i32>} : memref<4x2x32xf32, #tpu.memory_space<vmem>>, vector<1x2x32xf32>,
    %c1_605 = arith.constant 1 : index
    %c0_606 = arith.constant 0 : index
    %c0_607 = arith.constant 0 : index
    %1339 = vector.load %arg30[%c1_605, %c0_606, %c0_607] : memref<4x2x32xf32, #tpu.memory_space<vmem>>, vector<1x2x32xf32>
    %1340 = vector.shape_cast %1339 : vector<1x2x32xf32> to vector<2x32xf32>
    %1341 = vector.shape_cast %864 : vector<2x32xf32> to vector<1x2x32xf32>
    tpu.vector_store %arg30[%c1_605, %c0_606, %c0_607], %1341 {strides = array<i32>} : memref<4x2x32xf32, #tpu.memory_space<vmem>>, vector<1x2x32xf32>,
    %c2_608 = arith.constant 2 : index
    %c0_609 = arith.constant 0 : index
    %c0_610 = arith.constant 0 : index
    %1342 = vector.load %arg29[%c2_608, %c0_609, %c0_610] : memref<4x2x32xf32, #tpu.memory_space<vmem>>, vector<1x2x32xf32>
    %1343 = vector.shape_cast %1342 : vector<1x2x32xf32> to vector<2x32xf32>
    %1344 = vector.shape_cast %1270 : vector<2x32xf32> to vector<1x2x32xf32>
    tpu.vector_store %arg29[%c2_608, %c0_609, %c0_610], %1344 {strides = array<i32>} : memref<4x2x32xf32, #tpu.memory_space<vmem>>, vector<1x2x32xf32>,
    %c3_611 = arith.constant 3 : index
    %c0_612 = arith.constant 0 : index
    %c0_613 = arith.constant 0 : index
    %1345 = vector.load %arg29[%c3_611, %c0_612, %c0_613] : memref<4x2x32xf32, #tpu.memory_space<vmem>>, vector<1x2x32xf32>
    %1346 = vector.shape_cast %1345 : vector<1x2x32xf32> to vector<2x32xf32>
    %1347 = vector.shape_cast %1288 : vector<2x32xf32> to vector<1x2x32xf32>
    tpu.vector_store %arg29[%c3_611, %c0_612, %c0_613], %1347 {strides = array<i32>} : memref<4x2x32xf32, #tpu.memory_space<vmem>>, vector<1x2x32xf32>,
    %c2_614 = arith.constant 2 : index
    %c0_615 = arith.constant 0 : index
    %c0_616 = arith.constant 0 : index
    %1348 = vector.load %arg30[%c2_614, %c0_615, %c0_616] : memref<4x2x32xf32, #tpu.memory_space<vmem>>, vector<1x2x32xf32>
    %1349 = vector.shape_cast %1348 : vector<1x2x32xf32> to vector<2x32xf32>
    %1350 = vector.shape_cast %1268 : vector<2x32xf32> to vector<1x2x32xf32>
    tpu.vector_store %arg30[%c2_614, %c0_615, %c0_616], %1350 {strides = array<i32>} : memref<4x2x32xf32, #tpu.memory_space<vmem>>, vector<1x2x32xf32>,
    %c3_617 = arith.constant 3 : index
    %c0_618 = arith.constant 0 : index
    %c0_619 = arith.constant 0 : index
    %1351 = vector.load %arg30[%c3_617, %c0_618, %c0_619] : memref<4x2x32xf32, #tpu.memory_space<vmem>>, vector<1x2x32xf32>
    %1352 = vector.shape_cast %1351 : vector<1x2x32xf32> to vector<2x32xf32>
    %1353 = vector.shape_cast %1286 : vector<2x32xf32> to vector<1x2x32xf32>
    tpu.vector_store %arg30[%c3_617, %c0_618, %c0_619], %1353 {strides = array<i32>} : memref<4x2x32xf32, #tpu.memory_space<vmem>>, vector<1x2x32xf32>,
    return
  }
}

</mosaic_0001>

<bundles_post_ra>
// kernel: blstm_eend_forward.1
= control target key start
LH: loop header
LB: loop body
LE: loop exit
PB: predicated region body
PF: predicated region fallthrough
CT: control target
= control target key end

     0   :  { %s10923_s6 = smov 1   ;;  %s10924_s10 = smov 2   ;;  %s13305_s0 = inlined_call_operand.smem [shape: u32[33], index: -1, kind: input, shape index: {}] }
   0x1   :  { %s10996_s5 = sld [smem:[%s13305_s0]]   ;;  %s10925_s14 = smov 3  }
   0x2   :  { %s11001_s9 = sld [smem:[%s13305_s0 + %s10923_s6]]   ;;  %s10926_s18 = smov 4  }
   0x3   :  { %s11006_s13 = sld [smem:[%s13305_s0 + %s10924_s10]]   ;;  %s10927_s22 = smov 5  }
   0x4   :  { %s11011_s17 = sld [smem:[%s13305_s0 + %s10925_s14]]   ;;  %s10928_s26 = smov 6  }
   0x5   :  { %s11016_s21 = sld [smem:[%s13305_s0 + %s10926_s18]]   ;;  %s10929_s30 = smov 7  }
   0x6   :  { %s11021_s25 = sld [smem:[%s13305_s0 + %s10927_s22]]   ;;  %s10930_s4 = smov 8  }
   0x7   :  { %s11026_s29 = sld [smem:[%s13305_s0 + %s10928_s26]]   ;;  %s10931_s10 = smov 9  }
   0x8   :  { %13312 = sst [smem:[#allocation60_spill]] %s11001_s9  ;;  %s10932_s15 = smov 10  }
   0x9   :  { %s11031_s3 = sld [smem:[%s13305_s0 + %s10929_s30]]   ;;  %s10933_s20 = smov 11  }
   0xa   :  { %s11036_s8 = sld [smem:[%s13305_s0 + %s10930_s4]]   ;;  %s10934_s26 = smov 12  }
   0xb   :  { %s11041_s14 = sld [smem:[%s13305_s0 + %s10931_s10]]   ;;  %s10935_s1 = smov 13  }
   0xc   :  { %s11046_s19 = sld [smem:[%s13305_s0 + %s10932_s15]]   ;;  %s10936_s7 = smov 14  }
   0xd   :  { %s11051_s24 = sld [smem:[%s13305_s0 + %s10933_s20]]   ;;  %s10937_s15 = smov 15  }
   0xe   :  { %s11056_s30 = sld [smem:[%s13305_s0 + %s10934_s26]]   ;;  %s10938_s22 = smov 16  }
   0xf   :  { %s11061_s6 = sld [smem:[%s13305_s0 + %s10935_s1]]   ;;  %s10939_s28 = smov 17  }
  0x10   :  { %s11066_s12 = sld [smem:[%s13305_s0 + %s10936_s7]]   ;;  %s10940_s7 = smov 18  }
  0x11   :  { %13313 = sst [smem:[#allocation61_spill]] %s11041_s14 }
  0x12   :  { %s11071_s20 = sld [smem:[%s13305_s0 + %s10937_s15]]   ;;  %s10941_s15 = smov 19  }
  0x13   :  { %13314 = sst [smem:[#allocation62_spill]] %s11051_s24 }
  0x14   :  { %13315 = sst [smem:[#allocation63_spill]] %s11056_s30 }
  0x15   :  { %s11076_s27 = sld [smem:[%s13305_s0 + %s10938_s22]]   ;;  %s10942_s22 = smov 20  }
  0x16   :  { %13316 = sst [smem:[#allocation64_spill]] %s11066_s12 }
  0x17   :  { %s11081_s4 = sld [smem:[%s13305_s0 + %s10939_s28]]   ;;  %s10943_s28 = smov 21  }
  0x18   :  { %13317 = sst [smem:[#allocation65_spill]] %s11071_s20 }
  0x19   :  { %s11086_s12 = sld [smem:[%s13305_s0 + %s10940_s7]]   ;;  %s10944_s7 = smov 22  }
  0x1a   :  { %s11091_s24 = sld [smem:[%s13305_s0 + %s10941_s15]]   ;;  %s10945_s15 = smov 23  }
  0x1b   :  { %s11096_s9 = sld [smem:[%s13305_s0 + %s10942_s22]]   ;;  %s10946_s22 = smov 24  }
  0x1c   :  { %s11116_s20 = sld [smem:[%s13305_s0 + %s10946_s22]]   ;;  %s10950_s22 = smov 28  }
  0x1d   :  { %13318 = sst [smem:[#allocation66_spill]] %s11081_s4 }
  0x1e   :  { %s11101_s4 = sld [smem:[%s13305_s0 + %s10943_s28]]   ;;  %s10947_s28 = smov 25  }
  0x1f   :  { %13319 = sst [smem:[#allocation67_spill]] %s11086_s12 }
  0x20   :  { %13320 = sst [smem:[#allocation68_spill]] %s11091_s24 }
  0x21   :  { %s11106_s12 = sld [smem:[%s13305_s0 + %s10944_s7]]   ;;  %s10948_s7 = smov 26  }
  0x22   :  { %s11111_s24 = sld [smem:[%s13305_s0 + %s10945_s15]]   ;;  %s10949_s15 = smov 27  }
  0x23   :  { %13323 = sst [smem:[#allocation71_spill]] %s11116_s20 }
  0x24   :  { %13321 = sst [smem:[#allocation69_spill]] %s11101_s4 }
  0x25   :  { %s11121_s4 = sld [smem:[%s13305_s0 + %s10947_s28]]   ;;  %s10951_s28 = smov 29  }
  0x26   :  { %s11131_s30 = sld [smem:[%s13305_s0 + %s10949_s15]]   ;;  %s10953_s15 = smov 31  }
  0x27   :  { %13322 = sst [smem:[#allocation70_spill]] %s11106_s12 }
  0x28   :  { %s11126_s12 = sld [smem:[%s13305_s0 + %s10948_s7]]   ;;  %s10952_s7 = smov 30  }
  0x29   :  { %s11136_s20 = sld [smem:[%s13305_s0 + %s10950_s22]]   ;;  %s10954_s22 = smov 32  }
  0x2a   :  { %s11141_s14 = sld [smem:[%s13305_s0 + %s10951_s28]]  }
  0x2c   :  { %13325 = sst [smem:[#allocation73_spill]] %s11131_s30 }
  0x2d   :  { %s11151_s30 = sld [smem:[%s13305_s0 + %s10953_s15]]  }
  0x2e   :  { %13324 = sst [smem:[#allocation72_spill]] %s11126_s12 }
  0x2f   :  { %13326 = sst [smem:[#allocation74_spill]] %s11136_s20 }
  0x30   :  { %s11146_s12 = sld [smem:[%s13305_s0 + %s10952_s7]]  }
  0x31   :  { %s11156_s20 = sld [smem:[%s13305_s0 + %s10954_s22]]  }
  0x32   :  { %71 = vsyncpa [#allocation8], 0 }
  0x33   :  { %72 = vsyncpa [#allocation11], 0 }
  0x34   :  { %73 = vsyncpa [#allocation14], 0 }
  0x35   :  { %74 = vsyncpa [#allocation17], 0 }
  0x36   :  { %75 = vsyncpa [#allocation20], 0 }
  0x37   :  { %76 = vsyncpa [#allocation23], 0 }
  0x38   :  { %77 = vsyncpa [#allocation26], 0 }
  0x39   :  { %78 = vsyncpa [#allocation29], 0 }
  0x3a   :  { %79 = vsyncpa [#allocation32], 0 }
  0x3b   :  { %80 = vsyncpa [#allocation35], 0 }
  0x3c   :  { %81 = vsyncpa [#allocation38], 0 }
  0x3d   :  { %82 = vsyncpa [#allocation9], 0 }
  0x3e   :  { %83 = vsyncpa [#allocation42], 0 }
  0x3f   :  { %84 = vsyncpa [#allocation45], 0  ;;  %s10955_s28 = smov [#allocation10]   ;;  %s10956_s2 = smov [#allocation13]  }
  0x40   :  { %s105_s1 = sshll.u32 %s10955_s28, 4  ;;  %s125_s7 = sshll.u32 %s10956_s2, 4  ;;  %s106_s1 = int_to_ptr.vmem [resolvable:$true] %s105_s1  ;;  %s126_s7 = int_to_ptr.vmem [resolvable:$true] %s125_s7 }
  0x41   :  { %s10403_s0 = scalar_lea.vmem %s106_s1, 16  ;;  %s10407_s10 = scalar_lea.vmem %s106_s1, 32 }
  0x42   :  { %p10404_p0 = scmp.ne.s32.totalorder %s106_s1, %s10403_s0  ;;  %p10408_p1 = scmp.lt.s32.totalorder %s106_s1, %s106_s1 }
  0x43   :  { %p10409_p2 = scmp.lt.s32.totalorder %s10407_s10, %s10403_s0 }
  0x45   :  { %p10410_p3 = por %p10409_p2, %p10408_p1 }
  0x47   :  { %p10411_p4 = pnand %p10410_p3, %p10404_p0 }
  0x49   :  { %10414 = shalt.err (!%p10411_p4)
}
  0x4a   :  { %108 = dma.hbm_to_vmem [thread:$0]  %s11006_s13, 16, %s106_s1, [#allocation11]  }
  0x4b   :  { %s10423_s11 = scalar_lea.vmem %s126_s7, 16  ;;  %s10427_s15 = scalar_lea.vmem %s126_s7, 32 }
  0x4c   :  { %p10424_p5 = scmp.ne.s32.totalorder %s126_s7, %s10423_s11  ;;  %p10428_p6 = scmp.lt.s32.totalorder %s126_s7, %s126_s7 }
  0x4d   :  { %p10429_p7 = scmp.lt.s32.totalorder %s10427_s15, %s10423_s11 }
  0x4f   :  { %p10430_p8 = por %p10429_p7, %p10428_p6 }
  0x51   :  { %p10431_p9 = pnand %p10430_p8, %p10424_p5 }
  0x53   :  { %10434 = shalt.err (!%p10431_p9)
}
  0x54   :  { %128 = dma.hbm_to_vmem [thread:$0]  %s11016_s21, 16, %s126_s7, [#allocation14]  }
  0x55   :  { %s10957_s16 = smov [#allocation16]   ;;  %s10958_s22 = smov [#allocation19]  }
  0x56   :  { %s146_s18 = sshll.u32 %s10957_s16, 4  ;;  %s168_s23 = sshll.u32 %s10958_s22, 4  ;;  %s147_s18 = int_to_ptr.vmem [resolvable:$true] %s146_s18  ;;  %s169_s23 = int_to_ptr.vmem [resolvable:$true] %s168_s23 }
  0x57   :  { %s10443_s26 = scalar_lea.vmem %s147_s18, 512  ;;  %p10448_p11 = scmp.lt.s32.totalorder %s147_s18, %s147_s18 }
  0x58   :  { %p10444_p10 = scmp.ne.s32.totalorder %s147_s18, %s10443_s26  ;;  %p10449_p12 = scmp.lt.s32.totalorder %s10443_s26, %s10443_s26 }
  0x5a   :  { %p10450_p13 = por %p10449_p12, %p10448_p11 }
  0x5c   :  { %p10451_p0 = pnand %p10450_p13, %p10444_p10 }
  0x5e   :  { %10454 = shalt.err (!%p10451_p0)
}
  0x5f   :  { %s10959_s13 = smov 128   ;;  %s10960_s28 = smov 8  }
  0x60   :  { %152 = dma.hbm_to_vmem [thread:$0]  %s11026_s29, 512, %s147_s18, [#allocation17], %s10959_s13, %s10959_s13, %s10960_s28  }
  0x61   :  { %s10463_s21 = scalar_lea.vmem %s169_s23, 512  ;;  %p10468_p2 = scmp.lt.s32.totalorder %s169_s23, %s169_s23 }
  0x62   :  { %p10464_p1 = scmp.ne.s32.totalorder %s169_s23, %s10463_s21  ;;  %p10469_p3 = scmp.lt.s32.totalorder %s10463_s21, %s10463_s21 }
  0x64   :  { %p10470_p4 = por %p10469_p3, %p10468_p2 }
  0x66   :  { %p10471_p5 = pnand %p10470_p4, %p10464_p1 }
  0x68   :  { %10474 = shalt.err (!%p10471_p5)
}
  0x69   :  { %174 = dma.hbm_to_vmem [thread:$0]  %s11036_s8, 512, %s169_s23, [#allocation20], %s10959_s13, %s10959_s13, %s10960_s28  }
  0x6a   :  { %s10961_s1 = smov [#allocation22]   ;;  %s10962_s7 = smov [#allocation25]  }
  0x6b   :  { %s193_s2 = sshll.u32 %s10961_s1, 4  ;;  %s217_s0 = sshll.u32 %s10962_s7, 4  ;;  %s194_s2 = int_to_ptr.vmem [resolvable:$true] %s193_s2  ;;  %s218_s0 = int_to_ptr.vmem [resolvable:$true] %s217_s0 }
  0x6c   :  { %s10483_s10 = scalar_lea.vmem %s194_s2, 16  ;;  %s10487_s29 = scalar_lea.vmem %s194_s2, 32 }
  0x6d   :  { %p10484_p6 = scmp.ne.s32.totalorder %s194_s2, %s10483_s10  ;;  %p10488_p7 = scmp.lt.s32.totalorder %s194_s2, %s194_s2 }
  0x6e   :  { %p10489_p8 = scmp.lt.s32.totalorder %s10487_s29, %s10483_s10 }
  0x70   :  { %p10490_p9 = por %p10489_p8, %p10488_p7 }
  0x72   :  { %p10491_p10 = pnand %p10490_p9, %p10484_p6 }
  0x74   :  { %10494 = shalt.err (!%p10491_p10)
}
  0x75   :  { %196 = dma.hbm_to_vmem [thread:$0]  %s11046_s19, 16, %s194_s2, [#allocation23]  }
  0x76   :  { %s10503_s11 = scalar_lea.vmem %s218_s0, 16  ;;  %s10507_s15 = scalar_lea.vmem %s218_s0, 32 }
  0x77   :  { %p10504_p11 = scmp.ne.s32.totalorder %s218_s0, %s10503_s11  ;;  %p10508_p12 = scmp.lt.s32.totalorder %s218_s0, %s218_s0 }
  0x78   :  { %p10509_p13 = scmp.lt.s32.totalorder %s10507_s15, %s10503_s11 }
  0x7a   :  { %p10510_p0 = por %p10509_p13, %p10508_p12 }
  0x7c   :  { %p10511_p1 = pnand %p10510_p0, %p10504_p11 }
  0x7e   :  { %10514 = shalt.err (!%p10511_p1)
}
  0x7f   :  { %220 = dma.hbm_to_vmem [thread:$0]  %s11061_s6, 16, %s218_s0, [#allocation26]  }
  0x80   :  { %s10963_s8 = smov [#allocation28]   ;;  %s10964_s18 = smov [#allocation31]  }
  0x81   :  { %s241_s16 = sshll.u32 %s10963_s8, 4  ;;  %s266_s22 = sshll.u32 %s10964_s18, 4  ;;  %s242_s16 = int_to_ptr.vmem [resolvable:$true] %s241_s16  ;;  %s267_s22 = int_to_ptr.vmem [resolvable:$true] %s266_s22 }
  0x82   :  { %s10523_s23 = scalar_lea.vmem %s242_s16, 16  ;;  %s10527_s26 = scalar_lea.vmem %s242_s16, 32 }
  0x83   :  { %p10524_p2 = scmp.ne.s32.totalorder %s242_s16, %s10523_s23  ;;  %p10528_p3 = scmp.lt.s32.totalorder %s242_s16, %s242_s16 }
  0x84   :  { %p10529_p4 = scmp.lt.s32.totalorder %s10527_s26, %s10523_s23 }
  0x86   :  { %p10530_p5 = por %p10529_p4, %p10528_p3 }
  0x88   :  { %p10531_p6 = pnand %p10530_p5, %p10524_p2 }
  0x8a   :  { %10534 = shalt.err (!%p10531_p6)
}
  0x8b   :  { %244 = dma.hbm_to_vmem [thread:$0]  %s11076_s27, 16, %s242_s16, [#allocation29]  }
  0x8c   :  { %s10543_s19 = scalar_lea.vmem %s267_s22, 1024  ;;  %p10548_p8 = scmp.lt.s32.totalorder %s267_s22, %s267_s22 }
  0x8d   :  { %p10544_p7 = scmp.ne.s32.totalorder %s267_s22, %s10543_s19  ;;  %p10549_p9 = scmp.lt.s32.totalorder %s10543_s19, %s10543_s19 }
  0x8f   :  { %p10550_p10 = por %p10549_p9, %p10548_p8 }
  0x91   :  { %p10551_p11 = pnand %p10550_p10, %p10544_p7 }
  0x93   :  { %10554 = shalt.err (!%p10551_p11)
}
  0x94   :  { %272 = dma.hbm_to_vmem [thread:$0]  %s11096_s9, 1024, %s267_s22, [#allocation32], %s10959_s13, %s10959_s13, %s10960_s28  }
  0x95   :  { %s10965_s6 = smov [#allocation34]   ;;  %s10966_s1 = smov [#allocation37]  }
  0x96   :  { %s292_s21 = sshll.u32 %s10965_s6, 4  ;;  %s314_s2 = sshll.u32 %s10966_s1, 4  ;;  %s293_s21 = int_to_ptr.vmem [resolvable:$true] %s292_s21  ;;  %s315_s2 = int_to_ptr.vmem [resolvable:$true] %s314_s2 }
  0x97   :  { %s10563_s7 = scalar_lea.vmem %s293_s21, 1024  ;;  %p10568_p13 = scmp.lt.s32.totalorder %s293_s21, %s293_s21 }
  0x98   :  { %p10564_p12 = scmp.ne.s32.totalorder %s293_s21, %s10563_s7  ;;  %p10569_p0 = scmp.lt.s32.totalorder %s10563_s7, %s10563_s7 }
  0x9a   :  { %p10570_p1 = por %p10569_p0, %p10568_p13 }
  0x9c   :  { %p10571_p2 = pnand %p10570_p1, %p10564_p12 }
  0x9e   :  { %10574 = shalt.err (!%p10571_p2)
}
  0x9f   :  { %298 = dma.hbm_to_vmem [thread:$0]  %s11111_s24, 1024, %s293_s21, [#allocation35], %s10959_s13, %s10959_s13, %s10960_s28  }
  0xa0   :  { %s10583_s27 = scalar_lea.vmem %s315_s2, 1024  ;;  %p10588_p4 = scmp.lt.s32.totalorder %s315_s2, %s315_s2 }
  0xa1   :  { %p10584_p3 = scmp.ne.s32.totalorder %s315_s2, %s10583_s27  ;;  %p10589_p5 = scmp.lt.s32.totalorder %s10583_s27, %s10583_s27 }
  0xa3   :  { %p10590_p6 = por %p10589_p5, %p10588_p4 }
  0xa5   :  { %p10591_p7 = pnand %p10590_p6, %p10584_p3 }
  0xa7   :  { %10594 = shalt.err (!%p10591_p7)
}
  0xa8   :  { %320 = dma.hbm_to_vmem [thread:$0]  %s11121_s4, 1024, %s315_s2, [#allocation38], %s10959_s13, %s10959_s13, %s10960_s28  }
  0xa9   :  { %s10967_s9 = smov [#allocation7]   ;;  %s10968_s10 = smov [#allocation12]  }
  0xaa   :  { %s90_s0 = sshll.u32 %s10967_s9, 4  ;;  %s115_s29 = sshll.u32 %s10968_s10, 4  ;;  %s91_s0 = int_to_ptr.vmem [resolvable:$true] %s90_s0  ;;  %s116_s29 = int_to_ptr.vmem [resolvable:$true] %s115_s29 }
  0xab   :  { %s10603_s11 = scalar_lea.vmem %s91_s0, 256  ;;  %p10608_p9 = scmp.lt.s32.totalorder %s91_s0, %s91_s0 }
  0xac   :  { %p10604_p8 = scmp.ne.s32.totalorder %s91_s0, %s10603_s11  ;;  %p10609_p10 = scmp.lt.s32.totalorder %s10603_s11, %s10603_s11 }
  0xae   :  { %p10610_p11 = por %p10609_p10, %p10608_p9 }
  0xb0   :  { %p10611_p12 = pnand %p10610_p11, %p10604_p8 }
  0xb2   :  { %10614 = shalt.err (!%p10611_p12)
}
  0xb3   :  { %96 = dma.hbm_to_vmem [thread:$0]  %s10996_s5, 256, %s91_s0, [#allocation8], %s10959_s13, %s10959_s13, %s10960_s28  }
  0xb4   :  { %s10623_s24 = scalar_lea.vmem %s116_s29, 16  ;;  %s10627_s4 = scalar_lea.vmem %s116_s29, 32 }
  0xb5   :  { %p10624_p13 = scmp.ne.s32.totalorder %s116_s29, %s10623_s24  ;;  %p10628_p0 = scmp.lt.s32.totalorder %s116_s29, %s116_s29 }
  0xb6   :  { %p10629_p1 = scmp.lt.s32.totalorder %s10627_s4, %s10623_s24 }
  0xb8   :  { %p10630_p2 = por %p10629_p1, %p10628_p0 }
  0xba   :  { %p10631_p3 = pnand %p10630_p2, %p10624_p13 }
  0xbc   :  { %10634 = shalt.err (!%p10631_p3)
}
  0xbd   :  { %118 = dma.hbm_to_vmem [thread:$0]  %s11011_s17, 16, %s116_s29, [#allocation11]  }
  0xbe   :  { %s10969_s15 = smov [#allocation15]   ;;  %s10970_s16 = smov [#allocation18]  }
  0xbf   :  { %s134_s8 = sshll.u32 %s10969_s15, 4  ;;  %s159_s18 = sshll.u32 %s10970_s16, 4  ;;  %s135_s8 = int_to_ptr.vmem [resolvable:$true] %s134_s8  ;;  %s160_s18 = int_to_ptr.vmem [resolvable:$true] %s159_s18 }
  0xc0   :  { %s10643_s22 = scalar_lea.vmem %s135_s8, 512  ;;  %p10648_p5 = scmp.lt.s32.totalorder %s135_s8, %s135_s8 }
  0xc1   :  { %p10644_p4 = scmp.ne.s32.totalorder %s135_s8, %s10643_s22  ;;  %p10649_p6 = scmp.lt.s32.totalorder %s10643_s22, %s10643_s22 }
  0xc3   :  { %p10650_p7 = por %p10649_p6, %p10648_p5 }
  0xc5   :  { %p10651_p8 = pnand %p10650_p7, %p10644_p4 }
  0xc7   :  { %10654 = shalt.err (!%p10651_p8)
}
  0xc8   :  { %140 = dma.hbm_to_vmem [thread:$0]  %s11021_s25, 512, %s135_s8, [#allocation14], %s10959_s13, %s10959_s13, %s10960_s28  }
  0xc9   :  { %s10663_s5 = scalar_lea.vmem %s160_s18, 16  ;;  %s10667_s17 = scalar_lea.vmem %s160_s18, 32 }
  0xca   :  { %p10664_p9 = scmp.ne.s32.totalorder %s160_s18, %s10663_s5  ;;  %p10668_p10 = scmp.lt.s32.totalorder %s160_s18, %s160_s18 }
  0xcb   :  { %p10669_p11 = scmp.lt.s32.totalorder %s10667_s17, %s10663_s5 }
  0xcd   :  { %p10670_p12 = por %p10669_p11, %p10668_p10 }
  0xcf   :  { %p10671_p13 = pnand %p10670_p12, %p10664_p9 }
  0xd1   :  { %10674 = shalt.err (!%p10671_p13)
}
  0xd2   :  { %162 = dma.hbm_to_vmem [thread:$0]  %s11031_s3, 16, %s160_s18, [#allocation17]  }
  0xd3   :  { %s10971_s23 = smov [#allocation21]   ;;  %s10972_s19 = smov [#allocation24]  }
  0xd4   :  { %s180_s26 = sshll.u32 %s10971_s23, 4  ;;  %s204_s6 = sshll.u32 %s10972_s19, 4  ;;  %s181_s26 = int_to_ptr.vmem [resolvable:$true] %s180_s26  ;;  %s205_s6 = int_to_ptr.vmem [resolvable:$true] %s204_s6 }
  0xd5   :  { %s10683_s21 = scalar_lea.vmem %s181_s26, 512  ;;  %p10688_p1 = scmp.lt.s32.totalorder %s181_s26, %s181_s26 }
  0xd6   :  { %p10684_p0 = scmp.ne.s32.totalorder %s181_s26, %s10683_s21  ;;  %p10689_p2 = scmp.lt.s32.totalorder %s10683_s21, %s10683_s21 }
  0xd8   :  { %p10690_p3 = por %p10689_p2, %p10688_p1 }
  0xda   :  { %p10691_p4 = pnand %p10690_p3, %p10684_p0 }
  0xdc   :  { %10694 = shalt.err (!%p10691_p4)
}
  0xdd   :  { %s13327_s25 = sld [smem:[#allocation61_spill]]  ;;  %s10703_s1 = scalar_lea.vmem %s205_s6, 512 }
  0xde   :  { %p10704_p5 = scmp.ne.s32.totalorder %s205_s6, %s10703_s1  ;;  %p10708_p6 = scmp.lt.s32.totalorder %s205_s6, %s205_s6 }
  0xdf   :  { %p10709_p7 = scmp.lt.s32.totalorder %s10703_s1, %s10703_s1 }
  0xe1   :  { %p10710_p8 = por %p10709_p7, %p10708_p6 }
  0xe3   :  { %186 = dma.hbm_to_vmem [thread:$0]  %s13327_s25, 512, %s181_s26, [#allocation20], %s10959_s13, %s10959_s13, %s10960_s28  }
  0xe4   :  { %p10711_p9 = pnand %p10710_p8, %p10704_p5 }
  0xe6   :  { %10714 = shalt.err (!%p10711_p9)
}
  0xe7   :  { %s13328_s3 = sld [smem:[#allocation63_spill]]  ;;  %s10973_s2 = smov [#allocation27]  }
  0xe8   :  { %s228_s7 = sshll.u32 %s10973_s2, 4  ;;  %s10974_s27 = smov [#allocation30]   ;;  %s229_s7 = int_to_ptr.vmem [resolvable:$true] %s228_s7 }
  0xe9   :  { %s252_s9 = sshll.u32 %s10974_s27, 4  ;;  %s10723_s0 = scalar_lea.vmem %s229_s7, 512  ;;  %s253_s9 = int_to_ptr.vmem [resolvable:$true] %s252_s9 }
  0xea   :  { %p10724_p10 = scmp.ne.s32.totalorder %s229_s7, %s10723_s0  ;;  %p10728_p11 = scmp.lt.s32.totalorder %s229_s7, %s229_s7 }
  0xeb   :  { %p10729_p12 = scmp.lt.s32.totalorder %s10723_s0, %s10723_s0 }
  0xed   :  { %210 = dma.hbm_to_vmem [thread:$0]  %s13328_s3, 512, %s205_s6, [#allocation23], %s10959_s13, %s10959_s13, %s10960_s28  }
  0xee   :  { %p10730_p13 = por %p10729_p12, %p10728_p11 }
  0xf0   :  { %p10731_p0 = pnand %p10730_p13, %p10724_p10 }
  0xf2   :  { %10734 = shalt.err (!%p10731_p0)
}
  0xf3   :  { %s13329_s10 = sld [smem:[#allocation65_spill]]  ;;  %s10743_s29 = scalar_lea.vmem %s253_s9, 512 }
  0xf4   :  { %p10744_p1 = scmp.ne.s32.totalorder %s253_s9, %s10743_s29  ;;  %p10748_p2 = scmp.lt.s32.totalorder %s253_s9, %s253_s9 }
  0xf5   :  { %p10749_p3 = scmp.lt.s32.totalorder %s10743_s29, %s10743_s29 }
  0xf7   :  { %p10750_p4 = por %p10749_p3, %p10748_p2 }
  0xf9   :  { %234 = dma.hbm_to_vmem [thread:$0]  %s13329_s10, 512, %s229_s7, [#allocation26], %s10959_s13, %s10959_s13, %s10960_s28  }
  0xfa   :  { %p10751_p5 = pnand %p10750_p4, %p10744_p1 }
  0xfc   :  { %10754 = shalt.err (!%p10751_p5)
}
  0xfd   :  { %s13330_s11 = sld [smem:[#allocation67_spill]]  ;;  %s10975_s24 = smov [#allocation33]  }
  0xfe   :  { %s278_s4 = sshll.u32 %s10975_s24, 4  ;;  %s10976_s15 = smov [#allocation36]   ;;  %s279_s4 = int_to_ptr.vmem [resolvable:$true] %s278_s4 }
  0xff   :  { %s305_s8 = sshll.u32 %s10976_s15, 4  ;;  %s10763_s16 = scalar_lea.vmem %s279_s4, 512  ;;  %s306_s8 = int_to_ptr.vmem [resolvable:$true] %s305_s8 }
 0x100   :  { %p10764_p6 = scmp.ne.s32.totalorder %s279_s4, %s10763_s16  ;;  %p10768_p7 = scmp.lt.s32.totalorder %s279_s4, %s279_s4 }
 0x101   :  { %p10769_p8 = scmp.lt.s32.totalorder %s10763_s16, %s10763_s16 }
 0x103   :  { %258 = dma.hbm_to_vmem [thread:$0]  %s13330_s11, 512, %s253_s9, [#allocation29], %s10959_s13, %s10959_s13, %s10960_s28  }
 0x104   :  { %p10770_p9 = por %p10769_p8, %p10768_p7 }
 0x106   :  { %p10771_p10 = pnand %p10770_p9, %p10764_p6 }
 0x108   :  { %10774 = shalt.err (!%p10771_p10)
}
 0x109   :  { %s13331_s18 = sld [smem:[#allocation69_spill]]  ;;  %s10783_s22 = scalar_lea.vmem %s306_s8, 16 }
 0x10a   :  { %p10784_p11 = scmp.ne.s32.totalorder %s306_s8, %s10783_s22  ;;  %s10787_s5 = scalar_lea.vmem %s306_s8, 32 }
 0x10b   :  { %p10788_p12 = scmp.lt.s32.totalorder %s306_s8, %s306_s8  ;;  %p10789_p13 = scmp.lt.s32.totalorder %s10787_s5, %s10783_s22 }
 0x10d   :  { %p10790_p0 = por %p10789_p13, %p10788_p12 }
 0x10f   :  { %284 = dma.hbm_to_vmem [thread:$0]  %s13331_s18, 512, %s279_s4, [#allocation32], %s10959_s13, %s10959_s13, %s10960_s28  }
 0x110   :  { %p10791_p1 = pnand %p10790_p0, %p10784_p11 }
 0x112   :  { %10794 = shalt.err (!%p10791_p1)
}
 0x113   :  { %s13332_s17 = sld [smem:[#allocation71_spill]]  ;;  %s10977_s23 = smov [#allocation39]  }
 0x114   :  { %s327_s26 = sshll.u32 %s10977_s23, 4  ;;  %s328_s26 = int_to_ptr.vmem [resolvable:$true] %s327_s26 }
 0x115   :  { %s10803_s19 = scalar_lea.vmem %s328_s26, 16  ;;  %s10807_s6 = scalar_lea.vmem %s328_s26, 32 }
 0x116   :  { %p10804_p2 = scmp.ne.s32.totalorder %s328_s26, %s10803_s19  ;;  %p10808_p3 = scmp.lt.s32.totalorder %s328_s26, %s328_s26 }
 0x117   :  { %p10809_p4 = scmp.lt.s32.totalorder %s10807_s6, %s10803_s19 }
 0x119   :  { %308 = dma.hbm_to_vmem [thread:$0]  %s13332_s17, 16, %s306_s8, [#allocation35]  }
 0x11a   :  { %p10810_p5 = por %p10809_p4, %p10808_p3 }
 0x11c   :  { %p10811_p6 = pnand %p10810_p5, %p10804_p2 }
 0x11e   :  { %10814 = shalt.err (!%p10811_p6)
}
 0x11f   :  { %s13333_s13 = sld [smem:[#allocation72_spill]] }
 0x125   :  { %330 = dma.hbm_to_vmem [thread:$0]  %s13333_s13, 16, %s328_s26, [#allocation38]  }
 0x126   :  { %10895 = dma.done.wait [#allocation8], 256  }
 0x127   :  { %10896 = vsyncadd [#allocation8], 4294967040 }
 0x128   :  { %10897 = dma.done.wait [#allocation11], 32  }
 0x129   :  { %10898 = vsyncadd [#allocation11], 4294967264 }
 0x12a   :  { %10899 = dma.done.wait [#allocation14], 528  }
 0x12b   :  { %10900 = vsyncadd [#allocation14], 4294966768 }
 0x12c   :  { %10901 = dma.done.wait [#allocation17], 528  }
 0x12d   :  { %10902 = vsyncadd [#allocation17], 4294966768 }
 0x12e   :  { %10903 = dma.done.wait [#allocation20], 1024  }
 0x12f   :  { %10904 = vsyncadd [#allocation20], 4294966272 }
 0x130   :  { %10905 = dma.done.wait [#allocation23], 528  }
 0x131   :  { %10906 = vsyncadd [#allocation23], 4294966768 }
 0x132   :  { %10907 = dma.done.wait [#allocation26], 528  }
 0x133   :  { %10908 = vsyncadd [#allocation26], 4294966768 }
 0x134   :  { %10909 = dma.done.wait [#allocation29], 528  }
 0x135   :  { %10910 = vsyncadd [#allocation29], 4294966768 }
 0x136   :  { %10911 = dma.done.wait [#allocation32], 1536  }
 0x137   :  { %10912 = vsyncadd [#allocation32], 4294965760 }
 0x138   :  { %10913 = dma.done.wait [#allocation35], 1040  }
 0x139   :  { %10914 = vsyncadd [#allocation35], 4294966256 }
 0x13a   :  { %10915 = dma.done.wait [#allocation38], 1040  }
 0x13b   :  { %10916 = vsyncadd [#allocation38], 4294966256  ;;  %s13334_s28 = sld [smem:[#allocation60_spill]]  ;;  %v394_v4 = vld [vmem:[#allocation7] sm:$0xff]  ;;  %v395_v17 = vld [vmem:[#allocation7 + $0x8] sm:$0xff]  ;;  %vm494_vm0 = vcmask 261120  }
 0x13c   :  { %9049 = vmatprep.mubr.f32.mxu0 %v394_v4  ;;  %v8426_v19 = vld [vmem:[#allocation10] ss:$0 sm:$0xff]  ;;  %v542_v36 = vld [vmem:[#allocation15 + $0x10] sm:$0xff]  ;;  %v541_v37 = vld [vmem:[#allocation15 + $0x8] sm:$0xff]  ;;  %v10978_v41 = vmov 0.0   ;;  %vm10979_vm1 = vmmov 0  }
 0x13d   :  { %v543_v35 = vld [vmem:[#allocation15 + $0x18] sm:$0xff]  ;;  %v540_v38 = vld [vmem:[#allocation15] sm:$0xff]  ;;  %v11239_v42 = vld [vmem:[#allocation16 + $0x10] sm:$0xff]  ;;  %s10980_s21 = smov 64   ;;  %s10981_s25 = smov 32   ;;  %vm1014_vm2 = vcmask 1041409  }
 0x13e   :  { %9052 = vmatprep.subr.mxu1 %v543_v35  ;;  %v552_v39 = vld [vmem:[#allocation19 + $0x18] sm:$0xff]  ;;  %v11243_v43 = vld [vmem:[#allocation16 + $0x8] sm:$0xff]  ;;  %v551_v61 = vld [vmem:[#allocation19 + $0x10] sm:$0xff]  ;;  %vm997_vm3 = vcmask 253952   ;;  %vm1008_vm4 = vcmask 516352   ;;  %s13335_s1 = sld [smem:[#allocation62_spill]] }
 0x13f   :  { %9053 = vmatpush3.msra.mxu1 %v543_v35  ;;  %v11235_v40 = vld [vmem:[#allocation16 + $0x18] sm:$0xff]  ;;  %v11247_v44 = vld [vmem:[#allocation16] sm:$0xff]  ;;  %v550_v62 = vld [vmem:[#allocation19 + $0x8] sm:$0xff]  ;;  %s13336_s3 = sld [smem:[#allocation64_spill]]  ;;  %vm3062_vm5 = vcmask 523264   ;;  %s10982_s9 = smov 96  }
 0x140   :  { %9054 = vmatprep.subr.mxu1 %v542_v36  ;;  %v8427_v52 = vld [vmem:[#allocation12] ss:$0 sm:$0xff]  ;;  %v8428_v54 = vld [vmem:[#allocation13] ss:$0 sm:$0xff]  ;;  %v549_v63 = vld [vmem:[#allocation19] sm:$0xff]  ;;  %s13337_s2 = sld [smem:[#allocation66_spill]] }
 0x141   :  { %v411_v0 = vld [vmem:[%s13334_s28 + $0x78] sm:$0xff]  ;;  %v410_v1 = vld [vmem:[%s13334_s28 + $0x70] sm:$0xff]  ;;  %v409_v2 = vld [vmem:[%s13334_s28 + $0x68] sm:$0xff]  ;;  %9055 = vmatpush3.msra.mxu1 %v542_v36  ;;  %s13338_s7 = sld [smem:[#allocation68_spill]]  ;;  %vm8224_vm6 = vcmask 254976   ;;  %s10983_s10 = smov [#allocation41]  }
 0x142   :  { %9017 = vmatprep.subr.mxu0 %v411_v0  ;;  %v408_v3 = vld [vmem:[%s13334_s28 + $0x60] sm:$0xff]  ;;  %v407_v5 = vld [vmem:[%s13334_s28 + $0x58] sm:$0xff]  ;;  %v406_v6 = vld [vmem:[%s13334_s28 + $0x50] sm:$0xff]  ;;  %9056 = vmatprep.subr.mxu1 %v541_v37  ;;  %s13339_s27 = sld [smem:[#allocation70_spill]]  ;;  %s8333_s29 = sshll.u32 %s10983_s10, 4  ;;  %s8334_s29 = int_to_ptr.vmem [resolvable:$true] %s8333_s29 }
 0x143   :  { %9018 = vmatpush3.msra.mxu0 %v411_v0  ;;  %v405_v7 = vld [vmem:[%s13334_s28 + $0x48] sm:$0xff]  ;;  %v404_v8 = vld [vmem:[%s13334_s28 + $0x40] sm:$0xff]  ;;  %v403_v9 = vld [vmem:[%s13334_s28 + $0x38] sm:$0xff]  ;;  %9057 = vmatpush3.msra.mxu1 %v541_v37  ;;  %s13340_s0 = sld [smem:[#allocation74_spill]]  ;;  %s10984_s11 = smov [#allocation40]  }
 0x144   :  { %9019 = vmatprep.subr.mxu0 %v410_v1  ;;  %v402_v10 = vld [vmem:[%s13334_s28 + $0x30] sm:$0xff]  ;;  %v401_v11 = vld [vmem:[%s13334_s28 + $0x28] sm:$0xff]  ;;  %v400_v12 = vld [vmem:[%s13334_s28 + $0x20] sm:$0xff]  ;;  %9058 = vmatprep.subr.mxu1 %v540_v38  ;;  %s8321_s24 = sshll.u32 %s10984_s11, 4  ;;  %s10815_s4 = scalar_lea.vmem %s8334_s29, 128  ;;  %s8322_s24 = int_to_ptr.vmem [resolvable:$true] %s8321_s24 }
 0x145   :  { %9020 = vmatpush3.msra.mxu0 %v410_v1  ;;  %v399_v13 = vld [vmem:[%s13334_s28 + $0x18] sm:$0xff]  ;;  %v398_v14 = vld [vmem:[%s13334_s28 + $0x10] sm:$0xff]  ;;  %v397_v15 = vld [vmem:[%s13334_s28 + $0x8] sm:$0xff]  ;;  %9059 = vmatpush3.msra.mxu1 %v540_v38  ;;  %p10816_p7 = scmp.ne.s32.totalorder %s8334_s29, %s10815_s4  ;;  %p10820_p8 = scmp.lt.s32.totalorder %s8334_s29, %s8334_s29 }
 0x146   :  { %9021 = vmatprep.subr.mxu0 %v409_v2  ;;  %v396_v16 = vld [vmem:[%s13334_s28] sm:$0xff]  ;;  %9063 = vmatprep.subr.mxu1 %v552_v39  ;;  %v11272_v1 = vld [vmem:[#allocation21 + $0x10] sm:$0xff]  ;;  %p10821_p9 = scmp.lt.s32.totalorder %s10815_s4, %s10815_s4 }
 0x147   :  { %9022 = vmatpush3.msra.mxu0 %v409_v2  ;;  %v11267_v0 = vld [vmem:[#allocation21 + $0x18] sm:$0xff]  ;;  %v11278_v2 = vld [vmem:[#allocation21 + $0x8] sm:$0xff] }
 0x148   :  { %9023 = vmatprep.subr.mxu0 %v408_v3  ;;  %v8429_v4 = vld [vmem:[#allocation18] ss:$0 sm:$0xff]  ;;  %p10822_p10 = por %p10821_p9, %p10820_p8 }
 0x149   :  { %9024 = vmatpush3.msra.mxu0 %v408_v3  ;;  %v11282_v3 = vld [vmem:[#allocation21] sm:$0xff] }
 0x14a   :  { %9025 = vmatprep.subr.mxu0 %v407_v5  ;;  %p10823_p11 = pnand %p10822_p10, %p10816_p7 }
 0x14b   :  { %9026 = vmatpush3.msra.mxu0 %v407_v5 }
 0x14c   :  { %9027 = vmatprep.subr.mxu0 %v406_v6 }
 0x14d   :  { %9028 = vmatpush3.msra.mxu0 %v406_v6 }
 0x14e   :  { %9029 = vmatprep.subr.mxu0 %v405_v7 }
 0x14f   :  { %9030 = vmatpush3.msra.mxu0 %v405_v7 }
 0x150   :  { %9031 = vmatprep.subr.mxu0 %v404_v8 }
 0x151   :  { %9032 = vmatpush3.msra.mxu0 %v404_v8 }
 0x152   :  { %9033 = vmatprep.subr.mxu0 %v403_v9 }
 0x153   :  { %9034 = vmatpush3.msra.mxu0 %v403_v9  ;;  %v8432_v9 = vld [vmem:[#allocation22] ss:$0 sm:$0xff] }
 0x154   :  { %9035 = vmatprep.subr.mxu0 %v402_v10 }
 0x155   :  { %9036 = vmatpush3.msra.mxu0 %v402_v10 }
 0x156   :  { %9037 = vmatprep.subr.mxu0 %v401_v11 }
 0x157   :  { %9038 = vmatpush3.msra.mxu0 %v401_v11 }
 0x158   :  { %9039 = vmatprep.subr.mxu0 %v400_v12 }
 0x159   :  { %9040 = vmatpush3.msra.mxu0 %v400_v12 }
 0x15a   :  { %9041 = vmatprep.subr.mxu0 %v399_v13 }
 0x15b   :  { %9042 = vmatpush3.msra.mxu0 %v399_v13 }
 0x15c   :  { %9043 = vmatprep.subr.mxu0 %v398_v14 }
 0x15d   :  { %9044 = vmatpush3.msra.mxu0 %v398_v14 }
 0x15e   :  { %9045 = vmatprep.subr.mxu0 %v397_v15 }
 0x15f   :  { %9046 = vmatpush3.msra.mxu0 %v397_v15 }
 0x160   :  { %9047 = vmatprep.subr.mxu0 %v396_v16 }
 0x161   :  { %9048 = vmatpush3.msra.mxu0 %v396_v16 }
 0x162   :  { %9050 = vmatmul.mubr.f32.vlgmr.msra.gmra.mxu0 %v395_v17  ;;  %9096 = vmatprep.subr.mxu0 %v10978_v41 }
 0x163   :  { %9097 = vmatpush3.msra.mxu0 %v11235_v40  ;;  %9104 = vmatprep.mubr.msk.f32.mxu0 %vm10979_vm1, %v10978_v41 }
 0x164   :  { %9098 = vmatprep.subr.mxu0 %v10978_v41 }
 0x165   :  { %9099 = vmatpush3.msra.mxu0 %v11239_v42 }
 0x166   :  { %9100 = vmatprep.subr.mxu0 %v10978_v41 }
 0x167   :  { %9101 = vmatpush3.msra.mxu0 %v11243_v43 }
 0x168   :  { %9102 = vmatprep.subr.mxu0 %v10978_v41 }
 0x169   :  { %9103 = vmatpush3.msra.mxu0 %v11247_v44 }
 0x16a   :  { %9118 = vmatprep.subr.mxu0 %v10978_v41 }
 0x222   :  { %v9051_v18 = vpop.f32.mrf.mxu0 }
 0x223   :  { %v491_v22 = vadd.f32 %v9051_v18, %v8426_v19 }
 0x224   :  { %v485_v20 = vpop.f32.mrf.mxu0 }
 0x225   :  { %v486_v21 = vadd.f32 %v8426_v19, %v485_v20  ;;  %v498_v24 = vsel %vm494_vm0, %v491_v22, 0.0 }
 0x227   :  { %v495_v23 = vsel %vm494_vm0, %v486_v21, 0.0 }
 0x228   :  { %496 = vadd.xlane.f32.xlu0 %v495_v23 }
 0x22c   :  { %499 = vadd.xlane.f32.xlu0 %v498_v24 }
 0x2b1   :  { %v497_v25 = vpop.xlane.xlu0 %496 }
 0x2b2   :  { %v502_v26 = vmul.f32 0.03125, %v497_v25 }
 0x2b4   :  { %v504_v27 = vsub.f32 %v486_v21, %v502_v26 }
 0x2b5   :  { %v500_v28 = vpop.xlane.xlu0 %499 }
 0x2b6   :  { %v503_v29 = vmul.f32 0.03125, %v500_v28  ;;  %v506_v30 = vmul.f32 %v504_v27, %v504_v27 }
 0x2b8   :  { %v505_v31 = vsub.f32 %v491_v22, %v503_v29  ;;  %v508_v32 = vsel %vm494_vm0, %v506_v30, 0.0 }
 0x2b9   :  { %509 = vadd.xlane.f32.xlu1 %v508_v32 }
 0x2ba   :  { %v507_v33 = vmul.f32 %v505_v31, %v505_v31 }
 0x2bc   :  { %v511_v34 = vsel %vm494_vm0, %v507_v33, 0.0 }
 0x2bd   :  { %512 = vadd.xlane.f32.xlu1 %v511_v34 }
 0x342   :  { %v510_v45 = vpop.xlane.xlu1 %509 }
 0x343   :  { %v514_v46 = vmul.f32 0.03125, %v510_v45 }
 0x345   :  { %v516_v47 = vadd.f32 1e-05, %v514_v46 }
 0x346   :  { %v513_v48 = vpop.xlane.xlu1 %512 }
 0x347   :  { %9781 = vrsqrt.f32 %v516_v47  ;;  %v515_v49 = vmul.f32 0.03125, %v513_v48 }
 0x349   :  { %v517_v50 = vadd.f32 1e-05, %v515_v49 }
 0x34b   :  { %9783 = vrsqrt.f32 %v517_v50 }
 0x354   :  { %v9782_v51 = vpop.eup %9781 }
 0x355   :  { %v520_v53 = vmul.f32 %v9782_v51, %v504_v27 }
 0x357   :  { %v529_v55 = vmul.f32 %v8427_v52, %v520_v53 }
 0x358   :  { %v9784_v56 = vpop.eup %9783 }
 0x359   :  { %v521_v57 = vmul.f32 %v9784_v56, %v505_v31  ;;  %v538_v58 = vadd.f32 %v8428_v54, %v529_v55 }
 0x35b   :  { %v530_v59 = vmul.f32 %v8427_v52, %v521_v57  ;;  %9060 = vmatprep.mubr.msk.f32.mxu1 %vm494_vm0, %v538_v58 }
 0x35d   :  { %v539_v60 = vadd.f32 %v8428_v54, %v530_v59 }
 0x35f   :  { %9061 = vmatmul.mubr.msk.f32.vlgmr.msra.gmra.mxu1 %vm494_vm0, %v539_v60 }
 0x360   :  { %9064 = vmatpush3.msra.mxu1 %v552_v39  ;;  %9071 = vmatprep.mubr.msk.f32.mxu1 %vm494_vm0, %v538_v58 }
 0x361   :  { %9065 = vmatprep.subr.mxu1 %v551_v61 }
 0x362   :  { %9066 = vmatpush3.msra.mxu1 %v551_v61 }
 0x363   :  { %9067 = vmatprep.subr.mxu1 %v550_v62 }
 0x364   :  { %9068 = vmatpush3.msra.mxu1 %v550_v62 }
 0x365   :  { %9069 = vmatprep.subr.mxu1 %v549_v63 }
 0x366   :  { %9070 = vmatpush3.msra.mxu1 %v549_v63 }
 0x367   :  { %9072 = vmatmul.mubr.msk.f32.vlgmr.msra.gmra.mxu1 %vm494_vm0, %v539_v60  ;;  %9074 = vmatprep.subr.mxu1 %v10978_v41 }
 0x368   :  { %9075 = vmatpush3.msra.mxu1 %v11235_v40  ;;  %9082 = vmatprep.mubr.msk.f32.mxu1 %vm10979_vm1, %v10978_v41 }
 0x369   :  { %9076 = vmatprep.subr.mxu1 %v10978_v41 }
 0x36a   :  { %9077 = vmatpush3.msra.mxu1 %v11239_v42 }
 0x36b   :  { %9078 = vmatprep.subr.mxu1 %v10978_v41 }
 0x36c   :  { %9079 = vmatpush3.msra.mxu1 %v11243_v43 }
 0x36d   :  { %9080 = vmatprep.subr.mxu1 %v10978_v41 }
 0x36e   :  { %9081 = vmatpush3.msra.mxu1 %v11247_v44 }
 0x36f   :  { %9083 = vmatmul.mubr.f32.vlgmr.msra.gmra.mxu1 %v10978_v41  ;;  %9085 = vmatprep.subr.mxu1 %v10978_v41 }
 0x370   :  { %9086 = vmatpush3.msra.mxu1 %v11267_v0  ;;  %9093 = vmatprep.mubr.msk.f32.mxu1 %vm10979_vm1, %v10978_v41 }
 0x371   :  { %9087 = vmatprep.subr.mxu1 %v10978_v41 }
 0x372   :  { %9088 = vmatpush3.msra.mxu1 %v11272_v1 }
 0x373   :  { %9089 = vmatprep.subr.mxu1 %v10978_v41 }
 0x374   :  { %9090 = vmatpush3.msra.mxu1 %v11278_v2 }
 0x375   :  { %9091 = vmatprep.subr.mxu1 %v10978_v41 }
 0x376   :  { %9092 = vmatpush3.msra.mxu1 %v11282_v3 }
 0x377   :  { %9094 = vmatmul.mubr.f32.vlgmr.msra.gmra.mxu1 %v10978_v41  ;;  %9107 = vmatprep.subr.mxu1 %v10978_v41 }
 0x378   :  { %9108 = vmatpush3.msra.mxu1 %v11267_v0  ;;  %9115 = vmatprep.mubr.msk.f32.mxu1 %vm10979_vm1, %v10978_v41 }
 0x379   :  { %9109 = vmatprep.subr.mxu1 %v10978_v41 }
 0x37a   :  { %9110 = vmatpush3.msra.mxu1 %v11272_v1 }
 0x37b   :  { %9111 = vmatprep.subr.mxu1 %v10978_v41 }
 0x37c   :  { %9112 = vmatpush3.msra.mxu1 %v11278_v2 }
 0x37d   :  { %9113 = vmatprep.subr.mxu1 %v10978_v41 }
 0x37e   :  { %9114 = vmatpush3.msra.mxu1 %v11282_v3 }
 0x37f   :  { %9129 = vmatprep.subr.mxu1 %v10978_v41 }
 0x41f   :  { %v9062_v5 = vpop.f32.mrf.mxu1 }
 0x420   :  { %v642_v6 = vadd.f32 %v9062_v5, %v8429_v4 }
 0x421   :  { %v636_v7 = vpop.f32.mrf.mxu1 }
 0x422   :  { %646 = vst [vmem:[#allocation5 + $0x8] sm:$0xff] %v642_v6  ;;  %v637_v8 = vadd.f32 %v8429_v4, %v636_v7 }
 0x424   :  { %645 = vst [vmem:[#allocation5] sm:$0xff] %v637_v8 }
 0x427   :  { %v9073_v10 = vpop.f32.mrf.mxu1 }
 0x428   :  { %v725_v11 = vadd.f32 %v9073_v10, %v8432_v9 }
 0x429   :  { %v719_v12 = vpop.f32.mrf.mxu1  ;;  %v731_v18 = vld [vmem:[#allocation5 + $0x8] sm:$0x1] }
 0x42a   :  { %729 = vst [vmem:[#allocation6 + $0x8] sm:$0xff] %v725_v11  ;;  %v720_v13 = vadd.f32 %v8432_v9, %v719_v12 }
 0x42b   :  { %v730_v14 = vld [vmem:[#allocation5] sm:$0x1] }
 0x42c   :  { %728 = vst [vmem:[#allocation6] sm:$0xff] %v720_v13 }
 0x42f   :  { %v801_v15 = vpop.f32.mrf.mxu1 }
 0x430   :  { %v806_v16 = vrot.slane %v801_v15, 1  ;;  %v809_v17 = vadd.f32 %v801_v15, %v730_v14 }
 0x431   :  { %v9084_v19 = vpop.f32.mrf.mxu1  ;;  %v812_v27 = vld [vmem:[#allocation6 + $0xf] sm:$0x1] }
 0x432   :  { %v810_v20 = vadd.f32 %v806_v16, %v731_v18  ;;  %v8435_v21 = vmul.f32 -1.442695, %v809_v17 }
 0x433   :  { %v811_v23 = vld [vmem:[#allocation6 + $0x7] sm:$0x1] }
 0x434   :  { %9785 = vpow2.f32 %v8435_v21  ;;  %v8436_v22 = vmul.f32 -1.442695, %v810_v20 }
 0x436   :  { %9787 = vpow2.f32 %v8436_v22 }
 0x437   :  { %v879_v24 = vpop.f32.mrf.mxu1 }
 0x438   :  { %v884_v25 = vrot.slane %v879_v24, 1  ;;  %v887_v26 = vadd.f32 %v879_v24, %v811_v23 }
 0x439   :  { %v9095_v28 = vpop.f32.mrf.mxu1 }
 0x43a   :  { %v888_v29 = vadd.f32 %v884_v25, %v812_v27  ;;  %v8439_v30 = vmul.f32 -1.442695, %v887_v26 }
 0x43c   :  { %9789 = vpow2.f32 %v8439_v30  ;;  %v8440_v31 = vmul.f32 -1.442695, %v888_v29 }
 0x43e   :  { %9791 = vpow2.f32 %v8440_v31 }
 0x441   :  { %v9786_v32 = vpop.eup %9785 }
 0x442   :  { %v895_v33 = vadd.f32 1.0, %v9786_v32 }
 0x443   :  { %v9788_v34 = vpop.eup %9787 }
 0x444   :  { %v896_v35 = vadd.f32 1.0, %v9788_v34  ;;  %9793 = vrcp.f32 %v895_v33 }
 0x446   :  { %9795 = vrcp.f32 %v896_v35  ;;  %v1011_v35 = vld [vmem:[#allocation5 + $0x1] sm:$0x1] }
 0x449   :  { %v9790_v36 = vpop.eup %9789 }
 0x44a   :  { %v945_v37 = vadd.f32 1.0, %v9790_v36 }
 0x44b   :  { %v9792_v38 = vpop.eup %9791 }
 0x44c   :  { %v946_v39 = vadd.f32 1.0, %v9792_v38  ;;  %9797 = vrcp.f32 %v945_v37 }
 0x44e   :  { %9799 = vrcp.f32 %v946_v39  ;;  %v1012_v39 = vld [vmem:[#allocation5 + $0x9] sm:$0x1] }
 0x451   :  { %v9794_v45 = vpop.eup %9793 }
 0x452   :  { %v901_v46 = vmul.f32 2.0, %v9794_v45  ;;  %v905_v8 = vmul.f32 0.0, %v9794_v45 }
 0x453   :  { %v9796_v47 = vpop.eup %9795 }
 0x454   :  { %v8437_v48 = vadd.f32 -1.0, %v901_v46  ;;  %v902_v49 = vmul.f32 2.0, %v9796_v47  ;;  %v906_v5 = vmul.f32 0.0, %v9796_v47 }
 0x456   :  { %909 = vrot.lane.b32.xlu1 %v8437_v48, %s10980_s21  ;;  %v8438_v50 = vadd.f32 -1.0, %v902_v49  ;;  %v1096_v49 = vld [vmem:[#allocation6 + $0x6] sm:$0x1] }
 0x458   :  { %911 = vrot.lane.b32.xlu0 %v8438_v50, %s10980_s21 }
 0x459   :  { %v9798_v51 = vpop.eup %9797 }
 0x45a   :  { %v951_v55 = vmul.f32 2.0, %v9798_v51  ;;  %v955_v14 = vmul.f32 0.0, %v9798_v51 }
 0x45b   :  { %v9800_v52 = vpop.eup %9799 }
 0x45c   :  { %v952_v53 = vmul.f32 2.0, %v9800_v52  ;;  %v8441_v56 = vadd.f32 -1.0, %v951_v55  ;;  %v956_v11 = vmul.f32 0.0, %v9800_v52 }
 0x45e   :  { %v8442_v54 = vadd.f32 -1.0, %v952_v53  ;;  %v1097_v53 = vld [vmem:[#allocation6 + $0xe] sm:$0x1] }
 0x460   :  { %961 = vrot.lane.b32.xlu1 %v8442_v54, %s10980_s21 }
 0x464   :  { %959 = vrot.lane.b32.xlu1 %v8441_v56, %s10980_s21 }
 0x4c8   :  { %v910_v59 = vpop.permute.xlu1 %909 }
 0x4c9   :  { %v915_v60 = vmul.f32 %v9794_v45, %v910_v59 }
 0x4ca   :  { %v912_v57 = vpop.permute.xlu0 %911 }
 0x4cb   :  { %v916_v58 = vmul.f32 %v9796_v47, %v912_v57 }
 0x4cd   :  { %921 = vrot.lane.b32.xlu0 %v916_v58, %s10981_s25 }
 0x4d1   :  { %919 = vrot.lane.b32.xlu0 %v915_v60, %s10981_s25 }
 0x4d2   :  { %v962_v61 = vpop.permute.xlu1 %961 }
 0x4d3   :  { %v966_v62 = vmul.f32 %v9800_v52, %v962_v61 }
 0x4d5   :  { %971 = vrot.lane.b32.xlu1 %v966_v62, %s10981_s25 }
 0x4d6   :  { %v960_v63 = vpop.permute.xlu1 %959 }
 0x4d7   :  { %v965_v4 = vmul.f32 %v9798_v51, %v960_v63 }
 0x4d9   :  { %969 = vrot.lane.b32.xlu1 %v965_v4, %s10981_s25 }
 0x53f   :  { %v922_v6 = vpop.permute.xlu0 %921 }
 0x540   :  { %v11307_v7 = vadd.f32 %v922_v6, %v906_v5 }
 0x542   :  { %9801 = vtanh.f32 %v11307_v7 }
 0x543   :  { %v920_v9 = vpop.permute.xlu0 %919 }
 0x544   :  { %v11310_v10 = vadd.f32 %v920_v9, %v905_v8 }
 0x546   :  { %9803 = vtanh.f32 %v11310_v10 }
 0x547   :  { %v972_v12 = vpop.permute.xlu1 %971 }
 0x548   :  { %v11313_v13 = vadd.f32 %v972_v12, %v956_v11 }
 0x54a   :  { %9805 = vtanh.f32 %v11313_v13 }
 0x54b   :  { %v970_v15 = vpop.permute.xlu1 %969 }
 0x54c   :  { %v11316_v16 = vadd.f32 %v970_v15, %v955_v14 }
 0x54e   :  { %9807 = vtanh.f32 %v11316_v16 }
 0x54f   :  { %v9802_v17 = vpop.eup %9801 }
 0x550   :  { %933 = vrot.lane.b32.xlu0 %v9802_v17, %s10980_s21 }
 0x553   :  { %v9804_v18 = vpop.eup %9803 }
 0x554   :  { %931 = vrot.lane.b32.xlu0 %v9804_v18, %s10980_s21 }
 0x557   :  { %v9806_v19 = vpop.eup %9805 }
 0x558   :  { %983 = vrot.lane.b32.xlu1 %v9806_v19, %s10980_s21 }
 0x55b   :  { %v9808_v20 = vpop.eup %9807 }
 0x55c   :  { %981 = vrot.lane.b32.xlu1 %v9808_v20, %s10980_s21 }
 0x5c2   :  { %v934_v21 = vpop.permute.xlu0 %933 }
 0x5c3   :  { %v11323_v22 = vmul.f32 %v9796_v47, %v934_v21 }
 0x5c5   :  { %v1013_v24 = vrot.slane %v11323_v22, 7 }
 0x5c6   :  { %v932_v23 = vpop.permute.xlu0 %931 }
 0x5c7   :  { %v11326_v25 = vmul.f32 %v9794_v45, %v932_v23 }
 0x5c9   :  { %v1015_v26 = vsel %vm1014_vm2, %v1013_v24, %v11326_v25 }
 0x5ca   :  { %1016 = vrot.lane.b32.xlu0 %v1015_v26, %s10981_s25  ;;  %v984_v27 = vpop.permute.xlu1 %983 }
 0x5cb   :  { %v11331_v28 = vmul.f32 %v9800_v52, %v984_v27 }
 0x5cd   :  { %v1098_v30 = vrot.slane %v11331_v28, 7 }
 0x5ce   :  { %v982_v29 = vpop.permute.xlu1 %981 }
 0x5cf   :  { %v11334_v31 = vmul.f32 %v9798_v51, %v982_v29 }
 0x5d1   :  { %v1099_v32 = vsel %vm1014_vm2, %v1098_v30, %v11334_v31 }
 0x5d2   :  { %1100 = vrot.lane.b32.xlu1 %v1099_v32, %s10981_s25 }
 0x63c   :  { %v1017_v33 = vpop.permute.xlu0 %1016 }
 0x63d   :  { %9105 = vmatmul.mubr.msk.f32.vlgmr.msra.gmra.mxu0 %vm494_vm0, %v1017_v33 }
 0x63e   :  { %9119 = vmatpush3.msra.mxu0 %v11235_v40  ;;  %9126 = vmatprep.mubr.msk.f32.mxu0 %vm10979_vm1, %v10978_v41 }
 0x63f   :  { %9120 = vmatprep.subr.mxu0 %v10978_v41 }
 0x640   :  { %9121 = vmatpush3.msra.mxu0 %v11239_v42 }
 0x641   :  { %9122 = vmatprep.subr.mxu0 %v10978_v41 }
 0x642   :  { %9123 = vmatpush3.msra.mxu0 %v11243_v43 }
 0x643   :  { %9124 = vmatprep.subr.mxu0 %v10978_v41 }
 0x644   :  { %v1101_v34 = vpop.permute.xlu1 %1100  ;;  %9125 = vmatpush3.msra.mxu0 %v11247_v44 }
 0x645   :  { %9116 = vmatmul.mubr.msk.f32.vlgmr.msra.gmra.mxu1 %vm494_vm0, %v1101_v34  ;;  %9140 = vmatprep.subr.mxu0 %v10978_v41 }
 0x646   :  { %9130 = vmatpush3.msra.mxu1 %v11267_v0  ;;  %9137 = vmatprep.mubr.msk.f32.mxu1 %vm10979_vm1, %v10978_v41 }
 0x647   :  { %9131 = vmatprep.subr.mxu1 %v10978_v41 }
 0x648   :  { %9132 = vmatpush3.msra.mxu1 %v11272_v1 }
 0x649   :  { %9133 = vmatprep.subr.mxu1 %v10978_v41 }
 0x64a   :  { %9134 = vmatpush3.msra.mxu1 %v11278_v2 }
 0x64b   :  { %9135 = vmatprep.subr.mxu1 %v10978_v41 }
 0x64c   :  { %9136 = vmatpush3.msra.mxu1 %v11282_v3 }
 0x64d   :  { %9151 = vmatprep.subr.mxu1 %v10978_v41 }
 0x6fd   :  { %v1086_v36 = vpop.f32.mrf.mxu0 }
 0x6fe   :  { %v1091_v37 = vrot.slane %v1086_v36, 1  ;;  %v1094_v38 = vadd.f32 %v1086_v36, %v1011_v35 }
 0x6ff   :  { %v9106_v45 = vpop.f32.mrf.mxu0 }
 0x700   :  { %v1095_v46 = vadd.f32 %v1091_v37, %v1012_v39  ;;  %v8445_v47 = vmul.f32 -1.442695, %v1094_v38 }
 0x702   :  { %9809 = vpow2.f32 %v8445_v47  ;;  %v8446_v48 = vmul.f32 -1.442695, %v1095_v46 }
 0x704   :  { %9811 = vpow2.f32 %v8446_v48 }
 0x705   :  { %v1170_v50 = vpop.f32.mrf.mxu1 }
 0x706   :  { %v1175_v51 = vrot.slane %v1170_v50, 1  ;;  %v1178_v52 = vadd.f32 %v1170_v50, %v1096_v49 }
 0x707   :  { %v9117_v54 = vpop.f32.mrf.mxu1 }
 0x708   :  { %v1179_v55 = vadd.f32 %v1175_v51, %v1097_v53  ;;  %v8449_v56 = vmul.f32 -1.442695, %v1178_v52 }
 0x70a   :  { %9813 = vpow2.f32 %v8449_v56  ;;  %v8450_v57 = vmul.f32 -1.442695, %v1179_v55 }
 0x70c   :  { %9815 = vpow2.f32 %v8450_v57 }
 0x70f   :  { %v9810_v58 = vpop.eup %9809 }
 0x710   :  { %v1186_v59 = vadd.f32 1.0, %v9810_v58 }
 0x711   :  { %v9812_v60 = vpop.eup %9811 }
 0x712   :  { %v1187_v61 = vadd.f32 1.0, %v9812_v60  ;;  %9817 = vrcp.f32 %v1186_v59 }
 0x714   :  { %9819 = vrcp.f32 %v1187_v61 }
 0x717   :  { %v9814_v62 = vpop.eup %9813 }
 0x718   :  { %v1236_v63 = vadd.f32 1.0, %v9814_v62 }
 0x719   :  { %v9816_v4 = vpop.eup %9815 }
 0x71a   :  { %v1237_v5 = vadd.f32 1.0, %v9816_v4  ;;  %9821 = vrcp.f32 %v1236_v63 }
 0x71c   :  { %9823 = vrcp.f32 %v1237_v5  ;;  %v1300_v5 = vld [vmem:[#allocation5 + $0x2] sm:$0x1] }
 0x71f   :  { %v9818_v6 = vpop.eup %9817 }
 0x720   :  { %v1192_v12 = vmul.f32 2.0, %v9818_v6  ;;  %v1196_v37 = vmul.f32 %v9818_v6, %v11310_v10 }
 0x721   :  { %v9820_v8 = vpop.eup %9819 }
 0x722   :  { %v1193_v9 = vmul.f32 2.0, %v9820_v8  ;;  %v8447_v15 = vadd.f32 -1.0, %v1192_v12  ;;  %v1197_v34 = vmul.f32 %v9820_v8, %v11307_v7 }
 0x724   :  { %v8448_v11 = vadd.f32 -1.0, %v1193_v9 }
 0x726   :  { %1202 = vrot.lane.b32.xlu0 %v8448_v11, %s10980_s21  ;;  %v1301_v11 = vld [vmem:[#allocation5 + $0xa] sm:$0x1] }
 0x727   :  { %v9822_v14 = vpop.eup %9821 }
 0x728   :  { %v1242_v20 = vmul.f32 2.0, %v9822_v14  ;;  %v1246_v7 = vmul.f32 %v9822_v14, %v11316_v16 }
 0x729   :  { %v9824_v17 = vpop.eup %9823 }
 0x72a   :  { %1200 = vrot.lane.b32.xlu0 %v8447_v15, %s10980_s21  ;;  %v1243_v18 = vmul.f32 2.0, %v9824_v17  ;;  %v8451_v21 = vadd.f32 -1.0, %v1242_v20  ;;  %v1247_v45 = vmul.f32 %v9824_v17, %v11313_v13 }
 0x72c   :  { %v8452_v19 = vadd.f32 -1.0, %v1243_v18  ;;  %v1384_v18 = vld [vmem:[#allocation6 + $0x5] sm:$0x1] }
 0x72e   :  { %1252 = vrot.lane.b32.xlu1 %v8452_v19, %s10980_s21 }
 0x732   :  { %1250 = vrot.lane.b32.xlu1 %v8451_v21, %s10980_s21 }
 0x798   :  { %v1203_v23 = vpop.permute.xlu0 %1202 }
 0x799   :  { %v1207_v24 = vmul.f32 %v9820_v8, %v1203_v23  ;;  %v1385_v23 = vld [vmem:[#allocation6 + $0xd] sm:$0x1] }
 0x79b   :  { %1212 = vrot.lane.b32.xlu0 %v1207_v24, %s10981_s25 }
 0x79c   :  { %v1201_v26 = vpop.permute.xlu0 %1200 }
 0x79d   :  { %v1206_v27 = vmul.f32 %v9818_v6, %v1201_v26 }
 0x79f   :  { %1210 = vrot.lane.b32.xlu0 %v1206_v27, %s10981_s25 }
 0x7a0   :  { %v1253_v29 = vpop.permute.xlu1 %1252 }
 0x7a1   :  { %v1257_v30 = vmul.f32 %v9824_v17, %v1253_v29 }
 0x7a3   :  { %1262 = vrot.lane.b32.xlu1 %v1257_v30, %s10981_s25 }
 0x7a4   :  { %v1251_v32 = vpop.permute.xlu1 %1250 }
 0x7a5   :  { %v1256_v33 = vmul.f32 %v9822_v14, %v1251_v32 }
 0x7a7   :  { %1260 = vrot.lane.b32.xlu1 %v1256_v33, %s10981_s25 }
 0x80d   :  { %v1213_v35 = vpop.permute.xlu0 %1212 }
 0x80e   :  { %v11370_v36 = vadd.f32 %v1213_v35, %v1197_v34 }
 0x810   :  { %9825 = vtanh.f32 %v11370_v36 }
 0x811   :  { %v1211_v38 = vpop.permute.xlu0 %1210 }
 0x812   :  { %v11374_v39 = vadd.f32 %v1211_v38, %v1196_v37 }
 0x814   :  { %9827 = vtanh.f32 %v11374_v39 }
 0x815   :  { %v1263_v46 = vpop.permute.xlu1 %1262 }
 0x816   :  { %v11378_v47 = vadd.f32 %v1263_v46, %v1247_v45 }
 0x818   :  { %9829 = vtanh.f32 %v11378_v47 }
 0x819   :  { %v1261_v48 = vpop.permute.xlu1 %1260 }
 0x81a   :  { %v11382_v49 = vadd.f32 %v1261_v48, %v1246_v7 }
 0x81c   :  { %9831 = vtanh.f32 %v11382_v49 }
 0x81d   :  { %v9826_v10 = vpop.eup %9825 }
 0x81e   :  { %1224 = vrot.lane.b32.xlu0 %v9826_v10, %s10980_s21 }
 0x821   :  { %v9828_v50 = vpop.eup %9827 }
 0x822   :  { %1222 = vrot.lane.b32.xlu0 %v9828_v50, %s10980_s21 }
 0x825   :  { %v9830_v51 = vpop.eup %9829 }
 0x826   :  { %1274 = vrot.lane.b32.xlu1 %v9830_v51, %s10980_s21 }
 0x829   :  { %v9832_v13 = vpop.eup %9831 }
 0x82a   :  { %1272 = vrot.lane.b32.xlu1 %v9832_v13, %s10980_s21 }
 0x890   :  { %v1225_v52 = vpop.permute.xlu0 %1224 }
 0x891   :  { %v11389_v53 = vmul.f32 %v9820_v8, %v1225_v52 }
 0x893   :  { %v1302_v54 = vrot.slane %v11389_v53, 7 }
 0x894   :  { %v1223_v16 = vpop.permute.xlu0 %1222 }
 0x895   :  { %v11392_v55 = vmul.f32 %v9818_v6, %v1223_v16 }
 0x897   :  { %v1303_v56 = vsel %vm1014_vm2, %v1302_v54, %v11392_v55 }
 0x898   :  { %1304 = vrot.lane.b32.xlu0 %v1303_v56, %s10981_s25  ;;  %v1275_v57 = vpop.permute.xlu1 %1274 }
 0x899   :  { %v11397_v58 = vmul.f32 %v9824_v17, %v1275_v57 }
 0x89b   :  { %v1386_v60 = vrot.slane %v11397_v58, 7 }
 0x89c   :  { %v1273_v59 = vpop.permute.xlu1 %1272 }
 0x89d   :  { %v11400_v61 = vmul.f32 %v9822_v14, %v1273_v59 }
 0x89f   :  { %v1387_v62 = vsel %vm1014_vm2, %v1386_v60, %v11400_v61 }
 0x8a0   :  { %1388 = vrot.lane.b32.xlu1 %v1387_v62, %s10981_s25 }
 0x90a   :  { %v1305_v63 = vpop.permute.xlu0 %1304 }
 0x90b   :  { %9127 = vmatmul.mubr.msk.f32.vlgmr.msra.gmra.mxu0 %vm494_vm0, %v1305_v63 }
 0x90c   :  { %9141 = vmatpush3.msra.mxu0 %v11235_v40  ;;  %9148 = vmatprep.mubr.msk.f32.mxu0 %vm10979_vm1, %v10978_v41 }
 0x90d   :  { %9142 = vmatprep.subr.mxu0 %v10978_v41 }
 0x90e   :  { %9143 = vmatpush3.msra.mxu0 %v11239_v42 }
 0x90f   :  { %9144 = vmatprep.subr.mxu0 %v10978_v41 }
 0x910   :  { %9145 = vmatpush3.msra.mxu0 %v11243_v43 }
 0x911   :  { %9146 = vmatprep.subr.mxu0 %v10978_v41 }
 0x912   :  { %v1389_v4 = vpop.permute.xlu1 %1388  ;;  %9147 = vmatpush3.msra.mxu0 %v11247_v44 }
 0x913   :  { %9138 = vmatmul.mubr.msk.f32.vlgmr.msra.gmra.mxu1 %vm494_vm0, %v1389_v4  ;;  %9162 = vmatprep.subr.mxu0 %v10978_v41 }
 0x914   :  { %9152 = vmatpush3.msra.mxu1 %v11267_v0  ;;  %9159 = vmatprep.mubr.msk.f32.mxu1 %vm10979_vm1, %v10978_v41 }
 0x915   :  { %9153 = vmatprep.subr.mxu1 %v10978_v41 }
 0x916   :  { %9154 = vmatpush3.msra.mxu1 %v11272_v1 }
 0x917   :  { %9155 = vmatprep.subr.mxu1 %v10978_v41 }
 0x918   :  { %9156 = vmatpush3.msra.mxu1 %v11278_v2 }
 0x919   :  { %9157 = vmatprep.subr.mxu1 %v10978_v41 }
 0x91a   :  { %9158 = vmatpush3.msra.mxu1 %v11282_v3 }
 0x91b   :  { %9173 = vmatprep.subr.mxu1 %v10978_v41 }
 0x9cb   :  { %v1374_v6 = vpop.f32.mrf.mxu0 }
 0x9cc   :  { %v1379_v8 = vrot.slane %v1374_v6, 1  ;;  %v1382_v9 = vadd.f32 %v1374_v6, %v1300_v5 }
 0x9cd   :  { %v9128_v12 = vpop.f32.mrf.mxu0 }
 0x9ce   :  { %v1383_v14 = vadd.f32 %v1379_v8, %v1301_v11  ;;  %v8455_v15 = vmul.f32 -1.442695, %v1382_v9 }
 0x9d0   :  { %9833 = vpow2.f32 %v8455_v15  ;;  %v8456_v17 = vmul.f32 -1.442695, %v1383_v14 }
 0x9d2   :  { %9835 = vpow2.f32 %v8456_v17 }
 0x9d3   :  { %v1458_v19 = vpop.f32.mrf.mxu1 }
 0x9d4   :  { %v1463_v20 = vrot.slane %v1458_v19, 1  ;;  %v1466_v21 = vadd.f32 %v1458_v19, %v1384_v18 }
 0x9d5   :  { %v9139_v24 = vpop.f32.mrf.mxu1 }
 0x9d6   :  { %v1467_v26 = vadd.f32 %v1463_v20, %v1385_v23  ;;  %v8459_v27 = vmul.f32 -1.442695, %v1466_v21 }
 0x9d8   :  { %9837 = vpow2.f32 %v8459_v27  ;;  %v8460_v29 = vmul.f32 -1.442695, %v1467_v26 }
 0x9da   :  { %9839 = vpow2.f32 %v8460_v29 }
 0x9dd   :  { %v9834_v30 = vpop.eup %9833 }
 0x9de   :  { %v1474_v32 = vadd.f32 1.0, %v9834_v30 }
 0x9df   :  { %v9836_v33 = vpop.eup %9835 }
 0x9e0   :  { %v1475_v34 = vadd.f32 1.0, %v9836_v33  ;;  %9841 = vrcp.f32 %v1474_v32 }
 0x9e2   :  { %9843 = vrcp.f32 %v1475_v34 }
 0x9e5   :  { %v9838_v35 = vpop.eup %9837 }
 0x9e6   :  { %v1524_v37 = vadd.f32 1.0, %v9838_v35 }
 0x9e7   :  { %v9840_v38 = vpop.eup %9839 }
 0x9e8   :  { %v1525_v45 = vadd.f32 1.0, %v9840_v38  ;;  %9845 = vrcp.f32 %v1524_v37 }
 0x9ea   :  { %9847 = vrcp.f32 %v1525_v45 }
 0x9ed   :  { %v9842_v46 = vpop.eup %9841 }
 0x9ee   :  { %v1480_v50 = vmul.f32 2.0, %v9842_v46  ;;  %v1484_v14 = vmul.f32 %v9842_v46, %v11374_v39 }
 0x9ef   :  { %v9844_v7 = vpop.eup %9843 }
 0x9f0   :  { %v1481_v48 = vmul.f32 2.0, %v9844_v7  ;;  %v8457_v13 = vadd.f32 -1.0, %v1480_v50  ;;  %v1485_v9 = vmul.f32 %v9844_v7, %v11370_v36 }
 0x9f2   :  { %v8458_v10 = vadd.f32 -1.0, %v1481_v48 }
 0x9f4   :  { %1490 = vrot.lane.b32.xlu0 %v8458_v10, %s10980_s21 }
 0x9f5   :  { %v9846_v51 = vpop.eup %9845 }
 0x9f6   :  { %v1530_v56 = vmul.f32 2.0, %v9846_v51  ;;  %v1534_v36 = vmul.f32 %v9846_v51, %v11382_v49 }
 0x9f7   :  { %v9848_v52 = vpop.eup %9847 }
 0x9f8   :  { %1488 = vrot.lane.b32.xlu0 %v8457_v13, %s10980_s21  ;;  %v1531_v16 = vmul.f32 2.0, %v9848_v52  ;;  %v8461_v57 = vadd.f32 -1.0, %v1530_v56  ;;  %v1535_v18 = vmul.f32 %v9848_v52, %v11378_v47  ;;  %v1672_v13 = vld [vmem:[#allocation6 + $0x4] sm:$0x1] }
 0x9fa   :  { %v8462_v54 = vadd.f32 -1.0, %v1531_v16 }
 0x9fc   :  { %1540 = vrot.lane.b32.xlu1 %v8462_v54, %s10980_s21  ;;  %v1673_v54 = vld [vmem:[#allocation6 + $0xc] sm:$0x1] }
 0xa00   :  { %1538 = vrot.lane.b32.xlu1 %v8461_v57, %s10980_s21 }
 0xa66   :  { %v1491_v59 = vpop.permute.xlu0 %1490 }
 0xa67   :  { %v1495_v60 = vmul.f32 %v9844_v7, %v1491_v59 }
 0xa69   :  { %1500 = vrot.lane.b32.xlu0 %v1495_v60, %s10981_s25 }
 0xa6a   :  { %v1489_v62 = vpop.permute.xlu0 %1488 }
 0xa6b   :  { %v1494_v63 = vmul.f32 %v9842_v46, %v1489_v62 }
 0xa6d   :  { %1498 = vrot.lane.b32.xlu0 %v1494_v63, %s10981_s25 }
 0xa6e   :  { %v1541_v4 = vpop.permute.xlu1 %1540 }
 0xa6f   :  { %v1545_v5 = vmul.f32 %v9848_v52, %v1541_v4 }
 0xa71   :  { %1550 = vrot.lane.b32.xlu1 %v1545_v5, %s10981_s25 }
 0xa72   :  { %v1539_v6 = vpop.permute.xlu1 %1538 }
 0xa73   :  { %v1544_v8 = vmul.f32 %v9846_v51, %v1539_v6 }
 0xa75   :  { %1548 = vrot.lane.b32.xlu1 %v1544_v8, %s10981_s25 }
 0xadb   :  { %v1501_v11 = vpop.permute.xlu0 %1500 }
 0xadc   :  { %v11436_v12 = vadd.f32 %v1501_v11, %v1485_v9 }
 0xade   :  { %9849 = vtanh.f32 %v11436_v12 }
 0xadf   :  { %v1499_v15 = vpop.permute.xlu0 %1498 }
 0xae0   :  { %v11440_v17 = vadd.f32 %v1499_v15, %v1484_v14 }
 0xae2   :  { %9851 = vtanh.f32 %v11440_v17 }
 0xae3   :  { %v1551_v19 = vpop.permute.xlu1 %1550 }
 0xae4   :  { %v11444_v20 = vadd.f32 %v1551_v19, %v1535_v18 }
 0xae6   :  { %9853 = vtanh.f32 %v11444_v20 }
 0xae7   :  { %v1549_v21 = vpop.permute.xlu1 %1548 }
 0xae8   :  { %v11448_v23 = vadd.f32 %v1549_v21, %v1534_v36 }
 0xaea   :  { %9855 = vtanh.f32 %v11448_v23 }
 0xaeb   :  { %v9850_v39 = vpop.eup %9849 }
 0xaec   :  { %1512 = vrot.lane.b32.xlu0 %v9850_v39, %s10980_s21 }
 0xaef   :  { %v9852_v24 = vpop.eup %9851 }
 0xaf0   :  { %1510 = vrot.lane.b32.xlu0 %v9852_v24, %s10980_s21 }
 0xaf3   :  { %v9854_v26 = vpop.eup %9853 }
 0xaf4   :  { %1562 = vrot.lane.b32.xlu1 %v9854_v26, %s10980_s21 }
 0xaf7   :  { %v9856_v47 = vpop.eup %9855 }
 0xaf8   :  { %1560 = vrot.lane.b32.xlu1 %v9856_v47, %s10980_s21 }
 0xb5e   :  { %v1513_v27 = vpop.permute.xlu0 %1512 }
 0xb5f   :  { %v11455_v29 = vmul.f32 %v9844_v7, %v1513_v27 }
 0xb61   :  { %v1590_v30 = vrot.slane %v11455_v29, 7 }
 0xb62   :  { %v1511_v49 = vpop.permute.xlu0 %1510 }
 0xb63   :  { %v11458_v32 = vmul.f32 %v9842_v46, %v1511_v49 }
 0xb65   :  { %v1591_v33 = vsel %vm1014_vm2, %v1590_v30, %v11458_v32 }
 0xb66   :  { %1592 = vrot.lane.b32.xlu0 %v1591_v33, %s10981_s25  ;;  %v1563_v34 = vpop.permute.xlu1 %1562 }
 0xb67   :  { %v11463_v35 = vmul.f32 %v9848_v52, %v1563_v34 }
 0xb69   :  { %v1674_v38 = vrot.slane %v11463_v35, 7 }
 0xb6a   :  { %v1561_v37 = vpop.permute.xlu1 %1560 }
 0xb6b   :  { %v11466_v45 = vmul.f32 %v9846_v51, %v1561_v37 }
 0xb6d   :  { %v1675_v7 = vsel %vm1014_vm2, %v1674_v38, %v11466_v45 }
 0xb6e   :  { %1676 = vrot.lane.b32.xlu1 %v1675_v7, %s10981_s25 }
 0xbd8   :  { %v1593_v46 = vpop.permute.xlu0 %1592 }
 0xbd9   :  { %9149 = vmatmul.mubr.msk.f32.vlgmr.msra.gmra.mxu0 %vm494_vm0, %v1593_v46 }
 0xbda   :  { %9163 = vmatpush3.msra.mxu0 %v11235_v40  ;;  %9170 = vmatprep.mubr.msk.f32.mxu0 %vm10979_vm1, %v10978_v41  ;;  %v1588_v40 = vld [vmem:[#allocation5 + $0x3] sm:$0x1] }
 0xbdb   :  { %9164 = vmatprep.subr.mxu0 %v10978_v41 }
 0xbdc   :  { %9165 = vmatpush3.msra.mxu0 %v11239_v42 }
 0xbdd   :  { %9166 = vmatprep.subr.mxu0 %v10978_v41 }
 0xbde   :  { %9167 = vmatpush3.msra.mxu0 %v11243_v43 }
 0xbdf   :  { %9168 = vmatprep.subr.mxu0 %v10978_v41 }
 0xbe0   :  { %v1677_v48 = vpop.permute.xlu1 %1676  ;;  %9169 = vmatpush3.msra.mxu0 %v11247_v44 }
 0xbe1   :  { %9160 = vmatmul.mubr.msk.f32.vlgmr.msra.gmra.mxu1 %vm494_vm0, %v1677_v48  ;;  %9184 = vmatprep.subr.mxu0 %v10978_v41 }
 0xbe2   :  { %9174 = vmatpush3.msra.mxu1 %v11267_v0  ;;  %9181 = vmatprep.mubr.msk.f32.mxu1 %vm10979_vm1, %v10978_v41  ;;  %v1589_v0 = vld [vmem:[#allocation5 + $0xb] sm:$0x1] }
 0xbe3   :  { %9175 = vmatprep.subr.mxu1 %v10978_v41 }
 0xbe4   :  { %9176 = vmatpush3.msra.mxu1 %v11272_v1 }
 0xbe5   :  { %9177 = vmatprep.subr.mxu1 %v10978_v41 }
 0xbe6   :  { %9178 = vmatpush3.msra.mxu1 %v11278_v2 }
 0xbe7   :  { %9179 = vmatprep.subr.mxu1 %v10978_v41 }
 0xbe8   :  { %9180 = vmatpush3.msra.mxu1 %v11282_v3 }
 0xbe9   :  { %9195 = vmatprep.subr.mxu1 %v10978_v41 }
 0xc99   :  { %v1662_v42 = vpop.f32.mrf.mxu0 }
 0xc9a   :  { %v1667_v43 = vrot.slane %v1662_v42, 1  ;;  %v1670_v44 = vadd.f32 %v1662_v42, %v1588_v40 }
 0xc9b   :  { %v9150_v10 = vpop.f32.mrf.mxu0 }
 0xc9c   :  { %v1671_v50 = vadd.f32 %v1667_v43, %v1589_v0  ;;  %v8465_v51 = vmul.f32 -1.442695, %v1670_v44 }
 0xc9e   :  { %9857 = vpow2.f32 %v8465_v51  ;;  %v8466_v1 = vmul.f32 -1.442695, %v1671_v50 }
 0xca0   :  { %9859 = vpow2.f32 %v8466_v1 }
 0xca1   :  { %v1746_v52 = vpop.f32.mrf.mxu1 }
 0xca2   :  { %v1751_v2 = vrot.slane %v1746_v52, 1  ;;  %v1754_v16 = vadd.f32 %v1746_v52, %v1672_v13 }
 0xca3   :  { %v9161_v56 = vpop.f32.mrf.mxu1 }
 0xca4   :  { %v1755_v3 = vadd.f32 %v1751_v2, %v1673_v54  ;;  %v8469_v57 = vmul.f32 -1.442695, %v1754_v16 }
 0xca6   :  { %9861 = vpow2.f32 %v8469_v57  ;;  %v8470_v59 = vmul.f32 -1.442695, %v1755_v3 }
 0xca8   :  { %9863 = vpow2.f32 %v8470_v59 }
 0xcab   :  { %v9858_v60 = vpop.eup %9857 }
 0xcac   :  { %v1762_v62 = vadd.f32 1.0, %v9858_v60 }
 0xcad   :  { %v9860_v63 = vpop.eup %9859 }
 0xcae   :  { %v1763_v4 = vadd.f32 1.0, %v9860_v63  ;;  %9865 = vrcp.f32 %v1762_v62 }
 0xcb0   :  { %9867 = vrcp.f32 %v1763_v4 }
 0xcb3   :  { %v9862_v5 = vpop.eup %9861 }
 0xcb4   :  { %v1812_v6 = vadd.f32 1.0, %v9862_v5 }
 0xcb5   :  { %v9864_v8 = vpop.eup %9863 }
 0xcb6   :  { %v1813_v9 = vadd.f32 1.0, %v9864_v8  ;;  %9869 = vrcp.f32 %v1812_v6  ;;  %v11538_v8 = vld [vmem:[#allocation16 + $0x18] sm:$0xff] }
 0xcb8   :  { %9871 = vrcp.f32 %v1813_v9  ;;  %v11544_v9 = vld [vmem:[#allocation16 + $0x10] sm:$0xff] }
 0xcbb   :  { %v9866_v11 = vpop.eup %9865 }
 0xcbc   :  { %v1768_v19 = vmul.f32 2.0, %v9866_v11  ;;  %v1772_v43 = vmul.f32 %v9866_v11, %v11440_v17 }
 0xcbd   :  { %v9868_v14 = vpop.eup %9867 }
 0xcbe   :  { %v1769_v15 = vmul.f32 2.0, %v9868_v14  ;;  %v8467_v21 = vadd.f32 -1.0, %v1768_v19  ;;  %v1773_v48 = vmul.f32 %v9868_v14, %v11436_v12  ;;  %v11563_v19 = vld [vmem:[#allocation21 + $0x10] sm:$0xff] }
 0xcc0   :  { %v8468_v18 = vadd.f32 -1.0, %v1769_v15  ;;  %v11552_v15 = vld [vmem:[#allocation16] sm:$0xff] }
 0xcc2   :  { %1778 = vrot.lane.b32.xlu0 %v8468_v18, %s10980_s21  ;;  %v11557_v18 = vld [vmem:[#allocation21 + $0x18] sm:$0xff] }
 0xcc3   :  { %v9870_v36 = vpop.eup %9869 }
 0xcc4   :  { %v1818_v47 = vmul.f32 2.0, %v9870_v36  ;;  %v1822_v12 = vmul.f32 %v9870_v36, %v11448_v23 }
 0xcc5   :  { %v9872_v39 = vpop.eup %9871 }
 0xcc6   :  { %1776 = vrot.lane.b32.xlu0 %v8467_v21, %s10980_s21  ;;  %v1819_v24 = vmul.f32 2.0, %v9872_v39  ;;  %v8471_v27 = vadd.f32 -1.0, %v1818_v47  ;;  %v1823_v10 = vmul.f32 %v9872_v39, %v11444_v20  ;;  %v11571_v21 = vld [vmem:[#allocation21] sm:$0xff] }
 0xcc8   :  { %v8472_v26 = vadd.f32 -1.0, %v1819_v24 }
 0xcca   :  { %1828 = vrot.lane.b32.xlu1 %v8472_v26, %s10980_s21 }
 0xcce   :  { %1826 = vrot.lane.b32.xlu1 %v8471_v27, %s10980_s21  ;;  %v1877_v27 = vld [vmem:[#allocation5 + $0xc] sm:$0x1] }
 0xd34   :  { %v1779_v49 = vpop.permute.xlu0 %1778 }
 0xd35   :  { %v1783_v30 = vmul.f32 %v9868_v14, %v1779_v49 }
 0xd37   :  { %1788 = vrot.lane.b32.xlu0 %v1783_v30, %s10981_s25 }
 0xd38   :  { %v1777_v33 = vpop.permute.xlu0 %1776 }
 0xd39   :  { %v1782_v34 = vmul.f32 %v9866_v11, %v1777_v33 }
 0xd3b   :  { %1786 = vrot.lane.b32.xlu0 %v1782_v34, %s10981_s25 }
 0xd3c   :  { %v1829_v37 = vpop.permute.xlu1 %1828 }
 0xd3d   :  { %v1833_v38 = vmul.f32 %v9872_v39, %v1829_v37  ;;  %v1960_v37 = vld [vmem:[#allocation6 + $0x3] sm:$0x1] }
 0xd3f   :  { %1838 = vrot.lane.b32.xlu1 %v1833_v38, %s10981_s25 }
 0xd40   :  { %v1827_v7 = vpop.permute.xlu1 %1826 }
 0xd41   :  { %v1832_v46 = vmul.f32 %v9870_v36, %v1827_v7 }
 0xd43   :  { %1836 = vrot.lane.b32.xlu1 %v1832_v46, %s10981_s25 }
 0xda9   :  { %v1789_v40 = vpop.permute.xlu0 %1788 }
 0xdaa   :  { %v11502_v42 = vadd.f32 %v1789_v40, %v1773_v48  ;;  %v1961_v48 = vld [vmem:[#allocation6 + $0xb] sm:$0x1] }
 0xdac   :  { %9873 = vtanh.f32 %v11502_v42 }
 0xdad   :  { %v1787_v44 = vpop.permute.xlu0 %1786 }
 0xdae   :  { %v11506_v0 = vadd.f32 %v1787_v44, %v1772_v43 }
 0xdb0   :  { %9875 = vtanh.f32 %v11506_v0 }
 0xdb1   :  { %v1839_v50 = vpop.permute.xlu1 %1838 }
 0xdb2   :  { %v11510_v51 = vadd.f32 %v1839_v50, %v1823_v10 }
 0xdb4   :  { %9877 = vtanh.f32 %v11510_v51 }
 0xdb5   :  { %v1837_v1 = vpop.permute.xlu1 %1836 }
 0xdb6   :  { %v11514_v13 = vadd.f32 %v1837_v1, %v1822_v12 }
 0xdb8   :  { %9879 = vtanh.f32 %v11514_v13 }
 0xdb9   :  { %v9874_v17 = vpop.eup %9873 }
 0xdba   :  { %1800 = vrot.lane.b32.xlu0 %v9874_v17, %s10980_s21 }
 0xdbd   :  { %v9876_v52 = vpop.eup %9875 }
 0xdbe   :  { %1798 = vrot.lane.b32.xlu0 %v9876_v52, %s10980_s21 }
 0xdc1   :  { %v9878_v2 = vpop.eup %9877 }
 0xdc2   :  { %1850 = vrot.lane.b32.xlu1 %v9878_v2, %s10980_s21 }
 0xdc5   :  { %v9880_v20 = vpop.eup %9879 }
 0xdc6   :  { %1848 = vrot.lane.b32.xlu1 %v9880_v20, %s10980_s21 }
 0xe2c   :  { %v1801_v16 = vpop.permute.xlu0 %1800 }
 0xe2d   :  { %v11521_v54 = vmul.f32 %v9868_v14, %v1801_v16 }
 0xe2f   :  { %v1878_v56 = vrot.slane %v11521_v54, 7 }
 0xe30   :  { %v1799_v23 = vpop.permute.xlu0 %1798 }
 0xe31   :  { %v11524_v3 = vmul.f32 %v9866_v11, %v1799_v23  ;;  %v11548_v11 = vld [vmem:[#allocation16 + $0x8] sm:$0xff] }
 0xe33   :  { %v1879_v57 = vsel %vm1014_vm2, %v1878_v56, %v11524_v3 }
 0xe34   :  { %1880 = vrot.lane.b32.xlu0 %v1879_v57, %s10981_s25  ;;  %v1851_v59 = vpop.permute.xlu1 %1850 }
 0xe35   :  { %v11529_v60 = vmul.f32 %v9872_v39, %v1851_v59  ;;  %v1876_v39 = vld [vmem:[#allocation5 + $0x4] sm:$0x1] }
 0xe37   :  { %v1962_v63 = vrot.slane %v11529_v60, 7 }
 0xe38   :  { %v1849_v62 = vpop.permute.xlu1 %1848 }
 0xe39   :  { %v11532_v4 = vmul.f32 %v9870_v36, %v1849_v62  ;;  %v11567_v36 = vld [vmem:[#allocation21 + $0x8] sm:$0xff] }
 0xe3b   :  { %v1963_v5 = vsel %vm1014_vm2, %v1962_v63, %v11532_v4 }
 0xe3c   :  { %1964 = vrot.lane.b32.xlu1 %v1963_v5, %s10981_s25 }
 0xea6   :  { %v1881_v6 = vpop.permute.xlu0 %1880 }
 0xea7   :  { %9171 = vmatmul.mubr.msk.f32.vlgmr.msra.gmra.mxu0 %vm494_vm0, %v1881_v6 }
 0xea8   :  { %9185 = vmatpush3.msra.mxu0 %v11538_v8  ;;  %9192 = vmatprep.mubr.msk.f32.mxu0 %vm10979_vm1, %v10978_v41 }
 0xea9   :  { %9186 = vmatprep.subr.mxu0 %v10978_v41 }
 0xeaa   :  { %9187 = vmatpush3.msra.mxu0 %v11544_v9 }
 0xeab   :  { %9188 = vmatprep.subr.mxu0 %v10978_v41 }
 0xeac   :  { %9189 = vmatpush3.msra.mxu0 %v11548_v11 }
 0xead   :  { %9190 = vmatprep.subr.mxu0 %v10978_v41 }
 0xeae   :  { %v1965_v14 = vpop.permute.xlu1 %1964  ;;  %9191 = vmatpush3.msra.mxu0 %v11552_v15 }
 0xeaf   :  { %9182 = vmatmul.mubr.msk.f32.vlgmr.msra.gmra.mxu1 %vm494_vm0, %v1965_v14  ;;  %9206 = vmatprep.subr.mxu0 %v10978_v41 }
 0xeb0   :  { %9196 = vmatpush3.msra.mxu1 %v11557_v18  ;;  %9203 = vmatprep.mubr.msk.f32.mxu1 %vm10979_vm1, %v10978_v41 }
 0xeb1   :  { %9197 = vmatprep.subr.mxu1 %v10978_v41 }
 0xeb2   :  { %9198 = vmatpush3.msra.mxu1 %v11563_v19 }
 0xeb3   :  { %9199 = vmatprep.subr.mxu1 %v10978_v41 }
 0xeb4   :  { %9200 = vmatpush3.msra.mxu1 %v11567_v36 }
 0xeb5   :  { %9201 = vmatprep.subr.mxu1 %v10978_v41 }
 0xeb6   :  { %9202 = vmatpush3.msra.mxu1 %v11571_v21 }
 0xeb7   :  { %9217 = vmatprep.subr.mxu1 %v10978_v41 }
 0xf67   :  { %v1950_v24 = vpop.f32.mrf.mxu0 }
 0xf68   :  { %v1955_v26 = vrot.slane %v1950_v24, 1  ;;  %v1958_v47 = vadd.f32 %v1950_v24, %v1876_v39 }
 0xf69   :  { %v9172_v49 = vpop.f32.mrf.mxu0 }
 0xf6a   :  { %v1959_v30 = vadd.f32 %v1955_v26, %v1877_v27  ;;  %v8475_v33 = vmul.f32 -1.442695, %v1958_v47 }
 0xf6c   :  { %9881 = vpow2.f32 %v8475_v33  ;;  %v8476_v34 = vmul.f32 -1.442695, %v1959_v30 }
 0xf6e   :  { %9883 = vpow2.f32 %v8476_v34 }
 0xf6f   :  { %v2034_v38 = vpop.f32.mrf.mxu1 }
 0xf70   :  { %v2039_v7 = vrot.slane %v2034_v38, 1  ;;  %v2042_v46 = vadd.f32 %v2034_v38, %v1960_v37 }
 0xf71   :  { %v9183_v40 = vpop.f32.mrf.mxu1 }
 0xf72   :  { %v2043_v43 = vadd.f32 %v2039_v7, %v1961_v48  ;;  %v8479_v44 = vmul.f32 -1.442695, %v2042_v46 }
 0xf74   :  { %9885 = vpow2.f32 %v8479_v44  ;;  %v8480_v10 = vmul.f32 -1.442695, %v2043_v43 }
 0xf76   :  { %9887 = vpow2.f32 %v8480_v10 }
 0xf79   :  { %v9882_v50 = vpop.eup %9881 }
 0xf7a   :  { %v2050_v12 = vadd.f32 1.0, %v9882_v50 }
 0xf7b   :  { %v9884_v1 = vpop.eup %9883 }
 0xf7c   :  { %v2051_v17 = vadd.f32 1.0, %v9884_v1  ;;  %9889 = vrcp.f32 %v2050_v12 }
 0xf7e   :  { %9891 = vrcp.f32 %v2051_v17 }
 0xf81   :  { %v9886_v52 = vpop.eup %9885 }
 0xf82   :  { %v2100_v2 = vadd.f32 1.0, %v9886_v52 }
 0xf83   :  { %v9888_v20 = vpop.eup %9887 }
 0xf84   :  { %v2101_v16 = vadd.f32 1.0, %v9888_v20  ;;  %9893 = vrcp.f32 %v2100_v2 }
 0xf86   :  { %9895 = vrcp.f32 %v2101_v16 }
 0xf89   :  { %v9890_v23 = vpop.eup %9889 }
 0xf8a   :  { %v2056_v62 = vmul.f32 2.0, %v9890_v23  ;;  %v2060_v40 = vmul.f32 %v9890_v23, %v11506_v0 }
 0xf8b   :  { %v9892_v56 = vpop.eup %9891 }
 0xf8c   :  { %v2057_v57 = vmul.f32 2.0, %v9892_v56  ;;  %v8477_v5 = vadd.f32 -1.0, %v2056_v62  ;;  %v2061_v7 = vmul.f32 %v9892_v56, %v11502_v42 }
 0xf8e   :  { %v8478_v59 = vadd.f32 -1.0, %v2057_v57 }
 0xf90   :  { %2066 = vrot.lane.b32.xlu0 %v8478_v59, %s10980_s21 }
 0xf91   :  { %v9894_v63 = vpop.eup %9893 }
 0xf92   :  { %v2106_v24 = vmul.f32 2.0, %v9894_v63  ;;  %v2110_v42 = vmul.f32 %v9894_v63, %v11514_v13 }
 0xf93   :  { %v9896_v6 = vpop.eup %9895 }
 0xf94   :  { %2064 = vrot.lane.b32.xlu0 %v8477_v5, %s10980_s21  ;;  %v2107_v14 = vmul.f32 2.0, %v9896_v6  ;;  %v8481_v26 = vadd.f32 -1.0, %v2106_v24  ;;  %v2111_v10 = vmul.f32 %v9896_v6, %v11510_v51 }
 0xf96   :  { %v8482_v39 = vadd.f32 -1.0, %v2107_v14 }
 0xf98   :  { %2116 = vrot.lane.b32.xlu1 %v8482_v39, %s10980_s21 }
 0xf9c   :  { %2114 = vrot.lane.b32.xlu1 %v8481_v26, %s10980_s21 }
0x1002   :  { %v2067_v47 = vpop.permute.xlu0 %2066 }
0x1003   :  { %v2071_v27 = vmul.f32 %v9892_v56, %v2067_v47 }
0x1005   :  { %2076 = vrot.lane.b32.xlu0 %v2071_v27, %s10981_s25 }
0x1006   :  { %v2065_v49 = vpop.permute.xlu0 %2064 }
0x1007   :  { %v2070_v30 = vmul.f32 %v9890_v23, %v2065_v49 }
0x1009   :  { %2074 = vrot.lane.b32.xlu0 %v2070_v30, %s10981_s25  ;;  %v2165_v30 = vld [vmem:[#allocation5 + $0xd] sm:$0x1] }
0x100a   :  { %v2117_v33 = vpop.permute.xlu1 %2116 }
0x100b   :  { %v2121_v34 = vmul.f32 %v9896_v6, %v2117_v33 }
0x100d   :  { %2126 = vrot.lane.b32.xlu1 %v2121_v34, %s10981_s25 }
0x100e   :  { %v2115_v37 = vpop.permute.xlu1 %2114 }
0x100f   :  { %v2120_v38 = vmul.f32 %v9894_v63, %v2115_v37 }
0x1011   :  { %2124 = vrot.lane.b32.xlu1 %v2120_v38, %s10981_s25 }
0x1077   :  { %v2077_v46 = vpop.permute.xlu0 %2076 }
0x1078   :  { %v11584_v48 = vadd.f32 %v2077_v46, %v2061_v7  ;;  %v2248_v7 = vld [vmem:[#allocation6 + $0x2] sm:$0x1] }
0x107a   :  { %9897 = vtanh.f32 %v11584_v48 }
0x107b   :  { %v2075_v43 = vpop.permute.xlu0 %2074 }
0x107c   :  { %v11588_v44 = vadd.f32 %v2075_v43, %v2060_v40 }
0x107e   :  { %9899 = vtanh.f32 %v11588_v44 }
0x107f   :  { %v2127_v50 = vpop.permute.xlu1 %2126 }
0x1080   :  { %v11592_v12 = vadd.f32 %v2127_v50, %v2111_v10  ;;  %v2249_v10 = vld [vmem:[#allocation6 + $0xa] sm:$0x1] }
0x1082   :  { %9901 = vtanh.f32 %v11592_v12 }
0x1083   :  { %v2125_v1 = vpop.permute.xlu1 %2124 }
0x1084   :  { %v11596_v17 = vadd.f32 %v2125_v1, %v2110_v42 }
0x1086   :  { %9903 = vtanh.f32 %v11596_v17 }
0x1087   :  { %v9898_v0 = vpop.eup %9897 }
0x1088   :  { %2088 = vrot.lane.b32.xlu0 %v9898_v0, %s10980_s21 }
0x108b   :  { %v9900_v52 = vpop.eup %9899 }
0x108c   :  { %2086 = vrot.lane.b32.xlu0 %v9900_v52, %s10980_s21 }
0x108f   :  { %v9902_v2 = vpop.eup %9901 }
0x1090   :  { %2138 = vrot.lane.b32.xlu1 %v9902_v2, %s10980_s21 }
0x1093   :  { %v9904_v51 = vpop.eup %9903 }
0x1094   :  { %2136 = vrot.lane.b32.xlu1 %v9904_v51, %s10980_s21 }
0x10fa   :  { %v2089_v20 = vpop.permute.xlu0 %2088 }
0x10fb   :  { %v11603_v16 = vmul.f32 %v9892_v56, %v2089_v20 }
0x10fd   :  { %v2166_v57 = vrot.slane %v11603_v16, 7 }
0x10fe   :  { %v2087_v13 = vpop.permute.xlu0 %2086 }
0x10ff   :  { %v11606_v59 = vmul.f32 %v9890_v23, %v2087_v13 }
0x1101   :  { %v2167_v62 = vsel %vm1014_vm2, %v2166_v57, %v11606_v59 }
0x1102   :  { %2168 = vrot.lane.b32.xlu0 %v2167_v62, %s10981_s25  ;;  %v2139_v5 = vpop.permute.xlu1 %2138 }
0x1103   :  { %v11611_v14 = vmul.f32 %v9896_v6, %v2139_v5  ;;  %v2164_v6 = vld [vmem:[#allocation5 + $0x5] sm:$0x1] }
0x1105   :  { %v2250_v24 = vrot.slane %v11611_v14, 7 }
0x1106   :  { %v2137_v39 = vpop.permute.xlu1 %2136 }
0x1107   :  { %v11614_v26 = vmul.f32 %v9894_v63, %v2137_v39 }
0x1109   :  { %v2251_v56 = vsel %vm1014_vm2, %v2250_v24, %v11614_v26 }
0x110a   :  { %2252 = vrot.lane.b32.xlu1 %v2251_v56, %s10981_s25 }
0x1174   :  { %v2169_v23 = vpop.permute.xlu0 %2168 }
0x1175   :  { %9193 = vmatmul.mubr.msk.f32.vlgmr.msra.gmra.mxu0 %vm494_vm0, %v2169_v23 }
0x1176   :  { %9207 = vmatpush3.msra.mxu0 %v11538_v8  ;;  %9214 = vmatprep.mubr.msk.f32.mxu0 %vm10979_vm1, %v10978_v41 }
0x1177   :  { %9208 = vmatprep.subr.mxu0 %v10978_v41 }
0x1178   :  { %9209 = vmatpush3.msra.mxu0 %v11544_v9 }
0x1179   :  { %9210 = vmatprep.subr.mxu0 %v10978_v41 }
0x117a   :  { %9211 = vmatpush3.msra.mxu0 %v11548_v11 }
0x117b   :  { %9212 = vmatprep.subr.mxu0 %v10978_v41 }
0x117c   :  { %v2253_v63 = vpop.permute.xlu1 %2252  ;;  %9213 = vmatpush3.msra.mxu0 %v11552_v15 }
0x117d   :  { %9204 = vmatmul.mubr.msk.f32.vlgmr.msra.gmra.mxu1 %vm494_vm0, %v2253_v63  ;;  %9228 = vmatprep.subr.mxu0 %v10978_v41 }
0x117e   :  { %9218 = vmatpush3.msra.mxu1 %v11557_v18  ;;  %9225 = vmatprep.mubr.msk.f32.mxu1 %vm10979_vm1, %v10978_v41 }
0x117f   :  { %9219 = vmatprep.subr.mxu1 %v10978_v41 }
0x1180   :  { %9220 = vmatpush3.msra.mxu1 %v11563_v19 }
0x1181   :  { %9221 = vmatprep.subr.mxu1 %v10978_v41 }
0x1182   :  { %9222 = vmatpush3.msra.mxu1 %v11567_v36 }
0x1183   :  { %9223 = vmatprep.subr.mxu1 %v10978_v41 }
0x1184   :  { %9224 = vmatpush3.msra.mxu1 %v11571_v21 }
0x1185   :  { %9239 = vmatprep.subr.mxu1 %v10978_v41 }
0x1235   :  { %v2238_v47 = vpop.f32.mrf.mxu0 }
0x1236   :  { %v2243_v27 = vrot.slane %v2238_v47, 1  ;;  %v2246_v49 = vadd.f32 %v2238_v47, %v2164_v6 }
0x1237   :  { %v9194_v33 = vpop.f32.mrf.mxu0 }
0x1238   :  { %v2247_v34 = vadd.f32 %v2243_v27, %v2165_v30  ;;  %v8485_v37 = vmul.f32 -1.442695, %v2246_v49 }
0x123a   :  { %9905 = vpow2.f32 %v8485_v37  ;;  %v8486_v38 = vmul.f32 -1.442695, %v2247_v34 }
0x123c   :  { %9907 = vpow2.f32 %v8486_v38 }
0x123d   :  { %v2322_v46 = vpop.f32.mrf.mxu1 }
0x123e   :  { %v2327_v40 = vrot.slane %v2322_v46, 1  ;;  %v2330_v43 = vadd.f32 %v2322_v46, %v2248_v7 }
0x123f   :  { %v9205_v50 = vpop.f32.mrf.mxu1 }
0x1240   :  { %v2331_v42 = vadd.f32 %v2327_v40, %v2249_v10  ;;  %v8489_v1 = vmul.f32 -1.442695, %v2330_v43 }
0x1242   :  { %9909 = vpow2.f32 %v8489_v1  ;;  %v8490_v0 = vmul.f32 -1.442695, %v2331_v42 }
0x1244   :  { %9911 = vpow2.f32 %v8490_v0 }
0x1247   :  { %v9906_v52 = vpop.eup %9905 }
0x1248   :  { %v2338_v2 = vadd.f32 1.0, %v9906_v52 }
0x1249   :  { %v9908_v51 = vpop.eup %9907 }
0x124a   :  { %v2339_v20 = vadd.f32 1.0, %v9908_v51  ;;  %9913 = vrcp.f32 %v2338_v2 }
0x124c   :  { %9915 = vrcp.f32 %v2339_v20 }
0x124f   :  { %v9910_v13 = vpop.eup %9909 }
0x1250   :  { %v2388_v57 = vadd.f32 1.0, %v9910_v13 }
0x1251   :  { %v9912_v62 = vpop.eup %9911 }
0x1252   :  { %v2389_v5 = vadd.f32 1.0, %v9912_v62  ;;  %9917 = vrcp.f32 %v2388_v57 }
0x1254   :  { %9919 = vrcp.f32 %v2389_v5 }
0x1257   :  { %v9914_v39 = vpop.eup %9913 }
0x1258   :  { %v2344_v63 = vmul.f32 2.0, %v9914_v39  ;;  %v2348_v52 = vmul.f32 %v9914_v39, %v11588_v44 }
0x1259   :  { %v9916_v24 = vpop.eup %9915 }
0x125a   :  { %v2345_v56 = vmul.f32 2.0, %v9916_v24  ;;  %v8487_v47 = vadd.f32 -1.0, %v2344_v63  ;;  %v2349_v42 = vmul.f32 %v9916_v24, %v11584_v48 }
0x125c   :  { %v8488_v23 = vadd.f32 -1.0, %v2345_v56 }
0x125e   :  { %2354 = vrot.lane.b32.xlu0 %v8488_v23, %s10980_s21 }
0x125f   :  { %v9918_v6 = vpop.eup %9917 }
0x1260   :  { %v2394_v33 = vmul.f32 2.0, %v9918_v6  ;;  %v2398_v48 = vmul.f32 %v9918_v6, %v11596_v17 }
0x1261   :  { %v9920_v27 = vpop.eup %9919 }
0x1262   :  { %2352 = vrot.lane.b32.xlu0 %v8487_v47, %s10980_s21  ;;  %v2395_v49 = vmul.f32 2.0, %v9920_v27  ;;  %v8491_v34 = vadd.f32 -1.0, %v2394_v33  ;;  %v2399_v20 = vmul.f32 %v9920_v27, %v11592_v12 }
0x1264   :  { %v8492_v30 = vadd.f32 -1.0, %v2395_v49 }
0x1266   :  { %2404 = vrot.lane.b32.xlu1 %v8492_v30, %s10980_s21 }
0x126a   :  { %2402 = vrot.lane.b32.xlu1 %v8491_v34, %s10980_s21 }
0x12d0   :  { %v2355_v37 = vpop.permute.xlu0 %2354 }
0x12d1   :  { %v2359_v38 = vmul.f32 %v9916_v24, %v2355_v37 }
0x12d3   :  { %2364 = vrot.lane.b32.xlu0 %v2359_v38, %s10981_s25 }
0x12d4   :  { %v2353_v7 = vpop.permute.xlu0 %2352 }
0x12d5   :  { %v2358_v46 = vmul.f32 %v9914_v39, %v2353_v7 }
0x12d7   :  { %2362 = vrot.lane.b32.xlu0 %v2358_v46, %s10981_s25 }
0x12d8   :  { %v2405_v40 = vpop.permute.xlu1 %2404 }
0x12d9   :  { %v2409_v43 = vmul.f32 %v9920_v27, %v2405_v40 }
0x12db   :  { %2414 = vrot.lane.b32.xlu1 %v2409_v43, %s10981_s25 }
0x12dc   :  { %v2403_v10 = vpop.permute.xlu1 %2402 }
0x12dd   :  { %v2408_v50 = vmul.f32 %v9918_v6, %v2403_v10 }
0x12df   :  { %2412 = vrot.lane.b32.xlu1 %v2408_v50, %s10981_s25 }
0x1345   :  { %v2365_v1 = vpop.permute.xlu0 %2364 }
0x1346   :  { %v11650_v0 = vadd.f32 %v2365_v1, %v2349_v42 }
0x1348   :  { %9921 = vtanh.f32 %v11650_v0 }
0x1349   :  { %v2363_v2 = vpop.permute.xlu0 %2362 }
0x134a   :  { %v11654_v51 = vadd.f32 %v2363_v2, %v2348_v52 }
0x134c   :  { %9923 = vtanh.f32 %v11654_v51 }
0x134d   :  { %v2415_v13 = vpop.permute.xlu1 %2414 }
0x134e   :  { %v11658_v57 = vadd.f32 %v2415_v13, %v2399_v20 }
0x1350   :  { %9925 = vtanh.f32 %v11658_v57 }
0x1351   :  { %v2413_v62 = vpop.permute.xlu1 %2412 }
0x1352   :  { %v11662_v5 = vadd.f32 %v2413_v62, %v2398_v48 }
0x1354   :  { %9927 = vtanh.f32 %v11662_v5 }
0x1355   :  { %v9922_v44 = vpop.eup %9921 }
0x1356   :  { %2376 = vrot.lane.b32.xlu0 %v9922_v44, %s10980_s21 }
0x1359   :  { %v9924_v56 = vpop.eup %9923 }
0x135a   :  { %2374 = vrot.lane.b32.xlu0 %v9924_v56, %s10980_s21 }
0x135d   :  { %v9926_v23 = vpop.eup %9925 }
0x135e   :  { %2426 = vrot.lane.b32.xlu1 %v9926_v23, %s10980_s21 }
0x1361   :  { %v9928_v12 = vpop.eup %9927 }
0x1362   :  { %2424 = vrot.lane.b32.xlu1 %v9928_v12, %s10980_s21 }
0x13c8   :  { %v2377_v63 = vpop.permute.xlu0 %2376 }
0x13c9   :  { %v11669_v47 = vmul.f32 %v9916_v24, %v2377_v63 }
0x13cb   :  { %v2454_v49 = vrot.slane %v11669_v47, 7 }
0x13cc   :  { %v2375_v17 = vpop.permute.xlu0 %2374 }
0x13cd   :  { %v11672_v30 = vmul.f32 %v9914_v39, %v2375_v17 }
0x13cf   :  { %v2455_v33 = vsel %vm1014_vm2, %v2454_v49, %v11672_v30 }
0x13d0   :  { %2456 = vrot.lane.b32.xlu0 %v2455_v33, %s10981_s25  ;;  %v2427_v34 = vpop.permute.xlu1 %2426 }
0x13d1   :  { %v11677_v37 = vmul.f32 %v9920_v27, %v2427_v34 }
0x13d3   :  { %v2538_v7 = vrot.slane %v11677_v37, 7 }
0x13d4   :  { %v2425_v38 = vpop.permute.xlu1 %2424 }
0x13d5   :  { %v11680_v46 = vmul.f32 %v9918_v6, %v2425_v38 }
0x13d7   :  { %v2539_v24 = vsel %vm1014_vm2, %v2538_v7, %v11680_v46 }
0x13d8   :  { %2540 = vrot.lane.b32.xlu1 %v2539_v24, %s10981_s25 }
0x1442   :  { %v2457_v39 = vpop.permute.xlu0 %2456 }
0x1443   :  { %9215 = vmatmul.mubr.msk.f32.vlgmr.msra.gmra.mxu0 %vm494_vm0, %v2457_v39 }
0x1444   :  { %9229 = vmatpush3.msra.mxu0 %v11538_v8  ;;  %9236 = vmatprep.mubr.msk.f32.mxu0 %vm10979_vm1, %v10978_v41  ;;  %v2452_v8 = vld [vmem:[#allocation5 + $0x6] sm:$0x1] }
0x1445   :  { %9230 = vmatprep.subr.mxu0 %v10978_v41 }
0x1446   :  { %9231 = vmatpush3.msra.mxu0 %v11544_v9 }
0x1447   :  { %9232 = vmatprep.subr.mxu0 %v10978_v41 }
0x1448   :  { %9233 = vmatpush3.msra.mxu0 %v11548_v11 }
0x1449   :  { %9234 = vmatprep.subr.mxu0 %v10978_v41 }
0x144a   :  { %v2541_v6 = vpop.permute.xlu1 %2540  ;;  %9235 = vmatpush3.msra.mxu0 %v11552_v15 }
0x144b   :  { %9226 = vmatmul.mubr.msk.f32.vlgmr.msra.gmra.mxu1 %vm494_vm0, %v2541_v6 }
0x144c   :  { %9240 = vmatpush3.msra.mxu1 %v11557_v18  ;;  %9247 = vmatprep.mubr.msk.f32.mxu1 %vm10979_vm1, %v10978_v41  ;;  %v2453_v18 = vld [vmem:[#allocation5 + $0xe] sm:$0x1] }
0x144d   :  { %9241 = vmatprep.subr.mxu1 %v10978_v41 }
0x144e   :  { %9242 = vmatpush3.msra.mxu1 %v11563_v19  ;;  %v2536_v19 = vld [vmem:[#allocation6 + $0x1] sm:$0x1] }
0x144f   :  { %9243 = vmatprep.subr.mxu1 %v10978_v41 }
0x1450   :  { %9244 = vmatpush3.msra.mxu1 %v11567_v36  ;;  %v2537_v36 = vld [vmem:[#allocation6 + $0x9] sm:$0x1] }
0x1451   :  { %9245 = vmatprep.subr.mxu1 %v10978_v41 }
0x1452   :  { %9246 = vmatpush3.msra.mxu1 %v11571_v21 }
0x1503   :  { %v2526_v9 = vpop.f32.mrf.mxu0 }
0x1504   :  { %v2531_v11 = vrot.slane %v2526_v9, 1  ;;  %v2534_v15 = vadd.f32 %v2526_v9, %v2452_v8 }
0x1505   :  { %v9216_v27 = vpop.f32.mrf.mxu0 }
0x1506   :  { %v2535_v40 = vadd.f32 %v2531_v11, %v2453_v18  ;;  %v8495_v43 = vmul.f32 -1.442695, %v2534_v15 }
0x1508   :  { %9929 = vpow2.f32 %v8495_v43  ;;  %v8496_v10 = vmul.f32 -1.442695, %v2535_v40 }
0x150a   :  { %9931 = vpow2.f32 %v8496_v10 }
0x150b   :  { %v2610_v50 = vpop.f32.mrf.mxu1 }
0x150c   :  { %v2615_v42 = vrot.slane %v2610_v50, 1  ;;  %v2618_v1 = vadd.f32 %v2610_v50, %v2536_v19 }
0x150d   :  { %v9227_v52 = vpop.f32.mrf.mxu1 }
0x150e   :  { %v2619_v2 = vadd.f32 %v2615_v42, %v2537_v36  ;;  %v8499_v20 = vmul.f32 -1.442695, %v2618_v1 }
0x1510   :  { %9933 = vpow2.f32 %v8499_v20  ;;  %v8500_v21 = vmul.f32 -1.442695, %v2619_v2 }
0x1512   :  { %9935 = vpow2.f32 %v8500_v21 }
0x1515   :  { %v9930_v13 = vpop.eup %9929 }
0x1516   :  { %v2626_v48 = vadd.f32 1.0, %v9930_v13 }
0x1517   :  { %v9932_v62 = vpop.eup %9931 }
0x1518   :  { %v2627_v44 = vadd.f32 1.0, %v9932_v62  ;;  %9937 = vrcp.f32 %v2626_v48 }
0x151a   :  { %9939 = vrcp.f32 %v2627_v44 }
0x151d   :  { %v9934_v56 = vpop.eup %9933 }
0x151e   :  { %v2676_v23 = vadd.f32 1.0, %v9934_v56 }
0x151f   :  { %v9936_v12 = vpop.eup %9935 }
0x1520   :  { %v2677_v63 = vadd.f32 1.0, %v9936_v12  ;;  %9941 = vrcp.f32 %v2676_v23 }
0x1522   :  { %9943 = vrcp.f32 %v2677_v63 }
0x1525   :  { %v9938_v17 = vpop.eup %9937 }
0x1526   :  { %v2632_v38 = vmul.f32 2.0, %v9938_v17  ;;  %v2636_v52 = vmul.f32 %v9938_v17, %v11654_v51 }
0x1527   :  { %v9940_v49 = vpop.eup %9939 }
0x1528   :  { %v2633_v33 = vmul.f32 2.0, %v9940_v49  ;;  %v8497_v24 = vadd.f32 -1.0, %v2632_v38  ;;  %v2637_v42 = vmul.f32 %v9940_v49, %v11650_v0 }
0x152a   :  { %v8498_v34 = vadd.f32 -1.0, %v2633_v33 }
0x152c   :  { %2642 = vrot.lane.b32.xlu0 %v8498_v34, %s10980_s21 }
0x152d   :  { %v9942_v7 = vpop.eup %9941 }
0x152e   :  { %v2682_v9 = vmul.f32 2.0, %v9942_v7  ;;  %v2686_v0 = vmul.f32 %v9942_v7, %v11662_v5 }
0x152f   :  { %v9944_v39 = vpop.eup %9943 }
0x1530   :  { %2640 = vrot.lane.b32.xlu0 %v8497_v24, %s10980_s21  ;;  %v2683_v6 = vmul.f32 2.0, %v9944_v39  ;;  %v8501_v11 = vadd.f32 -1.0, %v2682_v9  ;;  %v2687_v21 = vmul.f32 %v9944_v39, %v11658_v57 }
0x1532   :  { %v8502_v8 = vadd.f32 -1.0, %v2683_v6 }
0x1534   :  { %2692 = vrot.lane.b32.xlu1 %v8502_v8, %s10980_s21 }
0x1538   :  { %2690 = vrot.lane.b32.xlu1 %v8501_v11, %s10980_s21 }
0x159e   :  { %v2643_v15 = vpop.permute.xlu0 %2642 }
0x159f   :  { %v2647_v18 = vmul.f32 %v9940_v49, %v2643_v15 }
0x15a1   :  { %2652 = vrot.lane.b32.xlu0 %v2647_v18, %s10981_s25  ;;  %v2740_v18 = vld [vmem:[#allocation5 + $0x7] sm:$0x1] }
0x15a2   :  { %v2641_v27 = vpop.permute.xlu0 %2640 }
0x15a3   :  { %v2646_v40 = vmul.f32 %v9938_v17, %v2641_v27 }
0x15a5   :  { %2650 = vrot.lane.b32.xlu0 %v2646_v40, %s10981_s25 }
0x15a6   :  { %v2693_v43 = vpop.permute.xlu1 %2692 }
0x15a7   :  { %v2697_v10 = vmul.f32 %v9944_v39, %v2693_v43  ;;  %v2741_v43 = vld [vmem:[#allocation5 + $0xf] sm:$0x1] }
0x15a9   :  { %2702 = vrot.lane.b32.xlu1 %v2697_v10, %s10981_s25 }
0x15aa   :  { %v2691_v19 = vpop.permute.xlu1 %2690 }
0x15ab   :  { %v2696_v50 = vmul.f32 %v9942_v7, %v2691_v19 }
0x15ad   :  { %2700 = vrot.lane.b32.xlu1 %v2696_v50, %s10981_s25 }
0x1613   :  { %v2653_v1 = vpop.permute.xlu0 %2652 }
0x1614   :  { %v11714_v36 = vadd.f32 %v2653_v1, %v2637_v42  ;;  %v2824_v42 = vld [vmem:[#allocation6] sm:$0x1] }
0x1616   :  { %9945 = vtanh.f32 %v11714_v36 }
0x1617   :  { %v2651_v2 = vpop.permute.xlu0 %2650 }
0x1618   :  { %v11718_v20 = vadd.f32 %v2651_v2, %v2636_v52 }
0x161a   :  { %9947 = vtanh.f32 %v11718_v20 }
0x161b   :  { %v2703_v13 = vpop.permute.xlu1 %2702 }
0x161c   :  { %v11722_v48 = vadd.f32 %v2703_v13, %v2687_v21  ;;  %v2825_v21 = vld [vmem:[#allocation6 + $0x8] sm:$0x1] }
0x161e   :  { %9949 = vtanh.f32 %v11722_v48 }
0x161f   :  { %v2701_v62 = vpop.permute.xlu1 %2700 }
0x1620   :  { %v11726_v44 = vadd.f32 %v2701_v62, %v2686_v0 }
0x1622   :  { %9951 = vtanh.f32 %v11726_v44 }
0x1623   :  { %v9946_v51 = vpop.eup %9945 }
0x1624   :  { %2664 = vrot.lane.b32.xlu0 %v9946_v51, %s10980_s21 }
0x1627   :  { %v9948_v56 = vpop.eup %9947 }
0x1628   :  { %2662 = vrot.lane.b32.xlu0 %v9948_v56, %s10980_s21 }
0x162b   :  { %v9950_v23 = vpop.eup %9949 }
0x162c   :  { %2714 = vrot.lane.b32.xlu1 %v9950_v23, %s10980_s21 }
0x162f   :  { %v9952_v57 = vpop.eup %9951 }
0x1630   :  { %2712 = vrot.lane.b32.xlu1 %v9952_v57, %s10980_s21 }
0x1696   :  { %v2665_v12 = vpop.permute.xlu0 %2664 }
0x1697   :  { %v11733_v63 = vmul.f32 %v9940_v49, %v2665_v12 }
0x1699   :  { %v2742_v33 = vrot.slane %v11733_v63, 7 }
0x169a   :  { %v2663_v5 = vpop.permute.xlu0 %2662 }
0x169b   :  { %v11736_v34 = vmul.f32 %v9938_v17, %v2663_v5 }
0x169d   :  { %v2743_v38 = vsel %vm1014_vm2, %v2742_v33, %v11736_v34 }
0x169e   :  { %2744 = vrot.lane.b32.xlu0 %v2743_v38, %s10981_s25  ;;  %v2715_v24 = vpop.permute.xlu1 %2714 }
0x169f   :  { %v11741_v6 = vmul.f32 %v9944_v39, %v2715_v24 }
0x16a1   :  { %v2826_v9 = vrot.slane %v11741_v6, 7 }
0x16a2   :  { %v2713_v8 = vpop.permute.xlu1 %2712 }
0x16a3   :  { %v11744_v11 = vmul.f32 %v9942_v7, %v2713_v8 }
0x16a5   :  { %v2827_v49 = vsel %vm1014_vm2, %v2826_v9, %v11744_v11 }
0x16a6   :  { %2828 = vrot.lane.b32.xlu1 %v2827_v49, %s10981_s25 }
0x1710   :  { %v2745_v17 = vpop.permute.xlu0 %2744 }
0x1711   :  { %9237 = vmatmul.mubr.msk.f32.vlgmr.msra.gmra.mxu0 %vm494_vm0, %v2745_v17 }
0x1718   :  { %v2829_v15 = vpop.permute.xlu1 %2828 }
0x1719   :  { %9248 = vmatmul.mubr.msk.f32.vlgmr.msra.gmra.mxu1 %vm494_vm0, %v2829_v15 }
0x17d1   :  { %v2814_v27 = vpop.f32.mrf.mxu0 }
0x17d2   :  { %v2819_v39 = vrot.slane %v2814_v27, 1  ;;  %v2822_v40 = vadd.f32 %v2814_v27, %v2740_v18 }
0x17d3   :  { %v9238_v10 = vpop.f32.mrf.mxu0 }
0x17d4   :  { %v2823_v19 = vadd.f32 %v2819_v39, %v2741_v43  ;;  %v8505_v7 = vmul.f32 -1.442695, %v2822_v40 }
0x17d6   :  { %9953 = vpow2.f32 %v8505_v7  ;;  %v8506_v50 = vmul.f32 -1.442695, %v2823_v19 }
0x17d8   :  { %9955 = vpow2.f32 %v8506_v50 }
0x17d9   :  { %v2898_v1 = vpop.f32.mrf.mxu1 }
0x17da   :  { %v2903_v52 = vrot.slane %v2898_v1, 1  ;;  %v2906_v2 = vadd.f32 %v2898_v1, %v2824_v42 }
0x17db   :  { %v9249_v13 = vpop.f32.mrf.mxu1 }
0x17dc   :  { %v2907_v0 = vadd.f32 %v2903_v52, %v2825_v21  ;;  %v8509_v62 = vmul.f32 -1.442695, %v2906_v2 }
0x17de   :  { %9957 = vpow2.f32 %v8509_v62  ;;  %v8510_v51 = vmul.f32 -1.442695, %v2907_v0 }
0x17e0   :  { %9959 = vpow2.f32 %v8510_v51 }
0x17e3   :  { %v9954_v56 = vpop.eup %9953 }
0x17e4   :  { %v2914_v23 = vadd.f32 1.0, %v9954_v56 }
0x17e5   :  { %v9956_v57 = vpop.eup %9955 }
0x17e6   :  { %v2915_v12 = vadd.f32 1.0, %v9956_v57  ;;  %9961 = vrcp.f32 %v2914_v23 }
0x17e8   :  { %9963 = vrcp.f32 %v2915_v12 }
0x17eb   :  { %v9958_v5 = vpop.eup %9957 }
0x17ec   :  { %v2964_v33 = vadd.f32 1.0, %v9958_v5 }
0x17ed   :  { %v9960_v38 = vpop.eup %9959 }
0x17ee   :  { %v2965_v24 = vadd.f32 1.0, %v9960_v38  ;;  %9965 = vrcp.f32 %v2964_v33 }
0x17f0   :  { %9967 = vrcp.f32 %v2965_v24 }
0x17f3   :  { %v11751_v8 = vpop.eup %9961 }
0x17f4   :  { %v2920_v9 = vmul.f32 2.0, %v11751_v8  ;;  %v2924_v0 = vmul.f32 %v11751_v8, %v11718_v20 }
0x17f5   :  { %v11754_v49 = vpop.eup %9963 }
0x17f6   :  { %v8507_v17 = vadd.f32 -1.0, %v2920_v9  ;;  %v2921_v15 = vmul.f32 2.0, %v11754_v49  ;;  %v2925_v56 = vmul.f32 %v11754_v49, %v11714_v36 }
0x17f8   :  { %2928 = vrot.lane.b32.xlu0 %v8507_v17, %s10980_s21  ;;  %v8508_v18 = vadd.f32 -1.0, %v2921_v15 }
0x17fb   :  { %v11758_v27 = vpop.eup %9965 }
0x17fc   :  { %2930 = vrot.lane.b32.xlu0 %v8508_v18, %s10980_s21  ;;  %v2970_v39 = vmul.f32 2.0, %v11758_v27  ;;  %v2974_v12 = vmul.f32 %v11758_v27, %v11726_v44 }
0x17fd   :  { %v11762_v40 = vpop.eup %9967 }
0x17fe   :  { %v8511_v43 = vadd.f32 -1.0, %v2970_v39  ;;  %v2971_v10 = vmul.f32 2.0, %v11762_v40  ;;  %v2975_v36 = vmul.f32 %v11762_v40, %v11722_v48 }
0x1800   :  { %2978 = vrot.lane.b32.xlu1 %v8511_v43, %s10980_s21  ;;  %v8512_v19 = vadd.f32 -1.0, %v2971_v10 }
0x1804   :  { %2980 = vrot.lane.b32.xlu1 %v8512_v19, %s10980_s21 }
0x186a   :  { %v2929_v7 = vpop.permute.xlu0 %2928 }
0x186b   :  { %v2934_v50 = vmul.f32 %v11751_v8, %v2929_v7 }
0x186d   :  { %2938 = vrot.lane.b32.xlu0 %v2934_v50, %s10981_s25 }
0x186e   :  { %v2931_v42 = vpop.permute.xlu0 %2930 }
0x186f   :  { %v2935_v1 = vmul.f32 %v11754_v49, %v2931_v42 }
0x1871   :  { %2940 = vrot.lane.b32.xlu0 %v2935_v1, %s10981_s25 }
0x1872   :  { %v2979_v52 = vpop.permute.xlu1 %2978 }
0x1873   :  { %v2984_v2 = vmul.f32 %v11758_v27, %v2979_v52 }
0x1875   :  { %991 = vrot.lane.b32.xlu0 %v11326_v25, %s10981_s25  ;;  %2988 = vrot.lane.b32.xlu1 %v2984_v2, %s10981_s25 }
0x1876   :  { %v2981_v21 = vpop.permute.xlu1 %2980 }
0x1877   :  { %v2985_v13 = vmul.f32 %v11762_v40, %v2981_v21 }
0x1879   :  { %2990 = vrot.lane.b32.xlu1 %v2985_v13, %s10981_s25 }
0x187d   :  { %1002 = vrot.lane.b32.xlu1 %v11334_v31, %s10980_s21 }
0x18df   :  { %v2939_v62 = vpop.permute.xlu0 %2938 }
0x18e0   :  { %v2944_v51 = vadd.f32 %v2939_v62, %v2924_v0 }
0x18e2   :  { %9969 = vtanh.f32 %v2944_v51 }
0x18e3   :  { %v2941_v25 = vpop.permute.xlu0 %2940 }
0x18e4   :  { %v2945_v23 = vadd.f32 %v2941_v25, %v2925_v56 }
0x18e6   :  { %9971 = vtanh.f32 %v2945_v23  ;;  %v8235_v57 = vrot.slane %v2945_v23, 7 }
0x18e7   :  { %v992_v5 = vpop.permute.xlu0 %991  ;;  %v2989_v33 = vpop.permute.xlu1 %2988 }
0x18e8   :  { %998 = vst.msk [vmem:[#allocation2] sm:$0x1] %vm997_vm3, %v992_v5  ;;  %v2994_v31 = vadd.f32 %v2989_v33, %v2974_v12  ;;  %v11787_v20 = vsel %vm1014_vm2, %v8235_v57, %v2944_v51 }
0x18ea   :  { %9973 = vtanh.f32 %v2994_v31 }
0x18eb   :  { %v2991_v38 = vpop.permute.xlu1 %2990 }
0x18ec   :  { %v2995_v24 = vadd.f32 %v2991_v38, %v2975_v36 }
0x18ee   :  { %9975 = vtanh.f32 %v2995_v24  ;;  %v8243_v9 = vrot.slane %v2995_v24, 7 }
0x18ef   :  { %v9970_v17 = vpop.eup %9969  ;;  %v1003_v15 = vpop.permute.xlu1 %1002 }
0x18f0   :  { %1009 = vst.msk [vmem:[#allocation2 + $0x7] sm:$0x1] %vm1008_vm4, %v1003_v15  ;;  %2950 = vrot.lane.b32.xlu0 %v9970_v17, %s10980_s21  ;;  %v11794_v44 = vsel %vm1014_vm2, %v8243_v9, %v2994_v31 }
0x18f3   :  { %v9972_v18 = vpop.eup %9971 }
0x18f4   :  { %2952 = vrot.lane.b32.xlu0 %v9972_v18, %s10980_s21 }
0x18f7   :  { %v9974_v39 = vpop.eup %9973 }
0x18f8   :  { %1282 = vrot.lane.b32.xlu0 %v11392_v55, %s10981_s25  ;;  %3000 = vrot.lane.b32.xlu1 %v9974_v39, %s10980_s21  ;;  %v3049_v55 = vld [vmem:[%s13336_s3 + $0x30] sm:$0xff]  ;;  %v11915_v39 = vld [vmem:[#allocation24 + $0x18] sm:$0xff] }
0x18fb   :  { %v9976_v48 = vpop.eup %9975 }
0x18fc   :  { %1570 = vrot.lane.b32.xlu0 %v11458_v32, %s10981_s25  ;;  %3002 = vrot.lane.b32.xlu1 %v9976_v48, %s10980_s21  ;;  %v3047_v32 = vld [vmem:[%s13336_s3 + $0x20] sm:$0xff] }
0x18fd   :  { %v11917_v48 = vld [vmem:[#allocation27 + $0x18] sm:$0xff] }
0x1900   :  { %1858 = vrot.lane.b32.xlu0 %v11524_v3, %s10981_s25  ;;  %1292 = vrot.lane.b32.xlu1 %v11400_v61, %s10980_s21  ;;  %v3048_v61 = vld [vmem:[%s13336_s3 + $0x28] sm:$0xff] }
0x1904   :  { %993 = vrot.lane.b32.xlu0 %v11323_v22, %s10981_s25  ;;  %1580 = vrot.lane.b32.xlu1 %v11466_v45, %s10980_s21  ;;  %v3037_v22 = vld [vmem:[%s13335_s1 + $0x38] sm:$0xff] }
0x1905   :  { %9250 = vmatprep.subr.mxu0 %v3037_v22 }
0x1906   :  { %9251 = vmatpush3.msra.mxu0 %v3037_v22 }
0x1908   :  { %1284 = vrot.lane.b32.xlu0 %v11389_v53, %s10981_s25  ;;  %1868 = vrot.lane.b32.xlu1 %v11532_v4, %s10980_s21  ;;  %v3036_v53 = vld [vmem:[%s13335_s1 + $0x30] sm:$0xff] }
0x1909   :  { %9252 = vmatprep.subr.mxu0 %v3036_v53  ;;  %v3045_v4 = vld [vmem:[%s13336_s3 + $0x10] sm:$0xff] }
0x190a   :  { %9253 = vmatpush3.msra.mxu0 %v3036_v53  ;;  %v11923_v53 = vld [vmem:[#allocation27 + $0x10] sm:$0xff] }
0x190c   :  { %1572 = vrot.lane.b32.xlu0 %v11455_v29, %s10981_s25  ;;  %1004 = vrot.lane.b32.xlu1 %v11331_v28, %s10980_s21  ;;  %v3050_v28 = vld [vmem:[%s13336_s3 + $0x38] sm:$0xff]  ;;  %v3034_v29 = vld [vmem:[%s13335_s1 + $0x20] sm:$0xff] }
0x190d   :  { %9269 = vmatprep.subr.mxu1 %v3050_v28 }
0x190e   :  { %9270 = vmatpush3.msra.mxu1 %v3050_v28  ;;  %v11921_v28 = vld [vmem:[#allocation24 + $0x10] sm:$0xff] }
0x190f   :  { %9271 = vmatprep.subr.mxu1 %v3049_v55 }
0x1910   :  { %1860 = vrot.lane.b32.xlu0 %v11521_v54, %s10981_s25  ;;  %1294 = vrot.lane.b32.xlu1 %v11397_v58, %s10980_s21  ;;  %v3035_v58 = vld [vmem:[%s13335_s1 + $0x28] sm:$0xff]  ;;  %v3046_v54 = vld [vmem:[%s13336_s3 + $0x18] sm:$0xff] }
0x1911   :  { %9254 = vmatprep.subr.mxu0 %v3035_v58  ;;  %9272 = vmatpush3.msra.mxu1 %v3049_v55  ;;  %v11929_v55 = vld [vmem:[#allocation24 + $0x8] sm:$0xff] }
0x1912   :  { %9255 = vmatpush3.msra.mxu0 %v3035_v58  ;;  %9273 = vmatprep.subr.mxu1 %v3048_v61  ;;  %v11931_v58 = vld [vmem:[#allocation27 + $0x8] sm:$0xff] }
0x1913   :  { %9256 = vmatprep.subr.mxu0 %v3034_v29  ;;  %9274 = vmatpush3.msra.mxu1 %v3048_v61  ;;  %v11937_v61 = vld [vmem:[#allocation24] sm:$0xff] }
0x1914   :  { %2146 = vrot.lane.b32.xlu0 %v11606_v59, %s10981_s25  ;;  %1582 = vrot.lane.b32.xlu1 %v11463_v35, %s10980_s21  ;;  %v3033_v35 = vld [vmem:[%s13335_s1 + $0x18] sm:$0xff] }
0x1915   :  { %9257 = vmatpush3.msra.mxu0 %v3034_v29  ;;  %9275 = vmatprep.subr.mxu1 %v3047_v32  ;;  %v11941_v29 = vld [vmem:[#allocation27] sm:$0xff] }
0x1916   :  { %9258 = vmatprep.subr.mxu0 %v3033_v35  ;;  %9276 = vmatpush3.msra.mxu1 %v3047_v32  ;;  %v8513_v32 = vld [vmem:[#allocation25] ss:$0 sm:$0xff] }
0x1917   :  { %9259 = vmatpush3.msra.mxu0 %v3033_v35  ;;  %9277 = vmatprep.subr.mxu1 %v3046_v54  ;;  %v8516_v35 = vld [vmem:[#allocation28] ss:$0 sm:$0xff] }
0x1918   :  { %2434 = vrot.lane.b32.xlu0 %v11672_v30, %s10981_s25  ;;  %1870 = vrot.lane.b32.xlu1 %v11529_v60, %s10980_s21  ;;  %v3032_v60 = vld [vmem:[%s13335_s1 + $0x10] sm:$0xff]  ;;  %v3043_v30 = vld [vmem:[%s13336_s3] sm:$0xff] }
0x1919   :  { %9278 = vmatpush3.msra.mxu1 %v3046_v54  ;;  %9260 = vmatprep.subr.mxu0 %v3032_v60 }
0x191a   :  { %9279 = vmatprep.subr.mxu1 %v3045_v4  ;;  %9261 = vmatpush3.msra.mxu0 %v3032_v60 }
0x191b   :  { %9280 = vmatpush3.msra.mxu1 %v3045_v4 }
0x191c   :  { %2722 = vrot.lane.b32.xlu0 %v11736_v34, %s10981_s25  ;;  %2156 = vrot.lane.b32.xlu1 %v11614_v26, %s10980_s21 }
0x1920   :  { %2148 = vrot.lane.b32.xlu0 %v11603_v16, %s10981_s25  ;;  %2444 = vrot.lane.b32.xlu1 %v11680_v46, %s10980_s21  ;;  %v3031_v16 = vld [vmem:[%s13335_s1 + $0x8] sm:$0xff] }
0x1921   :  { %9262 = vmatprep.subr.mxu0 %v3031_v16 }
0x1922   :  { %9263 = vmatpush3.msra.mxu0 %v3031_v16 }
0x1924   :  { %2436 = vrot.lane.b32.xlu0 %v11669_v47, %s10981_s25  ;;  %2732 = vrot.lane.b32.xlu1 %v11744_v11, %s10980_s21  ;;  %v3030_v47 = vld [vmem:[%s13335_s1] sm:$0xff] }
0x1925   :  { %9264 = vmatprep.subr.mxu0 %v3030_v47 }
0x1926   :  { %9265 = vmatpush3.msra.mxu0 %v3030_v47 }
0x1927   :  { %9288 = vmatprep.subr.mxu0 %v10978_v41 }
0x1928   :  { %2724 = vrot.lane.b32.xlu0 %v11733_v63, %s10981_s25  ;;  %2158 = vrot.lane.b32.xlu1 %v11611_v14, %s10980_s21  ;;  %v3044_v14 = vld [vmem:[%s13336_s3 + $0x8] sm:$0xff] }
0x1929   :  { %9281 = vmatprep.subr.mxu1 %v3044_v14 }
0x192a   :  { %9282 = vmatpush3.msra.mxu1 %v3044_v14 }
0x192b   :  { %9283 = vmatprep.subr.mxu1 %v3043_v30 }
0x192c   :  { %2446 = vrot.lane.b32.xlu1 %v11677_v37, %s10980_s21  ;;  %9284 = vmatpush3.msra.mxu1 %v3043_v30 }
0x192d   :  { %9299 = vmatprep.subr.mxu1 %v10978_v41 }
0x1930   :  { %2734 = vrot.lane.b32.xlu1 %v11741_v6, %s10980_s21 }
0x1962   :  { %v2951_v45 = vpop.permute.xlu0 %2950 }
0x1963   :  { %v2956_v3 = vmul.f32 %v11751_v8, %v2951_v45 }
0x1965   :  { %3010 = vrot.lane.b32.xlu0 %v2956_v3, %s10981_s25 }
0x1966   :  { %v2953_v59 = vpop.permute.xlu0 %2952 }
0x1967   :  { %v2957_v26 = vmul.f32 %v11754_v49, %v2953_v59 }
0x1969   :  { %v8219_v37 = vrot.slane %v2957_v26, 7  ;;  %3012 = vrot.lane.b32.xlu0 %v2957_v26, %s10981_s25 }
0x196a   :  { %v1283_v46 = vpop.permute.xlu0 %1282  ;;  %v3001_v63 = vpop.permute.xlu1 %3000 }
0x196b   :  { %1288 = vst.msk [vmem:[#allocation2 + $0x1] sm:$0x1] %vm997_vm3, %v1283_v46  ;;  %v3006_v34 = vmul.f32 %v11758_v27, %v3001_v63  ;;  %v11874_v6 = vsel %vm1014_vm2, %v8219_v37, %v2956_v3 }
0x196d   :  { %3020 = vrot.lane.b32.xlu1 %v3006_v34, %s10980_s21 }
0x196e   :  { %v1571_v11 = vpop.permute.xlu0 %1570  ;;  %v3003_v8 = vpop.permute.xlu1 %3002 }
0x196f   :  { %1576 = vst.msk [vmem:[#allocation2 + $0x2] sm:$0x1] %vm997_vm3, %v1571_v11  ;;  %v3007_v49 = vmul.f32 %v11762_v40, %v3003_v8 }
0x1971   :  { %v8226_v27 = vrot.slane %v3007_v49, 7  ;;  %3022 = vrot.lane.b32.xlu1 %v3007_v49, %s10980_s21 }
0x1972   :  { %v1859_v43 = vpop.permute.xlu0 %1858  ;;  %v1293_v10 = vpop.permute.xlu1 %1292 }
0x1973   :  { %1864 = vst.msk [vmem:[#allocation2 + $0x3] sm:$0x1] %vm997_vm3, %v1859_v43  ;;  %v11885_v19 = vsel %vm1014_vm2, %v8226_v27, %v3006_v34 }
0x1974   :  { %1298 = vst.msk [vmem:[#allocation2 + $0x6] sm:$0x1] %vm1008_vm4, %v1293_v10 }
0x1976   :  { %v994_v7 = vpop.permute.xlu0 %993  ;;  %v1581_v50 = vpop.permute.xlu1 %1580 }
0x1977   :  { %999 = vst.msk [vmem:[#allocation2 + $0x8] sm:$0x1] %vm997_vm3, %v994_v7 }
0x1978   :  { %1586 = vst.msk [vmem:[#allocation2 + $0x5] sm:$0x1] %vm1008_vm4, %v1581_v50 }
0x197a   :  { %v1285_v42 = vpop.permute.xlu0 %1284  ;;  %v1869_v40 = vpop.permute.xlu1 %1868 }
0x197b   :  { %1289 = vst.msk [vmem:[#allocation2 + $0x9] sm:$0x1] %vm997_vm3, %v1285_v42 }
0x197c   :  { %1874 = vst.msk [vmem:[#allocation2 + $0x4] sm:$0x1] %vm1008_vm4, %v1869_v40 }
0x197e   :  { %v1573_v1 = vpop.permute.xlu0 %1572  ;;  %v1005_v52 = vpop.permute.xlu1 %1004 }
0x197f   :  { %1577 = vst.msk [vmem:[#allocation2 + $0xa] sm:$0x1] %vm997_vm3, %v1573_v1 }
0x1980   :  { %1010 = vst.msk [vmem:[#allocation2 + $0xf] sm:$0x1] %vm1008_vm4, %v1005_v52 }
0x1982   :  { %v1861_v2 = vpop.permute.xlu0 %1860  ;;  %v1295_v21 = vpop.permute.xlu1 %1294 }
0x1983   :  { %1865 = vst.msk [vmem:[#allocation2 + $0xb] sm:$0x1] %vm997_vm3, %v1861_v2 }
0x1984   :  { %1299 = vst.msk [vmem:[#allocation2 + $0xe] sm:$0x1] %vm1008_vm4, %v1295_v21 }
0x1986   :  { %v2147_v13 = vpop.permute.xlu0 %2146  ;;  %v1583_v0 = vpop.permute.xlu1 %1582 }
0x1987   :  { %2152 = vst.msk [vmem:[#allocation2 + $0x4] sm:$0x1] %vm997_vm3, %v2147_v13 }
0x1988   :  { %1587 = vst.msk [vmem:[#allocation2 + $0xd] sm:$0x1] %vm1008_vm4, %v1583_v0 }
0x198a   :  { %v2435_v62 = vpop.permute.xlu0 %2434  ;;  %v1871_v51 = vpop.permute.xlu1 %1870 }
0x198b   :  { %2440 = vst.msk [vmem:[#allocation2 + $0x5] sm:$0x1] %vm997_vm3, %v2435_v62 }
0x198c   :  { %1875 = vst.msk [vmem:[#allocation2 + $0xc] sm:$0x1] %vm1008_vm4, %v1871_v51 }
0x198e   :  { %v2723_v56 = vpop.permute.xlu0 %2722  ;;  %v2157_v25 = vpop.permute.xlu1 %2156 }
0x198f   :  { %2728 = vst.msk [vmem:[#allocation2 + $0x6] sm:$0x1] %vm997_vm3, %v2723_v56 }
0x1990   :  { %2162 = vst.msk [vmem:[#allocation2 + $0x3] sm:$0x1] %vm1008_vm4, %v2157_v25 }
0x1992   :  { %v2149_v23 = vpop.permute.xlu0 %2148  ;;  %v2445_v57 = vpop.permute.xlu1 %2444 }
0x1993   :  { %2153 = vst.msk [vmem:[#allocation2 + $0xc] sm:$0x1] %vm997_vm3, %v2149_v23 }
0x1994   :  { %2450 = vst.msk [vmem:[#allocation2 + $0x2] sm:$0x1] %vm1008_vm4, %v2445_v57 }
0x1996   :  { %v2437_v12 = vpop.permute.xlu0 %2436  ;;  %v2733_v5 = vpop.permute.xlu1 %2732 }
0x1997   :  { %2441 = vst.msk [vmem:[#allocation2 + $0xd] sm:$0x1] %vm997_vm3, %v2437_v12 }
0x1998   :  { %2738 = vst.msk [vmem:[#allocation2 + $0x1] sm:$0x1] %vm1008_vm4, %v2733_v5 }
0x199a   :  { %v2725_v33 = vpop.permute.xlu0 %2724  ;;  %v2159_v31 = vpop.permute.xlu1 %2158 }
0x199b   :  { %2729 = vst.msk [vmem:[#allocation2 + $0xe] sm:$0x1] %vm997_vm3, %v2725_v33 }
0x199c   :  { %2163 = vst.msk [vmem:[#allocation2 + $0xb] sm:$0x1] %vm1008_vm4, %v2159_v31 }
0x199e   :  { %v2447_v36 = vpop.permute.xlu1 %2446 }
0x199f   :  { %2451 = vst.msk [vmem:[#allocation2 + $0xa] sm:$0x1] %vm1008_vm4, %v2447_v36 }
0x19a2   :  { %v2735_v38 = vpop.permute.xlu1 %2734 }
0x19a3   :  { %2739 = vst.msk [vmem:[#allocation2 + $0x9] sm:$0x1] %vm1008_vm4, %v2735_v38 }
0x19d7   :  { %v3011_v24 = vpop.permute.xlu0 %3010 }
0x19d8   :  { %3016 = vst.msk [vmem:[#allocation2 + $0x7] sm:$0x1] %vm997_vm3, %v3011_v24 }
0x19db   :  { %v3013_v9 = vpop.permute.xlu0 %3012 }
0x19dc   :  { %3017 = vst.msk [vmem:[#allocation2 + $0xf] sm:$0x1] %vm997_vm3, %v3013_v9 }
0x19df   :  { %v3021_v17 = vpop.permute.xlu1 %3020 }
0x19e0   :  { %3026 = vst.msk [vmem:[#allocation2] sm:$0x1] %vm1008_vm4, %v3021_v17 }
0x19e3   :  { %v3023_v15 = vpop.permute.xlu1 %3022 }
0x19e4   :  { %3027 = vst.msk [vmem:[#allocation2 + $0x8] sm:$0x1] %vm1008_vm4, %v3023_v15 }
0x19e7   :  { %v3028_v18 = vld [vmem:[#allocation2] sm:$0xff] }
0x19e8   :  { %9266 = vmatprep.mubr.msk.f32.mxu0 %vm3062_vm5, %v3028_v18  ;;  %9285 = vmatprep.mubr.msk.f32.mxu1 %vm3062_vm5, %v3028_v18 }
0x19eb   :  { %v3029_v22 = vld [vmem:[#allocation2 + $0x8] sm:$0xff] }
0x19ec   :  { %9267 = vmatmul.mubr.msk.f32.vlgmr.msra.gmra.mxu0 %vm3062_vm5, %v3029_v22  ;;  %9286 = vmatmul.mubr.msk.f32.vlgmr.msra.gmra.mxu1 %vm3062_vm5, %v3029_v22 }
0x19ed   :  { %9289 = vmatpush3.msra.mxu0 %v11915_v39  ;;  %9300 = vmatpush3.msra.mxu1 %v11917_v48 }
0x19ee   :  { %9290 = vmatprep.subr.mxu0 %v10978_v41  ;;  %9301 = vmatprep.subr.mxu1 %v10978_v41 }
0x19ef   :  { %9291 = vmatpush3.msra.mxu0 %v11921_v28  ;;  %9302 = vmatpush3.msra.mxu1 %v11923_v53 }
0x19f0   :  { %9292 = vmatprep.subr.mxu0 %v10978_v41  ;;  %9303 = vmatprep.subr.mxu1 %v10978_v41 }
0x19f1   :  { %9293 = vmatpush3.msra.mxu0 %v11929_v55  ;;  %9304 = vmatpush3.msra.mxu1 %v11931_v58 }
0x19f2   :  { %9294 = vmatprep.subr.mxu0 %v10978_v41  ;;  %9305 = vmatprep.subr.mxu1 %v10978_v41 }
0x19f3   :  { %9295 = vmatpush3.msra.mxu0 %v11937_v61  ;;  %9296 = vmatprep.mubr.msk.f32.mxu0 %vm10979_vm1, %v10978_v41 }
0x19f4   :  { %9306 = vmatpush3.msra.mxu1 %v11941_v29  ;;  %9307 = vmatprep.mubr.msk.f32.mxu1 %vm10979_vm1, %v10978_v41 }
0x19f5   :  { %9297 = vmatmul.mubr.f32.vlgmr.msra.gmra.mxu0 %v10978_v41  ;;  %9308 = vmatmul.mubr.f32.vlgmr.msra.gmra.mxu1 %v10978_v41 }
0x19f6   :  { %9310 = vmatprep.subr.mxu0 %v10978_v41  ;;  %9321 = vmatprep.subr.mxu1 %v10978_v41 }
0x19f7   :  { %9311 = vmatpush3.msra.mxu0 %v11915_v39  ;;  %9322 = vmatpush3.msra.mxu1 %v11917_v48 }
0x19f8   :  { %9312 = vmatprep.subr.mxu0 %v10978_v41  ;;  %9323 = vmatprep.subr.mxu1 %v10978_v41 }
0x19f9   :  { %9313 = vmatpush3.msra.mxu0 %v11921_v28  ;;  %9324 = vmatpush3.msra.mxu1 %v11923_v53 }
0x19fa   :  { %9314 = vmatprep.subr.mxu0 %v10978_v41  ;;  %9325 = vmatprep.subr.mxu1 %v10978_v41 }
0x19fb   :  { %9315 = vmatpush3.msra.mxu0 %v11929_v55  ;;  %9326 = vmatpush3.msra.mxu1 %v11931_v58 }
0x19fc   :  { %9316 = vmatprep.subr.mxu0 %v10978_v41  ;;  %9327 = vmatprep.subr.mxu1 %v10978_v41 }
0x19fd   :  { %9317 = vmatpush3.msra.mxu0 %v11937_v61  ;;  %9318 = vmatprep.mubr.msk.f32.mxu0 %vm10979_vm1, %v10978_v41 }
0x19fe   :  { %9328 = vmatpush3.msra.mxu1 %v11941_v29  ;;  %9329 = vmatprep.mubr.msk.f32.mxu1 %vm10979_vm1, %v10978_v41 }
0x19ff   :  { %9332 = vmatprep.subr.mxu0 %v10978_v41  ;;  %9343 = vmatprep.subr.mxu1 %v10978_v41 }
0x1aac   :  { %v9268_v45 = vpop.f32.mrf.mxu0  ;;  %v9287_v54 = vpop.f32.mrf.mxu1 }
0x1aad   :  { %v3141_v3 = vadd.f32 %v9268_v45, %v8513_v32  ;;  %v3224_v60 = vadd.f32 %v9287_v54, %v8516_v35 }
0x1aae   :  { %v3135_v4 = vpop.f32.mrf.mxu0  ;;  %v3218_v16 = vpop.f32.mrf.mxu1 }
0x1aaf   :  { %3145 = vst [vmem:[#allocation5 + $0x8] sm:$0xff] %v3141_v3  ;;  %3228 = vst [vmem:[#allocation6 + $0x8] sm:$0xff] %v3224_v60  ;;  %v3136_v59 = vadd.f32 %v8513_v32, %v3135_v4  ;;  %v3219_v14 = vadd.f32 %v8516_v35, %v3218_v16 }
0x1ab1   :  { %3144 = vst [vmem:[#allocation5] sm:$0xff] %v3136_v59  ;;  %3227 = vst [vmem:[#allocation6] sm:$0xff] %v3219_v14 }
0x1ab5   :  { %v3297_v26 = vpop.f32.mrf.mxu0  ;;  %v3375_v47 = vpop.f32.mrf.mxu1 }
0x1ab6   :  { %v3230_v30 = vld [vmem:[#allocation5 + $0x8] sm:$0x1]  ;;  %v3302_v37 = vrot.slane %v3297_v26, 1  ;;  %v3308_v46 = vld [vmem:[#allocation6 + $0xf] sm:$0x1]  ;;  %v3380_v63 = vrot.slane %v3375_v47, 1 }
0x1ab7   :  { %v9298_v34 = vpop.f32.mrf.mxu0  ;;  %v9309_v11 = vpop.f32.mrf.mxu1 }
0x1ab8   :  { %v3229_v8 = vld [vmem:[#allocation5] sm:$0x1]  ;;  %v3306_v49 = vadd.f32 %v3302_v37, %v3230_v30  ;;  %v3307_v27 = vld [vmem:[#allocation6 + $0x7] sm:$0x1]  ;;  %v3384_v43 = vadd.f32 %v3380_v63, %v3308_v46 }
0x1ab9   :  { %v3305_v10 = vadd.f32 %v3297_v26, %v3229_v8  ;;  %v3383_v7 = vadd.f32 %v3375_v47, %v3307_v27 }
0x1aba   :  { %v8520_v50 = vmul.f32 -1.442695, %v3306_v49  ;;  %v8524_v1 = vmul.f32 -1.442695, %v3384_v43 }
0x1abb   :  { %v8519_v42 = vmul.f32 -1.442695, %v3305_v10  ;;  %v8523_v40 = vmul.f32 -1.442695, %v3383_v7 }
0x1abc   :  { %9977 = vpow2.f32 %v8520_v50 }
0x1abd   :  { %9979 = vpow2.f32 %v8519_v42 }
0x1abe   :  { %9981 = vpow2.f32 %v8523_v40 }
0x1abf   :  { %9983 = vpow2.f32 %v8524_v1 }
0x1ac9   :  { %v9978_v52 = vpop.eup %9977 }
0x1aca   :  { %v9980_v2 = vpop.eup %9979  ;;  %v3392_v21 = vadd.f32 1.0, %v9978_v52 }
0x1acb   :  { %v9982_v13 = vpop.eup %9981  ;;  %v3391_v0 = vadd.f32 1.0, %v9980_v2 }
0x1acc   :  { %v9984_v62 = vpop.eup %9983  ;;  %9985 = vrcp.f32 %v3392_v21  ;;  %v3441_v51 = vadd.f32 1.0, %v9982_v13 }
0x1acd   :  { %9987 = vrcp.f32 %v3391_v0  ;;  %v3442_v56 = vadd.f32 1.0, %v9984_v62 }
0x1ace   :  { %9989 = vrcp.f32 %v3441_v51 }
0x1acf   :  { %9991 = vrcp.f32 %v3442_v56  ;;  %v3505_v56 = vld [vmem:[#allocation5 + $0x1] sm:$0x1] }
0x1ad9   :  { %v9986_v25 = vpop.eup %9985 }
0x1ada   :  { %v9988_v23 = vpop.eup %9987  ;;  %v3398_v57 = vmul.f32 2.0, %v9986_v25  ;;  %v3402_v60 = vmul.f32 0.0, %v9986_v25 }
0x1adb   :  { %v9990_v12 = vpop.eup %9989  ;;  %v3397_v31 = vmul.f32 2.0, %v9988_v23  ;;  %v3401_v26 = vmul.f32 0.0, %v9988_v23 }
0x1adc   :  { %v9992_v5 = vpop.eup %9991  ;;  %v8522_v33 = vadd.f32 -1.0, %v3398_v57  ;;  %v3447_v24 = vmul.f32 2.0, %v9990_v12  ;;  %v3451_v46 = vmul.f32 0.0, %v9990_v12 }
0x1add   :  { %v3448_v36 = vmul.f32 2.0, %v9992_v5  ;;  %v8521_v9 = vadd.f32 -1.0, %v3397_v31  ;;  %v3452_v59 = vmul.f32 0.0, %v9992_v5 }
0x1ade   :  { %3407 = vrot.lane.b32.xlu0 %v8522_v33, %s10980_s21  ;;  %v8525_v17 = vadd.f32 -1.0, %v3447_v24 }
0x1adf   :  { %v8526_v38 = vadd.f32 -1.0, %v3448_v36  ;;  %v3589_v36 = vld [vmem:[#allocation6 + $0x6] sm:$0x1] }
0x1ae1   :  { %3457 = vrot.lane.b32.xlu1 %v8526_v38, %s10980_s21 }
0x1ae2   :  { %3405 = vrot.lane.b32.xlu0 %v8521_v9, %s10980_s21 }
0x1ae5   :  { %3455 = vrot.lane.b32.xlu1 %v8525_v17, %s10980_s21 }
0x1b50   :  { %v3408_v15 = vpop.permute.xlu0 %3407 }
0x1b51   :  { %v3412_v18 = vmul.f32 %v9986_v25, %v3408_v15  ;;  %v3590_v15 = vld [vmem:[#allocation6 + $0xe] sm:$0x1] }
0x1b53   :  { %v3458_v22 = vpop.permute.xlu1 %3457  ;;  %3417 = vrot.lane.b32.xlu0 %v3412_v18, %s10981_s25 }
0x1b54   :  { %v3462_v32 = vmul.f32 %v9992_v5, %v3458_v22  ;;  %v3406_v35 = vpop.permute.xlu0 %3405 }
0x1b55   :  { %v3411_v45 = vmul.f32 %v9988_v23, %v3406_v35 }
0x1b56   :  { %3467 = vrot.lane.b32.xlu1 %v3462_v32, %s10981_s25 }
0x1b57   :  { %v3456_v54 = vpop.permute.xlu1 %3455  ;;  %3415 = vrot.lane.b32.xlu0 %v3411_v45, %s10981_s25 }
0x1b58   :  { %v3461_v3 = vmul.f32 %v9990_v12, %v3456_v54 }
0x1b5a   :  { %3465 = vrot.lane.b32.xlu1 %v3461_v3, %s10981_s25 }
0x1bc5   :  { %v3418_v4 = vpop.permute.xlu0 %3417 }
0x1bc6   :  { %v11983_v16 = vadd.f32 %v3418_v4, %v3402_v60 }
0x1bc8   :  { %9993 = vtanh.f32 %v11983_v16  ;;  %v3468_v14 = vpop.permute.xlu1 %3467 }
0x1bc9   :  { %v11986_v47 = vadd.f32 %v3468_v14, %v3452_v59  ;;  %v3416_v30 = vpop.permute.xlu0 %3415 }
0x1bca   :  { %v11988_v37 = vadd.f32 %v3416_v30, %v3401_v26 }
0x1bcb   :  { %9995 = vtanh.f32 %v11986_v47 }
0x1bcc   :  { %9997 = vtanh.f32 %v11988_v37  ;;  %v3466_v63 = vpop.permute.xlu1 %3465 }
0x1bcd   :  { %v11992_v34 = vadd.f32 %v3466_v63, %v3451_v46 }
0x1bcf   :  { %9999 = vtanh.f32 %v11992_v34 }
0x1bd5   :  { %v9994_v11 = vpop.eup %9993 }
0x1bd6   :  { %3429 = vrot.lane.b32.xlu0 %v9994_v11, %s10980_s21 }
0x1bd8   :  { %v9996_v8 = vpop.eup %9995 }
0x1bd9   :  { %v9998_v49 = vpop.eup %9997  ;;  %3479 = vrot.lane.b32.xlu1 %v9996_v8, %s10980_s21 }
0x1bda   :  { %3427 = vrot.lane.b32.xlu0 %v9998_v49, %s10980_s21 }
0x1bdc   :  { %v10000_v27 = vpop.eup %9999 }
0x1bdd   :  { %3477 = vrot.lane.b32.xlu1 %v10000_v27, %s10980_s21 }
0x1c48   :  { %v3430_v43 = vpop.permute.xlu0 %3429 }
0x1c49   :  { %v11999_v10 = vmul.f32 %v9986_v25, %v3430_v43 }
0x1c4b   :  { %v3480_v7 = vpop.permute.xlu1 %3479  ;;  %v3507_v40 = vrot.slane %v11999_v10, 7 }
0x1c4c   :  { %v12001_v50 = vmul.f32 %v9992_v5, %v3480_v7  ;;  %v3428_v42 = vpop.permute.xlu0 %3427 }
0x1c4d   :  { %v12004_v1 = vmul.f32 %v9988_v23, %v3428_v42 }
0x1c4e   :  { %v3591_v21 = vrot.slane %v12001_v50, 7 }
0x1c4f   :  { %v3478_v52 = vpop.permute.xlu1 %3477  ;;  %v3508_v2 = vsel %vm1014_vm2, %v3507_v40, %v12004_v1 }
0x1c50   :  { %v12009_v13 = vmul.f32 %v9990_v12, %v3478_v52  ;;  %3509 = vrot.lane.b32.xlu0 %v3508_v2, %s10981_s25  ;;  %v3506_v12 = vld [vmem:[#allocation5 + $0x9] sm:$0x1] }
0x1c52   :  { %v3592_v0 = vsel %vm1014_vm2, %v3591_v21, %v12009_v13 }
0x1c53   :  { %3593 = vrot.lane.b32.xlu1 %v3592_v0, %s10981_s25 }
0x1cc2   :  { %v3510_v62 = vpop.permute.xlu0 %3509 }
0x1cc3   :  { %9319 = vmatmul.mubr.msk.f32.vlgmr.msra.gmra.mxu0 %vm494_vm0, %v3510_v62 }
0x1cc4   :  { %9333 = vmatpush3.msra.mxu0 %v11915_v39  ;;  %9340 = vmatprep.mubr.msk.f32.mxu0 %vm10979_vm1, %v10978_v41 }
0x1cc5   :  { %v3594_v51 = vpop.permute.xlu1 %3593  ;;  %9334 = vmatprep.subr.mxu0 %v10978_v41 }
0x1cc6   :  { %9330 = vmatmul.mubr.msk.f32.vlgmr.msra.gmra.mxu1 %vm494_vm0, %v3594_v51  ;;  %9335 = vmatpush3.msra.mxu0 %v11921_v28 }
0x1cc7   :  { %9344 = vmatpush3.msra.mxu1 %v11917_v48  ;;  %9336 = vmatprep.subr.mxu0 %v10978_v41 }
0x1cc8   :  { %9345 = vmatprep.subr.mxu1 %v10978_v41  ;;  %9337 = vmatpush3.msra.mxu0 %v11929_v55 }
0x1cc9   :  { %9346 = vmatpush3.msra.mxu1 %v11923_v53  ;;  %9338 = vmatprep.subr.mxu0 %v10978_v41 }
0x1cca   :  { %9347 = vmatprep.subr.mxu1 %v10978_v41  ;;  %9339 = vmatpush3.msra.mxu0 %v11937_v61 }
0x1ccb   :  { %9348 = vmatpush3.msra.mxu1 %v11931_v58  ;;  %9351 = vmatprep.mubr.msk.f32.mxu1 %vm10979_vm1, %v10978_v41 }
0x1ccc   :  { %9349 = vmatprep.subr.mxu1 %v10978_v41  ;;  %9354 = vmatprep.subr.mxu0 %v10978_v41 }
0x1ccd   :  { %9350 = vmatpush3.msra.mxu1 %v11941_v29 }
0x1cce   :  { %9365 = vmatprep.subr.mxu1 %v10978_v41 }
0x1d83   :  { %v3579_v25 = vpop.f32.mrf.mxu0 }
0x1d84   :  { %v3584_v23 = vrot.slane %v3579_v25, 1  ;;  %v3587_v57 = vadd.f32 %v3579_v25, %v3505_v56 }
0x1d85   :  { %v9320_v5 = vpop.f32.mrf.mxu0 }
0x1d86   :  { %v3588_v33 = vadd.f32 %v3584_v23, %v3506_v12  ;;  %v8529_v31 = vmul.f32 -1.442695, %v3587_v57  ;;  %v3663_v38 = vpop.f32.mrf.mxu1 }
0x1d87   :  { %v3668_v24 = vrot.slane %v3663_v38, 1  ;;  %v3671_v9 = vadd.f32 %v3663_v38, %v3589_v36 }
0x1d88   :  { %10001 = vpow2.f32 %v8529_v31  ;;  %v8530_v17 = vmul.f32 -1.442695, %v3588_v33  ;;  %v9331_v18 = vpop.f32.mrf.mxu1 }
0x1d89   :  { %v3672_v22 = vadd.f32 %v3668_v24, %v3590_v15  ;;  %v8533_v32 = vmul.f32 -1.442695, %v3671_v9 }
0x1d8a   :  { %10003 = vpow2.f32 %v8530_v17 }
0x1d8b   :  { %10005 = vpow2.f32 %v8533_v32  ;;  %v8534_v35 = vmul.f32 -1.442695, %v3672_v22 }
0x1d8d   :  { %10007 = vpow2.f32 %v8534_v35 }
0x1d95   :  { %v10002_v45 = vpop.eup %10001 }
0x1d96   :  { %v3679_v54 = vadd.f32 1.0, %v10002_v45 }
0x1d97   :  { %v10004_v3 = vpop.eup %10003 }
0x1d98   :  { %v10006_v60 = vpop.eup %10005  ;;  %v3680_v4 = vadd.f32 1.0, %v10004_v3  ;;  %10009 = vrcp.f32 %v3679_v54 }
0x1d99   :  { %v3729_v59 = vadd.f32 1.0, %v10006_v60 }
0x1d9a   :  { %v10008_v14 = vpop.eup %10007  ;;  %10011 = vrcp.f32 %v3680_v4 }
0x1d9b   :  { %v3730_v26 = vadd.f32 1.0, %v10008_v14  ;;  %10013 = vrcp.f32 %v3729_v59 }
0x1d9d   :  { %10015 = vrcp.f32 %v3730_v26 }
0x1da5   :  { %v10010_v30 = vpop.eup %10009 }
0x1da6   :  { %v3685_v27 = vmul.f32 2.0, %v10010_v30  ;;  %v3689_v36 = vmul.f32 %v10010_v30, %v11988_v37 }
0x1da7   :  { %v10012_v46 = vpop.eup %10011 }
0x1da8   :  { %v3686_v63 = vmul.f32 2.0, %v10012_v46  ;;  %v10014_v11 = vpop.eup %10013  ;;  %v8531_v40 = vadd.f32 -1.0, %v3685_v27  ;;  %v3690_v57 = vmul.f32 %v10012_v46, %v11983_v16 }
0x1da9   :  { %v3735_v42 = vmul.f32 2.0, %v10014_v11  ;;  %v3739_v17 = vmul.f32 %v10014_v11, %v11992_v34 }
0x1daa   :  { %v10016_v8 = vpop.eup %10015  ;;  %v8532_v49 = vadd.f32 -1.0, %v3686_v63 }
0x1dab   :  { %v3736_v43 = vmul.f32 2.0, %v10016_v8  ;;  %v8535_v52 = vadd.f32 -1.0, %v3735_v42  ;;  %v3740_v33 = vmul.f32 %v10016_v8, %v11986_v47 }
0x1dac   :  { %3695 = vrot.lane.b32.xlu0 %v8532_v49, %s10980_s21 }
0x1dad   :  { %v8536_v7 = vadd.f32 -1.0, %v3736_v43  ;;  %v3794_v43 = vld [vmem:[#allocation5 + $0xa] sm:$0x1] }
0x1daf   :  { %3745 = vrot.lane.b32.xlu1 %v8536_v7, %s10980_s21 }
0x1db0   :  { %3693 = vrot.lane.b32.xlu0 %v8531_v40, %s10980_s21 }
0x1db3   :  { %3743 = vrot.lane.b32.xlu1 %v8535_v52, %s10980_s21  ;;  %v3877_v52 = vld [vmem:[#allocation6 + $0x5] sm:$0x1] }
0x1e1e   :  { %v3696_v2 = vpop.permute.xlu0 %3695 }
0x1e1f   :  { %v3700_v21 = vmul.f32 %v10012_v46, %v3696_v2 }
0x1e21   :  { %v3746_v0 = vpop.permute.xlu1 %3745  ;;  %3705 = vrot.lane.b32.xlu0 %v3700_v21, %s10981_s25 }
0x1e22   :  { %v3750_v62 = vmul.f32 %v10016_v8, %v3746_v0  ;;  %v3694_v51 = vpop.permute.xlu0 %3693 }
0x1e23   :  { %v3699_v56 = vmul.f32 %v10010_v30, %v3694_v51  ;;  %v3878_v51 = vld [vmem:[#allocation6 + $0xd] sm:$0x1] }
0x1e24   :  { %3755 = vrot.lane.b32.xlu1 %v3750_v62, %s10981_s25 }
0x1e25   :  { %v3744_v25 = vpop.permute.xlu1 %3743  ;;  %3703 = vrot.lane.b32.xlu0 %v3699_v56, %s10981_s25 }
0x1e26   :  { %v3749_v23 = vmul.f32 %v10014_v11, %v3744_v25 }
0x1e28   :  { %3753 = vrot.lane.b32.xlu1 %v3749_v23, %s10981_s25 }
0x1e93   :  { %v3706_v12 = vpop.permute.xlu0 %3705 }
0x1e94   :  { %v12046_v5 = vadd.f32 %v3706_v12, %v3690_v57 }
0x1e96   :  { %10017 = vtanh.f32 %v12046_v5  ;;  %v3756_v31 = vpop.permute.xlu1 %3755 }
0x1e97   :  { %v12051_v38 = vadd.f32 %v3756_v31, %v3740_v33  ;;  %v3704_v24 = vpop.permute.xlu0 %3703 }
0x1e98   :  { %v12053_v9 = vadd.f32 %v3704_v24, %v3689_v36 }
0x1e99   :  { %10019 = vtanh.f32 %v12051_v38 }
0x1e9a   :  { %10021 = vtanh.f32 %v12053_v9  ;;  %v3754_v16 = vpop.permute.xlu1 %3753 }
0x1e9b   :  { %v12058_v15 = vadd.f32 %v3754_v16, %v3739_v17 }
0x1e9d   :  { %10023 = vtanh.f32 %v12058_v15 }
0x1ea3   :  { %v10018_v47 = vpop.eup %10017 }
0x1ea4   :  { %3717 = vrot.lane.b32.xlu0 %v10018_v47, %s10980_s21 }
0x1ea6   :  { %v10020_v37 = vpop.eup %10019 }
0x1ea7   :  { %v10022_v18 = vpop.eup %10021  ;;  %3767 = vrot.lane.b32.xlu1 %v10020_v37, %s10980_s21 }
0x1ea8   :  { %3715 = vrot.lane.b32.xlu0 %v10022_v18, %s10980_s21 }
0x1eaa   :  { %v10024_v22 = vpop.eup %10023 }
0x1eab   :  { %3765 = vrot.lane.b32.xlu1 %v10024_v22, %s10980_s21 }
0x1f16   :  { %v3718_v34 = vpop.permute.xlu0 %3717 }
0x1f17   :  { %v12065_v32 = vmul.f32 %v10012_v46, %v3718_v34 }
0x1f19   :  { %v3768_v35 = vpop.permute.xlu1 %3767  ;;  %v3795_v3 = vrot.slane %v12065_v32, 7 }
0x1f1a   :  { %v12067_v45 = vmul.f32 %v10016_v8, %v3768_v35  ;;  %v3716_v54 = vpop.permute.xlu0 %3715 }
0x1f1b   :  { %v12070_v60 = vmul.f32 %v10010_v30, %v3716_v54 }
0x1f1c   :  { %v3879_v14 = vrot.slane %v12067_v45, 7 }
0x1f1d   :  { %v3766_v4 = vpop.permute.xlu1 %3765  ;;  %v3796_v59 = vsel %vm1014_vm2, %v3795_v3, %v12070_v60 }
0x1f1e   :  { %v12075_v26 = vmul.f32 %v10014_v11, %v3766_v4  ;;  %3797 = vrot.lane.b32.xlu0 %v3796_v59, %s10981_s25  ;;  %v3793_v11 = vld [vmem:[#allocation5 + $0x2] sm:$0x1] }
0x1f20   :  { %v3880_v46 = vsel %vm1014_vm2, %v3879_v14, %v12075_v26 }
0x1f21   :  { %3881 = vrot.lane.b32.xlu1 %v3880_v46, %s10981_s25 }
0x1f90   :  { %v3798_v63 = vpop.permute.xlu0 %3797 }
0x1f91   :  { %9341 = vmatmul.mubr.msk.f32.vlgmr.msra.gmra.mxu0 %vm494_vm0, %v3798_v63 }
0x1f92   :  { %9355 = vmatpush3.msra.mxu0 %v11915_v39  ;;  %9362 = vmatprep.mubr.msk.f32.mxu0 %vm10979_vm1, %v10978_v41 }
0x1f93   :  { %v3882_v30 = vpop.permute.xlu1 %3881  ;;  %9356 = vmatprep.subr.mxu0 %v10978_v41 }
0x1f94   :  { %9352 = vmatmul.mubr.msk.f32.vlgmr.msra.gmra.mxu1 %vm494_vm0, %v3882_v30  ;;  %9357 = vmatpush3.msra.mxu0 %v11921_v28 }
0x1f95   :  { %9366 = vmatpush3.msra.mxu1 %v11917_v48  ;;  %9358 = vmatprep.subr.mxu0 %v10978_v41 }
0x1f96   :  { %9367 = vmatprep.subr.mxu1 %v10978_v41  ;;  %9359 = vmatpush3.msra.mxu0 %v11929_v55 }
0x1f97   :  { %9368 = vmatpush3.msra.mxu1 %v11923_v53  ;;  %9360 = vmatprep.subr.mxu0 %v10978_v41 }
0x1f98   :  { %9369 = vmatprep.subr.mxu1 %v10978_v41  ;;  %9361 = vmatpush3.msra.mxu0 %v11937_v61 }
0x1f99   :  { %9370 = vmatpush3.msra.mxu1 %v11931_v58  ;;  %9373 = vmatprep.mubr.msk.f32.mxu1 %vm10979_vm1, %v10978_v41 }
0x1f9a   :  { %9371 = vmatprep.subr.mxu1 %v10978_v41  ;;  %9376 = vmatprep.subr.mxu0 %v10978_v41 }
0x1f9b   :  { %9372 = vmatpush3.msra.mxu1 %v11941_v29 }
0x1f9c   :  { %9387 = vmatprep.subr.mxu1 %v10978_v41 }
0x2051   :  { %v3867_v8 = vpop.f32.mrf.mxu0 }
0x2052   :  { %v3872_v49 = vrot.slane %v3867_v8, 1  ;;  %v3875_v27 = vadd.f32 %v3867_v8, %v3793_v11 }
0x2053   :  { %v9342_v7 = vpop.f32.mrf.mxu0 }
0x2054   :  { %v3876_v42 = vadd.f32 %v3872_v49, %v3794_v43  ;;  %v8539_v40 = vmul.f32 -1.442695, %v3875_v27  ;;  %v3951_v2 = vpop.f32.mrf.mxu1 }
0x2055   :  { %v3956_v21 = vrot.slane %v3951_v2, 1  ;;  %v3959_v0 = vadd.f32 %v3951_v2, %v3877_v52 }
0x2056   :  { %10025 = vpow2.f32 %v8539_v40  ;;  %v8540_v62 = vmul.f32 -1.442695, %v3876_v42  ;;  %v9353_v56 = vpop.f32.mrf.mxu1 }
0x2057   :  { %v3960_v25 = vadd.f32 %v3956_v21, %v3878_v51  ;;  %v8543_v23 = vmul.f32 -1.442695, %v3959_v0 }
0x2058   :  { %10027 = vpow2.f32 %v8540_v62 }
0x2059   :  { %10029 = vpow2.f32 %v8543_v23  ;;  %v8544_v57 = vmul.f32 -1.442695, %v3960_v25 }
0x205b   :  { %10031 = vpow2.f32 %v8544_v57 }
0x2063   :  { %v10026_v12 = vpop.eup %10025 }
0x2064   :  { %v3967_v33 = vadd.f32 1.0, %v10026_v12 }
0x2065   :  { %v10028_v31 = vpop.eup %10027 }
0x2066   :  { %v10030_v36 = vpop.eup %10029  ;;  %v3968_v24 = vadd.f32 1.0, %v10028_v31  ;;  %10033 = vrcp.f32 %v3967_v33 }
0x2067   :  { %v4017_v17 = vadd.f32 1.0, %v10030_v36 }
0x2068   :  { %v10032_v16 = vpop.eup %10031  ;;  %10035 = vrcp.f32 %v3968_v24 }
0x2069   :  { %v4018_v47 = vadd.f32 1.0, %v10032_v16  ;;  %10037 = vrcp.f32 %v4017_v17 }
0x206b   :  { %10039 = vrcp.f32 %v4018_v47 }
0x2073   :  { %v10034_v37 = vpop.eup %10033 }
0x2074   :  { %v3973_v3 = vmul.f32 2.0, %v10034_v37  ;;  %v3977_v62 = vmul.f32 %v10034_v37, %v12053_v9 }
0x2075   :  { %v10036_v18 = vpop.eup %10035 }
0x2076   :  { %v3974_v22 = vmul.f32 2.0, %v10036_v18  ;;  %v10038_v34 = vpop.eup %10037  ;;  %v8541_v46 = vadd.f32 -1.0, %v3973_v3  ;;  %v3978_v40 = vmul.f32 %v10036_v18, %v12046_v5 }
0x2077   :  { %v4023_v14 = vmul.f32 2.0, %v10038_v34  ;;  %v4027_v23 = vmul.f32 %v10038_v34, %v12058_v15 }
0x2078   :  { %v10040_v35 = vpop.eup %10039  ;;  %v8542_v54 = vadd.f32 -1.0, %v3974_v22 }
0x2079   :  { %v4024_v4 = vmul.f32 2.0, %v10040_v35  ;;  %v8545_v63 = vadd.f32 -1.0, %v4023_v14  ;;  %v4028_v21 = vmul.f32 %v10040_v35, %v12051_v38 }
0x207a   :  { %3983 = vrot.lane.b32.xlu0 %v8542_v54, %s10980_s21 }
0x207b   :  { %v8546_v59 = vadd.f32 -1.0, %v4024_v4 }
0x207d   :  { %4033 = vrot.lane.b32.xlu1 %v8546_v59, %s10980_s21 }
0x207e   :  { %3981 = vrot.lane.b32.xlu0 %v8541_v46, %s10980_s21 }
0x2081   :  { %4031 = vrot.lane.b32.xlu1 %v8545_v63, %s10980_s21 }
0x20ec   :  { %v3984_v30 = vpop.permute.xlu0 %3983 }
0x20ed   :  { %v3988_v11 = vmul.f32 %v10036_v18, %v3984_v30 }
0x20ef   :  { %v4034_v8 = vpop.permute.xlu1 %4033  ;;  %3993 = vrot.lane.b32.xlu0 %v3988_v11, %s10981_s25  ;;  %v4166_v11 = vld [vmem:[#allocation6 + $0xc] sm:$0x1] }
0x20f0   :  { %v4038_v49 = vmul.f32 %v10040_v35, %v4034_v8  ;;  %v3982_v27 = vpop.permute.xlu0 %3981 }
0x20f1   :  { %v3987_v43 = vmul.f32 %v10034_v37, %v3982_v27 }
0x20f2   :  { %4043 = vrot.lane.b32.xlu1 %v4038_v49, %s10981_s25 }
0x20f3   :  { %v4032_v7 = vpop.permute.xlu1 %4031  ;;  %3991 = vrot.lane.b32.xlu0 %v3987_v43, %s10981_s25 }
0x20f4   :  { %v4037_v42 = vmul.f32 %v10038_v34, %v4032_v7 }
0x20f6   :  { %4041 = vrot.lane.b32.xlu1 %v4037_v42, %s10981_s25 }
0x2161   :  { %v3994_v52 = vpop.permute.xlu0 %3993 }
0x2162   :  { %v12112_v2 = vadd.f32 %v3994_v52, %v3978_v40 }
0x2164   :  { %10041 = vtanh.f32 %v12112_v2  ;;  %v4044_v0 = vpop.permute.xlu1 %4043 }
0x2165   :  { %v12117_v51 = vadd.f32 %v4044_v0, %v4028_v21  ;;  %v3992_v56 = vpop.permute.xlu0 %3991 }
0x2166   :  { %v12119_v25 = vadd.f32 %v3992_v56, %v3977_v62 }
0x2167   :  { %10043 = vtanh.f32 %v12117_v51 }
0x2168   :  { %10045 = vtanh.f32 %v12119_v25  ;;  %v4042_v5 = vpop.permute.xlu1 %4041 }
0x2169   :  { %v12124_v57 = vadd.f32 %v4042_v5, %v4027_v23 }
0x216b   :  { %10047 = vtanh.f32 %v12124_v57 }
0x2171   :  { %v10042_v38 = vpop.eup %10041 }
0x2172   :  { %4005 = vrot.lane.b32.xlu0 %v10042_v38, %s10980_s21 }
0x2174   :  { %v10044_v9 = vpop.eup %10043 }
0x2175   :  { %v10046_v12 = vpop.eup %10045  ;;  %4055 = vrot.lane.b32.xlu1 %v10044_v9, %s10980_s21 }
0x2176   :  { %4003 = vrot.lane.b32.xlu0 %v10046_v12, %s10980_s21 }
0x2178   :  { %v10048_v33 = vpop.eup %10047 }
0x2179   :  { %4053 = vrot.lane.b32.xlu1 %v10048_v33, %s10980_s21 }
0x21e4   :  { %v4006_v15 = vpop.permute.xlu0 %4005 }
0x21e5   :  { %v12131_v31 = vmul.f32 %v10036_v18, %v4006_v15 }
0x21e7   :  { %v4056_v36 = vpop.permute.xlu1 %4055  ;;  %v4083_v16 = vrot.slane %v12131_v31, 7 }
0x21e8   :  { %v12133_v24 = vmul.f32 %v10040_v35, %v4056_v36  ;;  %v4004_v17 = vpop.permute.xlu0 %4003 }
0x21e9   :  { %v12136_v47 = vmul.f32 %v10034_v37, %v4004_v17 }
0x21ea   :  { %v4167_v3 = vrot.slane %v12133_v24, 7 }
0x21eb   :  { %v4054_v22 = vpop.permute.xlu1 %4053  ;;  %v4084_v54 = vsel %vm1014_vm2, %v4083_v16, %v12136_v47 }
0x21ec   :  { %v12141_v4 = vmul.f32 %v10038_v34, %v4054_v22  ;;  %4085 = vrot.lane.b32.xlu0 %v4084_v54, %s10981_s25 }
0x21ee   :  { %v4168_v18 = vsel %vm1014_vm2, %v4167_v3, %v12141_v4 }
0x21ef   :  { %4169 = vrot.lane.b32.xlu1 %v4168_v18, %s10981_s25 }
0x225e   :  { %v4086_v35 = vpop.permute.xlu0 %4085 }
0x225f   :  { %9363 = vmatmul.mubr.msk.f32.vlgmr.msra.gmra.mxu0 %vm494_vm0, %v4086_v35 }
0x2260   :  { %9377 = vmatpush3.msra.mxu0 %v11915_v39  ;;  %9384 = vmatprep.mubr.msk.f32.mxu0 %vm10979_vm1, %v10978_v41  ;;  %v4081_v39 = vld [vmem:[#allocation5 + $0x3] sm:$0x1] }
0x2261   :  { %v4170_v37 = vpop.permute.xlu1 %4169  ;;  %9378 = vmatprep.subr.mxu0 %v10978_v41 }
0x2262   :  { %9374 = vmatmul.mubr.msk.f32.vlgmr.msra.gmra.mxu1 %vm494_vm0, %v4170_v37  ;;  %9379 = vmatpush3.msra.mxu0 %v11921_v28 }
0x2263   :  { %9388 = vmatpush3.msra.mxu1 %v11917_v48  ;;  %9380 = vmatprep.subr.mxu0 %v10978_v41 }
0x2264   :  { %9389 = vmatprep.subr.mxu1 %v10978_v41  ;;  %9381 = vmatpush3.msra.mxu0 %v11929_v55  ;;  %v4082_v55 = vld [vmem:[#allocation5 + $0xb] sm:$0x1] }
0x2265   :  { %9390 = vmatpush3.msra.mxu1 %v11923_v53  ;;  %9382 = vmatprep.subr.mxu0 %v10978_v41 }
0x2266   :  { %9391 = vmatprep.subr.mxu1 %v10978_v41  ;;  %9383 = vmatpush3.msra.mxu0 %v11937_v61 }
0x2267   :  { %9392 = vmatpush3.msra.mxu1 %v11931_v58  ;;  %9395 = vmatprep.mubr.msk.f32.mxu1 %vm10979_vm1, %v10978_v41  ;;  %v4165_v58 = vld [vmem:[#allocation6 + $0x4] sm:$0x1] }
0x2268   :  { %9393 = vmatprep.subr.mxu1 %v10978_v41  ;;  %9398 = vmatprep.subr.mxu0 %v10978_v41 }
0x2269   :  { %9394 = vmatpush3.msra.mxu1 %v11941_v29 }
0x226a   :  { %9409 = vmatprep.subr.mxu1 %v10978_v41 }
0x231f   :  { %v4155_v48 = vpop.f32.mrf.mxu0 }
0x2320   :  { %v4160_v28 = vrot.slane %v4155_v48, 1  ;;  %v4163_v53 = vadd.f32 %v4155_v48, %v4081_v39 }
0x2321   :  { %v9364_v34 = vpop.f32.mrf.mxu0 }
0x2322   :  { %v4164_v61 = vadd.f32 %v4160_v28, %v4082_v55  ;;  %v8549_v59 = vmul.f32 -1.442695, %v4163_v53  ;;  %v4239_v14 = vpop.f32.mrf.mxu1 }
0x2323   :  { %v4244_v46 = vrot.slane %v4239_v14, 1  ;;  %v4247_v63 = vadd.f32 %v4239_v14, %v4165_v58 }
0x2324   :  { %10049 = vpow2.f32 %v8549_v59  ;;  %v8550_v30 = vmul.f32 -1.442695, %v4164_v61  ;;  %v9375_v8 = vpop.f32.mrf.mxu1 }
0x2325   :  { %v4248_v49 = vadd.f32 %v4244_v46, %v4166_v11  ;;  %v8553_v29 = vmul.f32 -1.442695, %v4247_v63 }
0x2326   :  { %10051 = vpow2.f32 %v8550_v30 }
0x2327   :  { %10053 = vpow2.f32 %v8553_v29  ;;  %v8554_v27 = vmul.f32 -1.442695, %v4248_v49 }
0x2329   :  { %10055 = vpow2.f32 %v8554_v27 }
0x2331   :  { %v10050_v43 = vpop.eup %10049 }
0x2332   :  { %v4255_v7 = vadd.f32 1.0, %v10050_v43 }
0x2333   :  { %v10052_v42 = vpop.eup %10051 }
0x2334   :  { %v10054_v40 = vpop.eup %10053  ;;  %v4256_v52 = vadd.f32 1.0, %v10052_v42  ;;  %10057 = vrcp.f32 %v4255_v7 }
0x2335   :  { %v4305_v21 = vadd.f32 1.0, %v10054_v40 }
0x2336   :  { %v10056_v0 = vpop.eup %10055  ;;  %10059 = vrcp.f32 %v4256_v52 }
0x2337   :  { %v4306_v62 = vadd.f32 1.0, %v10056_v0  ;;  %10061 = vrcp.f32 %v4305_v21 }
0x2339   :  { %10063 = vrcp.f32 %v4306_v62 }
0x2341   :  { %v10058_v56 = vpop.eup %10057 }
0x2342   :  { %v4261_v33 = vmul.f32 2.0, %v10058_v56  ;;  %v4265_v58 = vmul.f32 %v10058_v56, %v12119_v25 }
0x2343   :  { %v10060_v23 = vpop.eup %10059 }
0x2344   :  { %v4262_v5 = vmul.f32 2.0, %v10060_v23  ;;  %v10062_v38 = vpop.eup %10061  ;;  %v8551_v16 = vadd.f32 -1.0, %v4261_v33  ;;  %v4266_v53 = vmul.f32 %v10060_v23, %v12112_v2  ;;  %v12229_v33 = vld [vmem:[#allocation24 + $0x8] sm:$0xff] }
0x2345   :  { %v4311_v17 = vmul.f32 2.0, %v10062_v38  ;;  %v4315_v30 = vmul.f32 %v10062_v38, %v12124_v57 }
0x2346   :  { %v10064_v9 = vpop.eup %10063  ;;  %v8552_v12 = vadd.f32 -1.0, %v4262_v5 }
0x2347   :  { %v4312_v15 = vmul.f32 2.0, %v10064_v9  ;;  %v8555_v22 = vadd.f32 -1.0, %v4311_v17  ;;  %v4316_v61 = vmul.f32 %v10064_v9, %v12117_v51  ;;  %v12240_v17 = vld [vmem:[#allocation27 + $0x8] sm:$0xff] }
0x2348   :  { %4271 = vrot.lane.b32.xlu0 %v8552_v12, %s10980_s21  ;;  %v12224_v12 = vld [vmem:[#allocation27 + $0x18] sm:$0xff] }
0x2349   :  { %v8556_v36 = vadd.f32 -1.0, %v4312_v15  ;;  %v12232_v15 = vld [vmem:[#allocation27 + $0x10] sm:$0xff] }
0x234b   :  { %4321 = vrot.lane.b32.xlu1 %v8556_v36, %s10980_s21  ;;  %v12237_v36 = vld [vmem:[#allocation24] sm:$0xff] }
0x234c   :  { %4269 = vrot.lane.b32.xlu0 %v8551_v16, %s10980_s21  ;;  %v12247_v16 = vld [vmem:[#allocation27] sm:$0xff] }
0x234f   :  { %4319 = vrot.lane.b32.xlu1 %v8555_v22, %s10980_s21  ;;  %v4369_v22 = vld [vmem:[#allocation5 + $0x4] sm:$0x1] }
0x23ba   :  { %v4272_v54 = vpop.permute.xlu0 %4271 }
0x23bb   :  { %v4276_v3 = vmul.f32 %v10060_v23, %v4272_v54 }
0x23bd   :  { %v4322_v18 = vpop.permute.xlu1 %4321  ;;  %4281 = vrot.lane.b32.xlu0 %v4276_v3, %s10981_s25 }
0x23be   :  { %v4326_v35 = vmul.f32 %v10064_v9, %v4322_v18  ;;  %v4270_v37 = vpop.permute.xlu0 %4269 }
0x23bf   :  { %v4275_v39 = vmul.f32 %v10058_v56, %v4270_v37 }
0x23c0   :  { %4331 = vrot.lane.b32.xlu1 %v4326_v35, %s10981_s25  ;;  %v4370_v35 = vld [vmem:[#allocation5 + $0xc] sm:$0x1] }
0x23c1   :  { %v4320_v48 = vpop.permute.xlu1 %4319  ;;  %4279 = vrot.lane.b32.xlu0 %v4275_v39, %s10981_s25 }
0x23c2   :  { %v4325_v28 = vmul.f32 %v10062_v38, %v4320_v48 }
0x23c4   :  { %4329 = vrot.lane.b32.xlu1 %v4325_v28, %s10981_s25  ;;  %v4453_v28 = vld [vmem:[#allocation6 + $0x3] sm:$0x1] }
0x242f   :  { %v4282_v55 = vpop.permute.xlu0 %4281 }
0x2430   :  { %v12178_v34 = vadd.f32 %v4282_v55, %v4266_v53 }
0x2432   :  { %10065 = vtanh.f32 %v12178_v34  ;;  %v4332_v59 = vpop.permute.xlu1 %4331 }
0x2433   :  { %v12183_v14 = vadd.f32 %v4332_v59, %v4316_v61  ;;  %v4280_v46 = vpop.permute.xlu0 %4279 }
0x2434   :  { %v12185_v63 = vadd.f32 %v4280_v46, %v4265_v58  ;;  %v4454_v58 = vld [vmem:[#allocation6 + $0xb] sm:$0x1] }
0x2435   :  { %10067 = vtanh.f32 %v12183_v14 }
0x2436   :  { %10069 = vtanh.f32 %v12185_v63  ;;  %v4330_v2 = vpop.permute.xlu1 %4329 }
0x2437   :  { %v12190_v11 = vadd.f32 %v4330_v2, %v4315_v30 }
0x2439   :  { %10071 = vtanh.f32 %v12190_v11 }
0x243f   :  { %v10066_v51 = vpop.eup %10065 }
0x2440   :  { %4293 = vrot.lane.b32.xlu0 %v10066_v51, %s10980_s21 }
0x2442   :  { %v10068_v25 = vpop.eup %10067 }
0x2443   :  { %v10070_v8 = vpop.eup %10069  ;;  %4343 = vrot.lane.b32.xlu1 %v10068_v25, %s10980_s21 }
0x2444   :  { %4291 = vrot.lane.b32.xlu0 %v10070_v8, %s10980_s21 }
0x2446   :  { %v10072_v49 = vpop.eup %10071 }
0x2447   :  { %4341 = vrot.lane.b32.xlu1 %v10072_v49, %s10980_s21 }
0x24b2   :  { %v4294_v57 = vpop.permute.xlu0 %4293 }
0x24b3   :  { %v12197_v29 = vmul.f32 %v10060_v23, %v4294_v57 }
0x24b5   :  { %v4344_v27 = vpop.permute.xlu1 %4343  ;;  %v4371_v42 = vrot.slane %v12197_v29, 7 }
0x24b6   :  { %v12199_v43 = vmul.f32 %v10064_v9, %v4344_v27  ;;  %v4292_v7 = vpop.permute.xlu0 %4291 }
0x24b7   :  { %v12202_v40 = vmul.f32 %v10058_v56, %v4292_v7  ;;  %v12214_v56 = vld [vmem:[#allocation24 + $0x18] sm:$0xff] }
0x24b8   :  { %v4455_v0 = vrot.slane %v12199_v43, 7 }
0x24b9   :  { %v4342_v52 = vpop.permute.xlu1 %4341  ;;  %v4372_v21 = vsel %vm1014_vm2, %v4371_v42, %v12202_v40 }
0x24ba   :  { %v12207_v62 = vmul.f32 %v10062_v38, %v4342_v52  ;;  %4373 = vrot.lane.b32.xlu0 %v4372_v21, %s10981_s25  ;;  %v12221_v38 = vld [vmem:[#allocation24 + $0x10] sm:$0xff] }
0x24bc   :  { %v4456_v23 = vsel %vm1014_vm2, %v4455_v0, %v12207_v62 }
0x24bd   :  { %4457 = vrot.lane.b32.xlu1 %v4456_v23, %s10981_s25 }
0x252c   :  { %v4374_v5 = vpop.permute.xlu0 %4373 }
0x252d   :  { %9385 = vmatmul.mubr.msk.f32.vlgmr.msra.gmra.mxu0 %vm494_vm0, %v4374_v5 }
0x252e   :  { %9399 = vmatpush3.msra.mxu0 %v12214_v56  ;;  %9406 = vmatprep.mubr.msk.f32.mxu0 %vm10979_vm1, %v10978_v41 }
0x252f   :  { %v4458_v9 = vpop.permute.xlu1 %4457  ;;  %9400 = vmatprep.subr.mxu0 %v10978_v41 }
0x2530   :  { %9396 = vmatmul.mubr.msk.f32.vlgmr.msra.gmra.mxu1 %vm494_vm0, %v4458_v9  ;;  %9401 = vmatpush3.msra.mxu0 %v12221_v38 }
0x2531   :  { %9410 = vmatpush3.msra.mxu1 %v12224_v12  ;;  %9402 = vmatprep.subr.mxu0 %v10978_v41 }
0x2532   :  { %9411 = vmatprep.subr.mxu1 %v10978_v41  ;;  %9403 = vmatpush3.msra.mxu0 %v12229_v33 }
0x2533   :  { %9412 = vmatpush3.msra.mxu1 %v12232_v15  ;;  %9404 = vmatprep.subr.mxu0 %v10978_v41 }
0x2534   :  { %9413 = vmatprep.subr.mxu1 %v10978_v41  ;;  %9405 = vmatpush3.msra.mxu0 %v12237_v36 }
0x2535   :  { %9414 = vmatpush3.msra.mxu1 %v12240_v17  ;;  %9417 = vmatprep.mubr.msk.f32.mxu1 %vm10979_vm1, %v10978_v41 }
0x2536   :  { %9415 = vmatprep.subr.mxu1 %v10978_v41  ;;  %9420 = vmatprep.subr.mxu0 %v10978_v41 }
0x2537   :  { %9416 = vmatpush3.msra.mxu1 %v12247_v16 }
0x2538   :  { %9431 = vmatprep.subr.mxu1 %v10978_v41 }
0x25ed   :  { %v4443_v54 = vpop.f32.mrf.mxu0 }
0x25ee   :  { %v4448_v3 = vrot.slane %v4443_v54, 1  ;;  %v4451_v18 = vadd.f32 %v4443_v54, %v4369_v22 }
0x25ef   :  { %v9386_v37 = vpop.f32.mrf.mxu0 }
0x25f0   :  { %v4452_v39 = vadd.f32 %v4448_v3, %v4370_v35  ;;  %v8559_v48 = vmul.f32 -1.442695, %v4451_v18  ;;  %v4527_v53 = vpop.f32.mrf.mxu1 }
0x25f1   :  { %v4532_v55 = vrot.slane %v4527_v53, 1  ;;  %v4535_v61 = vadd.f32 %v4527_v53, %v4453_v28 }
0x25f2   :  { %10073 = vpow2.f32 %v8559_v48  ;;  %v8560_v59 = vmul.f32 -1.442695, %v4452_v39  ;;  %v9397_v46 = vpop.f32.mrf.mxu1 }
0x25f3   :  { %v4536_v30 = vadd.f32 %v4532_v55, %v4454_v58  ;;  %v8563_v2 = vmul.f32 -1.442695, %v4535_v61 }
0x25f4   :  { %10075 = vpow2.f32 %v8560_v59 }
0x25f5   :  { %10077 = vpow2.f32 %v8563_v2  ;;  %v8564_v51 = vmul.f32 -1.442695, %v4536_v30 }
0x25f7   :  { %10079 = vpow2.f32 %v8564_v51 }
0x25ff   :  { %v10074_v25 = vpop.eup %10073 }
0x2600   :  { %v4543_v8 = vadd.f32 1.0, %v10074_v25 }
0x2601   :  { %v10076_v49 = vpop.eup %10075 }
0x2602   :  { %v10078_v57 = vpop.eup %10077  ;;  %v4544_v27 = vadd.f32 1.0, %v10076_v49  ;;  %10081 = vrcp.f32 %v4543_v8 }
0x2603   :  { %v4593_v7 = vadd.f32 1.0, %v10078_v57 }
0x2604   :  { %v10080_v42 = vpop.eup %10079  ;;  %10083 = vrcp.f32 %v4544_v27 }
0x2605   :  { %v4594_v52 = vadd.f32 1.0, %v10080_v42  ;;  %10085 = vrcp.f32 %v4593_v7 }
0x2607   :  { %10087 = vrcp.f32 %v4594_v52 }
0x260f   :  { %v10082_v21 = vpop.eup %10081 }
0x2610   :  { %v4549_v54 = vmul.f32 2.0, %v10082_v21  ;;  %v4553_v49 = vmul.f32 %v10082_v21, %v12185_v63 }
0x2611   :  { %v10084_v0 = vpop.eup %10083 }
0x2612   :  { %v4550_v23 = vmul.f32 2.0, %v10084_v0  ;;  %v10086_v5 = vpop.eup %10085  ;;  %v8561_v37 = vadd.f32 -1.0, %v4549_v54  ;;  %v4554_v30 = vmul.f32 %v10084_v0, %v12178_v34 }
0x2613   :  { %v4599_v35 = vmul.f32 2.0, %v10086_v5  ;;  %v4603_v42 = vmul.f32 %v10086_v5, %v12190_v11 }
0x2614   :  { %v10088_v9 = vpop.eup %10087  ;;  %v8562_v22 = vadd.f32 -1.0, %v4550_v23 }
0x2615   :  { %v4600_v3 = vmul.f32 2.0, %v10088_v9  ;;  %v8565_v39 = vadd.f32 -1.0, %v4599_v35  ;;  %v4604_v25 = vmul.f32 %v10088_v9, %v12183_v14 }
0x2616   :  { %4559 = vrot.lane.b32.xlu0 %v8562_v22, %s10980_s21 }
0x2617   :  { %v8566_v18 = vadd.f32 -1.0, %v4600_v3 }
0x2619   :  { %4609 = vrot.lane.b32.xlu1 %v8566_v18, %s10980_s21 }
0x261a   :  { %4557 = vrot.lane.b32.xlu0 %v8561_v37, %s10980_s21 }
0x261d   :  { %4607 = vrot.lane.b32.xlu1 %v8565_v39, %s10980_s21 }
0x2688   :  { %v4560_v48 = vpop.permute.xlu0 %4559 }
0x2689   :  { %v4564_v28 = vmul.f32 %v10084_v0, %v4560_v48 }
0x268b   :  { %v4610_v53 = vpop.permute.xlu1 %4609  ;;  %4569 = vrot.lane.b32.xlu0 %v4564_v28, %s10981_s25 }
0x268c   :  { %v4614_v55 = vmul.f32 %v10088_v9, %v4610_v53  ;;  %v4558_v61 = vpop.permute.xlu0 %4557 }
0x268d   :  { %v4563_v59 = vmul.f32 %v10082_v21, %v4558_v61 }
0x268e   :  { %4619 = vrot.lane.b32.xlu1 %v4614_v55, %s10981_s25 }
0x268f   :  { %v4608_v58 = vpop.permute.xlu1 %4607  ;;  %4567 = vrot.lane.b32.xlu0 %v4563_v59, %s10981_s25 }
0x2690   :  { %v4613_v46 = vmul.f32 %v10086_v5, %v4608_v58 }
0x2692   :  { %4617 = vrot.lane.b32.xlu1 %v4613_v46, %s10981_s25  ;;  %v4658_v46 = vld [vmem:[#allocation5 + $0xd] sm:$0x1] }
0x26fd   :  { %v4570_v2 = vpop.permute.xlu0 %4569 }
0x26fe   :  { %v12260_v51 = vadd.f32 %v4570_v2, %v4554_v30 }
0x2700   :  { %10089 = vtanh.f32 %v12260_v51  ;;  %v4620_v8 = vpop.permute.xlu1 %4619 }
0x2701   :  { %v12265_v57 = vadd.f32 %v4620_v8, %v4604_v25  ;;  %v4568_v27 = vpop.permute.xlu0 %4567  ;;  %v4741_v8 = vld [vmem:[#allocation6 + $0x2] sm:$0x1] }
0x2702   :  { %v12267_v7 = vadd.f32 %v4568_v27, %v4553_v49 }
0x2703   :  { %10091 = vtanh.f32 %v12265_v57 }
0x2704   :  { %10093 = vtanh.f32 %v12267_v7  ;;  %v4618_v34 = vpop.permute.xlu1 %4617 }
0x2705   :  { %v12272_v52 = vadd.f32 %v4618_v34, %v4603_v42 }
0x2707   :  { %10095 = vtanh.f32 %v12272_v52 }
0x270d   :  { %v10090_v14 = vpop.eup %10089 }
0x270e   :  { %4581 = vrot.lane.b32.xlu0 %v10090_v14, %s10980_s21  ;;  %v4742_v14 = vld [vmem:[#allocation6 + $0xa] sm:$0x1] }
0x2710   :  { %v10092_v63 = vpop.eup %10091 }
0x2711   :  { %v10094_v23 = vpop.eup %10093  ;;  %4631 = vrot.lane.b32.xlu1 %v10092_v63, %s10980_s21 }
0x2712   :  { %4579 = vrot.lane.b32.xlu0 %v10094_v23, %s10980_s21 }
0x2714   :  { %v10096_v22 = vpop.eup %10095 }
0x2715   :  { %4629 = vrot.lane.b32.xlu1 %v10096_v22, %s10980_s21 }
0x2780   :  { %v4582_v11 = vpop.permute.xlu0 %4581 }
0x2781   :  { %v12279_v54 = vmul.f32 %v10084_v0, %v4582_v11 }
0x2783   :  { %v4632_v3 = vpop.permute.xlu1 %4631  ;;  %v4659_v37 = vrot.slane %v12279_v54, 7 }
0x2784   :  { %v12281_v18 = vmul.f32 %v10088_v9, %v4632_v3  ;;  %v4580_v35 = vpop.permute.xlu0 %4579 }
0x2785   :  { %v12284_v39 = vmul.f32 %v10082_v21, %v4580_v35 }
0x2786   :  { %v4743_v53 = vrot.slane %v12281_v18, 7 }
0x2787   :  { %v4630_v48 = vpop.permute.xlu1 %4629  ;;  %v4660_v28 = vsel %vm1014_vm2, %v4659_v37, %v12284_v39 }
0x2788   :  { %v12289_v55 = vmul.f32 %v10086_v5, %v4630_v48  ;;  %4661 = vrot.lane.b32.xlu0 %v4660_v28, %s10981_s25  ;;  %v4657_v5 = vld [vmem:[#allocation5 + $0x5] sm:$0x1] }
0x278a   :  { %v4744_v0 = vsel %vm1014_vm2, %v4743_v53, %v12289_v55 }
0x278b   :  { %4745 = vrot.lane.b32.xlu1 %v4744_v0, %s10981_s25 }
0x27fa   :  { %v4662_v9 = vpop.permute.xlu0 %4661 }
0x27fb   :  { %9407 = vmatmul.mubr.msk.f32.vlgmr.msra.gmra.mxu0 %vm494_vm0, %v4662_v9 }
0x27fc   :  { %9421 = vmatpush3.msra.mxu0 %v12214_v56  ;;  %9428 = vmatprep.mubr.msk.f32.mxu0 %vm10979_vm1, %v10978_v41 }
0x27fd   :  { %v4746_v21 = vpop.permute.xlu1 %4745  ;;  %9422 = vmatprep.subr.mxu0 %v10978_v41 }
0x27fe   :  { %9418 = vmatmul.mubr.msk.f32.vlgmr.msra.gmra.mxu1 %vm494_vm0, %v4746_v21  ;;  %9423 = vmatpush3.msra.mxu0 %v12221_v38 }
0x27ff   :  { %9432 = vmatpush3.msra.mxu1 %v12224_v12  ;;  %9424 = vmatprep.subr.mxu0 %v10978_v41 }
0x2800   :  { %9433 = vmatprep.subr.mxu1 %v10978_v41  ;;  %9425 = vmatpush3.msra.mxu0 %v12229_v33 }
0x2801   :  { %9434 = vmatpush3.msra.mxu1 %v12232_v15  ;;  %9426 = vmatprep.subr.mxu0 %v10978_v41 }
0x2802   :  { %9435 = vmatprep.subr.mxu1 %v10978_v41  ;;  %9427 = vmatpush3.msra.mxu0 %v12237_v36 }
0x2803   :  { %9436 = vmatpush3.msra.mxu1 %v12240_v17  ;;  %9439 = vmatprep.mubr.msk.f32.mxu1 %vm10979_vm1, %v10978_v41 }
0x2804   :  { %9437 = vmatprep.subr.mxu1 %v10978_v41  ;;  %9442 = vmatprep.subr.mxu0 %v10978_v41 }
0x2805   :  { %9438 = vmatpush3.msra.mxu1 %v12247_v16 }
0x2806   :  { %9453 = vmatprep.subr.mxu1 %v10978_v41 }
0x28bb   :  { %v4731_v61 = vpop.f32.mrf.mxu0 }
0x28bc   :  { %v4736_v59 = vrot.slane %v4731_v61, 1  ;;  %v4739_v58 = vadd.f32 %v4731_v61, %v4657_v5 }
0x28bd   :  { %v9408_v30 = vpop.f32.mrf.mxu0 }
0x28be   :  { %v4740_v2 = vadd.f32 %v4736_v59, %v4658_v46  ;;  %v8569_v25 = vmul.f32 -1.442695, %v4739_v58  ;;  %v4815_v49 = vpop.f32.mrf.mxu1 }
0x28bf   :  { %v4820_v27 = vrot.slane %v4815_v49, 1  ;;  %v4823_v42 = vadd.f32 %v4815_v49, %v4741_v8 }
0x28c0   :  { %10097 = vpow2.f32 %v8569_v25  ;;  %v8570_v34 = vmul.f32 -1.442695, %v4740_v2  ;;  %v9419_v63 = vpop.f32.mrf.mxu1 }
0x28c1   :  { %v4824_v23 = vadd.f32 %v4820_v27, %v4742_v14  ;;  %v8573_v22 = vmul.f32 -1.442695, %v4823_v42 }
0x28c2   :  { %10099 = vpow2.f32 %v8570_v34 }
0x28c3   :  { %10101 = vpow2.f32 %v8573_v22  ;;  %v8574_v11 = vmul.f32 -1.442695, %v4824_v23 }
0x28c5   :  { %10103 = vpow2.f32 %v8574_v11 }
0x28cd   :  { %v10098_v3 = vpop.eup %10097 }
0x28ce   :  { %v4831_v35 = vadd.f32 1.0, %v10098_v3 }
0x28cf   :  { %v10100_v37 = vpop.eup %10099 }
0x28d0   :  { %v10102_v48 = vpop.eup %10101  ;;  %v4832_v28 = vadd.f32 1.0, %v10100_v37  ;;  %10105 = vrcp.f32 %v4831_v35 }
0x28d1   :  { %v4881_v53 = vadd.f32 1.0, %v10102_v48 }
0x28d2   :  { %v10104_v0 = vpop.eup %10103  ;;  %10107 = vrcp.f32 %v4832_v28 }
0x28d3   :  { %v4882_v9 = vadd.f32 1.0, %v10104_v0  ;;  %10109 = vrcp.f32 %v4881_v53 }
0x28d5   :  { %10111 = vrcp.f32 %v4882_v9 }
0x28dd   :  { %v10106_v21 = vpop.eup %10105 }
0x28de   :  { %v4837_v30 = vmul.f32 2.0, %v10106_v21  ;;  %v4841_v0 = vmul.f32 %v10106_v21, %v12267_v7 }
0x28df   :  { %v10108_v5 = vpop.eup %10107 }
0x28e0   :  { %v4838_v61 = vmul.f32 2.0, %v10108_v5  ;;  %v10110_v59 = vpop.eup %10109  ;;  %v8571_v49 = vadd.f32 -1.0, %v4837_v30  ;;  %v4842_v35 = vmul.f32 %v10108_v5, %v12260_v51 }
0x28e1   :  { %v4887_v8 = vmul.f32 2.0, %v10110_v59  ;;  %v4891_v30 = vmul.f32 %v10110_v59, %v12272_v52 }
0x28e2   :  { %v10112_v58 = vpop.eup %10111  ;;  %v8572_v46 = vadd.f32 -1.0, %v4838_v61 }
0x28e3   :  { %v4888_v2 = vmul.f32 2.0, %v10112_v58  ;;  %v8575_v27 = vadd.f32 -1.0, %v4887_v8  ;;  %v4892_v28 = vmul.f32 %v10112_v58, %v12265_v57 }
0x28e4   :  { %4847 = vrot.lane.b32.xlu0 %v8572_v46, %s10980_s21 }
0x28e5   :  { %v8576_v25 = vadd.f32 -1.0, %v4888_v2 }
0x28e7   :  { %4897 = vrot.lane.b32.xlu1 %v8576_v25, %s10980_s21 }
0x28e8   :  { %4845 = vrot.lane.b32.xlu0 %v8571_v49, %s10980_s21 }
0x28eb   :  { %4895 = vrot.lane.b32.xlu1 %v8575_v27, %s10980_s21 }
0x2956   :  { %v4848_v42 = vpop.permute.xlu0 %4847 }
0x2957   :  { %v4852_v34 = vmul.f32 %v10108_v5, %v4848_v42 }
0x2959   :  { %v4898_v14 = vpop.permute.xlu1 %4897  ;;  %4857 = vrot.lane.b32.xlu0 %v4852_v34, %s10981_s25 }
0x295a   :  { %v4902_v63 = vmul.f32 %v10112_v58, %v4898_v14  ;;  %v4846_v23 = vpop.permute.xlu0 %4845 }
0x295b   :  { %v4851_v22 = vmul.f32 %v10106_v21, %v4846_v23 }
0x295c   :  { %4907 = vrot.lane.b32.xlu1 %v4902_v63, %s10981_s25 }
0x295d   :  { %v4896_v11 = vpop.permute.xlu1 %4895  ;;  %4855 = vrot.lane.b32.xlu0 %v4851_v22, %s10981_s25 }
0x295e   :  { %v4901_v3 = vmul.f32 %v10110_v59, %v4896_v11 }
0x2960   :  { %4905 = vrot.lane.b32.xlu1 %v4901_v3, %s10981_s25 }
0x29cb   :  { %v4858_v37 = vpop.permute.xlu0 %4857 }
0x29cc   :  { %v12326_v48 = vadd.f32 %v4858_v37, %v4842_v35 }
0x29ce   :  { %10113 = vtanh.f32 %v12326_v48  ;;  %v4908_v53 = vpop.permute.xlu1 %4907 }
0x29cf   :  { %v12331_v9 = vadd.f32 %v4908_v53, %v4892_v28  ;;  %v4856_v61 = vpop.permute.xlu0 %4855  ;;  %v5029_v28 = vld [vmem:[#allocation6 + $0x1] sm:$0x1] }
0x29d0   :  { %v12333_v46 = vadd.f32 %v4856_v61, %v4841_v0  ;;  %v5030_v61 = vld [vmem:[#allocation6 + $0x9] sm:$0x1] }
0x29d1   :  { %10115 = vtanh.f32 %v12331_v9 }
0x29d2   :  { %10117 = vtanh.f32 %v12333_v46  ;;  %v4906_v51 = vpop.permute.xlu1 %4905 }
0x29d3   :  { %v12338_v2 = vadd.f32 %v4906_v51, %v4891_v30 }
0x29d5   :  { %10119 = vtanh.f32 %v12338_v2 }
0x29db   :  { %v10114_v57 = vpop.eup %10113 }
0x29dc   :  { %4869 = vrot.lane.b32.xlu0 %v10114_v57, %s10980_s21 }
0x29de   :  { %v10116_v7 = vpop.eup %10115 }
0x29df   :  { %v10118_v25 = vpop.eup %10117  ;;  %4919 = vrot.lane.b32.xlu1 %v10116_v7, %s10980_s21 }
0x29e0   :  { %4867 = vrot.lane.b32.xlu0 %v10118_v25, %s10980_s21 }
0x29e2   :  { %v10120_v8 = vpop.eup %10119 }
0x29e3   :  { %4917 = vrot.lane.b32.xlu1 %v10120_v8, %s10980_s21 }
0x2a4e   :  { %v4870_v52 = vpop.permute.xlu0 %4869 }
0x2a4f   :  { %v12345_v49 = vmul.f32 %v10108_v5, %v4870_v52 }
0x2a51   :  { %v4920_v27 = vpop.permute.xlu1 %4919  ;;  %v4947_v14 = vrot.slane %v12345_v49, 7 }
0x2a52   :  { %v12347_v42 = vmul.f32 %v10112_v58, %v4920_v27  ;;  %v4868_v34 = vpop.permute.xlu0 %4867 }
0x2a53   :  { %v12350_v63 = vmul.f32 %v10106_v21, %v4868_v34 }
0x2a54   :  { %v5031_v11 = vrot.slane %v12347_v42, 7 }
0x2a55   :  { %v4918_v23 = vpop.permute.xlu1 %4917  ;;  %v4948_v22 = vsel %vm1014_vm2, %v4947_v14, %v12350_v63 }
0x2a56   :  { %v12355_v3 = vmul.f32 %v10110_v59, %v4918_v23  ;;  %4949 = vrot.lane.b32.xlu0 %v4948_v22, %s10981_s25 }
0x2a58   :  { %v5032_v5 = vsel %vm1014_vm2, %v5031_v11, %v12355_v3 }
0x2a59   :  { %5033 = vrot.lane.b32.xlu1 %v5032_v5, %s10981_s25 }
0x2ac8   :  { %v4950_v58 = vpop.permute.xlu0 %4949 }
0x2ac9   :  { %9429 = vmatmul.mubr.msk.f32.vlgmr.msra.gmra.mxu0 %vm494_vm0, %v4950_v58 }
0x2aca   :  { %9443 = vmatpush3.msra.mxu0 %v12214_v56  ;;  %9450 = vmatprep.mubr.msk.f32.mxu0 %vm10979_vm1, %v10978_v41  ;;  %v4945_v56 = vld [vmem:[#allocation5 + $0x6] sm:$0x1] }
0x2acb   :  { %v5034_v21 = vpop.permute.xlu1 %5033  ;;  %9444 = vmatprep.subr.mxu0 %v10978_v41 }
0x2acc   :  { %9440 = vmatmul.mubr.msk.f32.vlgmr.msra.gmra.mxu1 %vm494_vm0, %v5034_v21  ;;  %9445 = vmatpush3.msra.mxu0 %v12221_v38 }
0x2acd   :  { %9454 = vmatpush3.msra.mxu1 %v12224_v12  ;;  %9446 = vmatprep.subr.mxu0 %v10978_v41 }
0x2ace   :  { %9455 = vmatprep.subr.mxu1 %v10978_v41  ;;  %9447 = vmatpush3.msra.mxu0 %v12229_v33 }
0x2acf   :  { %9456 = vmatpush3.msra.mxu1 %v12232_v15  ;;  %9448 = vmatprep.subr.mxu0 %v10978_v41  ;;  %v4946_v15 = vld [vmem:[#allocation5 + $0xe] sm:$0x1] }
0x2ad0   :  { %9457 = vmatprep.subr.mxu1 %v10978_v41  ;;  %9449 = vmatpush3.msra.mxu0 %v12237_v36 }
0x2ad1   :  { %9458 = vmatpush3.msra.mxu1 %v12240_v17  ;;  %9461 = vmatprep.mubr.msk.f32.mxu1 %vm10979_vm1, %v10978_v41 }
0x2ad2   :  { %9459 = vmatprep.subr.mxu1 %v10978_v41 }
0x2ad3   :  { %9460 = vmatpush3.msra.mxu1 %v12247_v16 }
0x2b89   :  { %v5019_v38 = vpop.f32.mrf.mxu0 }
0x2b8a   :  { %v5024_v12 = vrot.slane %v5019_v38, 1  ;;  %v5027_v33 = vadd.f32 %v5019_v38, %v4945_v56 }
0x2b8b   :  { %v9430_v59 = vpop.f32.mrf.mxu0 }
0x2b8c   :  { %v5028_v35 = vadd.f32 %v5024_v12, %v4946_v15  ;;  %v8579_v37 = vmul.f32 -1.442695, %v5027_v33  ;;  %v5103_v53 = vpop.f32.mrf.mxu1 }
0x2b8d   :  { %v5108_v36 = vrot.slane %v5103_v53, 1  ;;  %v5111_v0 = vadd.f32 %v5103_v53, %v5029_v28 }
0x2b8e   :  { %10121 = vpow2.f32 %v8579_v37  ;;  %v8580_v17 = vmul.f32 -1.442695, %v5028_v35  ;;  %v9441_v30 = vpop.f32.mrf.mxu1 }
0x2b8f   :  { %v5112_v51 = vadd.f32 %v5108_v36, %v5030_v61  ;;  %v8583_v57 = vmul.f32 -1.442695, %v5111_v0 }
0x2b90   :  { %10123 = vpow2.f32 %v8580_v17 }
0x2b91   :  { %10125 = vpow2.f32 %v8583_v57  ;;  %v8584_v16 = vmul.f32 -1.442695, %v5112_v51 }
0x2b93   :  { %10127 = vpow2.f32 %v8584_v16 }
0x2b9b   :  { %v10122_v7 = vpop.eup %10121 }
0x2b9c   :  { %v5119_v25 = vadd.f32 1.0, %v10122_v7 }
0x2b9d   :  { %v10124_v8 = vpop.eup %10123 }
0x2b9e   :  { %v10126_v52 = vpop.eup %10125  ;;  %v5120_v27 = vadd.f32 1.0, %v10124_v8  ;;  %10129 = vrcp.f32 %v5119_v25 }
0x2b9f   :  { %v5169_v34 = vadd.f32 1.0, %v10126_v52 }
0x2ba0   :  { %v10128_v14 = vpop.eup %10127  ;;  %10131 = vrcp.f32 %v5120_v27 }
0x2ba1   :  { %v5170_v23 = vadd.f32 1.0, %v10128_v14  ;;  %10133 = vrcp.f32 %v5169_v34 }
0x2ba3   :  { %10135 = vrcp.f32 %v5170_v23 }
0x2bab   :  { %v10130_v22 = vpop.eup %10129 }
0x2bac   :  { %v5125_v38 = vmul.f32 2.0, %v10130_v22  ;;  %v5129_v8 = vmul.f32 %v10130_v22, %v12333_v46 }
0x2bad   :  { %v10132_v11 = vpop.eup %10131 }
0x2bae   :  { %v5126_v5 = vmul.f32 2.0, %v10132_v11  ;;  %v10134_v58 = vpop.eup %10133  ;;  %v8581_v59 = vadd.f32 -1.0, %v5125_v38  ;;  %v5130_v51 = vmul.f32 %v10132_v11, %v12326_v48 }
0x2baf   :  { %v5175_v15 = vmul.f32 2.0, %v10134_v58  ;;  %v5179_v14 = vmul.f32 %v10134_v58, %v12338_v2 }
0x2bb0   :  { %v10136_v21 = vpop.eup %10135  ;;  %v8582_v56 = vadd.f32 -1.0, %v5126_v5 }
0x2bb1   :  { %v5176_v12 = vmul.f32 2.0, %v10136_v21  ;;  %v8585_v35 = vadd.f32 -1.0, %v5175_v15  ;;  %v5180_v7 = vmul.f32 %v10136_v21, %v12331_v9 }
0x2bb2   :  { %5135 = vrot.lane.b32.xlu0 %v8582_v56, %s10980_s21 }
0x2bb3   :  { %v8586_v33 = vadd.f32 -1.0, %v5176_v12 }
0x2bb5   :  { %5185 = vrot.lane.b32.xlu1 %v8586_v33, %s10980_s21 }
0x2bb6   :  { %5133 = vrot.lane.b32.xlu0 %v8581_v59, %s10980_s21 }
0x2bb9   :  { %5183 = vrot.lane.b32.xlu1 %v8585_v35, %s10980_s21 }
0x2c24   :  { %v5136_v37 = vpop.permute.xlu0 %5135 }
0x2c25   :  { %v5140_v28 = vmul.f32 %v10132_v11, %v5136_v37 }
0x2c27   :  { %v5186_v53 = vpop.permute.xlu1 %5185  ;;  %5145 = vrot.lane.b32.xlu0 %v5140_v28, %s10981_s25 }
0x2c28   :  { %v5190_v36 = vmul.f32 %v10136_v21, %v5186_v53  ;;  %v5134_v0 = vpop.permute.xlu0 %5133 }
0x2c29   :  { %v5139_v17 = vmul.f32 %v10130_v22, %v5134_v0  ;;  %v5233_v0 = vld [vmem:[#allocation5 + $0x7] sm:$0x1] }
0x2c2a   :  { %5195 = vrot.lane.b32.xlu1 %v5190_v36, %s10981_s25 }
0x2c2b   :  { %v5184_v61 = vpop.permute.xlu1 %5183  ;;  %5143 = vrot.lane.b32.xlu0 %v5139_v17, %s10981_s25 }
0x2c2c   :  { %v5189_v30 = vmul.f32 %v10134_v58, %v5184_v61 }
0x2c2e   :  { %5193 = vrot.lane.b32.xlu1 %v5189_v30, %s10981_s25 }
0x2c99   :  { %v5146_v57 = vpop.permute.xlu0 %5145 }
0x2c9a   :  { %v12390_v16 = vadd.f32 %v5146_v57, %v5130_v51  ;;  %v5234_v51 = vld [vmem:[#allocation5 + $0xf] sm:$0x1] }
0x2c9c   :  { %10137 = vtanh.f32 %v12390_v16  ;;  %v5196_v25 = vpop.permute.xlu1 %5195 }
0x2c9d   :  { %v12395_v52 = vadd.f32 %v5196_v25, %v5180_v7  ;;  %v5144_v27 = vpop.permute.xlu0 %5143  ;;  %v5317_v25 = vld [vmem:[#allocation6] sm:$0x1] }
0x2c9e   :  { %v12397_v34 = vadd.f32 %v5144_v27, %v5129_v8 }
0x2c9f   :  { %10139 = vtanh.f32 %v12395_v52 }
0x2ca0   :  { %10141 = vtanh.f32 %v12397_v34  ;;  %v5194_v48 = vpop.permute.xlu1 %5193 }
0x2ca1   :  { %v12402_v23 = vadd.f32 %v5194_v48, %v5179_v14 }
0x2ca3   :  { %10143 = vtanh.f32 %v12402_v23 }
0x2ca9   :  { %v10138_v9 = vpop.eup %10137 }
0x2caa   :  { %5157 = vrot.lane.b32.xlu0 %v10138_v9, %s10980_s21  ;;  %v5318_v9 = vld [vmem:[#allocation6 + $0x8] sm:$0x1] }
0x2cac   :  { %v10140_v46 = vpop.eup %10139 }
0x2cad   :  { %v10142_v5 = vpop.eup %10141  ;;  %5207 = vrot.lane.b32.xlu1 %v10140_v46, %s10980_s21 }
0x2cae   :  { %5155 = vrot.lane.b32.xlu0 %v10142_v5, %s10980_s21 }
0x2cb0   :  { %v10144_v56 = vpop.eup %10143 }
0x2cb1   :  { %5205 = vrot.lane.b32.xlu1 %v10144_v56, %s10980_s21 }
0x2d1c   :  { %v5158_v2 = vpop.permute.xlu0 %5157 }
0x2d1d   :  { %v12409_v38 = vmul.f32 %v10132_v11, %v5158_v2 }
0x2d1f   :  { %v5208_v12 = vpop.permute.xlu1 %5207  ;;  %v5235_v59 = vrot.slane %v12409_v38, 7 }
0x2d20   :  { %v12411_v33 = vmul.f32 %v10136_v21, %v5208_v12  ;;  %v5156_v15 = vpop.permute.xlu0 %5155 }
0x2d21   :  { %v12414_v35 = vmul.f32 %v10130_v22, %v5156_v15 }
0x2d22   :  { %v5319_v53 = vrot.slane %v12411_v33, 7 }
0x2d23   :  { %v5206_v37 = vpop.permute.xlu1 %5205  ;;  %v5236_v28 = vsel %vm1014_vm2, %v5235_v59, %v12414_v35 }
0x2d24   :  { %v12419_v36 = vmul.f32 %v10134_v58, %v5206_v37  ;;  %5237 = vrot.lane.b32.xlu0 %v5236_v28, %s10981_s25 }
0x2d26   :  { %v5320_v11 = vsel %vm1014_vm2, %v5319_v53, %v12419_v36 }
0x2d27   :  { %5321 = vrot.lane.b32.xlu1 %v5320_v11, %s10981_s25 }
0x2d96   :  { %v5238_v21 = vpop.permute.xlu0 %5237 }
0x2d97   :  { %9451 = vmatmul.mubr.msk.f32.vlgmr.msra.gmra.mxu0 %vm494_vm0, %v5238_v21 }
0x2d99   :  { %v5322_v22 = vpop.permute.xlu1 %5321 }
0x2d9a   :  { %9462 = vmatmul.mubr.msk.f32.vlgmr.msra.gmra.mxu1 %vm494_vm0, %v5322_v22 }
0x2e57   :  { %v5307_v17 = vpop.f32.mrf.mxu0 }
0x2e58   :  { %v5312_v61 = vrot.slane %v5307_v17, 1  ;;  %v5315_v30 = vadd.f32 %v5307_v17, %v5233_v0 }
0x2e59   :  { %v9452_v58 = vpop.f32.mrf.mxu0 }
0x2e5a   :  { %v5316_v57 = vadd.f32 %v5312_v61, %v5234_v51  ;;  %v8589_v7 = vmul.f32 -1.442695, %v5315_v30  ;;  %v5391_v8 = vpop.f32.mrf.mxu1 }
0x2e5b   :  { %v5396_v27 = vrot.slane %v5391_v8, 1  ;;  %v5399_v14 = vadd.f32 %v5391_v8, %v5317_v25 }
0x2e5c   :  { %10145 = vpow2.f32 %v8589_v7  ;;  %v8590_v48 = vmul.f32 -1.442695, %v5316_v57  ;;  %v9463_v46 = vpop.f32.mrf.mxu1 }
0x2e5d   :  { %v5400_v5 = vadd.f32 %v5396_v27, %v5318_v9  ;;  %v8593_v56 = vmul.f32 -1.442695, %v5399_v14 }
0x2e5e   :  { %10147 = vpow2.f32 %v8590_v48 }
0x2e5f   :  { %10149 = vpow2.f32 %v8593_v56  ;;  %v8594_v2 = vmul.f32 -1.442695, %v5400_v5 }
0x2e61   :  { %10151 = vpow2.f32 %v8594_v2 }
0x2e69   :  { %v10146_v12 = vpop.eup %10145 }
0x2e6a   :  { %v5407_v15 = vadd.f32 1.0, %v10146_v12 }
0x2e6b   :  { %v10148_v59 = vpop.eup %10147 }
0x2e6c   :  { %v10150_v37 = vpop.eup %10149  ;;  %v5408_v28 = vadd.f32 1.0, %v10148_v59  ;;  %10153 = vrcp.f32 %v5407_v15 }
0x2e6d   :  { %v5457_v53 = vadd.f32 1.0, %v10150_v37 }
0x2e6e   :  { %v10152_v11 = vpop.eup %10151  ;;  %10155 = vrcp.f32 %v5408_v28 }
0x2e6f   :  { %v5458_v21 = vadd.f32 1.0, %v10152_v11  ;;  %10157 = vrcp.f32 %v5457_v53 }
0x2e71   :  { %10159 = vrcp.f32 %v5458_v21 }
0x2e79   :  { %v12427_v22 = vpop.eup %10153 }
0x2e7a   :  { %v5413_v0 = vmul.f32 2.0, %v12427_v22  ;;  %v5417_v15 = vmul.f32 %v12427_v22, %v12397_v34 }
0x2e7b   :  { %v12430_v17 = vpop.eup %10155 }
0x2e7c   :  { %v12432_v61 = vpop.eup %10157  ;;  %v8591_v30 = vadd.f32 -1.0, %v5413_v0  ;;  %v5414_v51 = vmul.f32 2.0, %v12430_v17  ;;  %v5418_v11 = vmul.f32 %v12430_v17, %v12390_v16 }
0x2e7d   :  { %v5463_v58 = vmul.f32 2.0, %v12432_v61  ;;  %v5467_v28 = vmul.f32 %v12432_v61, %v12402_v23 }
0x2e7e   :  { %v12436_v57 = vpop.eup %10159  ;;  %5421 = vrot.lane.b32.xlu0 %v8591_v30, %s10980_s21  ;;  %v8592_v8 = vadd.f32 -1.0, %v5414_v51 }
0x2e7f   :  { %v8595_v7 = vadd.f32 -1.0, %v5463_v58  ;;  %v5464_v25 = vmul.f32 2.0, %v12436_v57 }
0x2e81   :  { %5471 = vrot.lane.b32.xlu1 %v8595_v7, %s10980_s21  ;;  %v8596_v27 = vadd.f32 -1.0, %v5464_v25 }
0x2e82   :  { %5423 = vrot.lane.b32.xlu0 %v8592_v8, %s10980_s21 }
0x2e85   :  { %5473 = vrot.lane.b32.xlu1 %v8596_v27, %s10980_s21 }
0x2ef0   :  { %v5422_v14 = vpop.permute.xlu0 %5421 }
0x2ef1   :  { %v5427_v48 = vmul.f32 %v12427_v22, %v5422_v14 }
0x2ef3   :  { %v5472_v9 = vpop.permute.xlu1 %5471  ;;  %5431 = vrot.lane.b32.xlu0 %v5427_v48, %s10981_s25 }
0x2ef4   :  { %v5477_v46 = vmul.f32 %v12432_v61, %v5472_v9  ;;  %v5424_v5 = vpop.permute.xlu0 %5423 }
0x2ef5   :  { %v5428_v56 = vmul.f32 %v12430_v17, %v5424_v5 }
0x2ef6   :  { %5481 = vrot.lane.b32.xlu1 %v5477_v46, %s10981_s25 }
0x2ef7   :  { %v5474_v2 = vpop.permute.xlu1 %5473  ;;  %5433 = vrot.lane.b32.xlu0 %v5428_v56, %s10981_s25 }
0x2ef8   :  { %v5478_v12 = vmul.f32 %v12436_v57, %v5474_v2 }
0x2efa   :  { %5483 = vrot.lane.b32.xlu1 %v5478_v12, %s10981_s25 }
0x2efb   :  { %3487 = vrot.lane.b32.xlu0 %v12004_v1, %s10981_s25  ;;  %v5468_v1 = vmul.f32 %v12436_v57, %v12395_v52 }
0x2efe   :  { %3497 = vrot.lane.b32.xlu1 %v12009_v13, %s10980_s21 }
0x2f65   :  { %v5432_v59 = vpop.permute.xlu0 %5431 }
0x2f66   :  { %v5437_v37 = vadd.f32 %v5432_v59, %v5417_v15 }
0x2f68   :  { %10161 = vtanh.f32 %v5437_v37  ;;  %v5482_v53 = vpop.permute.xlu1 %5481 }
0x2f69   :  { %v5487_v21 = vadd.f32 %v5482_v53, %v5467_v28  ;;  %v5434_v0 = vpop.permute.xlu0 %5433 }
0x2f6a   :  { %v5438_v30 = vadd.f32 %v5434_v0, %v5418_v11 }
0x2f6b   :  { %10163 = vtanh.f32 %v5487_v21 }
0x2f6c   :  { %10165 = vtanh.f32 %v5438_v30  ;;  %v8265_v13 = vrot.slane %v5438_v30, 7  ;;  %v5484_v34 = vpop.permute.xlu1 %5483 }
0x2f6d   :  { %v5488_v51 = vadd.f32 %v5484_v34, %v5468_v1  ;;  %v3488_v58 = vpop.permute.xlu0 %3487 }
0x2f6e   :  { %3493 = vst.msk [vmem:[#allocation3] sm:$0x1] %vm997_vm3, %v3488_v58  ;;  %v12465_v23 = vsel %vm1014_vm2, %v8265_v13, %v5437_v37 }
0x2f6f   :  { %10167 = vtanh.f32 %v5488_v51  ;;  %v8273_v7 = vrot.slane %v5488_v51, 7 }
0x2f70   :  { %v3498_v16 = vpop.permute.xlu1 %3497 }
0x2f71   :  { %3503 = vst.msk [vmem:[#allocation3 + $0x7] sm:$0x1] %vm1008_vm4, %v3498_v16  ;;  %v12469_v25 = vsel %vm1014_vm2, %v8273_v7, %v5487_v21 }
0x2f75   :  { %v10162_v8 = vpop.eup %10161 }
0x2f76   :  { %5443 = vrot.lane.b32.xlu0 %v10162_v8, %s10980_s21 }
0x2f78   :  { %v10164_v52 = vpop.eup %10163 }
0x2f79   :  { %v10166_v27 = vpop.eup %10165  ;;  %5493 = vrot.lane.b32.xlu1 %v10164_v52, %s10980_s21 }
0x2f7a   :  { %5445 = vrot.lane.b32.xlu0 %v10166_v27, %s10980_s21 }
0x2f7c   :  { %v10168_v14 = vpop.eup %10167 }
0x2f7d   :  { %5495 = vrot.lane.b32.xlu1 %v10168_v14, %s10980_s21 }
0x2f7e   :  { %3775 = vrot.lane.b32.xlu0 %v12070_v60, %s10981_s25  ;;  %v5528_v60 = vld [vmem:[%s13337_s2 + $0x28] sm:$0xff] }
0x2f81   :  { %3785 = vrot.lane.b32.xlu1 %v12075_v26, %s10980_s21  ;;  %v5541_v26 = vld [vmem:[#allocation31 + $0x28] sm:$0xff] }
0x2f82   :  { %4063 = vrot.lane.b32.xlu0 %v12136_v47, %s10981_s25  ;;  %v5526_v47 = vld [vmem:[%s13337_s2 + $0x18] sm:$0xff] }
0x2f85   :  { %4073 = vrot.lane.b32.xlu1 %v12141_v4, %s10980_s21  ;;  %v5539_v4 = vld [vmem:[#allocation31 + $0x18] sm:$0xff] }
0x2f86   :  { %4351 = vrot.lane.b32.xlu0 %v12202_v40, %s10981_s25  ;;  %v5524_v40 = vld [vmem:[%s13337_s2 + $0x8] sm:$0xff] }
0x2f89   :  { %4361 = vrot.lane.b32.xlu1 %v12207_v62, %s10980_s21  ;;  %v5537_v62 = vld [vmem:[#allocation31 + $0x8] sm:$0xff] }
0x2f8a   :  { %3489 = vrot.lane.b32.xlu0 %v11999_v10, %s10981_s25  ;;  %v5530_v10 = vld [vmem:[%s13337_s2 + $0x38] sm:$0xff] }
0x2f8b   :  { %9464 = vmatprep.subr.mxu0 %v5530_v10 }
0x2f8c   :  { %9465 = vmatpush3.msra.mxu0 %v5530_v10 }
0x2f8d   :  { %3499 = vrot.lane.b32.xlu1 %v12001_v50, %s10980_s21  ;;  %v5543_v50 = vld [vmem:[#allocation31 + $0x38] sm:$0xff] }
0x2f8e   :  { %3777 = vrot.lane.b32.xlu0 %v12065_v32, %s10981_s25  ;;  %v5529_v32 = vld [vmem:[%s13337_s2 + $0x30] sm:$0xff]  ;;  %9483 = vmatprep.subr.mxu1 %v5543_v50 }
0x2f8f   :  { %9484 = vmatpush3.msra.mxu1 %v5543_v50  ;;  %9466 = vmatprep.subr.mxu0 %v5529_v32 }
0x2f90   :  { %9467 = vmatpush3.msra.mxu0 %v5529_v32  ;;  %v12583_v32 = vld [vmem:[#allocation30 + $0x18] sm:$0xff] }
0x2f91   :  { %3787 = vrot.lane.b32.xlu1 %v12067_v45, %s10980_s21  ;;  %v5542_v45 = vld [vmem:[#allocation31 + $0x30] sm:$0xff]  ;;  %9468 = vmatprep.subr.mxu0 %v5528_v60 }
0x2f92   :  { %4065 = vrot.lane.b32.xlu0 %v12131_v31, %s10981_s25  ;;  %9485 = vmatprep.subr.mxu1 %v5542_v45  ;;  %v5527_v31 = vld [vmem:[%s13337_s2 + $0x20] sm:$0xff] }
0x2f93   :  { %9486 = vmatpush3.msra.mxu1 %v5542_v45  ;;  %9469 = vmatpush3.msra.mxu0 %v5528_v60  ;;  %v12585_v45 = vld [vmem:[#allocation33 + $0x18] sm:$0xff] }
0x2f94   :  { %9487 = vmatprep.subr.mxu1 %v5541_v26  ;;  %9470 = vmatprep.subr.mxu0 %v5527_v31 }
0x2f95   :  { %4075 = vrot.lane.b32.xlu1 %v12133_v24, %s10980_s21  ;;  %9488 = vmatpush3.msra.mxu1 %v5541_v26  ;;  %v5540_v24 = vld [vmem:[#allocation31 + $0x20] sm:$0xff]  ;;  %v12589_v26 = vld [vmem:[#allocation30 + $0x10] sm:$0xff] }
0x2f96   :  { %4353 = vrot.lane.b32.xlu0 %v12197_v29, %s10981_s25  ;;  %9489 = vmatprep.subr.mxu1 %v5540_v24  ;;  %v5525_v29 = vld [vmem:[%s13337_s2 + $0x10] sm:$0xff] }
0x2f97   :  { %9471 = vmatpush3.msra.mxu0 %v5527_v31  ;;  %9490 = vmatpush3.msra.mxu1 %v5540_v24  ;;  %v12591_v31 = vld [vmem:[#allocation33 + $0x10] sm:$0xff]  ;;  %v12597_v24 = vld [vmem:[#allocation30 + $0x8] sm:$0xff] }
0x2f98   :  { %9472 = vmatprep.subr.mxu0 %v5526_v47  ;;  %9491 = vmatprep.subr.mxu1 %v5539_v4 }
0x2f99   :  { %4363 = vrot.lane.b32.xlu1 %v12199_v43, %s10980_s21  ;;  %9473 = vmatpush3.msra.mxu0 %v5526_v47  ;;  %v5538_v43 = vld [vmem:[#allocation31 + $0x10] sm:$0xff]  ;;  %v12599_v47 = vld [vmem:[#allocation33 + $0x8] sm:$0xff] }
0x2f9a   :  { %4639 = vrot.lane.b32.xlu0 %v12284_v39, %s10981_s25  ;;  %9492 = vmatpush3.msra.mxu1 %v5539_v4  ;;  %v5523_v39 = vld [vmem:[%s13337_s2] sm:$0xff]  ;;  %v12605_v4 = vld [vmem:[#allocation30] sm:$0xff] }
0x2f9b   :  { %9474 = vmatprep.subr.mxu0 %v5525_v29  ;;  %9493 = vmatprep.subr.mxu1 %v5538_v43 }
0x2f9c   :  { %9475 = vmatpush3.msra.mxu0 %v5525_v29  ;;  %9494 = vmatpush3.msra.mxu1 %v5538_v43  ;;  %v12609_v29 = vld [vmem:[#allocation33] sm:$0xff]  ;;  %v8597_v43 = vld [vmem:[%s13338_s7] ss:$0 sm:$0xff] }
0x2f9d   :  { %4649 = vrot.lane.b32.xlu1 %v12289_v55, %s10980_s21  ;;  %9476 = vmatprep.subr.mxu0 %v5524_v40  ;;  %v5536_v55 = vld [vmem:[#allocation31] sm:$0xff] }
0x2f9e   :  { %4927 = vrot.lane.b32.xlu0 %v12350_v63, %s10981_s25  ;;  %9495 = vmatprep.subr.mxu1 %v5537_v62 }
0x2f9f   :  { %9477 = vmatpush3.msra.mxu0 %v5524_v40  ;;  %9496 = vmatpush3.msra.mxu1 %v5537_v62  ;;  %v8600_v40 = vld [vmem:[%s13339_s27] ss:$0 sm:$0xff] }
0x2fa0   :  { %9478 = vmatprep.subr.mxu0 %v5523_v39  ;;  %9497 = vmatprep.subr.mxu1 %v5536_v55 }
0x2fa1   :  { %4937 = vrot.lane.b32.xlu1 %v12355_v3, %s10980_s21  ;;  %9479 = vmatpush3.msra.mxu0 %v5523_v39 }
0x2fa2   :  { %5215 = vrot.lane.b32.xlu0 %v12414_v35, %s10981_s25  ;;  %9498 = vmatpush3.msra.mxu1 %v5536_v55 }
0x2fa3   :  { %9502 = vmatprep.subr.mxu0 %v10978_v41  ;;  %9513 = vmatprep.subr.mxu1 %v10978_v41 }
0x2fa5   :  { %5225 = vrot.lane.b32.xlu1 %v12419_v36, %s10980_s21 }
0x2fa6   :  { %4641 = vrot.lane.b32.xlu0 %v12279_v54, %s10981_s25 }
0x2fa9   :  { %4651 = vrot.lane.b32.xlu1 %v12281_v18, %s10980_s21 }
0x2faa   :  { %4929 = vrot.lane.b32.xlu0 %v12345_v49, %s10981_s25 }
0x2fad   :  { %4939 = vrot.lane.b32.xlu1 %v12347_v42, %s10980_s21 }
0x2fae   :  { %5217 = vrot.lane.b32.xlu0 %v12409_v38, %s10981_s25 }
0x2fb1   :  { %5227 = vrot.lane.b32.xlu1 %v12411_v33, %s10980_s21 }
0x2fe8   :  { %v5444_v54 = vpop.permute.xlu0 %5443 }
0x2fe9   :  { %v5449_v18 = vmul.f32 %v12427_v22, %v5444_v54 }
0x2feb   :  { %v5494_v49 = vpop.permute.xlu1 %5493  ;;  %5503 = vrot.lane.b32.xlu0 %v5449_v18, %s10981_s25 }
0x2fec   :  { %v5499_v42 = vmul.f32 %v12432_v61, %v5494_v49  ;;  %v5446_v63 = vpop.permute.xlu0 %5445 }
0x2fed   :  { %v5450_v3 = vmul.f32 %v12430_v17, %v5446_v63 }
0x2fee   :  { %5513 = vrot.lane.b32.xlu1 %v5499_v42, %s10980_s21 }
0x2fef   :  { %v8250_v38 = vrot.slane %v5450_v3, 7  ;;  %v5496_v33 = vpop.permute.xlu1 %5495  ;;  %5505 = vrot.lane.b32.xlu0 %v5450_v3, %s10981_s25 }
0x2ff0   :  { %v5500_v35 = vmul.f32 %v12436_v57, %v5496_v33  ;;  %v3776_v36 = vpop.permute.xlu0 %3775 }
0x2ff1   :  { %3781 = vst.msk [vmem:[#allocation3 + $0x1] sm:$0x1] %vm997_vm3, %v3776_v36  ;;  %v12546_v22 = vsel %vm1014_vm2, %v8250_v38, %v5449_v18 }
0x2ff2   :  { %v8256_v61 = vrot.slane %v5500_v35, 7  ;;  %5515 = vrot.lane.b32.xlu1 %v5500_v35, %s10980_s21 }
0x2ff3   :  { %v3786_v17 = vpop.permute.xlu1 %3785 }
0x2ff4   :  { %3791 = vst.msk [vmem:[#allocation3 + $0x6] sm:$0x1] %vm1008_vm4, %v3786_v17  ;;  %v4064_v48 = vpop.permute.xlu0 %4063  ;;  %v12551_v9 = vsel %vm1014_vm2, %v8256_v61, %v5499_v42 }
0x2ff5   :  { %4069 = vst.msk [vmem:[#allocation3 + $0x2] sm:$0x1] %vm997_vm3, %v4064_v48 }
0x2ff7   :  { %v4074_v46 = vpop.permute.xlu1 %4073 }
0x2ff8   :  { %4079 = vst.msk [vmem:[#allocation3 + $0x5] sm:$0x1] %vm1008_vm4, %v4074_v46  ;;  %v4352_v57 = vpop.permute.xlu0 %4351 }
0x2ff9   :  { %4357 = vst.msk [vmem:[#allocation3 + $0x3] sm:$0x1] %vm997_vm3, %v4352_v57 }
0x2ffb   :  { %v4362_v5 = vpop.permute.xlu1 %4361 }
0x2ffc   :  { %4367 = vst.msk [vmem:[#allocation3 + $0x4] sm:$0x1] %vm1008_vm4, %v4362_v5  ;;  %v3490_v56 = vpop.permute.xlu0 %3489 }
0x2ffd   :  { %3494 = vst.msk [vmem:[#allocation3 + $0x8] sm:$0x1] %vm997_vm3, %v3490_v56 }
0x2fff   :  { %v3500_v2 = vpop.permute.xlu1 %3499 }
0x3000   :  { %3504 = vst.msk [vmem:[#allocation3 + $0xf] sm:$0x1] %vm1008_vm4, %v3500_v2  ;;  %v3778_v12 = vpop.permute.xlu0 %3777 }
0x3001   :  { %3782 = vst.msk [vmem:[#allocation3 + $0x9] sm:$0x1] %vm997_vm3, %v3778_v12 }
0x3003   :  { %v3788_v15 = vpop.permute.xlu1 %3787 }
0x3004   :  { %3792 = vst.msk [vmem:[#allocation3 + $0xe] sm:$0x1] %vm1008_vm4, %v3788_v15  ;;  %v4066_v59 = vpop.permute.xlu0 %4065 }
0x3005   :  { %4070 = vst.msk [vmem:[#allocation3 + $0xa] sm:$0x1] %vm997_vm3, %v4066_v59 }
0x3007   :  { %v4076_v37 = vpop.permute.xlu1 %4075 }
0x3008   :  { %4080 = vst.msk [vmem:[#allocation3 + $0xd] sm:$0x1] %vm1008_vm4, %v4076_v37  ;;  %v4354_v28 = vpop.permute.xlu0 %4353 }
0x3009   :  { %4358 = vst.msk [vmem:[#allocation3 + $0xb] sm:$0x1] %vm997_vm3, %v4354_v28 }
0x300b   :  { %v4364_v53 = vpop.permute.xlu1 %4363 }
0x300c   :  { %4368 = vst.msk [vmem:[#allocation3 + $0xc] sm:$0x1] %vm1008_vm4, %v4364_v53  ;;  %v4640_v11 = vpop.permute.xlu0 %4639 }
0x300d   :  { %4645 = vst.msk [vmem:[#allocation3 + $0x4] sm:$0x1] %vm997_vm3, %v4640_v11 }
0x300f   :  { %v4650_v21 = vpop.permute.xlu1 %4649 }
0x3010   :  { %4655 = vst.msk [vmem:[#allocation3 + $0x3] sm:$0x1] %vm1008_vm4, %v4650_v21  ;;  %v4928_v0 = vpop.permute.xlu0 %4927 }
0x3011   :  { %4933 = vst.msk [vmem:[#allocation3 + $0x5] sm:$0x1] %vm997_vm3, %v4928_v0 }
0x3013   :  { %v4938_v30 = vpop.permute.xlu1 %4937 }
0x3014   :  { %4943 = vst.msk [vmem:[#allocation3 + $0x2] sm:$0x1] %vm1008_vm4, %v4938_v30  ;;  %v5216_v1 = vpop.permute.xlu0 %5215 }
0x3015   :  { %5221 = vst.msk [vmem:[#allocation3 + $0x6] sm:$0x1] %vm997_vm3, %v5216_v1 }
0x3017   :  { %v5226_v13 = vpop.permute.xlu1 %5225 }
0x3018   :  { %5231 = vst.msk [vmem:[#allocation3 + $0x1] sm:$0x1] %vm1008_vm4, %v5226_v13  ;;  %v4642_v34 = vpop.permute.xlu0 %4641 }
0x3019   :  { %4646 = vst.msk [vmem:[#allocation3 + $0xc] sm:$0x1] %vm997_vm3, %v4642_v34 }
0x301b   :  { %v4652_v51 = vpop.permute.xlu1 %4651 }
0x301c   :  { %4656 = vst.msk [vmem:[#allocation3 + $0xb] sm:$0x1] %vm1008_vm4, %v4652_v51  ;;  %v4930_v58 = vpop.permute.xlu0 %4929 }
0x301d   :  { %4934 = vst.msk [vmem:[#allocation3 + $0xd] sm:$0x1] %vm997_vm3, %v4930_v58 }
0x301f   :  { %v4940_v7 = vpop.permute.xlu1 %4939 }
0x3020   :  { %4944 = vst.msk [vmem:[#allocation3 + $0xa] sm:$0x1] %vm1008_vm4, %v4940_v7  ;;  %v5218_v16 = vpop.permute.xlu0 %5217 }
0x3021   :  { %5222 = vst.msk [vmem:[#allocation3 + $0xe] sm:$0x1] %vm997_vm3, %v5218_v16 }
0x3023   :  { %v5228_v8 = vpop.permute.xlu1 %5227 }
0x3024   :  { %5232 = vst.msk [vmem:[#allocation3 + $0x9] sm:$0x1] %vm1008_vm4, %v5228_v8 }
0x305d   :  { %v5504_v52 = vpop.permute.xlu0 %5503 }
0x305e   :  { %5509 = vst.msk [vmem:[#allocation3 + $0x7] sm:$0x1] %vm997_vm3, %v5504_v52 }
0x3060   :  { %v5514_v27 = vpop.permute.xlu1 %5513 }
0x3061   :  { %5519 = vst.msk [vmem:[#allocation3] sm:$0x1] %vm1008_vm4, %v5514_v27  ;;  %v5506_v14 = vpop.permute.xlu0 %5505 }
0x3062   :  { %5510 = vst.msk [vmem:[#allocation3 + $0xf] sm:$0x1] %vm997_vm3, %v5506_v14 }
0x3064   :  { %v5516_v10 = vpop.permute.xlu1 %5515 }
0x3065   :  { %5520 = vst.msk [vmem:[#allocation3 + $0x8] sm:$0x1] %vm1008_vm4, %v5516_v10 }
0x3068   :  { %v5521_v50 = vld [vmem:[#allocation3] sm:$0xff] }
0x3069   :  { %9480 = vmatprep.mubr.msk.f32.mxu0 %vm3062_vm5, %v5521_v50  ;;  %9499 = vmatprep.mubr.msk.f32.mxu1 %vm3062_vm5, %v5521_v50 }
0x306c   :  { %v5522_v60 = vld [vmem:[#allocation3 + $0x8] sm:$0xff] }
0x306d   :  { %9481 = vmatmul.mubr.msk.f32.vlgmr.msra.gmra.mxu0 %vm3062_vm5, %v5522_v60  ;;  %9500 = vmatmul.mubr.msk.f32.vlgmr.msra.gmra.mxu1 %vm3062_vm5, %v5522_v60 }
0x306e   :  { %9503 = vmatpush3.msra.mxu0 %v12583_v32  ;;  %9514 = vmatpush3.msra.mxu1 %v12585_v45 }
0x306f   :  { %9504 = vmatprep.subr.mxu0 %v10978_v41  ;;  %9515 = vmatprep.subr.mxu1 %v10978_v41 }
0x3070   :  { %9505 = vmatpush3.msra.mxu0 %v12589_v26  ;;  %9516 = vmatpush3.msra.mxu1 %v12591_v31 }
0x3071   :  { %9506 = vmatprep.subr.mxu0 %v10978_v41  ;;  %9517 = vmatprep.subr.mxu1 %v10978_v41 }
0x3072   :  { %9507 = vmatpush3.msra.mxu0 %v12597_v24  ;;  %9518 = vmatpush3.msra.mxu1 %v12599_v47 }
0x3073   :  { %9508 = vmatprep.subr.mxu0 %v10978_v41  ;;  %9519 = vmatprep.subr.mxu1 %v10978_v41 }
0x3074   :  { %9509 = vmatpush3.msra.mxu0 %v12605_v4  ;;  %9510 = vmatprep.mubr.msk.f32.mxu0 %vm10979_vm1, %v10978_v41 }
0x3075   :  { %9520 = vmatpush3.msra.mxu1 %v12609_v29  ;;  %9521 = vmatprep.mubr.msk.f32.mxu1 %vm10979_vm1, %v10978_v41 }
0x3076   :  { %9511 = vmatmul.mubr.f32.vlgmr.msra.gmra.mxu0 %v10978_v41  ;;  %9522 = vmatmul.mubr.f32.vlgmr.msra.gmra.mxu1 %v10978_v41 }
0x3077   :  { %9524 = vmatprep.subr.mxu0 %v10978_v41  ;;  %9535 = vmatprep.subr.mxu1 %v10978_v41 }
0x3078   :  { %9525 = vmatpush3.msra.mxu0 %v12583_v32  ;;  %9536 = vmatpush3.msra.mxu1 %v12585_v45 }
0x3079   :  { %9526 = vmatprep.subr.mxu0 %v10978_v41  ;;  %9537 = vmatprep.subr.mxu1 %v10978_v41 }
0x307a   :  { %9527 = vmatpush3.msra.mxu0 %v12589_v26  ;;  %9538 = vmatpush3.msra.mxu1 %v12591_v31 }
0x307b   :  { %9528 = vmatprep.subr.mxu0 %v10978_v41  ;;  %9539 = vmatprep.subr.mxu1 %v10978_v41 }
0x307c   :  { %9529 = vmatpush3.msra.mxu0 %v12597_v24  ;;  %9540 = vmatpush3.msra.mxu1 %v12599_v47 }
0x307d   :  { %9530 = vmatprep.subr.mxu0 %v10978_v41  ;;  %9541 = vmatprep.subr.mxu1 %v10978_v41 }
0x307e   :  { %9531 = vmatpush3.msra.mxu0 %v12605_v4  ;;  %9532 = vmatprep.mubr.msk.f32.mxu0 %vm10979_vm1, %v10978_v41 }
0x307f   :  { %9542 = vmatpush3.msra.mxu1 %v12609_v29  ;;  %9543 = vmatprep.mubr.msk.f32.mxu1 %vm10979_vm1, %v10978_v41 }
0x3080   :  { %9546 = vmatprep.subr.mxu0 %v10978_v41  ;;  %9557 = vmatprep.subr.mxu1 %v10978_v41 }
0x312d   :  { %v9482_v62 = vpop.f32.mrf.mxu0  ;;  %v9501_v54 = vpop.f32.mrf.mxu1 }
0x312e   :  { %v5633_v18 = vadd.f32 %v9482_v62, %v8597_v43  ;;  %v5716_v39 = vadd.f32 %v9501_v54, %v8600_v40 }
0x312f   :  { %v5627_v55 = vpop.f32.mrf.mxu0  ;;  %v5710_v49 = vpop.f32.mrf.mxu1 }
0x3130   :  { %5637 = vst [vmem:[#allocation5 + $0x8] sm:$0xff] %v5633_v18  ;;  %5720 = vst [vmem:[#allocation6 + $0x8] sm:$0xff] %v5716_v39  ;;  %v5628_v42 = vadd.f32 %v8597_v43, %v5627_v55  ;;  %v5711_v63 = vadd.f32 %v8600_v40, %v5710_v49 }
0x3132   :  { %5636 = vst [vmem:[#allocation5] sm:$0xff] %v5628_v42  ;;  %5719 = vst [vmem:[#allocation6] sm:$0xff] %v5711_v63 }
0x3136   :  { %v5789_v3 = vpop.f32.mrf.mxu0  ;;  %v5867_v38 = vpop.f32.mrf.mxu1 }
0x3137   :  { %v5722_v33 = vld [vmem:[#allocation5 + $0x8] sm:$0x1]  ;;  %v5794_v35 = vrot.slane %v5789_v3, 1  ;;  %v5800_v36 = vld [vmem:[#allocation6 + $0xf] sm:$0x1]  ;;  %v5872_v61 = vrot.slane %v5867_v38, 1 }
0x3138   :  { %v9512_v17 = vpop.f32.mrf.mxu0  ;;  %v9523_v48 = vpop.f32.mrf.mxu1 }
0x3139   :  { %v5721_v46 = vld [vmem:[#allocation5] sm:$0x1]  ;;  %v5798_v57 = vadd.f32 %v5794_v35, %v5722_v33  ;;  %v5799_v5 = vld [vmem:[#allocation6 + $0x7] sm:$0x1]  ;;  %v5876_v56 = vadd.f32 %v5872_v61, %v5800_v36 }
0x313a   :  { %v5797_v2 = vadd.f32 %v5789_v3, %v5721_v46  ;;  %v5875_v12 = vadd.f32 %v5867_v38, %v5799_v5 }
0x313b   :  { %v8604_v15 = vmul.f32 -1.442695, %v5798_v57  ;;  %v8608_v28 = vmul.f32 -1.442695, %v5876_v56 }
0x313c   :  { %v8603_v59 = vmul.f32 -1.442695, %v5797_v2  ;;  %v8607_v37 = vmul.f32 -1.442695, %v5875_v12 }
0x313d   :  { %10169 = vpow2.f32 %v8604_v15 }
0x313e   :  { %10171 = vpow2.f32 %v8603_v59 }
0x313f   :  { %10173 = vpow2.f32 %v8607_v37 }
0x3140   :  { %10175 = vpow2.f32 %v8608_v28 }
0x314a   :  { %v10170_v53 = vpop.eup %10169 }
0x314b   :  { %v10172_v11 = vpop.eup %10171  ;;  %v5884_v21 = vadd.f32 1.0, %v10170_v53 }
0x314c   :  { %v10174_v0 = vpop.eup %10173  ;;  %v5883_v30 = vadd.f32 1.0, %v10172_v11 }
0x314d   :  { %v10176_v1 = vpop.eup %10175  ;;  %10177 = vrcp.f32 %v5884_v21  ;;  %v5933_v13 = vadd.f32 1.0, %v10174_v0 }
0x314e   :  { %10179 = vrcp.f32 %v5883_v30  ;;  %v5934_v34 = vadd.f32 1.0, %v10176_v1 }
0x314f   :  { %10181 = vrcp.f32 %v5933_v13 }
0x3150   :  { %10183 = vrcp.f32 %v5934_v34 }
0x315a   :  { %v10178_v51 = vpop.eup %10177 }
0x315b   :  { %v10180_v58 = vpop.eup %10179  ;;  %v5890_v7 = vmul.f32 2.0, %v10178_v51  ;;  %v5894_v63 = vmul.f32 0.0, %v10178_v51 }
0x315c   :  { %v10182_v16 = vpop.eup %10181  ;;  %v5889_v27 = vmul.f32 2.0, %v10180_v58  ;;  %v5893_v36 = vmul.f32 0.0, %v10180_v58 }
0x315d   :  { %v10184_v8 = vpop.eup %10183  ;;  %v8606_v52 = vadd.f32 -1.0, %v5890_v7  ;;  %v5939_v50 = vmul.f32 2.0, %v10182_v16  ;;  %v5943_v46 = vmul.f32 0.0, %v10182_v16 }
0x315e   :  { %v5940_v14 = vmul.f32 2.0, %v10184_v8  ;;  %v8605_v60 = vadd.f32 -1.0, %v5889_v27  ;;  %v5944_v33 = vmul.f32 0.0, %v10184_v8 }
0x315f   :  { %5899 = vrot.lane.b32.xlu0 %v8606_v52, %s10980_s21  ;;  %v8609_v43 = vadd.f32 -1.0, %v5939_v50 }
0x3160   :  { %v8610_v10 = vadd.f32 -1.0, %v5940_v14  ;;  %v5998_v14 = vld [vmem:[#allocation5 + $0x9] sm:$0x1] }
0x3162   :  { %5949 = vrot.lane.b32.xlu1 %v8610_v10, %s10980_s21 }
0x3163   :  { %5897 = vrot.lane.b32.xlu0 %v8605_v60, %s10980_s21 }
0x3166   :  { %5947 = vrot.lane.b32.xlu1 %v8609_v43, %s10980_s21  ;;  %v6081_v43 = vld [vmem:[#allocation6 + $0x6] sm:$0x1] }
0x31d1   :  { %v5900_v40 = vpop.permute.xlu0 %5899 }
0x31d2   :  { %v5904_v62 = vmul.f32 %v10178_v51, %v5900_v40 }
0x31d4   :  { %v5950_v54 = vpop.permute.xlu1 %5949  ;;  %5909 = vrot.lane.b32.xlu0 %v5904_v62, %s10981_s25 }
0x31d5   :  { %v5954_v18 = vmul.f32 %v10184_v8, %v5950_v54  ;;  %v5898_v39 = vpop.permute.xlu0 %5897 }
0x31d6   :  { %v5903_v55 = vmul.f32 %v10180_v58, %v5898_v39  ;;  %v6082_v39 = vld [vmem:[#allocation6 + $0xe] sm:$0x1] }
0x31d7   :  { %5959 = vrot.lane.b32.xlu1 %v5954_v18, %s10981_s25 }
0x31d8   :  { %v5948_v49 = vpop.permute.xlu1 %5947  ;;  %5907 = vrot.lane.b32.xlu0 %v5903_v55, %s10981_s25 }
0x31d9   :  { %v5953_v42 = vmul.f32 %v10182_v16, %v5948_v49 }
0x31db   :  { %5957 = vrot.lane.b32.xlu1 %v5953_v42, %s10981_s25 }
0x3246   :  { %v5910_v3 = vpop.permute.xlu0 %5909 }
0x3247   :  { %v12653_v38 = vadd.f32 %v5910_v3, %v5894_v63 }
0x3249   :  { %10185 = vtanh.f32 %v12653_v38  ;;  %v5960_v35 = vpop.permute.xlu1 %5959 }
0x324a   :  { %v12656_v61 = vadd.f32 %v5960_v35, %v5944_v33  ;;  %v5908_v17 = vpop.permute.xlu0 %5907 }
0x324b   :  { %v12658_v48 = vadd.f32 %v5908_v17, %v5893_v36 }
0x324c   :  { %10187 = vtanh.f32 %v12656_v61 }
0x324d   :  { %10189 = vtanh.f32 %v12658_v48  ;;  %v5958_v57 = vpop.permute.xlu1 %5957 }
0x324e   :  { %v12662_v5 = vadd.f32 %v5958_v57, %v5943_v46 }
0x3250   :  { %10191 = vtanh.f32 %v12662_v5 }
0x3256   :  { %v10186_v56 = vpop.eup %10185 }
0x3257   :  { %5921 = vrot.lane.b32.xlu0 %v10186_v56, %s10980_s21 }
0x3259   :  { %v10188_v2 = vpop.eup %10187 }
0x325a   :  { %v10190_v12 = vpop.eup %10189  ;;  %5971 = vrot.lane.b32.xlu1 %v10188_v2, %s10980_s21 }
0x325b   :  { %5919 = vrot.lane.b32.xlu0 %v10190_v12, %s10980_s21 }
0x325d   :  { %v10192_v15 = vpop.eup %10191 }
0x325e   :  { %5969 = vrot.lane.b32.xlu1 %v10192_v15, %s10980_s21 }
0x32c9   :  { %v5922_v59 = vpop.permute.xlu0 %5921 }
0x32ca   :  { %v12669_v37 = vmul.f32 %v10178_v51, %v5922_v59 }
0x32cc   :  { %v5972_v28 = vpop.permute.xlu1 %5971  ;;  %v5999_v21 = vrot.slane %v12669_v37, 7 }
0x32cd   :  { %v12671_v53 = vmul.f32 %v10184_v8, %v5972_v28  ;;  %v5920_v11 = vpop.permute.xlu0 %5919 }
0x32ce   :  { %v12674_v0 = vmul.f32 %v10180_v58, %v5920_v11 }
0x32cf   :  { %v6083_v13 = vrot.slane %v12671_v53, 7 }
0x32d0   :  { %v5970_v30 = vpop.permute.xlu1 %5969  ;;  %v6000_v1 = vsel %vm1014_vm2, %v5999_v21, %v12674_v0 }
0x32d1   :  { %v12679_v34 = vmul.f32 %v10182_v16, %v5970_v30  ;;  %6001 = vrot.lane.b32.xlu0 %v6000_v1, %s10981_s25  ;;  %v5997_v16 = vld [vmem:[#allocation5 + $0x1] sm:$0x1] }
0x32d3   :  { %v6084_v51 = vsel %vm1014_vm2, %v6083_v13, %v12679_v34 }
0x32d4   :  { %6085 = vrot.lane.b32.xlu1 %v6084_v51, %s10981_s25 }
0x3343   :  { %v6002_v7 = vpop.permute.xlu0 %6001 }
0x3344   :  { %9533 = vmatmul.mubr.msk.f32.vlgmr.msra.gmra.mxu0 %vm494_vm0, %v6002_v7 }
0x3345   :  { %9547 = vmatpush3.msra.mxu0 %v12583_v32  ;;  %9554 = vmatprep.mubr.msk.f32.mxu0 %vm10979_vm1, %v10978_v41 }
0x3346   :  { %v6086_v58 = vpop.permute.xlu1 %6085  ;;  %9548 = vmatprep.subr.mxu0 %v10978_v41 }
0x3347   :  { %9544 = vmatmul.mubr.msk.f32.vlgmr.msra.gmra.mxu1 %vm494_vm0, %v6086_v58  ;;  %9549 = vmatpush3.msra.mxu0 %v12589_v26 }
0x3348   :  { %9558 = vmatpush3.msra.mxu1 %v12585_v45  ;;  %9550 = vmatprep.subr.mxu0 %v10978_v41 }
0x3349   :  { %9559 = vmatprep.subr.mxu1 %v10978_v41  ;;  %9551 = vmatpush3.msra.mxu0 %v12597_v24 }
0x334a   :  { %9560 = vmatpush3.msra.mxu1 %v12591_v31  ;;  %9552 = vmatprep.subr.mxu0 %v10978_v41 }
0x334b   :  { %9561 = vmatprep.subr.mxu1 %v10978_v41  ;;  %9553 = vmatpush3.msra.mxu0 %v12605_v4 }
0x334c   :  { %9562 = vmatpush3.msra.mxu1 %v12599_v47  ;;  %9565 = vmatprep.mubr.msk.f32.mxu1 %vm10979_vm1, %v10978_v41 }
0x334d   :  { %9563 = vmatprep.subr.mxu1 %v10978_v41  ;;  %9568 = vmatprep.subr.mxu0 %v10978_v41 }
0x334e   :  { %9564 = vmatpush3.msra.mxu1 %v12609_v29 }
0x334f   :  { %9579 = vmatprep.subr.mxu1 %v10978_v41 }
0x3404   :  { %v6071_v8 = vpop.f32.mrf.mxu0 }
0x3405   :  { %v6076_v52 = vrot.slane %v6071_v8, 1  ;;  %v6079_v27 = vadd.f32 %v6071_v8, %v5997_v16 }
0x3406   :  { %v9534_v10 = vpop.f32.mrf.mxu0 }
0x3407   :  { %v6080_v50 = vadd.f32 %v6076_v52, %v5998_v14  ;;  %v8613_v60 = vmul.f32 -1.442695, %v6079_v27  ;;  %v6155_v40 = vpop.f32.mrf.mxu1 }
0x3408   :  { %v6160_v62 = vrot.slane %v6155_v40, 1  ;;  %v6163_v54 = vadd.f32 %v6155_v40, %v6081_v43 }
0x3409   :  { %10193 = vpow2.f32 %v8613_v60  ;;  %v8614_v18 = vmul.f32 -1.442695, %v6080_v50  ;;  %v9545_v55 = vpop.f32.mrf.mxu1 }
0x340a   :  { %v6164_v49 = vadd.f32 %v6160_v62, %v6082_v39  ;;  %v8617_v42 = vmul.f32 -1.442695, %v6163_v54 }
0x340b   :  { %10195 = vpow2.f32 %v8614_v18 }
0x340c   :  { %10197 = vpow2.f32 %v8617_v42  ;;  %v8618_v63 = vmul.f32 -1.442695, %v6164_v49 }
0x340e   :  { %10199 = vpow2.f32 %v8618_v63 }
0x3416   :  { %v10194_v3 = vpop.eup %10193 }
0x3417   :  { %v6171_v33 = vadd.f32 1.0, %v10194_v3 }
0x3418   :  { %v10196_v35 = vpop.eup %10195 }
0x3419   :  { %v10198_v36 = vpop.eup %10197  ;;  %v6172_v17 = vadd.f32 1.0, %v10196_v35  ;;  %10201 = vrcp.f32 %v6171_v33 }
0x341a   :  { %v6221_v46 = vadd.f32 1.0, %v10198_v36 }
0x341b   :  { %v10200_v57 = vpop.eup %10199  ;;  %10203 = vrcp.f32 %v6172_v17 }
0x341c   :  { %v6222_v56 = vadd.f32 1.0, %v10200_v57  ;;  %10205 = vrcp.f32 %v6221_v46 }
0x341e   :  { %10207 = vrcp.f32 %v6222_v56 }
0x3426   :  { %v10202_v2 = vpop.eup %10201 }
0x3427   :  { %v6177_v21 = vmul.f32 2.0, %v10202_v2  ;;  %v6181_v18 = vmul.f32 %v10202_v2, %v12658_v48 }
0x3428   :  { %v10204_v12 = vpop.eup %10203 }
0x3429   :  { %v6178_v15 = vmul.f32 2.0, %v10204_v12  ;;  %v10206_v59 = vpop.eup %10205  ;;  %v8615_v51 = vadd.f32 -1.0, %v6177_v21  ;;  %v6182_v60 = vmul.f32 %v10204_v12, %v12653_v38 }
0x342a   :  { %v6227_v13 = vmul.f32 2.0, %v10206_v59  ;;  %v6231_v42 = vmul.f32 %v10206_v59, %v12662_v5 }
0x342b   :  { %v10208_v28 = vpop.eup %10207  ;;  %v8616_v11 = vadd.f32 -1.0, %v6178_v15 }
0x342c   :  { %v6228_v30 = vmul.f32 2.0, %v10208_v28  ;;  %v8619_v7 = vadd.f32 -1.0, %v6227_v13  ;;  %v6232_v62 = vmul.f32 %v10208_v28, %v12656_v61 }
0x342d   :  { %6187 = vrot.lane.b32.xlu0 %v8616_v11, %s10980_s21 }
0x342e   :  { %v8620_v1 = vadd.f32 -1.0, %v6228_v30 }
0x3430   :  { %6237 = vrot.lane.b32.xlu1 %v8620_v1, %s10980_s21 }
0x3431   :  { %6185 = vrot.lane.b32.xlu0 %v8615_v51, %s10980_s21 }
0x3434   :  { %6235 = vrot.lane.b32.xlu1 %v8619_v7, %s10980_s21  ;;  %v6286_v7 = vld [vmem:[#allocation5 + $0xa] sm:$0x1] }
0x349f   :  { %v6188_v58 = vpop.permute.xlu0 %6187 }
0x34a0   :  { %v6192_v16 = vmul.f32 %v10204_v12, %v6188_v58 }
0x34a2   :  { %v6238_v8 = vpop.permute.xlu1 %6237  ;;  %6197 = vrot.lane.b32.xlu0 %v6192_v16, %s10981_s25 }
0x34a3   :  { %v6242_v52 = vmul.f32 %v10208_v28, %v6238_v8  ;;  %v6186_v27 = vpop.permute.xlu0 %6185 }
0x34a4   :  { %v6191_v14 = vmul.f32 %v10202_v2, %v6186_v27 }
0x34a5   :  { %6247 = vrot.lane.b32.xlu1 %v6242_v52, %s10981_s25  ;;  %v6369_v52 = vld [vmem:[#allocation6 + $0x5] sm:$0x1] }
0x34a6   :  { %v6236_v10 = vpop.permute.xlu1 %6235  ;;  %6195 = vrot.lane.b32.xlu0 %v6191_v14, %s10981_s25 }
0x34a7   :  { %v6241_v50 = vmul.f32 %v10206_v59, %v6236_v10 }
0x34a9   :  { %6245 = vrot.lane.b32.xlu1 %v6241_v50, %s10981_s25 }
0x3514   :  { %v6198_v43 = vpop.permute.xlu0 %6197 }
0x3515   :  { %v12716_v40 = vadd.f32 %v6198_v43, %v6182_v60  ;;  %v6370_v60 = vld [vmem:[#allocation6 + $0xd] sm:$0x1] }
0x3517   :  { %10209 = vtanh.f32 %v12716_v40  ;;  %v6248_v54 = vpop.permute.xlu1 %6247 }
0x3518   :  { %v12721_v39 = vadd.f32 %v6248_v54, %v6232_v62  ;;  %v6196_v55 = vpop.permute.xlu0 %6195 }
0x3519   :  { %v12723_v49 = vadd.f32 %v6196_v55, %v6181_v18 }
0x351a   :  { %10211 = vtanh.f32 %v12721_v39 }
0x351b   :  { %10213 = vtanh.f32 %v12723_v49  ;;  %v6246_v38 = vpop.permute.xlu1 %6245 }
0x351c   :  { %v12728_v63 = vadd.f32 %v6246_v38, %v6231_v42 }
0x351e   :  { %10215 = vtanh.f32 %v12728_v63 }
0x3524   :  { %v10210_v61 = vpop.eup %10209 }
0x3525   :  { %6209 = vrot.lane.b32.xlu0 %v10210_v61, %s10980_s21 }
0x3527   :  { %v10212_v48 = vpop.eup %10211 }
0x3528   :  { %v10214_v3 = vpop.eup %10213  ;;  %6259 = vrot.lane.b32.xlu1 %v10212_v48, %s10980_s21 }
0x3529   :  { %6207 = vrot.lane.b32.xlu0 %v10214_v3, %s10980_s21 }
0x352b   :  { %v10216_v33 = vpop.eup %10215 }
0x352c   :  { %6257 = vrot.lane.b32.xlu1 %v10216_v33, %s10980_s21 }
0x3597   :  { %v6210_v5 = vpop.permute.xlu0 %6209 }
0x3598   :  { %v12735_v35 = vmul.f32 %v10204_v12, %v6210_v5 }
0x359a   :  { %v6260_v36 = vpop.permute.xlu1 %6259  ;;  %v6287_v57 = vrot.slane %v12735_v35, 7 }
0x359b   :  { %v12737_v17 = vmul.f32 %v10208_v28, %v6260_v36  ;;  %v6208_v46 = vpop.permute.xlu0 %6207 }
0x359c   :  { %v12740_v56 = vmul.f32 %v10202_v2, %v6208_v46 }
0x359d   :  { %v6371_v21 = vrot.slane %v12737_v17, 7 }
0x359e   :  { %v6258_v15 = vpop.permute.xlu1 %6257  ;;  %v6288_v11 = vsel %vm1014_vm2, %v6287_v57, %v12740_v56 }
0x359f   :  { %v12745_v30 = vmul.f32 %v10206_v59, %v6258_v15  ;;  %6289 = vrot.lane.b32.xlu0 %v6288_v11, %s10981_s25  ;;  %v6285_v59 = vld [vmem:[#allocation5 + $0x2] sm:$0x1] }
0x35a1   :  { %v6372_v12 = vsel %vm1014_vm2, %v6371_v21, %v12745_v30 }
0x35a2   :  { %6373 = vrot.lane.b32.xlu1 %v6372_v12, %s10981_s25 }
0x3611   :  { %v6290_v28 = vpop.permute.xlu0 %6289 }
0x3612   :  { %9555 = vmatmul.mubr.msk.f32.vlgmr.msra.gmra.mxu0 %vm494_vm0, %v6290_v28 }
0x3613   :  { %9569 = vmatpush3.msra.mxu0 %v12583_v32  ;;  %9576 = vmatprep.mubr.msk.f32.mxu0 %vm10979_vm1, %v10978_v41 }
0x3614   :  { %v6374_v2 = vpop.permute.xlu1 %6373  ;;  %9570 = vmatprep.subr.mxu0 %v10978_v41 }
0x3615   :  { %9566 = vmatmul.mubr.msk.f32.vlgmr.msra.gmra.mxu1 %vm494_vm0, %v6374_v2  ;;  %9571 = vmatpush3.msra.mxu0 %v12589_v26 }
0x3616   :  { %9580 = vmatpush3.msra.mxu1 %v12585_v45  ;;  %9572 = vmatprep.subr.mxu0 %v10978_v41 }
0x3617   :  { %9581 = vmatprep.subr.mxu1 %v10978_v41  ;;  %9573 = vmatpush3.msra.mxu0 %v12597_v24 }
0x3618   :  { %9582 = vmatpush3.msra.mxu1 %v12591_v31  ;;  %9574 = vmatprep.subr.mxu0 %v10978_v41 }
0x3619   :  { %9583 = vmatprep.subr.mxu1 %v10978_v41  ;;  %9575 = vmatpush3.msra.mxu0 %v12605_v4 }
0x361a   :  { %9584 = vmatpush3.msra.mxu1 %v12599_v47  ;;  %9587 = vmatprep.mubr.msk.f32.mxu1 %vm10979_vm1, %v10978_v41 }
0x361b   :  { %9585 = vmatprep.subr.mxu1 %v10978_v41  ;;  %9590 = vmatprep.subr.mxu0 %v10978_v41 }
0x361c   :  { %9586 = vmatpush3.msra.mxu1 %v12609_v29 }
0x361d   :  { %9601 = vmatprep.subr.mxu1 %v10978_v41 }
0x36d2   :  { %v6359_v1 = vpop.f32.mrf.mxu0 }
0x36d3   :  { %v6364_v13 = vrot.slane %v6359_v1, 1  ;;  %v6367_v51 = vadd.f32 %v6359_v1, %v6285_v59 }
0x36d4   :  { %v9556_v58 = vpop.f32.mrf.mxu0 }
0x36d5   :  { %v6368_v16 = vadd.f32 %v6364_v13, %v6286_v7  ;;  %v8623_v8 = vmul.f32 -1.442695, %v6367_v51  ;;  %v6443_v27 = vpop.f32.mrf.mxu1 }
0x36d6   :  { %v6448_v14 = vrot.slane %v6443_v27, 1  ;;  %v6451_v10 = vadd.f32 %v6443_v27, %v6369_v52 }
0x36d7   :  { %10217 = vpow2.f32 %v8623_v8  ;;  %v8624_v50 = vmul.f32 -1.442695, %v6368_v16  ;;  %v9567_v43 = vpop.f32.mrf.mxu1 }
0x36d8   :  { %v6452_v62 = vadd.f32 %v6448_v14, %v6370_v60  ;;  %v8627_v54 = vmul.f32 -1.442695, %v6451_v10 }
0x36d9   :  { %10219 = vpow2.f32 %v8624_v50 }
0x36da   :  { %10221 = vpow2.f32 %v8627_v54  ;;  %v8628_v18 = vmul.f32 -1.442695, %v6452_v62 }
0x36dc   :  { %10223 = vpow2.f32 %v8628_v18 }
0x36e4   :  { %v10218_v55 = vpop.eup %10217 }
0x36e5   :  { %v6459_v42 = vadd.f32 1.0, %v10218_v55 }
0x36e6   :  { %v10220_v38 = vpop.eup %10219 }
0x36e7   :  { %v10222_v61 = vpop.eup %10221  ;;  %v6460_v48 = vadd.f32 1.0, %v10220_v38  ;;  %10225 = vrcp.f32 %v6459_v42 }
0x36e8   :  { %v6509_v3 = vadd.f32 1.0, %v10222_v61 }
0x36e9   :  { %v10224_v33 = vpop.eup %10223  ;;  %10227 = vrcp.f32 %v6460_v48 }
0x36ea   :  { %v6510_v5 = vadd.f32 1.0, %v10224_v33  ;;  %10229 = vrcp.f32 %v6509_v3 }
0x36ec   :  { %10231 = vrcp.f32 %v6510_v5 }
0x36f4   :  { %v10226_v36 = vpop.eup %10225 }
0x36f5   :  { %v6465_v12 = vmul.f32 2.0, %v10226_v36  ;;  %v6469_v54 = vmul.f32 %v10226_v36, %v12723_v49 }
0x36f6   :  { %v10228_v46 = vpop.eup %10227 }
0x36f7   :  { %v6466_v57 = vmul.f32 2.0, %v10228_v46  ;;  %v10230_v15 = vpop.eup %10229  ;;  %v8625_v1 = vadd.f32 -1.0, %v6465_v12  ;;  %v6470_v10 = vmul.f32 %v10228_v46, %v12716_v40 }
0x36f8   :  { %v6515_v59 = vmul.f32 2.0, %v10230_v15  ;;  %v6519_v38 = vmul.f32 %v10230_v15, %v12728_v63 }
0x36f9   :  { %v10232_v11 = vpop.eup %10231  ;;  %v8626_v21 = vadd.f32 -1.0, %v6466_v57 }
0x36fa   :  { %v6516_v28 = vmul.f32 2.0, %v10232_v11  ;;  %v8629_v13 = vadd.f32 -1.0, %v6515_v59  ;;  %v6520_v43 = vmul.f32 %v10232_v11, %v12721_v39 }
0x36fb   :  { %6475 = vrot.lane.b32.xlu0 %v8626_v21, %s10980_s21 }
0x36fc   :  { %v8630_v2 = vadd.f32 -1.0, %v6516_v28 }
0x36fe   :  { %6525 = vrot.lane.b32.xlu1 %v8630_v2, %s10980_s21 }
0x36ff   :  { %6473 = vrot.lane.b32.xlu0 %v8625_v1, %s10980_s21 }
0x3702   :  { %6523 = vrot.lane.b32.xlu1 %v8629_v13, %s10980_s21 }
0x376d   :  { %v6476_v51 = vpop.permute.xlu0 %6475 }
0x376e   :  { %v6480_v7 = vmul.f32 %v10228_v46, %v6476_v51 }
0x3770   :  { %v6526_v58 = vpop.permute.xlu1 %6525  ;;  %6485 = vrot.lane.b32.xlu0 %v6480_v7, %s10981_s25 }
0x3771   :  { %v6530_v16 = vmul.f32 %v10232_v11, %v6526_v58  ;;  %v6474_v8 = vpop.permute.xlu0 %6473 }
0x3772   :  { %v6479_v52 = vmul.f32 %v10226_v36, %v6474_v8 }
0x3773   :  { %6535 = vrot.lane.b32.xlu1 %v6530_v16, %s10981_s25 }
0x3774   :  { %v6524_v27 = vpop.permute.xlu1 %6523  ;;  %6483 = vrot.lane.b32.xlu0 %v6479_v52, %s10981_s25  ;;  %v6658_v52 = vld [vmem:[#allocation6 + $0xc] sm:$0x1] }
0x3775   :  { %v6529_v14 = vmul.f32 %v10230_v15, %v6524_v27 }
0x3777   :  { %6533 = vrot.lane.b32.xlu1 %v6529_v14, %s10981_s25 }
0x37e2   :  { %v6486_v50 = vpop.permute.xlu0 %6485 }
0x37e3   :  { %v12782_v60 = vadd.f32 %v6486_v50, %v6470_v10 }
0x37e5   :  { %10233 = vtanh.f32 %v12782_v60  ;;  %v6536_v62 = vpop.permute.xlu1 %6535 }
0x37e6   :  { %v12787_v18 = vadd.f32 %v6536_v62, %v6520_v43  ;;  %v6484_v55 = vpop.permute.xlu0 %6483 }
0x37e7   :  { %v12789_v42 = vadd.f32 %v6484_v55, %v6469_v54 }
0x37e8   :  { %10235 = vtanh.f32 %v12787_v18 }
0x37e9   :  { %10237 = vtanh.f32 %v12789_v42  ;;  %v6534_v40 = vpop.permute.xlu1 %6533 }
0x37ea   :  { %v12794_v61 = vadd.f32 %v6534_v40, %v6519_v38 }
0x37ec   :  { %10239 = vtanh.f32 %v12794_v61 }
0x37f2   :  { %v10234_v39 = vpop.eup %10233 }
0x37f3   :  { %6497 = vrot.lane.b32.xlu0 %v10234_v39, %s10980_s21 }
0x37f5   :  { %v10236_v49 = vpop.eup %10235 }
0x37f6   :  { %v10238_v48 = vpop.eup %10237  ;;  %6547 = vrot.lane.b32.xlu1 %v10236_v49, %s10980_s21 }
0x37f7   :  { %6495 = vrot.lane.b32.xlu0 %v10238_v48, %s10980_s21 }
0x37f9   :  { %v10240_v3 = vpop.eup %10239 }
0x37fa   :  { %6545 = vrot.lane.b32.xlu1 %v10240_v3, %s10980_s21 }
0x3865   :  { %v6498_v63 = vpop.permute.xlu0 %6497 }
0x3866   :  { %v12801_v33 = vmul.f32 %v10228_v46, %v6498_v63 }
0x3868   :  { %v6548_v5 = vpop.permute.xlu1 %6547  ;;  %v6575_v12 = vrot.slane %v12801_v33, 7 }
0x3869   :  { %v12803_v57 = vmul.f32 %v10232_v11, %v6548_v5  ;;  %v6496_v21 = vpop.permute.xlu0 %6495 }
0x386a   :  { %v12806_v28 = vmul.f32 %v10226_v36, %v6496_v21 }
0x386b   :  { %v6659_v1 = vrot.slane %v12803_v57, 7 }
0x386c   :  { %v6546_v2 = vpop.permute.xlu1 %6545  ;;  %v6576_v59 = vsel %vm1014_vm2, %v6575_v12, %v12806_v28 }
0x386d   :  { %v12811_v13 = vmul.f32 %v10230_v15, %v6546_v2  ;;  %6577 = vrot.lane.b32.xlu0 %v6576_v59, %s10981_s25 }
0x386f   :  { %v6660_v46 = vsel %vm1014_vm2, %v6659_v1, %v12811_v13 }
0x3870   :  { %6661 = vrot.lane.b32.xlu1 %v6660_v46, %s10981_s25 }
0x38df   :  { %v6578_v11 = vpop.permute.xlu0 %6577 }
0x38e0   :  { %9577 = vmatmul.mubr.msk.f32.vlgmr.msra.gmra.mxu0 %vm494_vm0, %v6578_v11 }
0x38e1   :  { %9591 = vmatpush3.msra.mxu0 %v12583_v32  ;;  %9598 = vmatprep.mubr.msk.f32.mxu0 %vm10979_vm1, %v10978_v41  ;;  %v6573_v32 = vld [vmem:[#allocation5 + $0x3] sm:$0x1] }
0x38e2   :  { %v6662_v36 = vpop.permute.xlu1 %6661  ;;  %9592 = vmatprep.subr.mxu0 %v10978_v41 }
0x38e3   :  { %9588 = vmatmul.mubr.msk.f32.vlgmr.msra.gmra.mxu1 %vm494_vm0, %v6662_v36  ;;  %9593 = vmatpush3.msra.mxu0 %v12589_v26 }
0x38e4   :  { %9602 = vmatpush3.msra.mxu1 %v12585_v45  ;;  %9594 = vmatprep.subr.mxu0 %v10978_v41 }
0x38e5   :  { %9603 = vmatprep.subr.mxu1 %v10978_v41  ;;  %9595 = vmatpush3.msra.mxu0 %v12597_v24  ;;  %v6574_v24 = vld [vmem:[#allocation5 + $0xb] sm:$0x1] }
0x38e6   :  { %9604 = vmatpush3.msra.mxu1 %v12591_v31  ;;  %9596 = vmatprep.subr.mxu0 %v10978_v41 }
0x38e7   :  { %9605 = vmatprep.subr.mxu1 %v10978_v41  ;;  %9597 = vmatpush3.msra.mxu0 %v12605_v4 }
0x38e8   :  { %9606 = vmatpush3.msra.mxu1 %v12599_v47  ;;  %9609 = vmatprep.mubr.msk.f32.mxu1 %vm10979_vm1, %v10978_v41  ;;  %v6657_v47 = vld [vmem:[#allocation6 + $0x4] sm:$0x1] }
0x38e9   :  { %9607 = vmatprep.subr.mxu1 %v10978_v41  ;;  %9612 = vmatprep.subr.mxu0 %v10978_v41 }
0x38ea   :  { %9608 = vmatpush3.msra.mxu1 %v12609_v29 }
0x38eb   :  { %9623 = vmatprep.subr.mxu1 %v10978_v41 }
0x39a0   :  { %v6647_v45 = vpop.f32.mrf.mxu0 }
0x39a1   :  { %v6652_v26 = vrot.slane %v6647_v45, 1  ;;  %v6655_v31 = vadd.f32 %v6647_v45, %v6573_v32 }
0x39a2   :  { %v9578_v15 = vpop.f32.mrf.mxu0 }
0x39a3   :  { %v6656_v4 = vadd.f32 %v6652_v26, %v6574_v24  ;;  %v8633_v51 = vmul.f32 -1.442695, %v6655_v31  ;;  %v6731_v7 = vpop.f32.mrf.mxu1 }
0x39a4   :  { %v6736_v58 = vrot.slane %v6731_v7, 1  ;;  %v6739_v16 = vadd.f32 %v6731_v7, %v6657_v47 }
0x39a5   :  { %10241 = vpow2.f32 %v8633_v51  ;;  %v8634_v8 = vmul.f32 -1.442695, %v6656_v4  ;;  %v9589_v27 = vpop.f32.mrf.mxu1 }
0x39a6   :  { %v6740_v14 = vadd.f32 %v6736_v58, %v6658_v52  ;;  %v8637_v29 = vmul.f32 -1.442695, %v6739_v16 }
0x39a7   :  { %10243 = vpow2.f32 %v8634_v8 }
0x39a8   :  { %10245 = vpow2.f32 %v8637_v29  ;;  %v8638_v10 = vmul.f32 -1.442695, %v6740_v14 }
0x39aa   :  { %10247 = vpow2.f32 %v8638_v10 }
0x39b2   :  { %v10242_v50 = vpop.eup %10241 }
0x39b3   :  { %v6747_v43 = vadd.f32 1.0, %v10242_v50 }
0x39b4   :  { %v10244_v62 = vpop.eup %10243 }
0x39b5   :  { %v10246_v54 = vpop.eup %10245  ;;  %v6748_v55 = vadd.f32 1.0, %v10244_v62  ;;  %10249 = vrcp.f32 %v6747_v43 }
0x39b6   :  { %v6797_v38 = vadd.f32 1.0, %v10246_v54 }
0x39b7   :  { %v10248_v40 = vpop.eup %10247  ;;  %10251 = vrcp.f32 %v6748_v55 }
0x39b8   :  { %v6798_v39 = vadd.f32 1.0, %v10248_v40  ;;  %10253 = vrcp.f32 %v6797_v38 }
0x39ba   :  { %10255 = vrcp.f32 %v6798_v39 }
0x39c2   :  { %v10250_v49 = vpop.eup %10249 }
0x39c3   :  { %v6753_v12 = vmul.f32 2.0, %v10250_v49  ;;  %v6757_v8 = vmul.f32 %v10250_v49, %v12789_v42 }
0x39c4   :  { %v10252_v48 = vpop.eup %10251 }
0x39c5   :  { %v6754_v3 = vmul.f32 2.0, %v10252_v48  ;;  %v10254_v63 = vpop.eup %10253  ;;  %v8635_v46 = vadd.f32 -1.0, %v6753_v12  ;;  %v6758_v51 = vmul.f32 %v10252_v48, %v12782_v60 }
0x39c6   :  { %v6803_v1 = vmul.f32 2.0, %v10254_v63  ;;  %v6807_v29 = vmul.f32 %v10254_v63, %v12794_v61 }
0x39c7   :  { %v10256_v5 = vpop.eup %10255  ;;  %v8636_v21 = vadd.f32 -1.0, %v6754_v3 }
0x39c8   :  { %v6804_v2 = vmul.f32 2.0, %v10256_v5  ;;  %v8639_v11 = vadd.f32 -1.0, %v6803_v1  ;;  %v6808_v58 = vmul.f32 %v10256_v5, %v12787_v18  ;;  %v12894_v1 = vld [vmem:[#allocation33 + $0x18] sm:$0xff] }
0x39c9   :  { %6763 = vrot.lane.b32.xlu0 %v8636_v21, %s10980_s21 }
0x39ca   :  { %v8640_v59 = vadd.f32 -1.0, %v6804_v2 }
0x39cc   :  { %6813 = vrot.lane.b32.xlu1 %v8640_v59, %s10980_s21 }
0x39cd   :  { %6761 = vrot.lane.b32.xlu0 %v8635_v46, %s10980_s21  ;;  %v12899_v46 = vld [vmem:[#allocation30 + $0x8] sm:$0xff] }
0x39d0   :  { %6811 = vrot.lane.b32.xlu1 %v8639_v11, %s10980_s21  ;;  %v12902_v11 = vld [vmem:[#allocation33 + $0x10] sm:$0xff] }
0x3a3b   :  { %v6764_v36 = vpop.permute.xlu0 %6763 }
0x3a3c   :  { %v6768_v32 = vmul.f32 %v10252_v48, %v6764_v36  ;;  %v12907_v36 = vld [vmem:[#allocation30] sm:$0xff] }
0x3a3e   :  { %v6814_v45 = vpop.permute.xlu1 %6813  ;;  %6773 = vrot.lane.b32.xlu0 %v6768_v32, %s10981_s25  ;;  %v12910_v32 = vld [vmem:[#allocation33 + $0x8] sm:$0xff] }
0x3a3f   :  { %v6818_v26 = vmul.f32 %v10256_v5, %v6814_v45  ;;  %v6762_v31 = vpop.permute.xlu0 %6761  ;;  %v12917_v45 = vld [vmem:[#allocation33] sm:$0xff] }
0x3a40   :  { %v6767_v24 = vmul.f32 %v10250_v49, %v6762_v31 }
0x3a41   :  { %6823 = vrot.lane.b32.xlu1 %v6818_v26, %s10981_s25  ;;  %v6861_v26 = vld [vmem:[#allocation5 + $0x4] sm:$0x1] }
0x3a42   :  { %v6812_v15 = vpop.permute.xlu1 %6811  ;;  %6771 = vrot.lane.b32.xlu0 %v6767_v24, %s10981_s25 }
0x3a43   :  { %v6817_v4 = vmul.f32 %v10254_v63, %v6812_v15 }
0x3a45   :  { %6821 = vrot.lane.b32.xlu1 %v6817_v4, %s10981_s25  ;;  %v6862_v4 = vld [vmem:[#allocation5 + $0xc] sm:$0x1] }
0x3ab0   :  { %v6774_v47 = vpop.permute.xlu0 %6773 }
0x3ab1   :  { %v12848_v7 = vadd.f32 %v6774_v47, %v6758_v51 }
0x3ab3   :  { %10257 = vtanh.f32 %v12848_v7  ;;  %v6824_v16 = vpop.permute.xlu1 %6823 }
0x3ab4   :  { %v12853_v52 = vadd.f32 %v6824_v16, %v6808_v58  ;;  %v6772_v27 = vpop.permute.xlu0 %6771  ;;  %v6945_v16 = vld [vmem:[#allocation6 + $0x3] sm:$0x1] }
0x3ab5   :  { %v12855_v14 = vadd.f32 %v6772_v27, %v6757_v8 }
0x3ab6   :  { %10259 = vtanh.f32 %v12853_v52 }
0x3ab7   :  { %10261 = vtanh.f32 %v12855_v14  ;;  %v6822_v60 = vpop.permute.xlu1 %6821 }
0x3ab8   :  { %v12860_v10 = vadd.f32 %v6822_v60, %v6807_v29 }
0x3aba   :  { %10263 = vtanh.f32 %v12860_v10 }
0x3ac0   :  { %v10258_v18 = vpop.eup %10257 }
0x3ac1   :  { %6785 = vrot.lane.b32.xlu0 %v10258_v18, %s10980_s21  ;;  %v6946_v18 = vld [vmem:[#allocation6 + $0xb] sm:$0x1] }
0x3ac3   :  { %v10260_v42 = vpop.eup %10259 }
0x3ac4   :  { %v10262_v50 = vpop.eup %10261  ;;  %6835 = vrot.lane.b32.xlu1 %v10260_v42, %s10980_s21 }
0x3ac5   :  { %6783 = vrot.lane.b32.xlu0 %v10262_v50, %s10980_s21 }
0x3ac7   :  { %v10264_v43 = vpop.eup %10263 }
0x3ac8   :  { %6833 = vrot.lane.b32.xlu1 %v10264_v43, %s10980_s21 }
0x3b33   :  { %v6786_v61 = vpop.permute.xlu0 %6785 }
0x3b34   :  { %v12867_v62 = vmul.f32 %v10252_v48, %v6786_v61 }
0x3b36   :  { %v6836_v54 = vpop.permute.xlu1 %6835  ;;  %v6863_v40 = vrot.slane %v12867_v62, 7 }
0x3b37   :  { %v12869_v55 = vmul.f32 %v10256_v5, %v6836_v54  ;;  %v6784_v38 = vpop.permute.xlu0 %6783 }
0x3b38   :  { %v12872_v39 = vmul.f32 %v10250_v49, %v6784_v38  ;;  %v12884_v49 = vld [vmem:[#allocation30 + $0x18] sm:$0xff] }
0x3b39   :  { %v6947_v12 = vrot.slane %v12869_v55, 7 }
0x3b3a   :  { %v6834_v3 = vpop.permute.xlu1 %6833  ;;  %v6864_v21 = vsel %vm1014_vm2, %v6863_v40, %v12872_v39 }
0x3b3b   :  { %v12877_v2 = vmul.f32 %v10254_v63, %v6834_v3  ;;  %6865 = vrot.lane.b32.xlu0 %v6864_v21, %s10981_s25  ;;  %v12891_v63 = vld [vmem:[#allocation30 + $0x10] sm:$0xff] }
0x3b3d   :  { %v6948_v48 = vsel %vm1014_vm2, %v6947_v12, %v12877_v2 }
0x3b3e   :  { %6949 = vrot.lane.b32.xlu1 %v6948_v48, %s10981_s25 }
0x3bad   :  { %v6866_v5 = vpop.permute.xlu0 %6865 }
0x3bae   :  { %9599 = vmatmul.mubr.msk.f32.vlgmr.msra.gmra.mxu0 %vm494_vm0, %v6866_v5 }
0x3baf   :  { %9613 = vmatpush3.msra.mxu0 %v12884_v49  ;;  %9620 = vmatprep.mubr.msk.f32.mxu0 %vm10979_vm1, %v10978_v41 }
0x3bb0   :  { %v6950_v59 = vpop.permute.xlu1 %6949  ;;  %9614 = vmatprep.subr.mxu0 %v10978_v41 }
0x3bb1   :  { %9610 = vmatmul.mubr.msk.f32.vlgmr.msra.gmra.mxu1 %vm494_vm0, %v6950_v59  ;;  %9615 = vmatpush3.msra.mxu0 %v12891_v63 }
0x3bb2   :  { %9624 = vmatpush3.msra.mxu1 %v12894_v1  ;;  %9616 = vmatprep.subr.mxu0 %v10978_v41 }
0x3bb3   :  { %9625 = vmatprep.subr.mxu1 %v10978_v41  ;;  %9617 = vmatpush3.msra.mxu0 %v12899_v46 }
0x3bb4   :  { %9626 = vmatpush3.msra.mxu1 %v12902_v11  ;;  %9618 = vmatprep.subr.mxu0 %v10978_v41 }
0x3bb5   :  { %9627 = vmatprep.subr.mxu1 %v10978_v41  ;;  %9619 = vmatpush3.msra.mxu0 %v12907_v36 }
0x3bb6   :  { %9628 = vmatpush3.msra.mxu1 %v12910_v32  ;;  %9631 = vmatprep.mubr.msk.f32.mxu1 %vm10979_vm1, %v10978_v41 }
0x3bb7   :  { %9629 = vmatprep.subr.mxu1 %v10978_v41  ;;  %9634 = vmatprep.subr.mxu0 %v10978_v41 }
0x3bb8   :  { %9630 = vmatpush3.msra.mxu1 %v12917_v45 }
0x3bb9   :  { %9645 = vmatprep.subr.mxu1 %v10978_v41 }
0x3c6e   :  { %v6935_v31 = vpop.f32.mrf.mxu0 }
0x3c6f   :  { %v6940_v24 = vrot.slane %v6935_v31, 1  ;;  %v6943_v15 = vadd.f32 %v6935_v31, %v6861_v26 }
0x3c70   :  { %v9600_v51 = vpop.f32.mrf.mxu0 }
0x3c71   :  { %v6944_v47 = vadd.f32 %v6940_v24, %v6862_v4  ;;  %v8643_v58 = vmul.f32 -1.442695, %v6943_v15  ;;  %v7019_v8 = vpop.f32.mrf.mxu1 }
0x3c72   :  { %v7024_v27 = vrot.slane %v7019_v8, 1  ;;  %v7027_v29 = vadd.f32 %v7019_v8, %v6945_v16 }
0x3c73   :  { %10265 = vpow2.f32 %v8643_v58  ;;  %v8644_v60 = vmul.f32 -1.442695, %v6944_v47  ;;  %v9611_v42 = vpop.f32.mrf.mxu1 }
0x3c74   :  { %v7028_v50 = vadd.f32 %v7024_v27, %v6946_v18  ;;  %v8647_v43 = vmul.f32 -1.442695, %v7027_v29 }
0x3c75   :  { %10267 = vpow2.f32 %v8644_v60 }
0x3c76   :  { %10269 = vpow2.f32 %v8647_v43  ;;  %v8648_v61 = vmul.f32 -1.442695, %v7028_v50 }
0x3c78   :  { %10271 = vpow2.f32 %v8648_v61 }
0x3c80   :  { %v10266_v54 = vpop.eup %10265 }
0x3c81   :  { %v7035_v38 = vadd.f32 1.0, %v10266_v54 }
0x3c82   :  { %v10268_v40 = vpop.eup %10267 }
0x3c83   :  { %v10270_v3 = vpop.eup %10269  ;;  %v7036_v21 = vadd.f32 1.0, %v10268_v40  ;;  %10273 = vrcp.f32 %v7035_v38 }
0x3c84   :  { %v7085_v12 = vadd.f32 1.0, %v10270_v3 }
0x3c85   :  { %v10272_v48 = vpop.eup %10271  ;;  %10275 = vrcp.f32 %v7036_v21 }
0x3c86   :  { %v7086_v5 = vadd.f32 1.0, %v10272_v48  ;;  %10277 = vrcp.f32 %v7085_v12 }
0x3c88   :  { %10279 = vrcp.f32 %v7086_v5 }
0x3c90   :  { %v10274_v59 = vpop.eup %10273 }
0x3c91   :  { %v7041_v51 = vmul.f32 2.0, %v10274_v59  ;;  %v7045_v48 = vmul.f32 %v10274_v59, %v12855_v14 }
0x3c92   :  { %v10276_v26 = vpop.eup %10275 }
0x3c93   :  { %v7042_v31 = vmul.f32 2.0, %v10276_v26  ;;  %v10278_v24 = vpop.eup %10277  ;;  %v8645_v8 = vadd.f32 -1.0, %v7041_v51  ;;  %v7046_v38 = vmul.f32 %v10276_v26, %v12848_v7 }
0x3c94   :  { %v7091_v16 = vmul.f32 2.0, %v10278_v24  ;;  %v7095_v51 = vmul.f32 %v10278_v24, %v12860_v10 }
0x3c95   :  { %v10280_v15 = vpop.eup %10279  ;;  %v8646_v4 = vadd.f32 -1.0, %v7042_v31 }
0x3c96   :  { %v7092_v47 = vmul.f32 2.0, %v10280_v15  ;;  %v8649_v27 = vadd.f32 -1.0, %v7091_v16  ;;  %v7096_v21 = vmul.f32 %v10280_v15, %v12853_v52 }
0x3c97   :  { %7051 = vrot.lane.b32.xlu0 %v8646_v4, %s10980_s21 }
0x3c98   :  { %v8650_v58 = vadd.f32 -1.0, %v7092_v47 }
0x3c9a   :  { %7101 = vrot.lane.b32.xlu1 %v8650_v58, %s10980_s21 }
0x3c9b   :  { %7049 = vrot.lane.b32.xlu0 %v8645_v8, %s10980_s21 }
0x3c9e   :  { %7099 = vrot.lane.b32.xlu1 %v8649_v27, %s10980_s21 }
0x3d09   :  { %v7052_v29 = vpop.permute.xlu0 %7051 }
0x3d0a   :  { %v7056_v60 = vmul.f32 %v10276_v26, %v7052_v29 }
0x3d0c   :  { %v7102_v18 = vpop.permute.xlu1 %7101  ;;  %7061 = vrot.lane.b32.xlu0 %v7056_v60, %s10981_s25 }
0x3d0d   :  { %v7106_v42 = vmul.f32 %v10280_v15, %v7102_v18  ;;  %v7050_v50 = vpop.permute.xlu0 %7049 }
0x3d0e   :  { %v7055_v43 = vmul.f32 %v10274_v59, %v7050_v50 }
0x3d0f   :  { %7111 = vrot.lane.b32.xlu1 %v7106_v42, %s10981_s25 }
0x3d10   :  { %v7100_v61 = vpop.permute.xlu1 %7099  ;;  %7059 = vrot.lane.b32.xlu0 %v7055_v43, %s10981_s25 }
0x3d11   :  { %v7105_v54 = vmul.f32 %v10278_v24, %v7100_v61 }
0x3d13   :  { %7109 = vrot.lane.b32.xlu1 %v7105_v54, %s10981_s25 }
0x3d7e   :  { %v7062_v40 = vpop.permute.xlu0 %7061 }
0x3d7f   :  { %v12930_v3 = vadd.f32 %v7062_v40, %v7046_v38 }
0x3d81   :  { %10281 = vtanh.f32 %v12930_v3  ;;  %v7112_v12 = vpop.permute.xlu1 %7111 }
0x3d82   :  { %v12935_v5 = vadd.f32 %v7112_v12, %v7096_v21  ;;  %v7060_v31 = vpop.permute.xlu0 %7059  ;;  %v7150_v12 = vld [vmem:[#allocation5 + $0xd] sm:$0x1] }
0x3d83   :  { %v12937_v4 = vadd.f32 %v7060_v31, %v7045_v48 }
0x3d84   :  { %10283 = vtanh.f32 %v12935_v5 }
0x3d85   :  { %10285 = vtanh.f32 %v12937_v4  ;;  %v7110_v7 = vpop.permute.xlu1 %7109 }
0x3d86   :  { %v12942_v47 = vadd.f32 %v7110_v7, %v7095_v51  ;;  %v7233_v7 = vld [vmem:[#allocation6 + $0x2] sm:$0x1] }
0x3d88   :  { %10287 = vtanh.f32 %v12942_v47 }
0x3d8e   :  { %v10282_v52 = vpop.eup %10281 }
0x3d8f   :  { %7073 = vrot.lane.b32.xlu0 %v10282_v52, %s10980_s21 }
0x3d91   :  { %v10284_v14 = vpop.eup %10283 }
0x3d92   :  { %v10286_v58 = vpop.eup %10285  ;;  %7123 = vrot.lane.b32.xlu1 %v10284_v14, %s10980_s21 }
0x3d93   :  { %7071 = vrot.lane.b32.xlu0 %v10286_v58, %s10980_s21 }
0x3d95   :  { %v10288_v16 = vpop.eup %10287 }
0x3d96   :  { %7121 = vrot.lane.b32.xlu1 %v10288_v16, %s10980_s21 }
0x3e01   :  { %v7074_v10 = vpop.permute.xlu0 %7073 }
0x3e02   :  { %v12949_v8 = vmul.f32 %v10276_v26, %v7074_v10  ;;  %v7234_v10 = vld [vmem:[#allocation6 + $0xa] sm:$0x1] }
0x3e04   :  { %v7124_v27 = vpop.permute.xlu1 %7123  ;;  %v7151_v18 = vrot.slane %v12949_v8, 7 }
0x3e05   :  { %v12951_v29 = vmul.f32 %v10280_v15, %v7124_v27  ;;  %v7072_v60 = vpop.permute.xlu0 %7071 }
0x3e06   :  { %v12954_v42 = vmul.f32 %v10274_v59, %v7072_v60 }
0x3e07   :  { %v7235_v61 = vrot.slane %v12951_v29, 7 }
0x3e08   :  { %v7122_v50 = vpop.permute.xlu1 %7121  ;;  %v7152_v43 = vsel %vm1014_vm2, %v7151_v18, %v12954_v42 }
0x3e09   :  { %v12959_v54 = vmul.f32 %v10278_v24, %v7122_v50  ;;  %7153 = vrot.lane.b32.xlu0 %v7152_v43, %s10981_s25  ;;  %v7149_v24 = vld [vmem:[#allocation5 + $0x5] sm:$0x1] }
0x3e0b   :  { %v7236_v26 = vsel %vm1014_vm2, %v7235_v61, %v12959_v54 }
0x3e0c   :  { %7237 = vrot.lane.b32.xlu1 %v7236_v26, %s10981_s25 }
0x3e7b   :  { %v7154_v15 = vpop.permute.xlu0 %7153 }
0x3e7c   :  { %9621 = vmatmul.mubr.msk.f32.vlgmr.msra.gmra.mxu0 %vm494_vm0, %v7154_v15 }
0x3e7d   :  { %9635 = vmatpush3.msra.mxu0 %v12884_v49  ;;  %9642 = vmatprep.mubr.msk.f32.mxu0 %vm10979_vm1, %v10978_v41 }
0x3e7e   :  { %v7238_v59 = vpop.permute.xlu1 %7237  ;;  %9636 = vmatprep.subr.mxu0 %v10978_v41 }
0x3e7f   :  { %9632 = vmatmul.mubr.msk.f32.vlgmr.msra.gmra.mxu1 %vm494_vm0, %v7238_v59  ;;  %9637 = vmatpush3.msra.mxu0 %v12891_v63 }
0x3e80   :  { %9646 = vmatpush3.msra.mxu1 %v12894_v1  ;;  %9638 = vmatprep.subr.mxu0 %v10978_v41 }
0x3e81   :  { %9647 = vmatprep.subr.mxu1 %v10978_v41  ;;  %9639 = vmatpush3.msra.mxu0 %v12899_v46 }
0x3e82   :  { %9648 = vmatpush3.msra.mxu1 %v12902_v11  ;;  %9640 = vmatprep.subr.mxu0 %v10978_v41 }
0x3e83   :  { %9649 = vmatprep.subr.mxu1 %v10978_v41  ;;  %9641 = vmatpush3.msra.mxu0 %v12907_v36 }
0x3e84   :  { %9650 = vmatpush3.msra.mxu1 %v12910_v32  ;;  %9653 = vmatprep.mubr.msk.f32.mxu1 %vm10979_vm1, %v10978_v41 }
0x3e85   :  { %9651 = vmatprep.subr.mxu1 %v10978_v41  ;;  %9656 = vmatprep.subr.mxu0 %v10978_v41 }
0x3e86   :  { %9652 = vmatpush3.msra.mxu1 %v12917_v45 }
0x3e87   :  { %9667 = vmatprep.subr.mxu1 %v10978_v41 }
0x3f3c   :  { %v7223_v38 = vpop.f32.mrf.mxu0 }
0x3f3d   :  { %v7228_v40 = vrot.slane %v7223_v38, 1  ;;  %v7231_v21 = vadd.f32 %v7223_v38, %v7149_v24 }
0x3f3e   :  { %v9622_v48 = vpop.f32.mrf.mxu0 }
0x3f3f   :  { %v7232_v31 = vadd.f32 %v7228_v40, %v7150_v12  ;;  %v8653_v51 = vmul.f32 -1.442695, %v7231_v21  ;;  %v7307_v52 = vpop.f32.mrf.mxu1 }
0x3f40   :  { %v7312_v14 = vrot.slane %v7307_v52, 1  ;;  %v7315_v58 = vadd.f32 %v7307_v52, %v7233_v7 }
0x3f41   :  { %10289 = vpow2.f32 %v8653_v51  ;;  %v8654_v16 = vmul.f32 -1.442695, %v7232_v31  ;;  %v9633_v27 = vpop.f32.mrf.mxu1 }
0x3f42   :  { %v7316_v60 = vadd.f32 %v7312_v14, %v7234_v10  ;;  %v8657_v18 = vmul.f32 -1.442695, %v7315_v58 }
0x3f43   :  { %10291 = vpow2.f32 %v8654_v16 }
0x3f44   :  { %10293 = vpow2.f32 %v8657_v18  ;;  %v8658_v50 = vmul.f32 -1.442695, %v7316_v60 }
0x3f46   :  { %10295 = vpow2.f32 %v8658_v50 }
0x3f4e   :  { %v10290_v43 = vpop.eup %10289 }
0x3f4f   :  { %v7323_v61 = vadd.f32 1.0, %v10290_v43 }
0x3f50   :  { %v10292_v26 = vpop.eup %10291 }
0x3f51   :  { %v10294_v15 = vpop.eup %10293  ;;  %v7324_v59 = vadd.f32 1.0, %v10292_v26  ;;  %10297 = vrcp.f32 %v7323_v61 }
0x3f52   :  { %v7373_v24 = vadd.f32 1.0, %v10294_v15 }
0x3f53   :  { %v10296_v38 = vpop.eup %10295  ;;  %10299 = vrcp.f32 %v7324_v59 }
0x3f54   :  { %v7374_v40 = vadd.f32 1.0, %v10296_v38  ;;  %10301 = vrcp.f32 %v7373_v24 }
0x3f56   :  { %10303 = vrcp.f32 %v7374_v40 }
0x3f5e   :  { %v10298_v21 = vpop.eup %10297 }
0x3f5f   :  { %v7329_v52 = vmul.f32 2.0, %v10298_v21 }
0x3f60   :  { %v10300_v12 = vpop.eup %10299 }
0x3f61   :  { %v7330_v48 = vmul.f32 2.0, %v10300_v12  ;;  %v10302_v31 = vpop.eup %10301  ;;  %v8655_v10 = vadd.f32 -1.0, %v7329_v52  ;;  %v7334_v24 = vmul.f32 %v10300_v12, %v12930_v3  ;;  %v7333_v52 = vmul.f32 %v10298_v21, %v12937_v4 }
0x3f62   :  { %v7379_v16 = vmul.f32 2.0, %v10302_v31 }
0x3f63   :  { %v10304_v51 = vpop.eup %10303  ;;  %v8656_v7 = vadd.f32 -1.0, %v7330_v48 }
0x3f64   :  { %v7380_v14 = vmul.f32 2.0, %v10304_v51  ;;  %v8659_v27 = vadd.f32 -1.0, %v7379_v16  ;;  %v7384_v48 = vmul.f32 %v10304_v51, %v12935_v5 }
0x3f65   :  { %7339 = vrot.lane.b32.xlu0 %v8656_v7, %s10980_s21 }
0x3f66   :  { %v8660_v58 = vadd.f32 -1.0, %v7380_v14 }
0x3f68   :  { %7389 = vrot.lane.b32.xlu1 %v8660_v58, %s10980_s21 }
0x3f69   :  { %7337 = vrot.lane.b32.xlu0 %v8655_v10, %s10980_s21  ;;  %v7383_v10 = vmul.f32 %v10302_v31, %v12942_v47 }
0x3f6c   :  { %7387 = vrot.lane.b32.xlu1 %v8659_v27, %s10980_s21 }
0x3fd7   :  { %v7340_v60 = vpop.permute.xlu0 %7339 }
0x3fd8   :  { %v7344_v18 = vmul.f32 %v10300_v12, %v7340_v60 }
0x3fda   :  { %v7390_v50 = vpop.permute.xlu1 %7389  ;;  %7349 = vrot.lane.b32.xlu0 %v7344_v18, %s10981_s25 }
0x3fdb   :  { %v7394_v43 = vmul.f32 %v10304_v51, %v7390_v50  ;;  %v7338_v61 = vpop.permute.xlu0 %7337 }
0x3fdc   :  { %v7343_v26 = vmul.f32 %v10298_v21, %v7338_v61 }
0x3fdd   :  { %7399 = vrot.lane.b32.xlu1 %v7394_v43, %s10981_s25 }
0x3fde   :  { %v7388_v15 = vpop.permute.xlu1 %7387  ;;  %7347 = vrot.lane.b32.xlu0 %v7343_v26, %s10981_s25 }
0x3fdf   :  { %v7393_v59 = vmul.f32 %v10302_v31, %v7388_v15 }
0x3fe1   :  { %7397 = vrot.lane.b32.xlu1 %v7393_v59, %s10981_s25 }
0x404c   :  { %v7350_v38 = vpop.permute.xlu0 %7349 }
0x404d   :  { %v12996_v40 = vadd.f32 %v7350_v38, %v7334_v24 }
0x404f   :  { %10305 = vtanh.f32 %v12996_v40  ;;  %v7400_v7 = vpop.permute.xlu1 %7399 }
0x4050   :  { %v13001_v14 = vadd.f32 %v7400_v7, %v7384_v48  ;;  %v7348_v58 = vpop.permute.xlu0 %7347 }
0x4051   :  { %v13003_v16 = vadd.f32 %v7348_v58, %v7333_v52 }
0x4052   :  { %10307 = vtanh.f32 %v13001_v14 }
0x4053   :  { %10309 = vtanh.f32 %v13003_v16  ;;  %v7398_v3 = vpop.permute.xlu1 %7397 }
0x4054   :  { %v13008_v27 = vadd.f32 %v7398_v3, %v7383_v10  ;;  %v7521_v10 = vld [vmem:[#allocation6 + $0x1] sm:$0x1] }
0x4056   :  { %10311 = vtanh.f32 %v13008_v27 }
0x405c   :  { %v10306_v5 = vpop.eup %10305 }
0x405d   :  { %7361 = vrot.lane.b32.xlu0 %v10306_v5, %s10980_s21 }
0x405f   :  { %v10308_v4 = vpop.eup %10307 }
0x4060   :  { %v10310_v60 = vpop.eup %10309  ;;  %7411 = vrot.lane.b32.xlu1 %v10308_v4, %s10980_s21  ;;  %v7522_v4 = vld [vmem:[#allocation6 + $0x9] sm:$0x1] }
0x4061   :  { %7359 = vrot.lane.b32.xlu0 %v10310_v60, %s10980_s21 }
0x4063   :  { %v10312_v18 = vpop.eup %10311 }
0x4064   :  { %7409 = vrot.lane.b32.xlu1 %v10312_v18, %s10980_s21 }
0x40cf   :  { %v7362_v47 = vpop.permute.xlu0 %7361 }
0x40d0   :  { %v13015_v50 = vmul.f32 %v10300_v12, %v7362_v47 }
0x40d2   :  { %v7412_v43 = vpop.permute.xlu1 %7411  ;;  %v7439_v15 = vrot.slane %v13015_v50, 7 }
0x40d3   :  { %v13017_v61 = vmul.f32 %v10304_v51, %v7412_v43  ;;  %v7360_v26 = vpop.permute.xlu0 %7359 }
0x40d4   :  { %v13020_v59 = vmul.f32 %v10298_v21, %v7360_v26 }
0x40d5   :  { %v7523_v48 = vrot.slane %v13017_v61, 7 }
0x40d6   :  { %v7410_v24 = vpop.permute.xlu1 %7409  ;;  %v7440_v38 = vsel %vm1014_vm2, %v7439_v15, %v13020_v59 }
0x40d7   :  { %v13025_v7 = vmul.f32 %v10302_v31, %v7410_v24  ;;  %7441 = vrot.lane.b32.xlu0 %v7440_v38, %s10981_s25 }
0x40d9   :  { %v7524_v12 = vsel %vm1014_vm2, %v7523_v48, %v13025_v7 }
0x40da   :  { %7525 = vrot.lane.b32.xlu1 %v7524_v12, %s10981_s25 }
0x4149   :  { %v7442_v51 = vpop.permute.xlu0 %7441 }
0x414a   :  { %9643 = vmatmul.mubr.msk.f32.vlgmr.msra.gmra.mxu0 %vm494_vm0, %v7442_v51 }
0x414b   :  { %9657 = vmatpush3.msra.mxu0 %v12884_v49  ;;  %9664 = vmatprep.mubr.msk.f32.mxu0 %vm10979_vm1, %v10978_v41  ;;  %v7437_v49 = vld [vmem:[#allocation5 + $0x6] sm:$0x1] }
0x414c   :  { %v7526_v21 = vpop.permute.xlu1 %7525  ;;  %9658 = vmatprep.subr.mxu0 %v10978_v41 }
0x414d   :  { %9654 = vmatmul.mubr.msk.f32.vlgmr.msra.gmra.mxu1 %vm494_vm0, %v7526_v21  ;;  %9659 = vmatpush3.msra.mxu0 %v12891_v63 }
0x414e   :  { %9668 = vmatpush3.msra.mxu1 %v12894_v1  ;;  %9660 = vmatprep.subr.mxu0 %v10978_v41 }
0x414f   :  { %9669 = vmatprep.subr.mxu1 %v10978_v41  ;;  %9661 = vmatpush3.msra.mxu0 %v12899_v46 }
0x4150   :  { %9670 = vmatpush3.msra.mxu1 %v12902_v11  ;;  %9662 = vmatprep.subr.mxu0 %v10978_v41  ;;  %v7438_v11 = vld [vmem:[#allocation5 + $0xe] sm:$0x1] }
0x4151   :  { %9671 = vmatprep.subr.mxu1 %v10978_v41  ;;  %9663 = vmatpush3.msra.mxu0 %v12907_v36 }
0x4152   :  { %9672 = vmatpush3.msra.mxu1 %v12910_v32  ;;  %9675 = vmatprep.mubr.msk.f32.mxu1 %vm10979_vm1, %v10978_v41 }
0x4153   :  { %9673 = vmatprep.subr.mxu1 %v10978_v41 }
0x4154   :  { %9674 = vmatpush3.msra.mxu1 %v12917_v45 }
0x420a   :  { %v7511_v63 = vpop.f32.mrf.mxu0 }
0x420b   :  { %v7516_v1 = vrot.slane %v7511_v63, 1  ;;  %v7519_v46 = vadd.f32 %v7511_v63, %v7437_v49 }
0x420c   :  { %v9644_v31 = vpop.f32.mrf.mxu0 }
0x420d   :  { %v7520_v52 = vadd.f32 %v7516_v1, %v7438_v11  ;;  %v8663_v58 = vmul.f32 -1.442695, %v7519_v46  ;;  %v7595_v3 = vpop.f32.mrf.mxu1 }
0x420e   :  { %v7600_v36 = vrot.slane %v7595_v3, 1  ;;  %v7603_v5 = vadd.f32 %v7595_v3, %v7521_v10 }
0x420f   :  { %10313 = vpow2.f32 %v8663_v58  ;;  %v8664_v32 = vmul.f32 -1.442695, %v7520_v52  ;;  %v9655_v60 = vpop.f32.mrf.mxu1 }
0x4210   :  { %v7604_v18 = vadd.f32 %v7600_v36, %v7522_v4  ;;  %v8667_v41 = vmul.f32 -1.442695, %v7603_v5 }
0x4211   :  { %10315 = vpow2.f32 %v8664_v32 }
0x4212   :  { %10317 = vpow2.f32 %v8667_v41  ;;  %v8668_v45 = vmul.f32 -1.442695, %v7604_v18 }
0x4214   :  { %10319 = vpow2.f32 %v8668_v45 }
0x421c   :  { %v10314_v47 = vpop.eup %10313 }
0x421d   :  { %v7611_v43 = vadd.f32 1.0, %v10314_v47 }
0x421e   :  { %v10316_v26 = vpop.eup %10315 }
0x421f   :  { %v10318_v15 = vpop.eup %10317  ;;  %v7612_v24 = vadd.f32 1.0, %v10316_v26  ;;  %10321 = vrcp.f32 %v7611_v43 }
0x4220   :  { %v7661_v38 = vadd.f32 1.0, %v10318_v15 }
0x4221   :  { %v10320_v48 = vpop.eup %10319  ;;  %10323 = vrcp.f32 %v7612_v24 }
0x4222   :  { %v7662_v12 = vadd.f32 1.0, %v10320_v48  ;;  %10325 = vrcp.f32 %v7661_v38 }
0x4224   :  { %10327 = vrcp.f32 %v7662_v12 }
0x422c   :  { %v10322_v51 = vpop.eup %10321 }
0x422d   :  { %v7617_v11 = vmul.f32 2.0, %v10322_v51  ;;  %v7621_v38 = vmul.f32 %v10322_v51, %v13003_v16 }
0x422e   :  { %v10324_v21 = vpop.eup %10323 }
0x422f   :  { %v7618_v49 = vmul.f32 2.0, %v10324_v21  ;;  %v10326_v63 = vpop.eup %10325  ;;  %v8665_v10 = vadd.f32 -1.0, %v7617_v11  ;;  %v7622_v47 = vmul.f32 %v10324_v21, %v12996_v40 }
0x4230   :  { %v7667_v58 = vmul.f32 2.0, %v10326_v63 }
0x4231   :  { %v10328_v1 = vpop.eup %10327  ;;  %v8666_v46 = vadd.f32 -1.0, %v7618_v49 }
0x4232   :  { %v7668_v31 = vmul.f32 2.0, %v10328_v1  ;;  %v8669_v3 = vadd.f32 -1.0, %v7667_v58  ;;  %v7672_v15 = vmul.f32 %v10328_v1, %v13001_v14 }
0x4233   :  { %7627 = vrot.lane.b32.xlu0 %v8666_v46, %s10980_s21  ;;  %v7671_v46 = vmul.f32 %v10326_v63, %v13008_v27  ;;  %v8120_v27 = vld [vmem:[#allocation37 + $0x38] sm:$0xff] }
0x4234   :  { %v8670_v52 = vadd.f32 -1.0, %v7668_v31  ;;  %9697 = vmatprep.subr.mxu1 %v8120_v27 }
0x4236   :  { %7677 = vrot.lane.b32.xlu1 %v8670_v52, %s10980_s21 }
0x4237   :  { %7625 = vrot.lane.b32.xlu0 %v8665_v10, %s10980_s21 }
0x423a   :  { %7675 = vrot.lane.b32.xlu1 %v8669_v3, %s10980_s21 }
0x42a5   :  { %v7628_v36 = vpop.permute.xlu0 %7627 }
0x42a6   :  { %v7632_v5 = vmul.f32 %v10324_v21, %v7628_v36 }
0x42a8   :  { %v7678_v32 = vpop.permute.xlu1 %7677  ;;  %7637 = vrot.lane.b32.xlu0 %v7632_v5, %s10981_s25 }
0x42a9   :  { %v7682_v4 = vmul.f32 %v10328_v1, %v7678_v32  ;;  %v7626_v60 = vpop.permute.xlu0 %7625 }
0x42aa   :  { %v7631_v18 = vmul.f32 %v10322_v51, %v7626_v60 }
0x42ab   :  { %7687 = vrot.lane.b32.xlu1 %v7682_v4, %s10981_s25 }
0x42ac   :  { %v7676_v41 = vpop.permute.xlu1 %7675  ;;  %7635 = vrot.lane.b32.xlu0 %v7631_v18, %s10981_s25 }
0x42ad   :  { %v7681_v45 = vmul.f32 %v10326_v63, %v7676_v41 }
0x42af   :  { %7685 = vrot.lane.b32.xlu1 %v7681_v45, %s10981_s25 }
0x431a   :  { %v7638_v43 = vpop.permute.xlu0 %7637 }
0x431b   :  { %v13060_v26 = vadd.f32 %v7638_v43, %v7622_v47  ;;  %v8119_v47 = vld [vmem:[#allocation37 + $0x30] sm:$0xff] }
0x431c   :  { %v10393_v43 = vld [vmem:[#allocation2] sm:$0xff] }
0x431d   :  { %10329 = vtanh.f32 %v13060_v26  ;;  %v7688_v24 = vpop.permute.xlu1 %7687 }
0x431e   :  { %v13065_v48 = vadd.f32 %v7688_v24, %v7672_v15  ;;  %v7636_v12 = vpop.permute.xlu0 %7635  ;;  %v8117_v15 = vld [vmem:[#allocation37 + $0x20] sm:$0xff]  ;;  %v8116_v24 = vld [vmem:[#allocation37 + $0x18] sm:$0xff] }
0x431f   :  { %v13067_v49 = vadd.f32 %v7636_v12, %v7621_v38  ;;  %v8115_v38 = vld [vmem:[#allocation37 + $0x10] sm:$0xff]  ;;  %v8114_v12 = vld [vmem:[#allocation37 + $0x8] sm:$0xff] }
0x4320   :  { %10331 = vtanh.f32 %v13065_v48 }
0x4321   :  { %10333 = vtanh.f32 %v13067_v49  ;;  %v7686_v40 = vpop.permute.xlu1 %7685 }
0x4322   :  { %v13072_v11 = vadd.f32 %v7686_v40, %v7671_v46  ;;  %v8113_v46 = vld [vmem:[#allocation37] sm:$0xff]  ;;  %v10394_v40 = vld [vmem:[#allocation2 + $0x8] sm:$0xff] }
0x4324   :  { %10335 = vtanh.f32 %v13072_v11 }
0x432a   :  { %v10330_v14 = vpop.eup %10329 }
0x432b   :  { %7649 = vrot.lane.b32.xlu0 %v10330_v14, %s10980_s21  ;;  %v7725_v14 = vld [vmem:[#allocation5 + $0x7] sm:$0x1] }
0x432d   :  { %v10332_v16 = vpop.eup %10331 }
0x432e   :  { %v10334_v31 = vpop.eup %10333  ;;  %7699 = vrot.lane.b32.xlu1 %v10332_v16, %s10980_s21 }
0x432f   :  { %7647 = vrot.lane.b32.xlu0 %v10334_v31, %s10980_s21 }
0x4331   :  { %v10336_v52 = vpop.eup %10335 }
0x4332   :  { %7697 = vrot.lane.b32.xlu1 %v10336_v52, %s10980_s21 }
0x439d   :  { %v7650_v58 = vpop.permute.xlu0 %7649 }
0x439e   :  { %v13079_v10 = vmul.f32 %v10324_v21, %v7650_v58 }
0x43a0   :  { %v7700_v3 = vpop.permute.xlu1 %7699  ;;  %v7727_v32 = vrot.slane %v13079_v10, 7 }
0x43a1   :  { %v13081_v36 = vmul.f32 %v10328_v1, %v7700_v3  ;;  %v7648_v5 = vpop.permute.xlu0 %7647 }
0x43a2   :  { %v13084_v4 = vmul.f32 %v10322_v51, %v7648_v5 }
0x43a3   :  { %v7811_v41 = vrot.slane %v13081_v36, 7 }
0x43a4   :  { %v7698_v60 = vpop.permute.xlu1 %7697  ;;  %v7728_v18 = vsel %vm1014_vm2, %v7727_v32, %v13084_v4  ;;  %v7809_v32 = vld [vmem:[#allocation6] sm:$0x1] }
0x43a5   :  { %v13089_v45 = vmul.f32 %v10326_v63, %v7698_v60  ;;  %7729 = vrot.lane.b32.xlu0 %v7728_v18, %s10981_s25  ;;  %v8118_v63 = vld [vmem:[#allocation37 + $0x28] sm:$0xff] }
0x43a7   :  { %v7812_v21 = vsel %vm1014_vm2, %v7811_v41, %v13089_v45 }
0x43a8   :  { %7813 = vrot.lane.b32.xlu1 %v7812_v21, %s10981_s25 }
0x4417   :  { %v7730_v1 = vpop.permute.xlu0 %7729 }
0x4418   :  { %9665 = vmatmul.mubr.msk.f32.vlgmr.msra.gmra.mxu0 %vm494_vm0, %v7730_v1  ;;  %v7810_v1 = vld [vmem:[#allocation6 + $0x8] sm:$0x1] }
0x441a   :  { %v7814_v51 = vpop.permute.xlu1 %7813 }
0x441b   :  { %9676 = vmatmul.mubr.msk.f32.vlgmr.msra.gmra.mxu1 %vm494_vm0, %v7814_v51 }
0x441c   :  { %9698 = vmatpush3.msra.mxu1 %v8120_v27  ;;  %9713 = vmatprep.mubr.msk.f32.mxu1 %vm3062_vm5, %v10393_v43  ;;  %v7726_v27 = vld [vmem:[#allocation5 + $0xf] sm:$0x1] }
0x441d   :  { %9699 = vmatprep.subr.mxu1 %v8119_v47 }
0x441e   :  { %9700 = vmatpush3.msra.mxu1 %v8119_v47 }
0x441f   :  { %9701 = vmatprep.subr.mxu1 %v8118_v63 }
0x4420   :  { %9702 = vmatpush3.msra.mxu1 %v8118_v63 }
0x4421   :  { %9703 = vmatprep.subr.mxu1 %v8117_v15 }
0x4422   :  { %9704 = vmatpush3.msra.mxu1 %v8117_v15 }
0x4423   :  { %9705 = vmatprep.subr.mxu1 %v8116_v24 }
0x4424   :  { %9706 = vmatpush3.msra.mxu1 %v8116_v24 }
0x4425   :  { %9707 = vmatprep.subr.mxu1 %v8115_v38 }
0x4426   :  { %9708 = vmatpush3.msra.mxu1 %v8115_v38 }
0x4427   :  { %9709 = vmatprep.subr.mxu1 %v8114_v12 }
0x4428   :  { %9710 = vmatpush3.msra.mxu1 %v8114_v12 }
0x4429   :  { %9711 = vmatprep.subr.mxu1 %v8113_v46 }
0x442a   :  { %9712 = vmatpush3.msra.mxu1 %v8113_v46 }
0x442b   :  { %9714 = vmatmul.mubr.msk.f32.vlgmr.msra.gmra.mxu1 %vm3062_vm5, %v10394_v40 }
0x44d8   :  { %v7799_v16 = vpop.f32.mrf.mxu0 }
0x44d9   :  { %v7804_v31 = vrot.slane %v7799_v16, 1  ;;  %v7807_v52 = vadd.f32 %v7799_v16, %v7725_v14 }
0x44da   :  { %v9666_v58 = vpop.f32.mrf.mxu0 }
0x44db   :  { %v7808_v3 = vadd.f32 %v7804_v31, %v7726_v27  ;;  %v8673_v5 = vmul.f32 -1.442695, %v7807_v52  ;;  %v7883_v60 = vpop.f32.mrf.mxu1 }
0x44dc   :  { %v7888_v18 = vrot.slane %v7883_v60, 1  ;;  %v7891_v41 = vadd.f32 %v7883_v60, %v7809_v32 }
0x44dd   :  { %10337 = vpow2.f32 %v8673_v5  ;;  %v8674_v21 = vmul.f32 -1.442695, %v7808_v3  ;;  %v9677_v51 = vpop.f32.mrf.mxu1 }
0x44de   :  { %v7892_v47 = vadd.f32 %v7888_v18, %v7810_v1  ;;  %v8677_v43 = vmul.f32 -1.442695, %v7891_v41 }
0x44df   :  { %10339 = vpow2.f32 %v8674_v21 }
0x44e0   :  { %10341 = vpow2.f32 %v8677_v43  ;;  %v8678_v63 = vmul.f32 -1.442695, %v7892_v47 }
0x44e2   :  { %10343 = vpow2.f32 %v8678_v63 }
0x44ea   :  { %v10338_v15 = vpop.eup %10337 }
0x44eb   :  { %v7899_v24 = vadd.f32 1.0, %v10338_v15 }
0x44ec   :  { %v10340_v38 = vpop.eup %10339 }
0x44ed   :  { %v10342_v12 = vpop.eup %10341  ;;  %v7900_v46 = vadd.f32 1.0, %v10340_v38  ;;  %10345 = vrcp.f32 %v7899_v24 }
0x44ee   :  { %v7949_v40 = vadd.f32 1.0, %v10342_v12 }
0x44ef   :  { %v10344_v14 = vpop.eup %10343  ;;  %10347 = vrcp.f32 %v7900_v46 }
0x44f0   :  { %v7950_v16 = vadd.f32 1.0, %v10344_v14  ;;  %10349 = vrcp.f32 %v7949_v40 }
0x44f2   :  { %10351 = vrcp.f32 %v7950_v16 }
0x44fa   :  { %v13099_v31 = vpop.eup %10345 }
0x44fb   :  { %v7905_v52 = vmul.f32 2.0, %v13099_v31  ;;  %v7909_v46 = vmul.f32 %v13099_v31, %v13067_v49 }
0x44fc   :  { %v13102_v27 = vpop.eup %10347 }
0x44fd   :  { %v13104_v58 = vpop.eup %10349  ;;  %v8675_v3 = vadd.f32 -1.0, %v7905_v52  ;;  %v7906_v5 = vmul.f32 2.0, %v13102_v27 }
0x44fe   :  { %v7955_v32 = vmul.f32 2.0, %v13104_v58  ;;  %v7959_v16 = vmul.f32 %v13104_v58, %v13072_v11 }
0x44ff   :  { %v13108_v60 = vpop.eup %10351  ;;  %7913 = vrot.lane.b32.xlu0 %v8675_v3, %s10980_s21  ;;  %v8676_v21 = vadd.f32 -1.0, %v7906_v5  ;;  %v7910_v3 = vmul.f32 %v13102_v27, %v13060_v26 }
0x4500   :  { %v8679_v18 = vadd.f32 -1.0, %v7955_v32  ;;  %v7956_v41 = vmul.f32 2.0, %v13108_v60 }
0x4502   :  { %7963 = vrot.lane.b32.xlu1 %v8679_v18, %s10980_s21  ;;  %v8680_v1 = vadd.f32 -1.0, %v7956_v41 }
0x4503   :  { %7915 = vrot.lane.b32.xlu0 %v8676_v21, %s10980_s21 }
0x4506   :  { %7965 = vrot.lane.b32.xlu1 %v8680_v1, %s10980_s21 }
0x4571   :  { %v7914_v51 = vpop.permute.xlu0 %7913 }
0x4572   :  { %v7919_v47 = vmul.f32 %v13099_v31, %v7914_v51 }
0x4574   :  { %v7964_v43 = vpop.permute.xlu1 %7963  ;;  %7923 = vrot.lane.b32.xlu0 %v7919_v47, %s10981_s25 }
0x4575   :  { %v7969_v63 = vmul.f32 %v13104_v58, %v7964_v43  ;;  %v7916_v15 = vpop.permute.xlu0 %7915 }
0x4576   :  { %v7920_v24 = vmul.f32 %v13102_v27, %v7916_v15 }
0x4577   :  { %7973 = vrot.lane.b32.xlu1 %v7969_v63, %s10981_s25 }
0x4578   :  { %v7966_v38 = vpop.permute.xlu1 %7965  ;;  %7925 = vrot.lane.b32.xlu0 %v7920_v24, %s10981_s25 }
0x4579   :  { %v7970_v12 = vmul.f32 %v13108_v60, %v7966_v38 }
0x457b   :  { %7975 = vrot.lane.b32.xlu1 %v7970_v12, %s10981_s25 }
0x457c   :  { %5979 = vrot.lane.b32.xlu0 %v12674_v0, %s10981_s25  ;;  %v7960_v0 = vmul.f32 %v13108_v60, %v13065_v48 }
0x457f   :  { %5989 = vrot.lane.b32.xlu1 %v12679_v34, %s10980_s21 }
0x45e6   :  { %v7924_v40 = vpop.permute.xlu0 %7923 }
0x45e7   :  { %v7929_v14 = vadd.f32 %v7924_v40, %v7909_v46 }
0x45e9   :  { %10353 = vtanh.f32 %v7929_v14  ;;  %v7974_v52 = vpop.permute.xlu1 %7973 }
0x45ea   :  { %v7979_v5 = vadd.f32 %v7974_v52, %v7959_v16  ;;  %v7926_v32 = vpop.permute.xlu0 %7925 }
0x45eb   :  { %v7930_v18 = vadd.f32 %v7926_v32, %v7910_v3 }
0x45ec   :  { %10355 = vtanh.f32 %v7979_v5 }
0x45ed   :  { %10357 = vtanh.f32 %v7930_v18  ;;  %v8296_v34 = vrot.slane %v7930_v18, 7  ;;  %v7976_v49 = vpop.permute.xlu1 %7975 }
0x45ee   :  { %v7980_v41 = vadd.f32 %v7976_v49, %v7960_v0  ;;  %v5980_v21 = vpop.permute.xlu0 %5979 }
0x45ef   :  { %5985 = vst.msk [vmem:[#allocation4] sm:$0x1] %vm997_vm3, %v5980_v21  ;;  %v13137_v11 = vsel %vm1014_vm2, %v8296_v34, %v7929_v14 }
0x45f0   :  { %10359 = vtanh.f32 %v7980_v41  ;;  %v8305_v1 = vrot.slane %v7980_v41, 7 }
0x45f1   :  { %v5990_v26 = vpop.permute.xlu1 %5989 }
0x45f2   :  { %5995 = vst.msk [vmem:[#allocation4 + $0x7] sm:$0x1] %vm1008_vm4, %v5990_v26  ;;  %v13141_v51 = vsel %vm1014_vm2, %v8305_v1, %v7979_v5 }
0x45f6   :  { %v10354_v47 = vpop.eup %10353 }
0x45f7   :  { %7935 = vrot.lane.b32.xlu0 %v10354_v47, %s10980_s21 }
0x45f9   :  { %v10356_v48 = vpop.eup %10355 }
0x45fa   :  { %v10358_v43 = vpop.eup %10357  ;;  %7985 = vrot.lane.b32.xlu1 %v10356_v48, %s10980_s21 }
0x45fb   :  { %7937 = vrot.lane.b32.xlu0 %v10358_v43, %s10980_s21 }
0x45fd   :  { %v10360_v63 = vpop.eup %10359 }
0x45fe   :  { %7987 = vrot.lane.b32.xlu1 %v10360_v63, %s10980_s21 }
0x45ff   :  { %6267 = vrot.lane.b32.xlu0 %v12740_v56, %s10981_s25  ;;  %v8018_v56 = vld [vmem:[#allocation34 + $0x18] sm:$0xff] }
0x4602   :  { %6277 = vrot.lane.b32.xlu1 %v12745_v30, %s10980_s21  ;;  %v8017_v30 = vld [vmem:[#allocation34 + $0x10] sm:$0xff] }
0x4603   :  { %6555 = vrot.lane.b32.xlu0 %v12806_v28, %s10981_s25 }
0x4606   :  { %6565 = vrot.lane.b32.xlu1 %v12811_v13, %s10980_s21  ;;  %v8015_v13 = vld [vmem:[#allocation34] sm:$0xff] }
0x4607   :  { %6843 = vrot.lane.b32.xlu0 %v12872_v39, %s10981_s25 }
0x460a   :  { %6853 = vrot.lane.b32.xlu1 %v12877_v2, %s10980_s21 }
0x460b   :  { %5981 = vrot.lane.b32.xlu0 %v12669_v37, %s10981_s25  ;;  %v8022_v37 = vld [vmem:[#allocation34 + $0x38] sm:$0xff] }
0x460c   :  { %9678 = vmatprep.subr.mxu0 %v8022_v37 }
0x460d   :  { %9679 = vmatpush3.msra.mxu0 %v8022_v37 }
0x460e   :  { %5991 = vrot.lane.b32.xlu1 %v12671_v53, %s10980_s21  ;;  %v8021_v53 = vld [vmem:[#allocation34 + $0x30] sm:$0xff] }
0x460f   :  { %6269 = vrot.lane.b32.xlu0 %v12735_v35, %s10981_s25  ;;  %9680 = vmatprep.subr.mxu0 %v8021_v53  ;;  %v8020_v35 = vld [vmem:[#allocation34 + $0x28] sm:$0xff] }
0x4610   :  { %9681 = vmatpush3.msra.mxu0 %v8021_v53 }
0x4611   :  { %9682 = vmatprep.subr.mxu0 %v8020_v35 }
0x4612   :  { %6279 = vrot.lane.b32.xlu1 %v12737_v17, %s10980_s21  ;;  %v8019_v17 = vld [vmem:[#allocation34 + $0x20] sm:$0xff]  ;;  %9683 = vmatpush3.msra.mxu0 %v8020_v35 }
0x4613   :  { %6557 = vrot.lane.b32.xlu0 %v12801_v33, %s10981_s25  ;;  %9684 = vmatprep.subr.mxu0 %v8019_v17  ;;  %v8016_v33 = vld [vmem:[#allocation34 + $0x8] sm:$0xff] }
0x4614   :  { %9685 = vmatpush3.msra.mxu0 %v8019_v17 }
0x4615   :  { %9686 = vmatprep.subr.mxu0 %v8018_v56 }
0x4616   :  { %6567 = vrot.lane.b32.xlu1 %v12803_v57, %s10980_s21  ;;  %9687 = vmatpush3.msra.mxu0 %v8018_v56 }
0x4617   :  { %6845 = vrot.lane.b32.xlu0 %v12867_v62, %s10981_s25  ;;  %9688 = vmatprep.subr.mxu0 %v8017_v30 }
0x4618   :  { %9689 = vmatpush3.msra.mxu0 %v8017_v30 }
0x4619   :  { %9690 = vmatprep.subr.mxu0 %v8016_v33 }
0x461a   :  { %6855 = vrot.lane.b32.xlu1 %v12869_v55, %s10980_s21  ;;  %9691 = vmatpush3.msra.mxu0 %v8016_v33 }
0x461b   :  { %7131 = vrot.lane.b32.xlu0 %v12954_v42, %s10981_s25  ;;  %9692 = vmatprep.subr.mxu0 %v8015_v13 }
0x461c   :  { %9693 = vmatpush3.msra.mxu0 %v8015_v13 }
0x461e   :  { %7141 = vrot.lane.b32.xlu1 %v12959_v54, %s10980_s21 }
0x461f   :  { %7419 = vrot.lane.b32.xlu0 %v13020_v59, %s10981_s25 }
0x4622   :  { %7429 = vrot.lane.b32.xlu1 %v13025_v7, %s10980_s21 }
0x4623   :  { %7707 = vrot.lane.b32.xlu0 %v13084_v4, %s10981_s25 }
0x4626   :  { %7717 = vrot.lane.b32.xlu1 %v13089_v45, %s10980_s21  ;;  %v8684_v45 = vld [vmem:[#allocation39] ss:$0 sm:$0xff] }
0x4627   :  { %7133 = vrot.lane.b32.xlu0 %v12949_v8, %s10981_s25 }
0x462a   :  { %7143 = vrot.lane.b32.xlu1 %v12951_v29, %s10980_s21 }
0x462b   :  { %7421 = vrot.lane.b32.xlu0 %v13015_v50, %s10981_s25  ;;  %v9715_v50 = vpop.f32.mrf.mxu1 }
0x462c   :  { %v8200_v38 = vadd.f32 %v9715_v50, %v8684_v45 }
0x462d   :  { %v8194_v4 = vpop.f32.mrf.mxu1 }
0x462e   :  { %7431 = vrot.lane.b32.xlu1 %v13017_v61, %s10980_s21 }
0x462f   :  { %7709 = vrot.lane.b32.xlu0 %v13079_v10, %s10981_s25 }
0x4632   :  { %7719 = vrot.lane.b32.xlu1 %v13081_v36, %s10980_s21 }
0x4669   :  { %v7936_v57 = vpop.permute.xlu0 %7935 }
0x466a   :  { %v7941_v28 = vmul.f32 %v13099_v31, %v7936_v57 }
0x466c   :  { %v7986_v62 = vpop.permute.xlu1 %7985  ;;  %7995 = vrot.lane.b32.xlu0 %v7941_v28, %s10981_s25 }
0x466d   :  { %v7991_v55 = vmul.f32 %v13104_v58, %v7986_v62  ;;  %v7938_v39 = vpop.permute.xlu0 %7937 }
0x466e   :  { %v7942_v2 = vmul.f32 %v13102_v27, %v7938_v39  ;;  %v8195_v27 = vadd.f32 %v8684_v45, %v8194_v4 }
0x466f   :  { %8005 = vrot.lane.b32.xlu1 %v7991_v55, %s10980_s21 }
0x4670   :  { %v8280_v8 = vrot.slane %v7942_v2, 7  ;;  %v7988_v29 = vpop.permute.xlu1 %7987  ;;  %7997 = vrot.lane.b32.xlu0 %v7942_v2, %s10981_s25  ;;  %10361 = vtanh.f32 %v8195_v27 }
0x4671   :  { %v7992_v42 = vmul.f32 %v13108_v60, %v7988_v29  ;;  %v6268_v54 = vpop.permute.xlu0 %6267  ;;  %10363 = vtanh.f32 %v8200_v38 }
0x4672   :  { %6273 = vst.msk [vmem:[#allocation4 + $0x1] sm:$0x1] %vm997_vm3, %v6268_v54  ;;  %v13208_v61 = vsel %vm1014_vm2, %v8280_v8, %v7941_v28 }
0x4673   :  { %v8287_v59 = vrot.slane %v7992_v42, 7  ;;  %8007 = vrot.lane.b32.xlu1 %v7992_v42, %s10980_s21 }
0x4674   :  { %v6278_v7 = vpop.permute.xlu1 %6277 }
0x4675   :  { %6283 = vst.msk [vmem:[#allocation4 + $0x6] sm:$0x1] %vm1008_vm4, %v6278_v7  ;;  %v6556_v10 = vpop.permute.xlu0 %6555  ;;  %v13213_v36 = vsel %vm1014_vm2, %v8287_v59, %v7991_v55 }
0x4676   :  { %6561 = vst.msk [vmem:[#allocation4 + $0x2] sm:$0x1] %vm997_vm3, %v6556_v10 }
0x4678   :  { %v6566_v31 = vpop.permute.xlu1 %6565 }
0x4679   :  { %6571 = vst.msk [vmem:[#allocation4 + $0x5] sm:$0x1] %vm1008_vm4, %v6566_v31  ;;  %v6844_v58 = vpop.permute.xlu0 %6843 }
0x467a   :  { %6849 = vst.msk [vmem:[#allocation4 + $0x3] sm:$0x1] %vm997_vm3, %v6844_v58 }
0x467c   :  { %v6854_v60 = vpop.permute.xlu1 %6853 }
0x467d   :  { %6859 = vst.msk [vmem:[#allocation4 + $0x4] sm:$0x1] %vm1008_vm4, %v6854_v60  ;;  %v5982_v15 = vpop.permute.xlu0 %5981  ;;  %v13225_v52 = vpop.eup %10361 }
0x467e   :  { %5986 = vst.msk [vmem:[#allocation4 + $0x8] sm:$0x1] %vm997_vm3, %v5982_v15  ;;  %v8205_v32 = vmul.f32 %v13225_v52, %v13225_v52  ;;  %v13233_v34 = vpop.eup %10363 }
0x467f   :  { %v8206_v41 = vmul.f32 %v13233_v34, %v13233_v34 }
0x4680   :  { %v5992_v24 = vpop.permute.xlu1 %5991 }
0x4681   :  { %5996 = vst.msk [vmem:[#allocation4 + $0xf] sm:$0x1] %vm1008_vm4, %v5992_v24  ;;  %v6270_v12 = vpop.permute.xlu0 %6269 }
0x4682   :  { %6274 = vst.msk [vmem:[#allocation4 + $0x9] sm:$0x1] %vm997_vm3, %v6270_v12 }
0x4684   :  { %v6280_v46 = vpop.permute.xlu1 %6279 }
0x4685   :  { %6284 = vst.msk [vmem:[#allocation4 + $0xe] sm:$0x1] %vm1008_vm4, %v6280_v46  ;;  %v6558_v40 = vpop.permute.xlu0 %6557 }
0x4686   :  { %6562 = vst.msk [vmem:[#allocation4 + $0xa] sm:$0x1] %vm997_vm3, %v6558_v40 }
0x4688   :  { %v6568_v14 = vpop.permute.xlu1 %6567 }
0x4689   :  { %6572 = vst.msk [vmem:[#allocation4 + $0xd] sm:$0x1] %vm1008_vm4, %v6568_v14  ;;  %v6846_v16 = vpop.permute.xlu0 %6845 }
0x468a   :  { %6850 = vst.msk [vmem:[#allocation4 + $0xb] sm:$0x1] %vm997_vm3, %v6846_v16 }
0x468c   :  { %v6856_v3 = vpop.permute.xlu1 %6855 }
0x468d   :  { %6860 = vst.msk [vmem:[#allocation4 + $0xc] sm:$0x1] %vm1008_vm4, %v6856_v3  ;;  %v7132_v5 = vpop.permute.xlu0 %7131 }
0x468e   :  { %7137 = vst.msk [vmem:[#allocation4 + $0x4] sm:$0x1] %vm997_vm3, %v7132_v5 }
0x468f   :  { %8207 = vadd.xlane.f32.xlu0 %v8205_v32 }
0x4690   :  { %v7142_v18 = vpop.permute.xlu1 %7141 }
0x4691   :  { %7147 = vst.msk [vmem:[#allocation4 + $0x3] sm:$0x1] %vm1008_vm4, %v7142_v18  ;;  %v7420_v0 = vpop.permute.xlu0 %7419 }
0x4692   :  { %7425 = vst.msk [vmem:[#allocation4 + $0x5] sm:$0x1] %vm997_vm3, %v7420_v0 }
0x4694   :  { %v7430_v49 = vpop.permute.xlu1 %7429 }
0x4695   :  { %7435 = vst.msk [vmem:[#allocation4 + $0x2] sm:$0x1] %vm1008_vm4, %v7430_v49  ;;  %v7708_v21 = vpop.permute.xlu0 %7707 }
0x4696   :  { %7713 = vst.msk [vmem:[#allocation4 + $0x6] sm:$0x1] %vm997_vm3, %v7708_v21 }
0x4697   :  { %8209 = vadd.xlane.f32.xlu1 %v8206_v41 }
0x4698   :  { %v7718_v1 = vpop.permute.xlu1 %7717 }
0x4699   :  { %7723 = vst.msk [vmem:[#allocation4 + $0x1] sm:$0x1] %vm1008_vm4, %v7718_v1  ;;  %v7134_v26 = vpop.permute.xlu0 %7133 }
0x469a   :  { %7138 = vst.msk [vmem:[#allocation4 + $0xc] sm:$0x1] %vm997_vm3, %v7134_v26 }
0x469c   :  { %v7144_v47 = vpop.permute.xlu1 %7143 }
0x469d   :  { %7148 = vst.msk [vmem:[#allocation4 + $0xb] sm:$0x1] %vm1008_vm4, %v7144_v47  ;;  %v7422_v48 = vpop.permute.xlu0 %7421 }
0x469e   :  { %7426 = vst.msk [vmem:[#allocation4 + $0xd] sm:$0x1] %vm997_vm3, %v7422_v48 }
0x46a0   :  { %v7432_v43 = vpop.permute.xlu1 %7431 }
0x46a1   :  { %7436 = vst.msk [vmem:[#allocation4 + $0xa] sm:$0x1] %vm1008_vm4, %v7432_v43  ;;  %v7710_v63 = vpop.permute.xlu0 %7709 }
0x46a2   :  { %7714 = vst.msk [vmem:[#allocation4 + $0xe] sm:$0x1] %vm997_vm3, %v7710_v63 }
0x46a4   :  { %v7720_v37 = vpop.permute.xlu1 %7719 }
0x46a5   :  { %7724 = vst.msk [vmem:[#allocation4 + $0x9] sm:$0x1] %vm1008_vm4, %v7720_v37  ;;  %8267 = vrot.lane.b32.xlu0 %v12465_v23, %s10982_s9 }
0x46a8   :  { %8275 = vrot.lane.b32.xlu1 %v12469_v25, %s10982_s9 }
0x46a9   :  { %8298 = vrot.lane.b32.xlu0 %v13137_v11, %s10982_s9 }
0x46ac   :  { %8307 = vrot.lane.b32.xlu1 %v13141_v51, %s10982_s9 }
0x46ad   :  { %8221 = vrot.lane.b32.xlu0 %v11874_v6, %s10981_s25 }
0x46b0   :  { %8228 = vrot.lane.b32.xlu1 %v11885_v19, %s10981_s25 }
0x46b1   :  { %8237 = vrot.lane.b32.xlu0 %v11787_v20, %s10982_s9 }
0x46b4   :  { %8245 = vrot.lane.b32.xlu1 %v11794_v44, %s10982_s9 }
0x46b5   :  { %8252 = vrot.lane.b32.xlu0 %v12546_v22, %s10981_s25 }
0x46b8   :  { %8258 = vrot.lane.b32.xlu1 %v12551_v9, %s10981_s25 }
0x46b9   :  { %8282 = vrot.lane.b32.xlu0 %v13208_v61, %s10981_s25 }
0x46bc   :  { %8289 = vrot.lane.b32.xlu1 %v13213_v36, %s10981_s25 }
0x46de   :  { %v7996_v6 = vpop.permute.xlu0 %7995 }
0x46df   :  { %8001 = vst.msk [vmem:[#allocation4 + $0x7] sm:$0x1] %vm997_vm3, %v7996_v6 }
0x46e1   :  { %v8006_v19 = vpop.permute.xlu1 %8005 }
0x46e2   :  { %8011 = vst.msk [vmem:[#allocation4] sm:$0x1] %vm1008_vm4, %v8006_v19  ;;  %v7998_v20 = vpop.permute.xlu0 %7997 }
0x46e3   :  { %8002 = vst.msk [vmem:[#allocation4 + $0xf] sm:$0x1] %vm997_vm3, %v7998_v20 }
0x46e5   :  { %v8008_v44 = vpop.permute.xlu1 %8007 }
0x46e6   :  { %8012 = vst.msk [vmem:[#allocation4 + $0x8] sm:$0x1] %vm1008_vm4, %v8008_v44 }
0x46e9   :  { %v8013_v23 = vld [vmem:[#allocation4] sm:$0xff] }
0x46ea   :  { %9694 = vmatprep.mubr.msk.f32.mxu0 %vm3062_vm5, %v8013_v23 }
0x46ed   :  { %v8014_v25 = vld [vmem:[#allocation4 + $0x8] sm:$0xff] }
0x46ee   :  { %9695 = vmatmul.mubr.msk.f32.vlgmr.msra.gmra.mxu0 %vm3062_vm5, %v8014_v25 }
0x4718   :  { %v8208_v22 = vpop.xlane.xlu0 %8207 }
0x4719   :  { %v8211_v9 = vmax.f32 %v8208_v22, 1e-24 }
0x471b   :  { %10365 = vrsqrt.f32 %v8211_v9 }
0x471c   :  { %v8268_v11 = vpop.permute.xlu0 %8267 }
0x471d   :  { %8270 = vst.msk [vmem:[#allocation41] sm:$0x3] %vm8224_vm6, %v8268_v11 }
0x4720   :  { %v8210_v51 = vpop.xlane.xlu1 %8209  ;;  %v8299_v53 = vpop.permute.xlu0 %8298 }
0x4721   :  { %v8212_v35 = vmax.f32 %v8210_v51, 1e-24  ;;  %8302 = vst.msk [vmem:[#allocation41 + $0x4] sm:$0x3] %vm8224_vm6, %v8299_v53 }
0x4723   :  { %10367 = vrsqrt.f32 %v8212_v35 }
0x4724   :  { %v8276_v17 = vpop.permute.xlu1 %8275  ;;  %v8222_v56 = vpop.permute.xlu0 %8221 }
0x4725   :  { %8279 = vst.msk [vmem:[#allocation41 + $0x2] sm:$0x3] %vm8224_vm6, %v8276_v17  ;;  %8225 = vst.msk [vmem:[#allocation43] sm:$0x3] %vm8224_vm6, %v8222_v56 }
0x4728   :  { %v10366_v30 = vpop.eup %10365  ;;  %v8308_v33 = vpop.permute.xlu1 %8307 }
0x4729   :  { %v8238_v57 = vpop.permute.xlu0 %8237  ;;  %v8215_v28 = vmul.f32 %v10366_v30, %v13225_v52  ;;  %8311 = vst.msk [vmem:[#allocation41 + $0x6] sm:$0x3] %vm8224_vm6, %v8308_v33 }
0x472a   :  { %8240 = vst.msk [vmem:[#allocation44] sm:$0x3] %vm8224_vm6, %v8238_v57 }
0x472b   :  { %8217 = vst [vmem:[%s13340_s0] sm:$0xff] %v8215_v28 }
0x472c   :  { %v8229_v13 = vpop.permute.xlu1 %8228 }
0x472d   :  { %v8253_v62 = vpop.permute.xlu0 %8252  ;;  %8232 = vst.msk [vmem:[#allocation43 + $0x2] sm:$0x3] %vm8224_vm6, %v8229_v13 }
0x472e   :  { %8255 = vst.msk [vmem:[#allocation40] sm:$0x3] %vm8224_vm6, %v8253_v62 }
0x4730   :  { %v10368_v55 = vpop.eup %10367  ;;  %v8246_v39 = vpop.permute.xlu1 %8245 }
0x4731   :  { %v8283_v2 = vpop.permute.xlu0 %8282  ;;  %v8216_v8 = vmul.f32 %v10368_v55, %v13233_v34  ;;  %8249 = vst.msk [vmem:[#allocation44 + $0x2] sm:$0x3] %vm8224_vm6, %v8246_v39 }
0x4732   :  { %8286 = vst.msk [vmem:[#allocation40 + $0x4] sm:$0x3] %vm8224_vm6, %v8283_v2 }
0x4733   :  { %8218 = vst [vmem:[%s13340_s0 + $0x8] sm:$0xff] %v8216_v8 }
0x4734   :  { %v8259_v29 = vpop.permute.xlu1 %8258 }
0x4735   :  { %8262 = vst.msk [vmem:[#allocation40 + $0x2] sm:$0x3] %vm8224_vm6, %v8259_v29 }
0x4736   :  { %10826 = shalt.err (!%p10823_p11)
}
0x4737   :  { %s10985_s15 = smov 2   ;;  %s10986_s8 = smov [#allocation43]  }
0x4738   :  { %8339 = dma.vmem_to_hbm [thread:$0]  %s8334_s29, 128, %s11146_s12, [#allocation42], %s10981_s25, %s10981_s25, %s10985_s15   ;;  %v8290_v42 = vpop.permute.xlu1 %8289 }
0x4739   :  { %s8345_s16 = sshll.u32 %s10986_s8, 4  ;;  %8293 = vst.msk [vmem:[#allocation40 + $0x6] sm:$0x3] %vm8224_vm6, %v8290_v42  ;;  %s10987_s18 = smov [#allocation44]   ;;  %s8346_s16 = int_to_ptr.vmem [resolvable:$true] %s8345_s16 }
0x473a   :  { %s8357_s22 = sshll.u32 %s10987_s18, 4  ;;  %s10835_s5 = scalar_lea.vmem %s8322_s24, 128  ;;  %s8358_s22 = int_to_ptr.vmem [resolvable:$true] %s8357_s22 }
0x473b   :  { %p10836_p12 = scmp.ne.s32.totalorder %s8322_s24, %s10835_s5  ;;  %p10840_p13 = scmp.lt.s32.totalorder %s8322_s24, %s8322_s24 }
0x473c   :  { %p10841_p0 = scmp.lt.s32.totalorder %s10835_s5, %s10835_s5 }
0x473e   :  { %p10842_p1 = por %p10841_p0, %p10840_p13 }
0x4740   :  { %p10843_p2 = pnand %p10842_p1, %p10836_p12 }
0x4742   :  { %10846 = shalt.err (!%p10843_p2)
}
0x4743   :  { %8327 = dma.vmem_to_hbm [thread:$0]  %s8322_s24, 128, %s11141_s14, [#allocation9], %s10981_s25, %s10981_s25, %s10985_s15  }
0x4744   :  { %s10855_s12 = scalar_lea.vmem %s8346_s16, 64  ;;  %p10860_p4 = scmp.lt.s32.totalorder %s8346_s16, %s8346_s16 }
0x4745   :  { %p10856_p3 = scmp.ne.s32.totalorder %s8346_s16, %s10855_s12  ;;  %p10861_p5 = scmp.lt.s32.totalorder %s10855_s12, %s10855_s12 }
0x4747   :  { %p10862_p6 = por %p10861_p5, %p10860_p4 }
0x4749   :  { %p10863_p7 = pnand %p10862_p6, %p10856_p3 }
0x474b   :  { %10866 = shalt.err (!%p10863_p7)
}
0x474c   :  { %8351 = dma.vmem_to_hbm [thread:$0]  %s8346_s16, 64, %s11151_s30, [#allocation42], %s10981_s25, %s10981_s25, %s10985_s15  }
0x474d   :  { %s10875_s17 = scalar_lea.vmem %s8358_s22, 64  ;;  %p10880_p9 = scmp.lt.s32.totalorder %s8358_s22, %s8358_s22 }
0x474e   :  { %p10876_p8 = scmp.ne.s32.totalorder %s8358_s22, %s10875_s17  ;;  %p10881_p10 = scmp.lt.s32.totalorder %s10875_s17, %s10875_s17 }
0x4750   :  { %p10882_p11 = por %p10881_p10, %p10880_p9 }
0x4752   :  { %p10883_p12 = pnand %p10882_p11, %p10876_p8 }
0x4754   :  { %10886 = shalt.err (!%p10883_p12)
}
0x4755   :  { %s13341_s14 = sld [smem:[#allocation73_spill]]  ;;  %v8681_v54 = vld [vmem:[#allocation36] ss:$0 sm:$0xff] }
0x4756   :  { %8363 = dma.vmem_to_hbm [thread:$0]  %s8358_s22, 64, %s11156_s20, [#allocation45], %s10981_s25, %s10981_s25, %s10985_s15  }
0x47ae   :  { %v9696_v50 = vpop.f32.mrf.mxu0 }
0x47af   :  { %v8108_v61 = vadd.f32 %v9696_v50, %v8681_v54 }
0x47b0   :  { %v8102_v59 = vpop.f32.mrf.mxu0 }
0x47b1   :  { %8112 = vst [vmem:[%s13341_s14 + $0x8] sm:$0xff] %v8108_v61  ;;  %v8103_v7 = vadd.f32 %v8681_v54, %v8102_v59 }
0x47b3   :  { %8111 = vst [vmem:[%s13341_s14] sm:$0xff] %v8103_v7 }
0x47b4   :  { %10917 = dma.done.wait [#allocation9], 128  }
0x47b5   :  { %10918 = vsyncadd [#allocation9], 4294967168 }
0x47b6   :  { %10919 = dma.done.wait [#allocation42], 192  }
0x47b7   :  { %10920 = vsyncadd [#allocation42], 4294967104 }
0x47b8   :  { %10921 = dma.done.wait [#allocation45], 64  }
0x47b9   :  { %10922 = vsyncadd [#allocation45], 4294967232 }
0x47ba   :  { %8380 = vsyncpa [#allocation8], 1 }
0x47bb   :  { %8381 = vsyncpa [#allocation11], 1 }
0x47bc   :  { %8382 = vsyncpa [#allocation14], 1 }
0x47bd   :  { %8383 = vsyncpa [#allocation17], 1 }
0x47be   :  { %8384 = vsyncpa [#allocation20], 1 }
0x47bf   :  { %8385 = vsyncpa [#allocation23], 1 }
0x47c0   :  { %8386 = vsyncpa [#allocation26], 1 }
0x47c1   :  { %8387 = vsyncpa [#allocation29], 1 }
0x47c2   :  { %8388 = vsyncpa [#allocation32], 1 }
0x47c3   :  { %8389 = vsyncpa [#allocation35], 1 }
0x47c4   :  { %8390 = vsyncpa [#allocation38], 1 }
0x47c5   :  { %8391 = vsyncpa [#allocation9], 1 }
0x47c6   :  { %8392 = vsyncpa [#allocation42], 1 }
0x47c7   :  { %8393 = vsyncpa [#allocation45], 1 }

</bundles_post_ra>
